<compile_context>
chip_gen: v6e
topology: v6e:2x2x1
jax: 0.10.0
libtpu: 0.0.40
codegen_flags: <defaults>
</compile_context>

<pallas_src>
import functools

import numpy as np
import jax
import jax.numpy as jnp
from jax.experimental import pallas as pl
from jax.experimental.pallas import tpu as pltpu

# ----------------------- config (mini Swin) -----------------------
BATCH = 2
IN_CHANS = 3
IMG_SIZE = 32
PATCH = 4
EMBED_DIM = 32
DEPTHS = (2, 2)
NUM_HEADS = (2, 4)
WINDOW = 4
MLP_RATIO = 4
LN_EPS = 1e-5
MAX_ROW_TILE = 512
NEG_INF = -1e9


def _detect_grid_steps():
    """v7x has 2 TensorCores -> prefer 2 'parallel' grid steps; v5e/v6e -> 1 fat step."""
    try:
        kind = jax.devices()[0].device_kind.lower()
    except Exception:
        return 1
    return 2 if ("v7" in kind or "tpu7" in kind) else 1


_GRID_STEPS = _detect_grid_steps()


def _pick_tm(M, cap=MAX_ROW_TILE):
    tm = M
    if _GRID_STEPS > 1 and M % _GRID_STEPS == 0:
        half = M // _GRID_STEPS
        if half % 8 == 0:
            tm = half
    if tm <= cap:
        return tm
    t = cap - (cap % 8)
    while t >= 8:
        if M % t == 0:
            return t
        t -= 8
    return M


def _attn_steps(T, wsq):
    if _GRID_STEPS > 1 and T % _GRID_STEPS == 0:
        tT = T // _GRID_STEPS
        if tT % wsq == 0 and tT % 8 == 0:
            return _GRID_STEPS
    return 1


def _mosaic_params(semantics):
    return pltpu.CompilerParams(dimension_semantics=semantics)


def _cost(flops, bytes_accessed, transcendentals=0):
    try:
        return pl.CostEstimate(flops=int(flops), transcendentals=int(transcendentals),
                               bytes_accessed=int(bytes_accessed))
    except Exception:
        return None


# ----------------------- Pallas kernels -----------------------
def _ln_linear_kernel(x_ref, g_ref, bl_ref, w_ref, b_ref, o_ref, *, eps, activation):
    """Fused pre-LayerNorm -> x@w + b -> optional GELU. bf16 MXU operands, f32 accumulation."""
    x = x_ref[...].astype(jnp.float32)
    mu = jnp.mean(x, axis=-1, keepdims=True)
    xc = x - mu
    var = jnp.mean(xc * xc, axis=-1, keepdims=True)
    xn = xc * jax.lax.rsqrt(var + eps) * g_ref[...] + bl_ref[...]
    y = jnp.dot(xn.astype(jnp.bfloat16), w_ref[...], preferred_element_type=jnp.float32)
    y = y + b_ref[...]
    if activation == "gelu":
        # TODO(synk): HF Swin uses exact (erf) GELU; tanh approximation for a Mosaic-safe lowering.
        y = jax.nn.gelu(y, approximate=True)
    o_ref[...] = y.astype(o_ref.dtype)


def _linear_ln_kernel(x_ref, w_ref, b_ref, g_ref, bl_ref, o_ref, *, eps):
    """Fused x@w + b -> post-LayerNorm (patch embedding)."""
    y = jnp.dot(x_ref[...].astype(jnp.bfloat16), w_ref[...], preferred_element_type=jnp.float32)
    y = y + b_ref[...]
    mu = jnp.mean(y, axis=-1, keepdims=True)
    yc = y - mu
    var = jnp.mean(yc * yc, axis=-1, keepdims=True)
    o_ref[...] = (yc * jax.lax.rsqrt(var + eps) * g_ref[...] + bl_ref[...]).astype(o_ref.dtype)


def _linear_res_kernel(x_ref, w_ref, b_ref, r_ref, o_ref):
    """Fused x@w + b + residual."""
    y = jnp.dot(x_ref[...].astype(jnp.bfloat16), w_ref[...], preferred_element_type=jnp.float32)
    o_ref[...] = (y + b_ref[...] + r_ref[...].astype(jnp.float32)).astype(o_ref.dtype)


def _attn_proj_kernel(qkv_ref, bias_ref, pw_ref, pb_ref, res_ref, o_ref, *, C, heads, scale):
    """All windows of the row-block at once, all heads, fused output-proj + residual.

    qkv_ref : (tT, 3C) bf16 lane-dense, tokens in window order.
    bias_ref: (heads, tT, tT) f32 = rel-pos bias + shift mask + cross-window -inf mask.
    pw_ref  : (heads, hd, C) bf16 output-projection weight (head-major rows).
    """
    hd = C // heads
    qkv = qkv_ref[...].astype(jnp.float32)            # cast once; lane slices done in f32
    acc = None
    for h in range(heads):
        q = qkv[:, h * hd:(h + 1) * hd].astype(jnp.bfloat16)
        k = qkv[:, C + h * hd:C + (h + 1) * hd].astype(jnp.bfloat16)
        v = qkv[:, 2 * C + h * hd:2 * C + (h + 1) * hd].astype(jnp.bfloat16)
        # q @ k^T without an explicit transpose (contract last dims of both).
        s = jax.lax.dot_general(q, k, (((1,), (1,)), ((), ())),
                                preferred_element_type=jnp.float32) * scale
        s = s + bias_ref[h]
        s = s - jnp.max(s, axis=-1, keepdims=True)
        e = jnp.exp(s)
        p = e * pl.reciprocal(jnp.sum(e, axis=-1, keepdims=True), approx=True)
        o_h = jnp.dot(p.astype(jnp.bfloat16), v, preferred_element_type=jnp.float32)
        y_h = jnp.dot(o_h.astype(jnp.bfloat16), pw_ref[h],
                      preferred_element_type=jnp.float32)          # (tT, C)
        acc = y_h if acc is None else acc + y_h
    out = acc + pb_ref[...] + res_ref[...].astype(jnp.float32)
    o_ref[...] = out.astype(o_ref.dtype)


def _final_ln_pool_kernel(x_ref, g_ref, b_ref, pm_ref, h_ref, p_ref, *, eps):
    """Final LayerNorm + mean pooling (HF SwinModel pooler) in one kernel."""
    x = x_ref[...].astype(jnp.float32)
    mu = jnp.mean(x, axis=-1, keepdims=True)
    xc = x - mu
    var = jnp.mean(xc * xc, axis=-1, keepdims=True)
    y = xc * jax.lax.rsqrt(var + eps) * g_ref[...] + b_ref[...]
    h_ref[...] = y.astype(h_ref.dtype)
    p_ref[...] = jnp.dot(pm_ref[...], y, preferred_element_type=jnp.float32).astype(p_ref.dtype)


# ----------------------- Pallas wrappers -----------------------
def pallas_ln_linear(x, g, bl, w, b, activation="none", out_dtype=jnp.bfloat16):
    M, K = x.shape
    N = w.shape[1]
    tm = _pick_tm(M)
    flops = 2 * M * K * N + 10 * M * K
    bytes_acc = M * K * x.dtype.itemsize + K * N * 2 + M * N * jnp.dtype(out_dtype).itemsize
    trans = M * N if activation == "gelu" else 0
    return pl.pallas_call(
        functools.partial(_ln_linear_kernel, eps=LN_EPS, activation=activation),
        out_shape=jax.ShapeDtypeStruct((M, N), out_dtype),
        grid=(M // tm,),
        in_specs=[
            pl.BlockSpec((tm, K), lambda i: (i, 0)),
            pl.BlockSpec((1, K), lambda i: (0, 0)),
            pl.BlockSpec((1, K), lambda i: (0, 0)),
            pl.BlockSpec((K, N), lambda i: (0, 0)),
            pl.BlockSpec((1, N), lambda i: (0, 0)),
        ],
        out_specs=pl.BlockSpec((tm, N), lambda i: (i, 0)),
        compiler_params=_mosaic_params(("parallel",)),
        cost_estimate=_cost(flops, bytes_acc, trans),
    )(x, g.reshape(1, K), bl.reshape(1, K), w, b.reshape(1, N))


def pallas_linear_ln(x, w, b, g, bl, out_dtype=jnp.bfloat16):
    M, K = x.shape
    N = w.shape[1]
    tm = _pick_tm(M)
    flops = 2 * M * K * N + 10 * M * N
    bytes_acc = M * K * x.dtype.itemsize + K * N * 2 + M * N * jnp.dtype(out_dtype).itemsize
    return pl.pallas_call(
        functools.partial(_linear_ln_kernel, eps=LN_EPS),
        out_shape=jax.ShapeDtypeStruct((M, N), out_dtype),
        grid=(M // tm,),
        in_specs=[
            pl.BlockSpec((tm, K), lambda i: (i, 0)),
            pl.BlockSpec((K, N), lambda i: (0, 0)),
            pl.BlockSpec((1, N), lambda i: (0, 0)),
            pl.BlockSpec((1, N), lambda i: (0, 0)),
            pl.BlockSpec((1, N), lambda i: (0, 0)),
        ],
        out_specs=pl.BlockSpec((tm, N), lambda i: (i, 0)),
        compiler_params=_mosaic_params(("parallel",)),
        cost_estimate=_cost(flops, bytes_acc),
    )(x, w, b.reshape(1, N), g.reshape(1, N), bl.reshape(1, N))


def pallas_linear_res(x, w, b, res, out_dtype=jnp.bfloat16):
    M, K = x.shape
    N = w.shape[1]
    tm = _pick_tm(M)
    flops = 2 * M * K * N
    bytes_acc = M * K * 2 + K * N * 2 + 2 * M * N * 2
    return pl.pallas_call(
        _linear_res_kernel,
        out_shape=jax.ShapeDtypeStruct((M, N), out_dtype),
        grid=(M // tm,),
        in_specs=[
            pl.BlockSpec((tm, K), lambda i: (i, 0)),
            pl.BlockSpec((K, N), lambda i: (0, 0)),
            pl.BlockSpec((1, N), lambda i: (0, 0)),
            pl.BlockSpec((tm, N), lambda i: (i, 0)),
        ],
        out_specs=pl.BlockSpec((tm, N), lambda i: (i, 0)),
        compiler_params=_mosaic_params(("parallel",)),
        cost_estimate=_cost(flops, bytes_acc),
    )(x, w, b.reshape(1, N), res)


def pallas_window_attention_proj(qkv, res, bias, proj_w, proj_b, *, heads, scale):
    """qkv: (T, 3C) bf16 in window order; bias: (steps, heads, tT, tT) f32 block-diag constant;
    proj_w: (heads, hd, C) bf16; res: (T, C) bf16.  Returns (T, C) bf16 = proj(attn) + res."""
    T, threeC = qkv.shape
    C = threeC // 3
    hd = C // heads
    steps = bias.shape[0]
    tT = T // steps
    flops = 4 * T * tT * C + 2 * T * C * C
    trans = heads * T * tT
    bytes_acc = T * threeC * 2 + bias.size * 4 + 2 * T * C * 2 + heads * hd * C * 2
    return pl.pallas_call(
        functools.partial(_attn_proj_kernel, C=C, heads=heads, scale=scale),
        out_shape=jax.ShapeDtypeStruct((T, C), jnp.bfloat16),
        grid=(steps,),
        in_specs=[
            pl.BlockSpec((tT, threeC), lambda i: (i, 0)),
            pl.BlockSpec((None, heads, tT, tT), lambda i: (i, 0, 0, 0)),
            pl.BlockSpec((heads, hd, C), lambda i: (0, 0, 0)),
            pl.BlockSpec((1, C), lambda i: (0, 0)),
            pl.BlockSpec((tT, C), lambda i: (i, 0)),
        ],
        out_specs=pl.BlockSpec((tT, C), lambda i: (i, 0)),
        compiler_params=_mosaic_params(("parallel",)),
        cost_estimate=_cost(flops, bytes_acc, trans),
    )(qkv, bias, proj_w, proj_b.reshape(1, C), res)


def pallas_final_ln_pool(x, g, b, B, L):
    M, C = x.shape
    pool = np.zeros((B, M), np.float32)
    for bb in range(B):
        pool[bb, bb * L:(bb + 1) * L] = 1.0 / L
    pool = jnp.asarray(pool)
    return pl.pallas_call(
        functools.partial(_final_ln_pool_kernel, eps=LN_EPS),
        out_shape=(jax.ShapeDtypeStruct((M, C), jnp.float32),
                   jax.ShapeDtypeStruct((B, C), jnp.float32)),
        grid=(1,),
        in_specs=[
            pl.BlockSpec((M, C), lambda i: (0, 0)),
            pl.BlockSpec((1, C), lambda i: (0, 0)),
            pl.BlockSpec((1, C), lambda i: (0, 0)),
            pl.BlockSpec((B, M), lambda i: (0, 0)),
        ],
        out_specs=(pl.BlockSpec((M, C), lambda i: (0, 0)),
                   pl.BlockSpec((B, C), lambda i: (0, 0))),
        compiler_params=_mosaic_params(("arbitrary",)),
        cost_estimate=_cost(12 * M * C + 2 * B * M * C, M * C * 6 + B * C * 4),
    )(x, g.reshape(1, C), b.reshape(1, C), pool)


# ----------------------- Swin constants (built at init, host-side) -----------------------
def relative_position_index(ws):
    coords = np.stack(np.meshgrid(np.arange(ws), np.arange(ws), indexing="ij"), axis=0)
    flat = coords.reshape(2, -1)
    rel = flat[:, :, None] - flat[:, None, :]
    rel = rel.transpose(1, 2, 0).astype(np.int64)
    rel[:, :, 0] += ws - 1
    rel[:, :, 1] += ws - 1
    rel[:, :, 0] *= 2 * ws - 1
    return rel.sum(-1).astype(np.int32)  # (ws*ws, ws*ws)


def make_shift_mask(H, W, ws, shift):
    img_mask = np.zeros((H, W), dtype=np.float32)
    cnt = 0
    for hs in (slice(0, -ws), slice(-ws, -shift), slice(-shift, None)):
        for wsl in (slice(0, -ws), slice(-ws, -shift), slice(-shift, None)):
            img_mask[hs, wsl] = cnt
            cnt += 1
    m = img_mask.reshape(H // ws, ws, W // ws, ws).transpose(0, 2, 1, 3).reshape(-1, ws * ws)
    diff = m[:, None, :] - m[:, :, None]
    return np.where(diff != 0, -100.0, 0.0).astype(np.float32)  # (nW, ws*ws, ws*ws)


def window_perm(H, W, ws, shift):
    """Token permutation: natural order -> (roll + window partition) order, plus inverse."""
    idx = np.arange(H * W, dtype=np.int32).reshape(H, W)
    if shift > 0:
        idx = np.roll(idx, (-shift, -shift), axis=(0, 1))
    idx = idx.reshape(H // ws, ws, W // ws, ws).transpose(0, 2, 1, 3).reshape(-1)
    if np.array_equal(idx, np.arange(H * W, dtype=np.int32)):
        return None, None
    inv = np.argsort(idx).astype(np.int32)
    return idx.astype(np.int32), inv


def build_attn_bias(B, nW, wsq, heads, rel_bias, shift_mask, steps):
    """Pre-summed block-diagonal attention bias: rel-pos bias + shift mask on each window's
    diagonal block, NEG_INF elsewhere (masks cross-window / cross-batch attention)."""
    T = B * nW * wsq
    bias = np.full((heads, T, T), NEG_INF, dtype=np.float32)
    for b in range(B):
        for w in range(nW):
            s0 = (b * nW + w) * wsq
            blk = rel_bias.copy()
            if shift_mask is not None:
                blk = blk + shift_mask[w][None]
            bias[:, s0:s0 + wsq, s0:s0 + wsq] = blk
    tT = T // steps
    out = np.stack([bias[:, i * tT:(i + 1) * tT, i * tT:(i + 1) * tT] for i in range(steps)], 0)
    return jnp.asarray(out)  # (steps, heads, tT, tT)


# ----------------------- parameter init -----------------------
def init_params(key):
    keys = iter(jax.random.split(key, 512))

    def nrm(shape):
        return 0.02 * jax.random.normal(next(keys), shape, dtype=jnp.float32)

    pe_w = nrm((EMBED_DIM, IN_CHANS, PATCH, PATCH))
    params = {
        "patch_embed": {
            "proj_w": pe_w.reshape(EMBED_DIM, IN_CHANS * PATCH * PATCH).T.astype(jnp.bfloat16),
            "proj_b": nrm((EMBED_DIM,)),
            "norm_g": jnp.ones((EMBED_DIM,), jnp.float32),
            "norm_b": jnp.zeros((EMBED_DIM,), jnp.float32),
        }
    }

    stages = []
    H = W = IMG_SIZE // PATCH
    for i, (depth, heads) in enumerate(zip(DEPTHS, NUM_HEADS)):
        dim = EMBED_DIM * (2 ** i)
        hd = dim // heads
        ws = min(WINDOW, H)
        wsq = ws * ws
        nW = (H // ws) * (W // ws)
        T = BATCH * nW * wsq
        rel_idx = relative_position_index(ws)
        blocks = []
        for j in range(depth):
            shift = (WINDOW // 2) if (j % 2 == 1 and H > ws) else 0
            q_w, k_w, v_w = nrm((dim, dim)), nrm((dim, dim)), nrm((dim, dim))
            q_b, k_b, v_b = nrm((dim,)), nrm((dim,)), nrm((dim,))
            rel_table = np.asarray(nrm(((2 * ws - 1) ** 2, heads)))
            rel_bias = rel_table[rel_idx.reshape(-1)]
            rel_bias = rel_bias.reshape(wsq, wsq, heads).transpose(2, 0, 1)  # (heads, wsq, wsq)
            shift_mask = make_shift_mask(H, W, ws, shift) if shift > 0 else None
            steps = _attn_steps(T, wsq)
            pf, pbw = window_perm(H, W, ws, shift)
            blk = {
                "norm1_g": jnp.ones((dim,), jnp.float32),
                "norm1_b": jnp.zeros((dim,), jnp.float32),
                "qkv_w": jnp.concatenate([q_w, k_w, v_w], axis=1).astype(jnp.bfloat16),
                "qkv_b": jnp.concatenate([q_b, k_b, v_b], axis=0),
                "attn_bias": build_attn_bias(BATCH, nW, wsq, heads, rel_bias, shift_mask, steps),
                "proj_w": nrm((dim, dim)).reshape(heads, hd, dim).astype(jnp.bfloat16),
                "proj_b": nrm((dim,)),
                "norm2_g": jnp.ones((dim,), jnp.float32),
                "norm2_b": jnp.zeros((dim,), jnp.float32),
                "fc1_w": nrm((dim, MLP_RATIO * dim)).astype(jnp.bfloat16),
                "fc1_b": nrm((MLP_RATIO * dim,)),
                "fc2_w": nrm((MLP_RATIO * dim, dim)).astype(jnp.bfloat16),
                "fc2_b": nrm((dim,)),
                "heads": heads,
                "perm_fwd": None if pf is None else jnp.asarray(pf),
                "perm_bwd": None if pbw is None else jnp.asarray(pbw),
            }
            blocks.append(blk)
        stage = {"blocks": blocks}
        if i < len(DEPTHS) - 1:
            stage["merge"] = {
                "norm_g": jnp.ones((4 * dim,), jnp.float32),
                "norm_b": jnp.zeros((4 * dim,), jnp.float32),
                "red_w": nrm((4 * dim, 2 * dim)).astype(jnp.bfloat16),
                "red_b": jnp.zeros((2 * dim,), jnp.float32),  # Swin merge has no bias
            }
            H //= 2
            W //= 2
        stages.append(stage)
    params["stages"] = stages

    cf = EMBED_DIM * (2 ** (len(DEPTHS) - 1))
    params["norm_g"] = jnp.ones((cf,), jnp.float32)
    params["norm_b"] = jnp.zeros((cf,), jnp.float32)
    return params


# ----------------------- model forward -----------------------
def patch_embed(x, p):
    B, C, H, W = x.shape
    gh, gw = H // PATCH, W // PATCH
    patches = x.reshape(B, C, gh, PATCH, gw, PATCH)
    patches = patches.transpose(0, 2, 4, 1, 3, 5).reshape(B * gh * gw, C * PATCH * PATCH)
    y = pallas_linear_ln(patches, p["proj_w"], p["proj_b"], p["norm_g"], p["norm_b"])
    return y.reshape(B, gh * gw, EMBED_DIM), gh, gw


def swin_block(x, blk):
    B, L, C = x.shape
    heads = blk["heads"]
    hd = C // heads

    # natural order -> (roll + window partition) order: single gather (identity skipped).
    xw = x if blk["perm_fwd"] is None else jnp.take(x, blk["perm_fwd"], axis=1)
    wf = xw.reshape(B * L, C)                                      # window-ordered residual (bf16)

    # fused LayerNorm + QKV projection -> lane-dense (T, 3C) bf16
    qkv = pallas_ln_linear(wf, blk["norm1_g"], blk["norm1_b"], blk["qkv_w"], blk["qkv_b"],
                           out_dtype=jnp.bfloat16)

    # all windows + heads in one kernel; bias/mask constant, proj + residual fused.
    attn = pallas_window_attention_proj(qkv, wf, blk["attn_bias"], blk["proj_w"], blk["proj_b"],
                                        heads=heads, scale=hd ** -0.5)   # (T, C) bf16

    # MLP (per-token, so it runs in window order): fused LN + fc1 + GELU, then fc2 + residual.
    h1 = pallas_ln_linear(attn, blk["norm2_g"], blk["norm2_b"], blk["fc1_w"], blk["fc1_b"],
                          activation="gelu", out_dtype=jnp.bfloat16)
    y = pallas_linear_res(h1, blk["fc2_w"], blk["fc2_b"], attn)          # (T, C) bf16

    y = y.reshape(B, L, C)
    if blk["perm_bwd"] is not None:
        y = jnp.take(y, blk["perm_bwd"], axis=1)                   # back to natural token order
    return y


def patch_merging(x, p, H, W):
    B, L, C = x.shape
    xg = x.reshape(B, H, W, C)
    x0 = xg[:, 0::2, 0::2, :]
    x1 = xg[:, 1::2, 0::2, :]
    x2 = xg[:, 0::2, 1::2, :]
    x3 = xg[:, 1::2, 1::2, :]
    cat = jnp.concatenate([x0, x1, x2, x3], axis=-1).reshape(B * (H // 2) * (W // 2), 4 * C)
    y = pallas_ln_linear(cat, p["norm_g"], p["norm_b"], p["red_w"], p["red_b"])
    return y.reshape(B, (H // 2) * (W // 2), 2 * C)


def swin_forward(params, x):
    x, H, W = patch_embed(x, params["patch_embed"])
    for stage in params["stages"]:
        for blk in stage["blocks"]:
            x = swin_block(x, blk)
        if "merge" in stage:
            x = patch_merging(x, stage["merge"], H, W)
            H //= 2
            W //= 2
    B, L, C = x.shape
    last_hidden, pooled = pallas_final_ln_pool(x.reshape(B * L, C),
                                               params["norm_g"], params["norm_b"], B, L)
    return last_hidden.reshape(B, L, C), pooled


# ----------------------- main -----------------------
if __name__ == "__main__":
    key = jax.random.PRNGKey(0)
    pkey, xkey = jax.random.split(key)
    params = init_params(pkey)
    x = jax.random.normal(xkey, (BATCH, IN_CHANS, IMG_SIZE, IMG_SIZE), dtype=jnp.float32)

    forward = jax.jit(functools.partial(swin_forward, params))
    last_hidden, pooled = forward(x)
    jax.block_until_ready((last_hidden, pooled))

    final_dim = EMBED_DIM * (2 ** (len(DEPTHS) - 1))
    final_tokens = (IMG_SIZE // PATCH // (2 ** (len(DEPTHS) - 1))) ** 2
    assert last_hidden.shape == (BATCH, final_tokens, final_dim), last_hidden.shape
    assert pooled.shape == (BATCH, final_dim), pooled.shape
    assert bool(jnp.all(jnp.isfinite(last_hidden))) and bool(jnp.all(jnp.isfinite(pooled)))
    print("KERNEL_OK")
</pallas_src>

<mosaic_0001>
module attributes {stable_mosaic.version = 11 : i64} {
  func.func @_linear_ln_kernel(%arg0: i32, %arg1: memref<128x48xf32, #tpu.memory_space<vmem>>, %arg2: memref<48x32xbf16, #tpu.memory_space<vmem>>, %arg3: memref<1x32xf32, #tpu.memory_space<vmem>>, %arg4: memref<1x32xf32, #tpu.memory_space<vmem>>, %arg5: memref<1x32xf32, #tpu.memory_space<vmem>>, %arg6: memref<128x32xbf16, #tpu.memory_space<vmem>>) attributes {dimension_semantics = [#tpu.dimension_semantics<parallel>], iteration_bounds = array<i64: 1>, scalar_prefetch = 0 : i64, scratch_operands = 0 : i64, tpu.core_type = #tpu.core_type<tc>, window_params = [{transform_indices = @transform_0, window_bounds = array<i64: 128, 48>}, {pipeline_mode = #tpu.pipeline_mode<synchronous>, transform_indices = @transform_1, window_bounds = array<i64: 48, 32>}, {pipeline_mode = #tpu.pipeline_mode<synchronous>, transform_indices = @transform_2, window_bounds = array<i64: 1, 32>}, {pipeline_mode = #tpu.pipeline_mode<synchronous>, transform_indices = @transform_3, window_bounds = array<i64: 1, 32>}, {pipeline_mode = #tpu.pipeline_mode<synchronous>, transform_indices = @transform_4, window_bounds = array<i64: 1, 32>}, {transform_indices = @transform_5, window_bounds = array<i64: 128, 32>}]} {
    %c0 = arith.constant 0 : index
    %c0_0 = arith.constant 0 : index
    %0 = vector.load %arg1[%c0, %c0_0] : memref<128x48xf32, #tpu.memory_space<vmem>>, vector<128x48xf32>
    %1 = arith.truncf %0 : vector<128x48xf32> to vector<128x48xbf16>
    %c0_1 = arith.constant 0 : index
    %c0_2 = arith.constant 0 : index
    %2 = vector.load %arg2[%c0_1, %c0_2] : memref<48x32xbf16, #tpu.memory_space<vmem>>, vector<48x32xbf16>
    %cst = arith.constant dense<0.000000e+00> : vector<128x32xf32>
    %3 = tpu.matmul %1, %2, %cst {dimension_numbers = #tpu.dot_dimension_numbers<[1], [0], [0], [1], [0, 0, 1, 1], [], []>} : vector<128x48xbf16>, vector<48x32xbf16>, vector<128x32xf32> -> vector<128x32xf32>
    %c0_3 = arith.constant 0 : index
    %c0_4 = arith.constant 0 : index
    %4 = vector.load %arg3[%c0_3, %c0_4] : memref<1x32xf32, #tpu.memory_space<vmem>>, vector<1x32xf32>
    %5 = vector.broadcast %4 : vector<1x32xf32> to vector<128x32xf32>
    %6 = arith.addf %3, %5 : vector<128x32xf32>
    %cst_5 = arith.constant dense<0.000000e+00> : vector<128xf32>
    %7 = vector.multi_reduction <add>, %6, %cst_5 [1] : vector<128x32xf32> to vector<128xf32>
    %8 = vector.shape_cast %7 : vector<128xf32> to vector<128x1xf32>
    %cst_6 = arith.constant 3.200000e+01 : f32
    %9 = vector.broadcast %cst_6 : f32 to vector<128x1xf32>
    %10 = arith.divf %8, %9 : vector<128x1xf32>
    %11 = vector.broadcast %10 : vector<128x1xf32> to vector<128x32xf32>
    %12 = arith.subf %6, %11 : vector<128x32xf32>
    %13 = arith.mulf %12, %12 : vector<128x32xf32>
    %cst_7 = arith.constant dense<0.000000e+00> : vector<128xf32>
    %14 = vector.multi_reduction <add>, %13, %cst_7 [1] : vector<128x32xf32> to vector<128xf32>
    %15 = vector.shape_cast %14 : vector<128xf32> to vector<128x1xf32>
    %cst_8 = arith.constant 3.200000e+01 : f32
    %16 = vector.broadcast %cst_8 : f32 to vector<128x1xf32>
    %17 = arith.divf %15, %16 : vector<128x1xf32>
    %cst_9 = arith.constant 9.99999974E-6 : f32
    %18 = vector.broadcast %cst_9 : f32 to vector<128x1xf32>
    %19 = arith.addf %17, %18 : vector<128x1xf32>
    %20 = math.rsqrt %19 : vector<128x1xf32>
    %21 = vector.broadcast %20 : vector<128x1xf32> to vector<128x32xf32>
    %22 = arith.mulf %12, %21 : vector<128x32xf32>
    %c0_10 = arith.constant 0 : index
    %c0_11 = arith.constant 0 : index
    %23 = vector.load %arg4[%c0_10, %c0_11] : memref<1x32xf32, #tpu.memory_space<vmem>>, vector<1x32xf32>
    %24 = vector.broadcast %23 : vector<1x32xf32> to vector<128x32xf32>
    %25 = arith.mulf %22, %24 : vector<128x32xf32>
    %c0_12 = arith.constant 0 : index
    %c0_13 = arith.constant 0 : index
    %26 = vector.load %arg5[%c0_12, %c0_13] : memref<1x32xf32, #tpu.memory_space<vmem>>, vector<1x32xf32>
    %27 = vector.broadcast %26 : vector<1x32xf32> to vector<128x32xf32>
    %28 = arith.addf %25, %27 : vector<128x32xf32>
    %29 = arith.truncf %28 : vector<128x32xf32> to vector<128x32xbf16>
    %c0_14 = arith.constant 0 : index
    %c0_15 = arith.constant 0 : index
    %30 = vector.load %arg6[%c0_14, %c0_15] : memref<128x32xbf16, #tpu.memory_space<vmem>>, vector<128x32xbf16>
    tpu.vector_store %arg6[%c0_14, %c0_15], %29 {strides = array<i32>} : memref<128x32xbf16, #tpu.memory_space<vmem>>, vector<128x32xbf16>,
    return
  }
  func.func @transform_0(%arg0: i32) -> (i32, i32) {
    %c0_i32 = arith.constant 0 : i32
    %c0_i32_0 = arith.constant 0 : i32
    return %arg0, %c0_i32 : i32, i32
  }
  func.func @transform_1(%arg0: i32) -> (i32, i32) {
    %c0_i32 = arith.constant 0 : i32
    %c0_i32_0 = arith.constant 0 : i32
    %c0_i32_1 = arith.constant 0 : i32
    return %c0_i32, %c0_i32_0 : i32, i32
  }
  func.func @transform_2(%arg0: i32) -> (i32, i32) {
    %c0_i32 = arith.constant 0 : i32
    %c0_i32_0 = arith.constant 0 : i32
    %c0_i32_1 = arith.constant 0 : i32
    return %c0_i32, %c0_i32_0 : i32, i32
  }
  func.func @transform_3(%arg0: i32) -> (i32, i32) {
    %c0_i32 = arith.constant 0 : i32
    %c0_i32_0 = arith.constant 0 : i32
    %c0_i32_1 = arith.constant 0 : i32
    return %c0_i32, %c0_i32_0 : i32, i32
  }
  func.func @transform_4(%arg0: i32) -> (i32, i32) {
    %c0_i32 = arith.constant 0 : i32
    %c0_i32_0 = arith.constant 0 : i32
    %c0_i32_1 = arith.constant 0 : i32
    return %c0_i32, %c0_i32_0 : i32, i32
  }
  func.func @transform_5(%arg0: i32) -> (i32, i32) {
    %c0_i32 = arith.constant 0 : i32
    %c0_i32_0 = arith.constant 0 : i32
    return %arg0, %c0_i32 : i32, i32
  }
}

module attributes {stable_mosaic.version = 11 : i64} {
  func.func @_ln_linear_kernel(%arg0: i32, %arg1: memref<128x32xbf16, #tpu.memory_space<vmem>>, %arg2: memref<1x32xf32, #tpu.memory_space<vmem>>, %arg3: memref<1x32xf32, #tpu.memory_space<vmem>>, %arg4: memref<32x96xbf16, #tpu.memory_space<vmem>>, %arg5: memref<1x96xf32, #tpu.memory_space<vmem>>, %arg6: memref<128x96xbf16, #tpu.memory_space<vmem>>) attributes {dimension_semantics = [#tpu.dimension_semantics<parallel>], iteration_bounds = array<i64: 1>, scalar_prefetch = 0 : i64, scratch_operands = 0 : i64, tpu.core_type = #tpu.core_type<tc>, window_params = [{transform_indices = @transform_0, window_bounds = array<i64: 128, 32>}, {pipeline_mode = #tpu.pipeline_mode<synchronous>, transform_indices = @transform_1, window_bounds = array<i64: 1, 32>}, {pipeline_mode = #tpu.pipeline_mode<synchronous>, transform_indices = @transform_2, window_bounds = array<i64: 1, 32>}, {pipeline_mode = #tpu.pipeline_mode<synchronous>, transform_indices = @transform_3, window_bounds = array<i64: 32, 96>}, {pipeline_mode = #tpu.pipeline_mode<synchronous>, transform_indices = @transform_4, window_bounds = array<i64: 1, 96>}, {transform_indices = @transform_5, window_bounds = array<i64: 128, 96>}]} {
    %c0 = arith.constant 0 : index
    %c0_0 = arith.constant 0 : index
    %0 = vector.load %arg1[%c0, %c0_0] : memref<128x32xbf16, #tpu.memory_space<vmem>>, vector<128x32xbf16>
    %1 = arith.extf %0 : vector<128x32xbf16> to vector<128x32xf32>
    %cst = arith.constant dense<0.000000e+00> : vector<128xf32>
    %2 = vector.multi_reduction <add>, %1, %cst [1] : vector<128x32xf32> to vector<128xf32>
    %3 = vector.shape_cast %2 : vector<128xf32> to vector<128x1xf32>
    %cst_1 = arith.constant 3.200000e+01 : f32
    %4 = vector.broadcast %cst_1 : f32 to vector<128x1xf32>
    %5 = arith.divf %3, %4 : vector<128x1xf32>
    %6 = vector.broadcast %5 : vector<128x1xf32> to vector<128x32xf32>
    %7 = arith.subf %1, %6 : vector<128x32xf32>
    %8 = arith.mulf %7, %7 : vector<128x32xf32>
    %cst_2 = arith.constant dense<0.000000e+00> : vector<128xf32>
    %9 = vector.multi_reduction <add>, %8, %cst_2 [1] : vector<128x32xf32> to vector<128xf32>
    %10 = vector.shape_cast %9 : vector<128xf32> to vector<128x1xf32>
    %cst_3 = arith.constant 3.200000e+01 : f32
    %11 = vector.broadcast %cst_3 : f32 to vector<128x1xf32>
    %12 = arith.divf %10, %11 : vector<128x1xf32>
    %cst_4 = arith.constant 9.99999974E-6 : f32
    %13 = vector.broadcast %cst_4 : f32 to vector<128x1xf32>
    %14 = arith.addf %12, %13 : vector<128x1xf32>
    %15 = math.rsqrt %14 : vector<128x1xf32>
    %16 = vector.broadcast %15 : vector<128x1xf32> to vector<128x32xf32>
    %17 = arith.mulf %7, %16 : vector<128x32xf32>
    %c0_5 = arith.constant 0 : index
    %c0_6 = arith.constant 0 : index
    %18 = vector.load %arg2[%c0_5, %c0_6] : memref<1x32xf32, #tpu.memory_space<vmem>>, vector<1x32xf32>
    %19 = vector.broadcast %18 : vector<1x32xf32> to vector<128x32xf32>
    %20 = arith.mulf %17, %19 : vector<128x32xf32>
    %c0_7 = arith.constant 0 : index
    %c0_8 = arith.constant 0 : index
    %21 = vector.load %arg3[%c0_7, %c0_8] : memref<1x32xf32, #tpu.memory_space<vmem>>, vector<1x32xf32>
    %22 = vector.broadcast %21 : vector<1x32xf32> to vector<128x32xf32>
    %23 = arith.addf %20, %22 : vector<128x32xf32>
    %24 = arith.truncf %23 : vector<128x32xf32> to vector<128x32xbf16>
    %c0_9 = arith.constant 0 : index
    %c0_10 = arith.constant 0 : index
    %25 = vector.load %arg4[%c0_9, %c0_10] : memref<32x96xbf16, #tpu.memory_space<vmem>>, vector<32x96xbf16>
    %cst_11 = arith.constant dense<0.000000e+00> : vector<128x96xf32>
    %26 = tpu.matmul %24, %25, %cst_11 {dimension_numbers = #tpu.dot_dimension_numbers<[1], [0], [0], [1], [0, 0, 1, 1], [], []>} : vector<128x32xbf16>, vector<32x96xbf16>, vector<128x96xf32> -> vector<128x96xf32>
    %c0_12 = arith.constant 0 : index
    %c0_13 = arith.constant 0 : index
    %27 = vector.load %arg5[%c0_12, %c0_13] : memref<1x96xf32, #tpu.memory_space<vmem>>, vector<1x96xf32>
    %28 = vector.broadcast %27 : vector<1x96xf32> to vector<128x96xf32>
    %29 = arith.addf %26, %28 : vector<128x96xf32>
    %30 = arith.truncf %29 : vector<128x96xf32> to vector<128x96xbf16>
    %c0_14 = arith.constant 0 : index
    %c0_15 = arith.constant 0 : index
    %31 = vector.load %arg6[%c0_14, %c0_15] : memref<128x96xbf16, #tpu.memory_space<vmem>>, vector<128x96xbf16>
    tpu.vector_store %arg6[%c0_14, %c0_15], %30 {strides = array<i32>} : memref<128x96xbf16, #tpu.memory_space<vmem>>, vector<128x96xbf16>,
    return
  }
  func.func @transform_0(%arg0: i32) -> (i32, i32) {
    %c0_i32 = arith.constant 0 : i32
    %c0_i32_0 = arith.constant 0 : i32
    return %arg0, %c0_i32 : i32, i32
  }
  func.func @transform_1(%arg0: i32) -> (i32, i32) {
    %c0_i32 = arith.constant 0 : i32
    %c0_i32_0 = arith.constant 0 : i32
    %c0_i32_1 = arith.constant 0 : i32
    return %c0_i32, %c0_i32_0 : i32, i32
  }
  func.func @transform_2(%arg0: i32) -> (i32, i32) {
    %c0_i32 = arith.constant 0 : i32
    %c0_i32_0 = arith.constant 0 : i32
    %c0_i32_1 = arith.constant 0 : i32
    return %c0_i32, %c0_i32_0 : i32, i32
  }
  func.func @transform_3(%arg0: i32) -> (i32, i32) {
    %c0_i32 = arith.constant 0 : i32
    %c0_i32_0 = arith.constant 0 : i32
    %c0_i32_1 = arith.constant 0 : i32
    return %c0_i32, %c0_i32_0 : i32, i32
  }
  func.func @transform_4(%arg0: i32) -> (i32, i32) {
    %c0_i32 = arith.constant 0 : i32
    %c0_i32_0 = arith.constant 0 : i32
    %c0_i32_1 = arith.constant 0 : i32
    return %c0_i32, %c0_i32_0 : i32, i32
  }
  func.func @transform_5(%arg0: i32) -> (i32, i32) {
    %c0_i32 = arith.constant 0 : i32
    %c0_i32_0 = arith.constant 0 : i32
    return %arg0, %c0_i32 : i32, i32
  }
}

module attributes {stable_mosaic.version = 11 : i64} {
  func.func @_attn_proj_kernel(%arg0: i32, %arg1: memref<128x96xbf16, #tpu.memory_space<vmem>>, %arg2: memref<1x2x128x128xf32, #tpu.memory_space<vmem>>, %arg3: memref<2x16x32xbf16, #tpu.memory_space<vmem>>, %arg4: memref<1x32xf32, #tpu.memory_space<vmem>>, %arg5: memref<128x32xbf16, #tpu.memory_space<vmem>>, %arg6: memref<128x32xbf16, #tpu.memory_space<vmem>>) attributes {dimension_semantics = [#tpu.dimension_semantics<parallel>], iteration_bounds = array<i64: 1>, scalar_prefetch = 0 : i64, scratch_operands = 0 : i64, tpu.core_type = #tpu.core_type<tc>, window_params = [{transform_indices = @transform_0, window_bounds = array<i64: 128, 96>}, {transform_indices = @transform_1, window_bounds = array<i64: 1, 2, 128, 128>}, {pipeline_mode = #tpu.pipeline_mode<synchronous>, transform_indices = @transform_2, window_bounds = array<i64: 2, 16, 32>}, {pipeline_mode = #tpu.pipeline_mode<synchronous>, transform_indices = @transform_3, window_bounds = array<i64: 1, 32>}, {transform_indices = @transform_4, window_bounds = array<i64: 128, 32>}, {transform_indices = @transform_5, window_bounds = array<i64: 128, 32>}]} {
    %c0 = arith.constant 0 : index
    %c0_0 = arith.constant 0 : index
    %0 = vector.load %arg1[%c0, %c0_0] : memref<128x96xbf16, #tpu.memory_space<vmem>>, vector<128x96xbf16>
    %1 = arith.extf %0 : vector<128x96xbf16> to vector<128x96xf32>
    %2 = vector.extract_strided_slice %1 {offsets = [0, 0], sizes = [128, 16], strides = [1, 1]} : vector<128x96xf32> to vector<128x16xf32>
    %3 = arith.truncf %2 : vector<128x16xf32> to vector<128x16xbf16>
    %4 = vector.extract_strided_slice %1 {offsets = [0, 32], sizes = [128, 16], strides = [1, 1]} : vector<128x96xf32> to vector<128x16xf32>
    %5 = arith.truncf %4 : vector<128x16xf32> to vector<128x16xbf16>
    %6 = vector.extract_strided_slice %1 {offsets = [0, 64], sizes = [128, 16], strides = [1, 1]} : vector<128x96xf32> to vector<128x16xf32>
    %7 = arith.truncf %6 : vector<128x16xf32> to vector<128x16xbf16>
    %cst = arith.constant dense<0.000000e+00> : vector<128x128xf32>
    %8 = tpu.matmul %3, %5, %cst {dimension_numbers = #tpu.dot_dimension_numbers<[1], [1], [0], [0], [0, 0, 1, 0], [], []>} : vector<128x16xbf16>, vector<128x16xbf16>, vector<128x128xf32> -> vector<128x128xf32>
    %cst_1 = arith.constant 2.500000e-01 : f32
    %9 = vector.broadcast %cst_1 : f32 to vector<128x128xf32>
    %10 = arith.mulf %8, %9 : vector<128x128xf32>
    %c0_2 = arith.constant 0 : index
    %c0_3 = arith.constant 0 : index
    %c0_4 = arith.constant 0 : index
    %c0_5 = arith.constant 0 : index
    %11 = vector.load %arg2[%c0_2, %c0_3, %c0_4, %c0_5] : memref<1x2x128x128xf32, #tpu.memory_space<vmem>>, vector<1x1x128x128xf32>
    %12 = vector.shape_cast %11 : vector<1x1x128x128xf32> to vector<128x128xf32>
    %13 = arith.addf %10, %12 : vector<128x128xf32>
    %cst_6 = arith.constant dense<0xFF800000> : vector<128xf32>
    %14 = vector.multi_reduction <maximumf>, %13, %cst_6 [1] : vector<128x128xf32> to vector<128xf32>
    %15 = vector.shape_cast %14 : vector<128xf32> to vector<128x1xf32>
    %16 = vector.broadcast %15 : vector<128x1xf32> to vector<128x128xf32>
    %17 = arith.subf %13, %16 : vector<128x128xf32>
    %18 = math.exp %17 : vector<128x128xf32>
    %cst_7 = arith.constant dense<0.000000e+00> : vector<128xf32>
    %19 = vector.multi_reduction <add>, %18, %cst_7 [1] : vector<128x128xf32> to vector<128xf32>
    %20 = vector.shape_cast %19 : vector<128xf32> to vector<128x1xf32>
    %21 = tpu.reciprocal %20 {approx = true} : vector<128x1xf32> -> vector<128x1xf32>
    %22 = vector.broadcast %21 : vector<128x1xf32> to vector<128x128xf32>
    %23 = arith.mulf %18, %22 : vector<128x128xf32>
    %24 = arith.truncf %23 : vector<128x128xf32> to vector<128x128xbf16>
    %cst_8 = arith.constant dense<0.000000e+00> : vector<128x16xf32>
    %25 = tpu.matmul %24, %7, %cst_8 {dimension_numbers = #tpu.dot_dimension_numbers<[1], [0], [0], [1], [0, 0, 1, 1], [], []>} : vector<128x128xbf16>, vector<128x16xbf16>, vector<128x16xf32> -> vector<128x16xf32>
    %26 = arith.truncf %25 : vector<128x16xf32> to vector<128x16xbf16>
    %c0_9 = arith.constant 0 : index
    %c0_10 = arith.constant 0 : index
    %c0_11 = arith.constant 0 : index
    %27 = vector.load %arg3[%c0_9, %c0_10, %c0_11] : memref<2x16x32xbf16, #tpu.memory_space<vmem>>, vector<1x16x32xbf16>
    %28 = vector.shape_cast %27 : vector<1x16x32xbf16> to vector<16x32xbf16>
    %cst_12 = arith.constant dense<0.000000e+00> : vector<128x32xf32>
    %29 = tpu.matmul %26, %28, %cst_12 {dimension_numbers = #tpu.dot_dimension_numbers<[1], [0], [0], [1], [0, 0, 1, 1], [], []>} : vector<128x16xbf16>, vector<16x32xbf16>, vector<128x32xf32> -> vector<128x32xf32>
    %30 = vector.extract_strided_slice %1 {offsets = [0, 16], sizes = [128, 16], strides = [1, 1]} : vector<128x96xf32> to vector<128x16xf32>
    %31 = arith.truncf %30 : vector<128x16xf32> to vector<128x16xbf16>
    %32 = vector.extract_strided_slice %1 {offsets = [0, 48], sizes = [128, 16], strides = [1, 1]} : vector<128x96xf32> to vector<128x16xf32>
    %33 = arith.truncf %32 : vector<128x16xf32> to vector<128x16xbf16>
    %34 = vector.extract_strided_slice %1 {offsets = [0, 80], sizes = [128, 16], strides = [1, 1]} : vector<128x96xf32> to vector<128x16xf32>
    %35 = arith.truncf %34 : vector<128x16xf32> to vector<128x16xbf16>
    %cst_13 = arith.constant dense<0.000000e+00> : vector<128x128xf32>
    %36 = tpu.matmul %31, %33, %cst_13 {dimension_numbers = #tpu.dot_dimension_numbers<[1], [1], [0], [0], [0, 0, 1, 0], [], []>} : vector<128x16xbf16>, vector<128x16xbf16>, vector<128x128xf32> -> vector<128x128xf32>
    %cst_14 = arith.constant 2.500000e-01 : f32
    %37 = vector.broadcast %cst_14 : f32 to vector<128x128xf32>
    %38 = arith.mulf %36, %37 : vector<128x128xf32>
    %c0_15 = arith.constant 0 : index
    %c1 = arith.constant 1 : index
    %c0_16 = arith.constant 0 : index
    %c0_17 = arith.constant 0 : index
    %39 = vector.load %arg2[%c0_15, %c1, %c0_16, %c0_17] : memref<1x2x128x128xf32, #tpu.memory_space<vmem>>, vector<1x1x128x128xf32>
    %40 = vector.shape_cast %39 : vector<1x1x128x128xf32> to vector<128x128xf32>
    %41 = arith.addf %38, %40 : vector<128x128xf32>
    %cst_18 = arith.constant dense<0xFF800000> : vector<128xf32>
    %42 = vector.multi_reduction <maximumf>, %41, %cst_18 [1] : vector<128x128xf32> to vector<128xf32>
    %43 = vector.shape_cast %42 : vector<128xf32> to vector<128x1xf32>
    %44 = vector.broadcast %43 : vector<128x1xf32> to vector<128x128xf32>
    %45 = arith.subf %41, %44 : vector<128x128xf32>
    %46 = math.exp %45 : vector<128x128xf32>
    %cst_19 = arith.constant dense<0.000000e+00> : vector<128xf32>
    %47 = vector.multi_reduction <add>, %46, %cst_19 [1] : vector<128x128xf32> to vector<128xf32>
    %48 = vector.shape_cast %47 : vector<128xf32> to vector<128x1xf32>
    %49 = tpu.reciprocal %48 {approx = true} : vector<128x1xf32> -> vector<128x1xf32>
    %50 = vector.broadcast %49 : vector<128x1xf32> to vector<128x128xf32>
    %51 = arith.mulf %46, %50 : vector<128x128xf32>
    %52 = arith.truncf %51 : vector<128x128xf32> to vector<128x128xbf16>
    %cst_20 = arith.constant dense<0.000000e+00> : vector<128x16xf32>
    %53 = tpu.matmul %52, %35, %cst_20 {dimension_numbers = #tpu.dot_dimension_numbers<[1], [0], [0], [1], [0, 0, 1, 1], [], []>} : vector<128x128xbf16>, vector<128x16xbf16>, vector<128x16xf32> -> vector<128x16xf32>
    %54 = arith.truncf %53 : vector<128x16xf32> to vector<128x16xbf16>
    %c1_21 = arith.constant 1 : index
    %c0_22 = arith.constant 0 : index
    %c0_23 = arith.constant 0 : index
    %55 = vector.load %arg3[%c1_21, %c0_22, %c0_23] : memref<2x16x32xbf16, #tpu.memory_space<vmem>>, vector<1x16x32xbf16>
    %56 = vector.shape_cast %55 : vector<1x16x32xbf16> to vector<16x32xbf16>
    %cst_24 = arith.constant dense<0.000000e+00> : vector<128x32xf32>
    %57 = tpu.matmul %54, %56, %cst_24 {dimension_numbers = #tpu.dot_dimension_numbers<[1], [0], [0], [1], [0, 0, 1, 1], [], []>} : vector<128x16xbf16>, vector<16x32xbf16>, vector<128x32xf32> -> vector<128x32xf32>
    %58 = arith.addf %29, %57 : vector<128x32xf32>
    %c0_25 = arith.constant 0 : index
    %c0_26 = arith.constant 0 : index
    %59 = vector.load %arg4[%c0_25, %c0_26] : memref<1x32xf32, #tpu.memory_space<vmem>>, vector<1x32xf32>
    %60 = vector.broadcast %59 : vector<1x32xf32> to vector<128x32xf32>
    %61 = arith.addf %58, %60 : vector<128x32xf32>
    %c0_27 = arith.constant 0 : index
    %c0_28 = arith.constant 0 : index
    %62 = vector.load %arg5[%c0_27, %c0_28] : memref<128x32xbf16, #tpu.memory_space<vmem>>, vector<128x32xbf16>
    %63 = arith.extf %62 : vector<128x32xbf16> to vector<128x32xf32>
    %64 = arith.addf %61, %63 : vector<128x32xf32>
    %65 = arith.truncf %64 : vector<128x32xf32> to vector<128x32xbf16>
    %c0_29 = arith.constant 0 : index
    %c0_30 = arith.constant 0 : index
    %66 = vector.load %arg6[%c0_29, %c0_30] : memref<128x32xbf16, #tpu.memory_space<vmem>>, vector<128x32xbf16>
    tpu.vector_store %arg6[%c0_29, %c0_30], %65 {strides = array<i32>} : memref<128x32xbf16, #tpu.memory_space<vmem>>, vector<128x32xbf16>,
    return
  }
  func.func @transform_0(%arg0: i32) -> (i32, i32) {
    %c0_i32 = arith.constant 0 : i32
    %c0_i32_0 = arith.constant 0 : i32
    return %arg0, %c0_i32 : i32, i32
  }
  func.func @transform_1(%arg0: i32) -> (i32, i32, i32, i32) {
    %c0_i32 = arith.constant 0 : i32
    %c0_i32_0 = arith.constant 0 : i32
    %c0_i32_1 = arith.constant 0 : i32
    %c0_i32_2 = arith.constant 0 : i32
    return %arg0, %c0_i32, %c0_i32_0, %c0_i32_1 : i32, i32, i32, i32
  }
  func.func @transform_2(%arg0: i32) -> (i32, i32, i32) {
    %c0_i32 = arith.constant 0 : i32
    %c0_i32_0 = arith.constant 0 : i32
    %c0_i32_1 = arith.constant 0 : i32
    %c0_i32_2 = arith.constant 0 : i32
    return %c0_i32, %c0_i32_0, %c0_i32_1 : i32, i32, i32
  }
  func.func @transform_3(%arg0: i32) -> (i32, i32) {
    %c0_i32 = arith.constant 0 : i32
    %c0_i32_0 = arith.constant 0 : i32
    %c0_i32_1 = arith.constant 0 : i32
    return %c0_i32, %c0_i32_0 : i32, i32
  }
  func.func @transform_4(%arg0: i32) -> (i32, i32) {
    %c0_i32 = arith.constant 0 : i32
    %c0_i32_0 = arith.constant 0 : i32
    return %arg0, %c0_i32 : i32, i32
  }
  func.func @transform_5(%arg0: i32) -> (i32, i32) {
    %c0_i32 = arith.constant 0 : i32
    %c0_i32_0 = arith.constant 0 : i32
    return %arg0, %c0_i32 : i32, i32
  }
}

module attributes {stable_mosaic.version = 11 : i64} {
  func.func @_ln_linear_kernel(%arg0: i32, %arg1: memref<128x32xbf16, #tpu.memory_space<vmem>>, %arg2: memref<1x32xf32, #tpu.memory_space<vmem>>, %arg3: memref<1x32xf32, #tpu.memory_space<vmem>>, %arg4: memref<32x128xbf16, #tpu.memory_space<vmem>>, %arg5: memref<1x128xf32, #tpu.memory_space<vmem>>, %arg6: memref<128x128xbf16, #tpu.memory_space<vmem>>) attributes {dimension_semantics = [#tpu.dimension_semantics<parallel>], iteration_bounds = array<i64: 1>, scalar_prefetch = 0 : i64, scratch_operands = 0 : i64, tpu.core_type = #tpu.core_type<tc>, window_params = [{transform_indices = @transform_0, window_bounds = array<i64: 128, 32>}, {pipeline_mode = #tpu.pipeline_mode<synchronous>, transform_indices = @transform_1, window_bounds = array<i64: 1, 32>}, {pipeline_mode = #tpu.pipeline_mode<synchronous>, transform_indices = @transform_2, window_bounds = array<i64: 1, 32>}, {pipeline_mode = #tpu.pipeline_mode<synchronous>, transform_indices = @transform_3, window_bounds = array<i64: 32, 128>}, {pipeline_mode = #tpu.pipeline_mode<synchronous>, transform_indices = @transform_4, window_bounds = array<i64: 1, 128>}, {transform_indices = @transform_5, window_bounds = array<i64: 128, 128>}]} {
    %c0 = arith.constant 0 : index
    %c0_0 = arith.constant 0 : index
    %0 = vector.load %arg1[%c0, %c0_0] : memref<128x32xbf16, #tpu.memory_space<vmem>>, vector<128x32xbf16>
    %1 = arith.extf %0 : vector<128x32xbf16> to vector<128x32xf32>
    %cst = arith.constant dense<0.000000e+00> : vector<128xf32>
    %2 = vector.multi_reduction <add>, %1, %cst [1] : vector<128x32xf32> to vector<128xf32>
    %3 = vector.shape_cast %2 : vector<128xf32> to vector<128x1xf32>
    %cst_1 = arith.constant 3.200000e+01 : f32
    %4 = vector.broadcast %cst_1 : f32 to vector<128x1xf32>
    %5 = arith.divf %3, %4 : vector<128x1xf32>
    %6 = vector.broadcast %5 : vector<128x1xf32> to vector<128x32xf32>
    %7 = arith.subf %1, %6 : vector<128x32xf32>
    %8 = arith.mulf %7, %7 : vector<128x32xf32>
    %cst_2 = arith.constant dense<0.000000e+00> : vector<128xf32>
    %9 = vector.multi_reduction <add>, %8, %cst_2 [1] : vector<128x32xf32> to vector<128xf32>
    %10 = vector.shape_cast %9 : vector<128xf32> to vector<128x1xf32>
    %cst_3 = arith.constant 3.200000e+01 : f32
    %11 = vector.broadcast %cst_3 : f32 to vector<128x1xf32>
    %12 = arith.divf %10, %11 : vector<128x1xf32>
    %cst_4 = arith.constant 9.99999974E-6 : f32
    %13 = vector.broadcast %cst_4 : f32 to vector<128x1xf32>
    %14 = arith.addf %12, %13 : vector<128x1xf32>
    %15 = math.rsqrt %14 : vector<128x1xf32>
    %16 = vector.broadcast %15 : vector<128x1xf32> to vector<128x32xf32>
    %17 = arith.mulf %7, %16 : vector<128x32xf32>
    %c0_5 = arith.constant 0 : index
    %c0_6 = arith.constant 0 : index
    %18 = vector.load %arg2[%c0_5, %c0_6] : memref<1x32xf32, #tpu.memory_space<vmem>>, vector<1x32xf32>
    %19 = vector.broadcast %18 : vector<1x32xf32> to vector<128x32xf32>
    %20 = arith.mulf %17, %19 : vector<128x32xf32>
    %c0_7 = arith.constant 0 : index
    %c0_8 = arith.constant 0 : index
    %21 = vector.load %arg3[%c0_7, %c0_8] : memref<1x32xf32, #tpu.memory_space<vmem>>, vector<1x32xf32>
    %22 = vector.broadcast %21 : vector<1x32xf32> to vector<128x32xf32>
    %23 = arith.addf %20, %22 : vector<128x32xf32>
    %24 = arith.truncf %23 : vector<128x32xf32> to vector<128x32xbf16>
    %c0_9 = arith.constant 0 : index
    %c0_10 = arith.constant 0 : index
    %25 = vector.load %arg4[%c0_9, %c0_10] : memref<32x128xbf16, #tpu.memory_space<vmem>>, vector<32x128xbf16>
    %cst_11 = arith.constant dense<0.000000e+00> : vector<128x128xf32>
    %26 = tpu.matmul %24, %25, %cst_11 {dimension_numbers = #tpu.dot_dimension_numbers<[1], [0], [0], [1], [0, 0, 1, 1], [], []>} : vector<128x32xbf16>, vector<32x128xbf16>, vector<128x128xf32> -> vector<128x128xf32>
    %c0_12 = arith.constant 0 : index
    %c0_13 = arith.constant 0 : index
    %27 = vector.load %arg5[%c0_12, %c0_13] : memref<1x128xf32, #tpu.memory_space<vmem>>, vector<1x128xf32>
    %28 = vector.broadcast %27 : vector<1x128xf32> to vector<128x128xf32>
    %29 = arith.addf %26, %28 : vector<128x128xf32>
    %30 = arith.mulf %29, %29 : vector<128x128xf32>
    %31 = arith.mulf %29, %30 : vector<128x128xf32>
    %cst_14 = arith.constant 4.471500e-02 : f32
    %32 = vector.broadcast %cst_14 : f32 to vector<128x128xf32>
    %33 = arith.mulf %32, %31 : vector<128x128xf32>
    %34 = arith.addf %29, %33 : vector<128x128xf32>
    %cst_15 = arith.constant 0.797884583 : f32
    %35 = vector.broadcast %cst_15 : f32 to vector<128x128xf32>
    %36 = arith.mulf %35, %34 : vector<128x128xf32>
    %37 = math.tanh %36 : vector<128x128xf32>
    %cst_16 = arith.constant 1.000000e+00 : f32
    %38 = vector.broadcast %cst_16 : f32 to vector<128x128xf32>
    %39 = arith.addf %38, %37 : vector<128x128xf32>
    %cst_17 = arith.constant 5.000000e-01 : f32
    %40 = vector.broadcast %cst_17 : f32 to vector<128x128xf32>
    %41 = arith.mulf %40, %39 : vector<128x128xf32>
    %42 = arith.mulf %29, %41 : vector<128x128xf32>
    %43 = arith.truncf %42 : vector<128x128xf32> to vector<128x128xbf16>
    %c0_18 = arith.constant 0 : index
    %c0_19 = arith.constant 0 : index
    %44 = vector.load %arg6[%c0_18, %c0_19] : memref<128x128xbf16, #tpu.memory_space<vmem>>, vector<128x128xbf16>
    tpu.vector_store %arg6[%c0_18, %c0_19], %43 {strides = array<i32>} : memref<128x128xbf16, #tpu.memory_space<vmem>>, vector<128x128xbf16>,
    return
  }
  func.func @transform_0(%arg0: i32) -> (i32, i32) {
    %c0_i32 = arith.constant 0 : i32
    %c0_i32_0 = arith.constant 0 : i32
    return %arg0, %c0_i32 : i32, i32
  }
  func.func @transform_1(%arg0: i32) -> (i32, i32) {
    %c0_i32 = arith.constant 0 : i32
    %c0_i32_0 = arith.constant 0 : i32
    %c0_i32_1 = arith.constant 0 : i32
    return %c0_i32, %c0_i32_0 : i32, i32
  }
  func.func @transform_2(%arg0: i32) -> (i32, i32) {
    %c0_i32 = arith.constant 0 : i32
    %c0_i32_0 = arith.constant 0 : i32
    %c0_i32_1 = arith.constant 0 : i32
    return %c0_i32, %c0_i32_0 : i32, i32
  }
  func.func @transform_3(%arg0: i32) -> (i32, i32) {
    %c0_i32 = arith.constant 0 : i32
    %c0_i32_0 = arith.constant 0 : i32
    %c0_i32_1 = arith.constant 0 : i32
    return %c0_i32, %c0_i32_0 : i32, i32
  }
  func.func @transform_4(%arg0: i32) -> (i32, i32) {
    %c0_i32 = arith.constant 0 : i32
    %c0_i32_0 = arith.constant 0 : i32
    %c0_i32_1 = arith.constant 0 : i32
    return %c0_i32, %c0_i32_0 : i32, i32
  }
  func.func @transform_5(%arg0: i32) -> (i32, i32) {
    %c0_i32 = arith.constant 0 : i32
    %c0_i32_0 = arith.constant 0 : i32
    return %arg0, %c0_i32 : i32, i32
  }
}

module attributes {stable_mosaic.version = 11 : i64} {
  func.func @_linear_res_kernel(%arg0: i32, %arg1: memref<128x128xbf16, #tpu.memory_space<vmem>>, %arg2: memref<128x32xbf16, #tpu.memory_space<vmem>>, %arg3: memref<1x32xf32, #tpu.memory_space<vmem>>, %arg4: memref<128x32xbf16, #tpu.memory_space<vmem>>, %arg5: memref<128x32xbf16, #tpu.memory_space<vmem>>) attributes {dimension_semantics = [#tpu.dimension_semantics<parallel>], iteration_bounds = array<i64: 1>, scalar_prefetch = 0 : i64, scratch_operands = 0 : i64, tpu.core_type = #tpu.core_type<tc>, window_params = [{transform_indices = @transform_0, window_bounds = array<i64: 128, 128>}, {pipeline_mode = #tpu.pipeline_mode<synchronous>, transform_indices = @transform_1, window_bounds = array<i64: 128, 32>}, {pipeline_mode = #tpu.pipeline_mode<synchronous>, transform_indices = @transform_2, window_bounds = array<i64: 1, 32>}, {transform_indices = @transform_3, window_bounds = array<i64: 128, 32>}, {transform_indices = @transform_4, window_bounds = array<i64: 128, 32>}]} {
    %c0 = arith.constant 0 : index
    %c0_0 = arith.constant 0 : index
    %0 = vector.load %arg1[%c0, %c0_0] : memref<128x128xbf16, #tpu.memory_space<vmem>>, vector<128x128xbf16>
    %c0_1 = arith.constant 0 : index
    %c0_2 = arith.constant 0 : index
    %1 = vector.load %arg2[%c0_1, %c0_2] : memref<128x32xbf16, #tpu.memory_space<vmem>>, vector<128x32xbf16>
    %cst = arith.constant dense<0.000000e+00> : vector<128x32xf32>
    %2 = tpu.matmul %0, %1, %cst {dimension_numbers = #tpu.dot_dimension_numbers<[1], [0], [0], [1], [0, 0, 1, 1], [], []>} : vector<128x128xbf16>, vector<128x32xbf16>, vector<128x32xf32> -> vector<128x32xf32>
    %c0_3 = arith.constant 0 : index
    %c0_4 = arith.constant 0 : index
    %3 = vector.load %arg3[%c0_3, %c0_4] : memref<1x32xf32, #tpu.memory_space<vmem>>, vector<1x32xf32>
    %4 = vector.broadcast %3 : vector<1x32xf32> to vector<128x32xf32>
    %5 = arith.addf %2, %4 : vector<128x32xf32>
    %c0_5 = arith.constant 0 : index
    %c0_6 = arith.constant 0 : index
    %6 = vector.load %arg4[%c0_5, %c0_6] : memref<128x32xbf16, #tpu.memory_space<vmem>>, vector<128x32xbf16>
    %7 = arith.extf %6 : vector<128x32xbf16> to vector<128x32xf32>
    %8 = arith.addf %5, %7 : vector<128x32xf32>
    %9 = arith.truncf %8 : vector<128x32xf32> to vector<128x32xbf16>
    %c0_7 = arith.constant 0 : index
    %c0_8 = arith.constant 0 : index
    %10 = vector.load %arg5[%c0_7, %c0_8] : memref<128x32xbf16, #tpu.memory_space<vmem>>, vector<128x32xbf16>
    tpu.vector_store %arg5[%c0_7, %c0_8], %9 {strides = array<i32>} : memref<128x32xbf16, #tpu.memory_space<vmem>>, vector<128x32xbf16>,
    return
  }
  func.func @transform_0(%arg0: i32) -> (i32, i32) {
    %c0_i32 = arith.constant 0 : i32
    %c0_i32_0 = arith.constant 0 : i32
    return %arg0, %c0_i32 : i32, i32
  }
  func.func @transform_1(%arg0: i32) -> (i32, i32) {
    %c0_i32 = arith.constant 0 : i32
    %c0_i32_0 = arith.constant 0 : i32
    %c0_i32_1 = arith.constant 0 : i32
    return %c0_i32, %c0_i32_0 : i32, i32
  }
  func.func @transform_2(%arg0: i32) -> (i32, i32) {
    %c0_i32 = arith.constant 0 : i32
    %c0_i32_0 = arith.constant 0 : i32
    %c0_i32_1 = arith.constant 0 : i32
    return %c0_i32, %c0_i32_0 : i32, i32
  }
  func.func @transform_3(%arg0: i32) -> (i32, i32) {
    %c0_i32 = arith.constant 0 : i32
    %c0_i32_0 = arith.constant 0 : i32
    return %arg0, %c0_i32 : i32, i32
  }
  func.func @transform_4(%arg0: i32) -> (i32, i32) {
    %c0_i32 = arith.constant 0 : i32
    %c0_i32_0 = arith.constant 0 : i32
    return %arg0, %c0_i32 : i32, i32
  }
}

module attributes {stable_mosaic.version = 11 : i64} {
  func.func @_ln_linear_kernel(%arg0: i32, %arg1: memref<32x128xbf16, #tpu.memory_space<vmem>>, %arg2: memref<1x128xf32, #tpu.memory_space<vmem>>, %arg3: memref<1x128xf32, #tpu.memory_space<vmem>>, %arg4: memref<128x64xbf16, #tpu.memory_space<vmem>>, %arg5: memref<1x64xf32, #tpu.memory_space<vmem>>, %arg6: memref<32x64xbf16, #tpu.memory_space<vmem>>) attributes {dimension_semantics = [#tpu.dimension_semantics<parallel>], iteration_bounds = array<i64: 1>, scalar_prefetch = 0 : i64, scratch_operands = 0 : i64, tpu.core_type = #tpu.core_type<tc>, window_params = [{transform_indices = @transform_0, window_bounds = array<i64: 32, 128>}, {pipeline_mode = #tpu.pipeline_mode<synchronous>, transform_indices = @transform_1, window_bounds = array<i64: 1, 128>}, {pipeline_mode = #tpu.pipeline_mode<synchronous>, transform_indices = @transform_2, window_bounds = array<i64: 1, 128>}, {pipeline_mode = #tpu.pipeline_mode<synchronous>, transform_indices = @transform_3, window_bounds = array<i64: 128, 64>}, {pipeline_mode = #tpu.pipeline_mode<synchronous>, transform_indices = @transform_4, window_bounds = array<i64: 1, 64>}, {transform_indices = @transform_5, window_bounds = array<i64: 32, 64>}]} {
    %c0 = arith.constant 0 : index
    %c0_0 = arith.constant 0 : index
    %0 = vector.load %arg1[%c0, %c0_0] : memref<32x128xbf16, #tpu.memory_space<vmem>>, vector<32x128xbf16>
    %1 = arith.extf %0 : vector<32x128xbf16> to vector<32x128xf32>
    %cst = arith.constant dense<0.000000e+00> : vector<32xf32>
    %2 = vector.multi_reduction <add>, %1, %cst [1] : vector<32x128xf32> to vector<32xf32>
    %3 = vector.shape_cast %2 : vector<32xf32> to vector<32x1xf32>
    %cst_1 = arith.constant 1.280000e+02 : f32
    %4 = vector.broadcast %cst_1 : f32 to vector<32x1xf32>
    %5 = arith.divf %3, %4 : vector<32x1xf32>
    %6 = vector.broadcast %5 : vector<32x1xf32> to vector<32x128xf32>
    %7 = arith.subf %1, %6 : vector<32x128xf32>
    %8 = arith.mulf %7, %7 : vector<32x128xf32>
    %cst_2 = arith.constant dense<0.000000e+00> : vector<32xf32>
    %9 = vector.multi_reduction <add>, %8, %cst_2 [1] : vector<32x128xf32> to vector<32xf32>
    %10 = vector.shape_cast %9 : vector<32xf32> to vector<32x1xf32>
    %cst_3 = arith.constant 1.280000e+02 : f32
    %11 = vector.broadcast %cst_3 : f32 to vector<32x1xf32>
    %12 = arith.divf %10, %11 : vector<32x1xf32>
    %cst_4 = arith.constant 9.99999974E-6 : f32
    %13 = vector.broadcast %cst_4 : f32 to vector<32x1xf32>
    %14 = arith.addf %12, %13 : vector<32x1xf32>
    %15 = math.rsqrt %14 : vector<32x1xf32>
    %16 = vector.broadcast %15 : vector<32x1xf32> to vector<32x128xf32>
    %17 = arith.mulf %7, %16 : vector<32x128xf32>
    %c0_5 = arith.constant 0 : index
    %c0_6 = arith.constant 0 : index
    %18 = vector.load %arg2[%c0_5, %c0_6] : memref<1x128xf32, #tpu.memory_space<vmem>>, vector<1x128xf32>
    %19 = vector.broadcast %18 : vector<1x128xf32> to vector<32x128xf32>
    %20 = arith.mulf %17, %19 : vector<32x128xf32>
    %c0_7 = arith.constant 0 : index
    %c0_8 = arith.constant 0 : index
    %21 = vector.load %arg3[%c0_7, %c0_8] : memref<1x128xf32, #tpu.memory_space<vmem>>, vector<1x128xf32>
    %22 = vector.broadcast %21 : vector<1x128xf32> to vector<32x128xf32>
    %23 = arith.addf %20, %22 : vector<32x128xf32>
    %24 = arith.truncf %23 : vector<32x128xf32> to vector<32x128xbf16>
    %c0_9 = arith.constant 0 : index
    %c0_10 = arith.constant 0 : index
    %25 = vector.load %arg4[%c0_9, %c0_10] : memref<128x64xbf16, #tpu.memory_space<vmem>>, vector<128x64xbf16>
    %cst_11 = arith.constant dense<0.000000e+00> : vector<32x64xf32>
    %26 = tpu.matmul %24, %25, %cst_11 {dimension_numbers = #tpu.dot_dimension_numbers<[1], [0], [0], [1], [0, 0, 1, 1], [], []>} : vector<32x128xbf16>, vector<128x64xbf16>, vector<32x64xf32> -> vector<32x64xf32>
    %c0_12 = arith.constant 0 : index
    %c0_13 = arith.constant 0 : index
    %27 = vector.load %arg5[%c0_12, %c0_13] : memref<1x64xf32, #tpu.memory_space<vmem>>, vector<1x64xf32>
    %28 = vector.broadcast %27 : vector<1x64xf32> to vector<32x64xf32>
    %29 = arith.addf %26, %28 : vector<32x64xf32>
    %30 = arith.truncf %29 : vector<32x64xf32> to vector<32x64xbf16>
    %c0_14 = arith.constant 0 : index
    %c0_15 = arith.constant 0 : index
    %31 = vector.load %arg6[%c0_14, %c0_15] : memref<32x64xbf16, #tpu.memory_space<vmem>>, vector<32x64xbf16>
    tpu.vector_store %arg6[%c0_14, %c0_15], %30 {strides = array<i32>} : memref<32x64xbf16, #tpu.memory_space<vmem>>, vector<32x64xbf16>,
    return
  }
  func.func @transform_0(%arg0: i32) -> (i32, i32) {
    %c0_i32 = arith.constant 0 : i32
    %c0_i32_0 = arith.constant 0 : i32
    return %arg0, %c0_i32 : i32, i32
  }
  func.func @transform_1(%arg0: i32) -> (i32, i32) {
    %c0_i32 = arith.constant 0 : i32
    %c0_i32_0 = arith.constant 0 : i32
    %c0_i32_1 = arith.constant 0 : i32
    return %c0_i32, %c0_i32_0 : i32, i32
  }
  func.func @transform_2(%arg0: i32) -> (i32, i32) {
    %c0_i32 = arith.constant 0 : i32
    %c0_i32_0 = arith.constant 0 : i32
    %c0_i32_1 = arith.constant 0 : i32
    return %c0_i32, %c0_i32_0 : i32, i32
  }
  func.func @transform_3(%arg0: i32) -> (i32, i32) {
    %c0_i32 = arith.constant 0 : i32
    %c0_i32_0 = arith.constant 0 : i32
    %c0_i32_1 = arith.constant 0 : i32
    return %c0_i32, %c0_i32_0 : i32, i32
  }
  func.func @transform_4(%arg0: i32) -> (i32, i32) {
    %c0_i32 = arith.constant 0 : i32
    %c0_i32_0 = arith.constant 0 : i32
    %c0_i32_1 = arith.constant 0 : i32
    return %c0_i32, %c0_i32_0 : i32, i32
  }
  func.func @transform_5(%arg0: i32) -> (i32, i32) {
    %c0_i32 = arith.constant 0 : i32
    %c0_i32_0 = arith.constant 0 : i32
    return %arg0, %c0_i32 : i32, i32
  }
}

module attributes {stable_mosaic.version = 11 : i64} {
  func.func @_ln_linear_kernel(%arg0: i32, %arg1: memref<32x64xbf16, #tpu.memory_space<vmem>>, %arg2: memref<1x64xf32, #tpu.memory_space<vmem>>, %arg3: memref<1x64xf32, #tpu.memory_space<vmem>>, %arg4: memref<64x192xbf16, #tpu.memory_space<vmem>>, %arg5: memref<1x192xf32, #tpu.memory_space<vmem>>, %arg6: memref<32x192xbf16, #tpu.memory_space<vmem>>) attributes {dimension_semantics = [#tpu.dimension_semantics<parallel>], iteration_bounds = array<i64: 1>, scalar_prefetch = 0 : i64, scratch_operands = 0 : i64, tpu.core_type = #tpu.core_type<tc>, window_params = [{transform_indices = @transform_0, window_bounds = array<i64: 32, 64>}, {pipeline_mode = #tpu.pipeline_mode<synchronous>, transform_indices = @transform_1, window_bounds = array<i64: 1, 64>}, {pipeline_mode = #tpu.pipeline_mode<synchronous>, transform_indices = @transform_2, window_bounds = array<i64: 1, 64>}, {pipeline_mode = #tpu.pipeline_mode<synchronous>, transform_indices = @transform_3, window_bounds = array<i64: 64, 192>}, {pipeline_mode = #tpu.pipeline_mode<synchronous>, transform_indices = @transform_4, window_bounds = array<i64: 1, 192>}, {transform_indices = @transform_5, window_bounds = array<i64: 32, 192>}]} {
    %c0 = arith.constant 0 : index
    %c0_0 = arith.constant 0 : index
    %0 = vector.load %arg1[%c0, %c0_0] : memref<32x64xbf16, #tpu.memory_space<vmem>>, vector<32x64xbf16>
    %1 = arith.extf %0 : vector<32x64xbf16> to vector<32x64xf32>
    %cst = arith.constant dense<0.000000e+00> : vector<32xf32>
    %2 = vector.multi_reduction <add>, %1, %cst [1] : vector<32x64xf32> to vector<32xf32>
    %3 = vector.shape_cast %2 : vector<32xf32> to vector<32x1xf32>
    %cst_1 = arith.constant 6.400000e+01 : f32
    %4 = vector.broadcast %cst_1 : f32 to vector<32x1xf32>
    %5 = arith.divf %3, %4 : vector<32x1xf32>
    %6 = vector.broadcast %5 : vector<32x1xf32> to vector<32x64xf32>
    %7 = arith.subf %1, %6 : vector<32x64xf32>
    %8 = arith.mulf %7, %7 : vector<32x64xf32>
    %cst_2 = arith.constant dense<0.000000e+00> : vector<32xf32>
    %9 = vector.multi_reduction <add>, %8, %cst_2 [1] : vector<32x64xf32> to vector<32xf32>
    %10 = vector.shape_cast %9 : vector<32xf32> to vector<32x1xf32>
    %cst_3 = arith.constant 6.400000e+01 : f32
    %11 = vector.broadcast %cst_3 : f32 to vector<32x1xf32>
    %12 = arith.divf %10, %11 : vector<32x1xf32>
    %cst_4 = arith.constant 9.99999974E-6 : f32
    %13 = vector.broadcast %cst_4 : f32 to vector<32x1xf32>
    %14 = arith.addf %12, %13 : vector<32x1xf32>
    %15 = math.rsqrt %14 : vector<32x1xf32>
    %16 = vector.broadcast %15 : vector<32x1xf32> to vector<32x64xf32>
    %17 = arith.mulf %7, %16 : vector<32x64xf32>
    %c0_5 = arith.constant 0 : index
    %c0_6 = arith.constant 0 : index
    %18 = vector.load %arg2[%c0_5, %c0_6] : memref<1x64xf32, #tpu.memory_space<vmem>>, vector<1x64xf32>
    %19 = vector.broadcast %18 : vector<1x64xf32> to vector<32x64xf32>
    %20 = arith.mulf %17, %19 : vector<32x64xf32>
    %c0_7 = arith.constant 0 : index
    %c0_8 = arith.constant 0 : index
    %21 = vector.load %arg3[%c0_7, %c0_8] : memref<1x64xf32, #tpu.memory_space<vmem>>, vector<1x64xf32>
    %22 = vector.broadcast %21 : vector<1x64xf32> to vector<32x64xf32>
    %23 = arith.addf %20, %22 : vector<32x64xf32>
    %24 = arith.truncf %23 : vector<32x64xf32> to vector<32x64xbf16>
    %c0_9 = arith.constant 0 : index
    %c0_10 = arith.constant 0 : index
    %25 = vector.load %arg4[%c0_9, %c0_10] : memref<64x192xbf16, #tpu.memory_space<vmem>>, vector<64x192xbf16>
    %cst_11 = arith.constant dense<0.000000e+00> : vector<32x192xf32>
    %26 = tpu.matmul %24, %25, %cst_11 {dimension_numbers = #tpu.dot_dimension_numbers<[1], [0], [0], [1], [0, 0, 1, 1], [], []>} : vector<32x64xbf16>, vector<64x192xbf16>, vector<32x192xf32> -> vector<32x192xf32>
    %c0_12 = arith.constant 0 : index
    %c0_13 = arith.constant 0 : index
    %27 = vector.load %arg5[%c0_12, %c0_13] : memref<1x192xf32, #tpu.memory_space<vmem>>, vector<1x192xf32>
    %28 = vector.broadcast %27 : vector<1x192xf32> to vector<32x192xf32>
    %29 = arith.addf %26, %28 : vector<32x192xf32>
    %30 = arith.truncf %29 : vector<32x192xf32> to vector<32x192xbf16>
    %c0_14 = arith.constant 0 : index
    %c0_15 = arith.constant 0 : index
    %31 = vector.load %arg6[%c0_14, %c0_15] : memref<32x192xbf16, #tpu.memory_space<vmem>>, vector<32x192xbf16>
    tpu.vector_store %arg6[%c0_14, %c0_15], %30 {strides = array<i32>} : memref<32x192xbf16, #tpu.memory_space<vmem>>, vector<32x192xbf16>,
    return
  }
  func.func @transform_0(%arg0: i32) -> (i32, i32) {
    %c0_i32 = arith.constant 0 : i32
    %c0_i32_0 = arith.constant 0 : i32
    return %arg0, %c0_i32 : i32, i32
  }
  func.func @transform_1(%arg0: i32) -> (i32, i32) {
    %c0_i32 = arith.constant 0 : i32
    %c0_i32_0 = arith.constant 0 : i32
    %c0_i32_1 = arith.constant 0 : i32
    return %c0_i32, %c0_i32_0 : i32, i32
  }
  func.func @transform_2(%arg0: i32) -> (i32, i32) {
    %c0_i32 = arith.constant 0 : i32
    %c0_i32_0 = arith.constant 0 : i32
    %c0_i32_1 = arith.constant 0 : i32
    return %c0_i32, %c0_i32_0 : i32, i32
  }
  func.func @transform_3(%arg0: i32) -> (i32, i32) {
    %c0_i32 = arith.constant 0 : i32
    %c0_i32_0 = arith.constant 0 : i32
    %c0_i32_1 = arith.constant 0 : i32
    return %c0_i32, %c0_i32_0 : i32, i32
  }
  func.func @transform_4(%arg0: i32) -> (i32, i32) {
    %c0_i32 = arith.constant 0 : i32
    %c0_i32_0 = arith.constant 0 : i32
    %c0_i32_1 = arith.constant 0 : i32
    return %c0_i32, %c0_i32_0 : i32, i32
  }
  func.func @transform_5(%arg0: i32) -> (i32, i32) {
    %c0_i32 = arith.constant 0 : i32
    %c0_i32_0 = arith.constant 0 : i32
    return %arg0, %c0_i32 : i32, i32
  }
}

module attributes {stable_mosaic.version = 11 : i64} {
  func.func @_attn_proj_kernel(%arg0: i32, %arg1: memref<32x192xbf16, #tpu.memory_space<vmem>>, %arg2: memref<1x4x32x32xf32, #tpu.memory_space<vmem>>, %arg3: memref<4x16x64xbf16, #tpu.memory_space<vmem>>, %arg4: memref<1x64xf32, #tpu.memory_space<vmem>>, %arg5: memref<32x64xbf16, #tpu.memory_space<vmem>>, %arg6: memref<32x64xbf16, #tpu.memory_space<vmem>>) attributes {dimension_semantics = [#tpu.dimension_semantics<parallel>], iteration_bounds = array<i64: 1>, scalar_prefetch = 0 : i64, scratch_operands = 0 : i64, tpu.core_type = #tpu.core_type<tc>, window_params = [{transform_indices = @transform_0, window_bounds = array<i64: 32, 192>}, {transform_indices = @transform_1, window_bounds = array<i64: 1, 4, 32, 32>}, {pipeline_mode = #tpu.pipeline_mode<synchronous>, transform_indices = @transform_2, window_bounds = array<i64: 4, 16, 64>}, {pipeline_mode = #tpu.pipeline_mode<synchronous>, transform_indices = @transform_3, window_bounds = array<i64: 1, 64>}, {transform_indices = @transform_4, window_bounds = array<i64: 32, 64>}, {transform_indices = @transform_5, window_bounds = array<i64: 32, 64>}]} {
    %c0 = arith.constant 0 : index
    %c0_0 = arith.constant 0 : index
    %0 = vector.load %arg1[%c0, %c0_0] : memref<32x192xbf16, #tpu.memory_space<vmem>>, vector<32x192xbf16>
    %1 = arith.extf %0 : vector<32x192xbf16> to vector<32x192xf32>
    %2 = vector.extract_strided_slice %1 {offsets = [0, 0], sizes = [32, 16], strides = [1, 1]} : vector<32x192xf32> to vector<32x16xf32>
    %3 = arith.truncf %2 : vector<32x16xf32> to vector<32x16xbf16>
    %4 = vector.extract_strided_slice %1 {offsets = [0, 64], sizes = [32, 16], strides = [1, 1]} : vector<32x192xf32> to vector<32x16xf32>
    %5 = arith.truncf %4 : vector<32x16xf32> to vector<32x16xbf16>
    %6 = vector.extract_strided_slice %1 {offsets = [0, 128], sizes = [32, 16], strides = [1, 1]} : vector<32x192xf32> to vector<32x16xf32>
    %7 = arith.truncf %6 : vector<32x16xf32> to vector<32x16xbf16>
    %cst = arith.constant dense<0.000000e+00> : vector<32x32xf32>
    %8 = tpu.matmul %3, %5, %cst {dimension_numbers = #tpu.dot_dimension_numbers<[1], [1], [0], [0], [0, 0, 1, 0], [], []>} : vector<32x16xbf16>, vector<32x16xbf16>, vector<32x32xf32> -> vector<32x32xf32>
    %cst_1 = arith.constant 2.500000e-01 : f32
    %9 = vector.broadcast %cst_1 : f32 to vector<32x32xf32>
    %10 = arith.mulf %8, %9 : vector<32x32xf32>
    %c0_2 = arith.constant 0 : index
    %c0_3 = arith.constant 0 : index
    %c0_4 = arith.constant 0 : index
    %c0_5 = arith.constant 0 : index
    %11 = vector.load %arg2[%c0_2, %c0_3, %c0_4, %c0_5] : memref<1x4x32x32xf32, #tpu.memory_space<vmem>>, vector<1x1x32x32xf32>
    %12 = vector.shape_cast %11 : vector<1x1x32x32xf32> to vector<32x32xf32>
    %13 = arith.addf %10, %12 : vector<32x32xf32>
    %cst_6 = arith.constant dense<0xFF800000> : vector<32xf32>
    %14 = vector.multi_reduction <maximumf>, %13, %cst_6 [1] : vector<32x32xf32> to vector<32xf32>
    %15 = vector.shape_cast %14 : vector<32xf32> to vector<32x1xf32>
    %16 = vector.broadcast %15 : vector<32x1xf32> to vector<32x32xf32>
    %17 = arith.subf %13, %16 : vector<32x32xf32>
    %18 = math.exp %17 : vector<32x32xf32>
    %cst_7 = arith.constant dense<0.000000e+00> : vector<32xf32>
    %19 = vector.multi_reduction <add>, %18, %cst_7 [1] : vector<32x32xf32> to vector<32xf32>
    %20 = vector.shape_cast %19 : vector<32xf32> to vector<32x1xf32>
    %21 = tpu.reciprocal %20 {approx = true} : vector<32x1xf32> -> vector<32x1xf32>
    %22 = vector.broadcast %21 : vector<32x1xf32> to vector<32x32xf32>
    %23 = arith.mulf %18, %22 : vector<32x32xf32>
    %24 = arith.truncf %23 : vector<32x32xf32> to vector<32x32xbf16>
    %cst_8 = arith.constant dense<0.000000e+00> : vector<32x16xf32>
    %25 = tpu.matmul %24, %7, %cst_8 {dimension_numbers = #tpu.dot_dimension_numbers<[1], [0], [0], [1], [0, 0, 1, 1], [], []>} : vector<32x32xbf16>, vector<32x16xbf16>, vector<32x16xf32> -> vector<32x16xf32>
    %26 = arith.truncf %25 : vector<32x16xf32> to vector<32x16xbf16>
    %c0_9 = arith.constant 0 : index
    %c0_10 = arith.constant 0 : index
    %c0_11 = arith.constant 0 : index
    %27 = vector.load %arg3[%c0_9, %c0_10, %c0_11] : memref<4x16x64xbf16, #tpu.memory_space<vmem>>, vector<1x16x64xbf16>
    %28 = vector.shape_cast %27 : vector<1x16x64xbf16> to vector<16x64xbf16>
    %cst_12 = arith.constant dense<0.000000e+00> : vector<32x64xf32>
    %29 = tpu.matmul %26, %28, %cst_12 {dimension_numbers = #tpu.dot_dimension_numbers<[1], [0], [0], [1], [0, 0, 1, 1], [], []>} : vector<32x16xbf16>, vector<16x64xbf16>, vector<32x64xf32> -> vector<32x64xf32>
    %30 = vector.extract_strided_slice %1 {offsets = [0, 16], sizes = [32, 16], strides = [1, 1]} : vector<32x192xf32> to vector<32x16xf32>
    %31 = arith.truncf %30 : vector<32x16xf32> to vector<32x16xbf16>
    %32 = vector.extract_strided_slice %1 {offsets = [0, 80], sizes = [32, 16], strides = [1, 1]} : vector<32x192xf32> to vector<32x16xf32>
    %33 = arith.truncf %32 : vector<32x16xf32> to vector<32x16xbf16>
    %34 = vector.extract_strided_slice %1 {offsets = [0, 144], sizes = [32, 16], strides = [1, 1]} : vector<32x192xf32> to vector<32x16xf32>
    %35 = arith.truncf %34 : vector<32x16xf32> to vector<32x16xbf16>
    %cst_13 = arith.constant dense<0.000000e+00> : vector<32x32xf32>
    %36 = tpu.matmul %31, %33, %cst_13 {dimension_numbers = #tpu.dot_dimension_numbers<[1], [1], [0], [0], [0, 0, 1, 0], [], []>} : vector<32x16xbf16>, vector<32x16xbf16>, vector<32x32xf32> -> vector<32x32xf32>
    %cst_14 = arith.constant 2.500000e-01 : f32
    %37 = vector.broadcast %cst_14 : f32 to vector<32x32xf32>
    %38 = arith.mulf %36, %37 : vector<32x32xf32>
    %c0_15 = arith.constant 0 : index
    %c1 = arith.constant 1 : index
    %c0_16 = arith.constant 0 : index
    %c0_17 = arith.constant 0 : index
    %39 = vector.load %arg2[%c0_15, %c1, %c0_16, %c0_17] : memref<1x4x32x32xf32, #tpu.memory_space<vmem>>, vector<1x1x32x32xf32>
    %40 = vector.shape_cast %39 : vector<1x1x32x32xf32> to vector<32x32xf32>
    %41 = arith.addf %38, %40 : vector<32x32xf32>
    %cst_18 = arith.constant dense<0xFF800000> : vector<32xf32>
    %42 = vector.multi_reduction <maximumf>, %41, %cst_18 [1] : vector<32x32xf32> to vector<32xf32>
    %43 = vector.shape_cast %42 : vector<32xf32> to vector<32x1xf32>
    %44 = vector.broadcast %43 : vector<32x1xf32> to vector<32x32xf32>
    %45 = arith.subf %41, %44 : vector<32x32xf32>
    %46 = math.exp %45 : vector<32x32xf32>
    %cst_19 = arith.constant dense<0.000000e+00> : vector<32xf32>
    %47 = vector.multi_reduction <add>, %46, %cst_19 [1] : vector<32x32xf32> to vector<32xf32>
    %48 = vector.shape_cast %47 : vector<32xf32> to vector<32x1xf32>
    %49 = tpu.reciprocal %48 {approx = true} : vector<32x1xf32> -> vector<32x1xf32>
    %50 = vector.broadcast %49 : vector<32x1xf32> to vector<32x32xf32>
    %51 = arith.mulf %46, %50 : vector<32x32xf32>
    %52 = arith.truncf %51 : vector<32x32xf32> to vector<32x32xbf16>
    %cst_20 = arith.constant dense<0.000000e+00> : vector<32x16xf32>
    %53 = tpu.matmul %52, %35, %cst_20 {dimension_numbers = #tpu.dot_dimension_numbers<[1], [0], [0], [1], [0, 0, 1, 1], [], []>} : vector<32x32xbf16>, vector<32x16xbf16>, vector<32x16xf32> -> vector<32x16xf32>
    %54 = arith.truncf %53 : vector<32x16xf32> to vector<32x16xbf16>
    %c1_21 = arith.constant 1 : index
    %c0_22 = arith.constant 0 : index
    %c0_23 = arith.constant 0 : index
    %55 = vector.load %arg3[%c1_21, %c0_22, %c0_23] : memref<4x16x64xbf16, #tpu.memory_space<vmem>>, vector<1x16x64xbf16>
    %56 = vector.shape_cast %55 : vector<1x16x64xbf16> to vector<16x64xbf16>
    %cst_24 = arith.constant dense<0.000000e+00> : vector<32x64xf32>
    %57 = tpu.matmul %54, %56, %cst_24 {dimension_numbers = #tpu.dot_dimension_numbers<[1], [0], [0], [1], [0, 0, 1, 1], [], []>} : vector<32x16xbf16>, vector<16x64xbf16>, vector<32x64xf32> -> vector<32x64xf32>
    %58 = arith.addf %29, %57 : vector<32x64xf32>
    %59 = vector.extract_strided_slice %1 {offsets = [0, 32], sizes = [32, 16], strides = [1, 1]} : vector<32x192xf32> to vector<32x16xf32>
    %60 = arith.truncf %59 : vector<32x16xf32> to vector<32x16xbf16>
    %61 = vector.extract_strided_slice %1 {offsets = [0, 96], sizes = [32, 16], strides = [1, 1]} : vector<32x192xf32> to vector<32x16xf32>
    %62 = arith.truncf %61 : vector<32x16xf32> to vector<32x16xbf16>
    %63 = vector.extract_strided_slice %1 {offsets = [0, 160], sizes = [32, 16], strides = [1, 1]} : vector<32x192xf32> to vector<32x16xf32>
    %64 = arith.truncf %63 : vector<32x16xf32> to vector<32x16xbf16>
    %cst_25 = arith.constant dense<0.000000e+00> : vector<32x32xf32>
    %65 = tpu.matmul %60, %62, %cst_25 {dimension_numbers = #tpu.dot_dimension_numbers<[1], [1], [0], [0], [0, 0, 1, 0], [], []>} : vector<32x16xbf16>, vector<32x16xbf16>, vector<32x32xf32> -> vector<32x32xf32>
    %cst_26 = arith.constant 2.500000e-01 : f32
    %66 = vector.broadcast %cst_26 : f32 to vector<32x32xf32>
    %67 = arith.mulf %65, %66 : vector<32x32xf32>
    %c0_27 = arith.constant 0 : index
    %c2 = arith.constant 2 : index
    %c0_28 = arith.constant 0 : index
    %c0_29 = arith.constant 0 : index
    %68 = vector.load %arg2[%c0_27, %c2, %c0_28, %c0_29] : memref<1x4x32x32xf32, #tpu.memory_space<vmem>>, vector<1x1x32x32xf32>
    %69 = vector.shape_cast %68 : vector<1x1x32x32xf32> to vector<32x32xf32>
    %70 = arith.addf %67, %69 : vector<32x32xf32>
    %cst_30 = arith.constant dense<0xFF800000> : vector<32xf32>
    %71 = vector.multi_reduction <maximumf>, %70, %cst_30 [1] : vector<32x32xf32> to vector<32xf32>
    %72 = vector.shape_cast %71 : vector<32xf32> to vector<32x1xf32>
    %73 = vector.broadcast %72 : vector<32x1xf32> to vector<32x32xf32>
    %74 = arith.subf %70, %73 : vector<32x32xf32>
    %75 = math.exp %74 : vector<32x32xf32>
    %cst_31 = arith.constant dense<0.000000e+00> : vector<32xf32>
    %76 = vector.multi_reduction <add>, %75, %cst_31 [1] : vector<32x32xf32> to vector<32xf32>
    %77 = vector.shape_cast %76 : vector<32xf32> to vector<32x1xf32>
    %78 = tpu.reciprocal %77 {approx = true} : vector<32x1xf32> -> vector<32x1xf32>
    %79 = vector.broadcast %78 : vector<32x1xf32> to vector<32x32xf32>
    %80 = arith.mulf %75, %79 : vector<32x32xf32>
    %81 = arith.truncf %80 : vector<32x32xf32> to vector<32x32xbf16>
    %cst_32 = arith.constant dense<0.000000e+00> : vector<32x16xf32>
    %82 = tpu.matmul %81, %64, %cst_32 {dimension_numbers = #tpu.dot_dimension_numbers<[1], [0], [0], [1], [0, 0, 1, 1], [], []>} : vector<32x32xbf16>, vector<32x16xbf16>, vector<32x16xf32> -> vector<32x16xf32>
    %83 = arith.truncf %82 : vector<32x16xf32> to vector<32x16xbf16>
    %c2_33 = arith.constant 2 : index
    %c0_34 = arith.constant 0 : index
    %c0_35 = arith.constant 0 : index
    %84 = vector.load %arg3[%c2_33, %c0_34, %c0_35] : memref<4x16x64xbf16, #tpu.memory_space<vmem>>, vector<1x16x64xbf16>
    %85 = vector.shape_cast %84 : vector<1x16x64xbf16> to vector<16x64xbf16>
    %cst_36 = arith.constant dense<0.000000e+00> : vector<32x64xf32>
    %86 = tpu.matmul %83, %85, %cst_36 {dimension_numbers = #tpu.dot_dimension_numbers<[1], [0], [0], [1], [0, 0, 1, 1], [], []>} : vector<32x16xbf16>, vector<16x64xbf16>, vector<32x64xf32> -> vector<32x64xf32>
    %87 = arith.addf %58, %86 : vector<32x64xf32>
    %88 = vector.extract_strided_slice %1 {offsets = [0, 48], sizes = [32, 16], strides = [1, 1]} : vector<32x192xf32> to vector<32x16xf32>
    %89 = arith.truncf %88 : vector<32x16xf32> to vector<32x16xbf16>
    %90 = vector.extract_strided_slice %1 {offsets = [0, 112], sizes = [32, 16], strides = [1, 1]} : vector<32x192xf32> to vector<32x16xf32>
    %91 = arith.truncf %90 : vector<32x16xf32> to vector<32x16xbf16>
    %92 = vector.extract_strided_slice %1 {offsets = [0, 176], sizes = [32, 16], strides = [1, 1]} : vector<32x192xf32> to vector<32x16xf32>
    %93 = arith.truncf %92 : vector<32x16xf32> to vector<32x16xbf16>
    %cst_37 = arith.constant dense<0.000000e+00> : vector<32x32xf32>
    %94 = tpu.matmul %89, %91, %cst_37 {dimension_numbers = #tpu.dot_dimension_numbers<[1], [1], [0], [0], [0, 0, 1, 0], [], []>} : vector<32x16xbf16>, vector<32x16xbf16>, vector<32x32xf32> -> vector<32x32xf32>
    %cst_38 = arith.constant 2.500000e-01 : f32
    %95 = vector.broadcast %cst_38 : f32 to vector<32x32xf32>
    %96 = arith.mulf %94, %95 : vector<32x32xf32>
    %c0_39 = arith.constant 0 : index
    %c3 = arith.constant 3 : index
    %c0_40 = arith.constant 0 : index
    %c0_41 = arith.constant 0 : index
    %97 = vector.load %arg2[%c0_39, %c3, %c0_40, %c0_41] : memref<1x4x32x32xf32, #tpu.memory_space<vmem>>, vector<1x1x32x32xf32>
    %98 = vector.shape_cast %97 : vector<1x1x32x32xf32> to vector<32x32xf32>
    %99 = arith.addf %96, %98 : vector<32x32xf32>
    %cst_42 = arith.constant dense<0xFF800000> : vector<32xf32>
    %100 = vector.multi_reduction <maximumf>, %99, %cst_42 [1] : vector<32x32xf32> to vector<32xf32>
    %101 = vector.shape_cast %100 : vector<32xf32> to vector<32x1xf32>
    %102 = vector.broadcast %101 : vector<32x1xf32> to vector<32x32xf32>
    %103 = arith.subf %99, %102 : vector<32x32xf32>
    %104 = math.exp %103 : vector<32x32xf32>
    %cst_43 = arith.constant dense<0.000000e+00> : vector<32xf32>
    %105 = vector.multi_reduction <add>, %104, %cst_43 [1] : vector<32x32xf32> to vector<32xf32>
    %106 = vector.shape_cast %105 : vector<32xf32> to vector<32x1xf32>
    %107 = tpu.reciprocal %106 {approx = true} : vector<32x1xf32> -> vector<32x1xf32>
    %108 = vector.broadcast %107 : vector<32x1xf32> to vector<32x32xf32>
    %109 = arith.mulf %104, %108 : vector<32x32xf32>
    %110 = arith.truncf %109 : vector<32x32xf32> to vector<32x32xbf16>
    %cst_44 = arith.constant dense<0.000000e+00> : vector<32x16xf32>
    %111 = tpu.matmul %110, %93, %cst_44 {dimension_numbers = #tpu.dot_dimension_numbers<[1], [0], [0], [1], [0, 0, 1, 1], [], []>} : vector<32x32xbf16>, vector<32x16xbf16>, vector<32x16xf32> -> vector<32x16xf32>
    %112 = arith.truncf %111 : vector<32x16xf32> to vector<32x16xbf16>
    %c3_45 = arith.constant 3 : index
    %c0_46 = arith.constant 0 : index
    %c0_47 = arith.constant 0 : index
    %113 = vector.load %arg3[%c3_45, %c0_46, %c0_47] : memref<4x16x64xbf16, #tpu.memory_space<vmem>>, vector<1x16x64xbf16>
    %114 = vector.shape_cast %113 : vector<1x16x64xbf16> to vector<16x64xbf16>
    %cst_48 = arith.constant dense<0.000000e+00> : vector<32x64xf32>
    %115 = tpu.matmul %112, %114, %cst_48 {dimension_numbers = #tpu.dot_dimension_numbers<[1], [0], [0], [1], [0, 0, 1, 1], [], []>} : vector<32x16xbf16>, vector<16x64xbf16>, vector<32x64xf32> -> vector<32x64xf32>
    %116 = arith.addf %87, %115 : vector<32x64xf32>
    %c0_49 = arith.constant 0 : index
    %c0_50 = arith.constant 0 : index
    %117 = vector.load %arg4[%c0_49, %c0_50] : memref<1x64xf32, #tpu.memory_space<vmem>>, vector<1x64xf32>
    %118 = vector.broadcast %117 : vector<1x64xf32> to vector<32x64xf32>
    %119 = arith.addf %116, %118 : vector<32x64xf32>
    %c0_51 = arith.constant 0 : index
    %c0_52 = arith.constant 0 : index
    %120 = vector.load %arg5[%c0_51, %c0_52] : memref<32x64xbf16, #tpu.memory_space<vmem>>, vector<32x64xbf16>
    %121 = arith.extf %120 : vector<32x64xbf16> to vector<32x64xf32>
    %122 = arith.addf %119, %121 : vector<32x64xf32>
    %123 = arith.truncf %122 : vector<32x64xf32> to vector<32x64xbf16>
    %c0_53 = arith.constant 0 : index
    %c0_54 = arith.constant 0 : index
    %124 = vector.load %arg6[%c0_53, %c0_54] : memref<32x64xbf16, #tpu.memory_space<vmem>>, vector<32x64xbf16>
    tpu.vector_store %arg6[%c0_53, %c0_54], %123 {strides = array<i32>} : memref<32x64xbf16, #tpu.memory_space<vmem>>, vector<32x64xbf16>,
    return
  }
  func.func @transform_0(%arg0: i32) -> (i32, i32) {
    %c0_i32 = arith.constant 0 : i32
    %c0_i32_0 = arith.constant 0 : i32
    return %arg0, %c0_i32 : i32, i32
  }
  func.func @transform_1(%arg0: i32) -> (i32, i32, i32, i32) {
    %c0_i32 = arith.constant 0 : i32
    %c0_i32_0 = arith.constant 0 : i32
    %c0_i32_1 = arith.constant 0 : i32
    %c0_i32_2 = arith.constant 0 : i32
    return %arg0, %c0_i32, %c0_i32_0, %c0_i32_1 : i32, i32, i32, i32
  }
  func.func @transform_2(%arg0: i32) -> (i32, i32, i32) {
    %c0_i32 = arith.constant 0 : i32
    %c0_i32_0 = arith.constant 0 : i32
    %c0_i32_1 = arith.constant 0 : i32
    %c0_i32_2 = arith.constant 0 : i32
    return %c0_i32, %c0_i32_0, %c0_i32_1 : i32, i32, i32
  }
  func.func @transform_3(%arg0: i32) -> (i32, i32) {
    %c0_i32 = arith.constant 0 : i32
    %c0_i32_0 = arith.constant 0 : i32
    %c0_i32_1 = arith.constant 0 : i32
    return %c0_i32, %c0_i32_0 : i32, i32
  }
  func.func @transform_4(%arg0: i32) -> (i32, i32) {
    %c0_i32 = arith.constant 0 : i32
    %c0_i32_0 = arith.constant 0 : i32
    return %arg0, %c0_i32 : i32, i32
  }
  func.func @transform_5(%arg0: i32) -> (i32, i32) {
    %c0_i32 = arith.constant 0 : i32
    %c0_i32_0 = arith.constant 0 : i32
    return %arg0, %c0_i32 : i32, i32
  }
}

module attributes {stable_mosaic.version = 11 : i64} {
  func.func @_ln_linear_kernel(%arg0: i32, %arg1: memref<32x64xbf16, #tpu.memory_space<vmem>>, %arg2: memref<1x64xf32, #tpu.memory_space<vmem>>, %arg3: memref<1x64xf32, #tpu.memory_space<vmem>>, %arg4: memref<64x256xbf16, #tpu.memory_space<vmem>>, %arg5: memref<1x256xf32, #tpu.memory_space<vmem>>, %arg6: memref<32x256xbf16, #tpu.memory_space<vmem>>) attributes {dimension_semantics = [#tpu.dimension_semantics<parallel>], iteration_bounds = array<i64: 1>, scalar_prefetch = 0 : i64, scratch_operands = 0 : i64, tpu.core_type = #tpu.core_type<tc>, window_params = [{transform_indices = @transform_0, window_bounds = array<i64: 32, 64>}, {pipeline_mode = #tpu.pipeline_mode<synchronous>, transform_indices = @transform_1, window_bounds = array<i64: 1, 64>}, {pipeline_mode = #tpu.pipeline_mode<synchronous>, transform_indices = @transform_2, window_bounds = array<i64: 1, 64>}, {pipeline_mode = #tpu.pipeline_mode<synchronous>, transform_indices = @transform_3, window_bounds = array<i64: 64, 256>}, {pipeline_mode = #tpu.pipeline_mode<synchronous>, transform_indices = @transform_4, window_bounds = array<i64: 1, 256>}, {transform_indices = @transform_5, window_bounds = array<i64: 32, 256>}]} {
    %c0 = arith.constant 0 : index
    %c0_0 = arith.constant 0 : index
    %0 = vector.load %arg1[%c0, %c0_0] : memref<32x64xbf16, #tpu.memory_space<vmem>>, vector<32x64xbf16>
    %1 = arith.extf %0 : vector<32x64xbf16> to vector<32x64xf32>
    %cst = arith.constant dense<0.000000e+00> : vector<32xf32>
    %2 = vector.multi_reduction <add>, %1, %cst [1] : vector<32x64xf32> to vector<32xf32>
    %3 = vector.shape_cast %2 : vector<32xf32> to vector<32x1xf32>
    %cst_1 = arith.constant 6.400000e+01 : f32
    %4 = vector.broadcast %cst_1 : f32 to vector<32x1xf32>
    %5 = arith.divf %3, %4 : vector<32x1xf32>
    %6 = vector.broadcast %5 : vector<32x1xf32> to vector<32x64xf32>
    %7 = arith.subf %1, %6 : vector<32x64xf32>
    %8 = arith.mulf %7, %7 : vector<32x64xf32>
    %cst_2 = arith.constant dense<0.000000e+00> : vector<32xf32>
    %9 = vector.multi_reduction <add>, %8, %cst_2 [1] : vector<32x64xf32> to vector<32xf32>
    %10 = vector.shape_cast %9 : vector<32xf32> to vector<32x1xf32>
    %cst_3 = arith.constant 6.400000e+01 : f32
    %11 = vector.broadcast %cst_3 : f32 to vector<32x1xf32>
    %12 = arith.divf %10, %11 : vector<32x1xf32>
    %cst_4 = arith.constant 9.99999974E-6 : f32
    %13 = vector.broadcast %cst_4 : f32 to vector<32x1xf32>
    %14 = arith.addf %12, %13 : vector<32x1xf32>
    %15 = math.rsqrt %14 : vector<32x1xf32>
    %16 = vector.broadcast %15 : vector<32x1xf32> to vector<32x64xf32>
    %17 = arith.mulf %7, %16 : vector<32x64xf32>
    %c0_5 = arith.constant 0 : index
    %c0_6 = arith.constant 0 : index
    %18 = vector.load %arg2[%c0_5, %c0_6] : memref<1x64xf32, #tpu.memory_space<vmem>>, vector<1x64xf32>
    %19 = vector.broadcast %18 : vector<1x64xf32> to vector<32x64xf32>
    %20 = arith.mulf %17, %19 : vector<32x64xf32>
    %c0_7 = arith.constant 0 : index
    %c0_8 = arith.constant 0 : index
    %21 = vector.load %arg3[%c0_7, %c0_8] : memref<1x64xf32, #tpu.memory_space<vmem>>, vector<1x64xf32>
    %22 = vector.broadcast %21 : vector<1x64xf32> to vector<32x64xf32>
    %23 = arith.addf %20, %22 : vector<32x64xf32>
    %24 = arith.truncf %23 : vector<32x64xf32> to vector<32x64xbf16>
    %c0_9 = arith.constant 0 : index
    %c0_10 = arith.constant 0 : index
    %25 = vector.load %arg4[%c0_9, %c0_10] : memref<64x256xbf16, #tpu.memory_space<vmem>>, vector<64x256xbf16>
    %cst_11 = arith.constant dense<0.000000e+00> : vector<32x256xf32>
    %26 = tpu.matmul %24, %25, %cst_11 {dimension_numbers = #tpu.dot_dimension_numbers<[1], [0], [0], [1], [0, 0, 1, 1], [], []>} : vector<32x64xbf16>, vector<64x256xbf16>, vector<32x256xf32> -> vector<32x256xf32>
    %c0_12 = arith.constant 0 : index
    %c0_13 = arith.constant 0 : index
    %27 = vector.load %arg5[%c0_12, %c0_13] : memref<1x256xf32, #tpu.memory_space<vmem>>, vector<1x256xf32>
    %28 = vector.broadcast %27 : vector<1x256xf32> to vector<32x256xf32>
    %29 = arith.addf %26, %28 : vector<32x256xf32>
    %30 = arith.mulf %29, %29 : vector<32x256xf32>
    %31 = arith.mulf %29, %30 : vector<32x256xf32>
    %cst_14 = arith.constant 4.471500e-02 : f32
    %32 = vector.broadcast %cst_14 : f32 to vector<32x256xf32>
    %33 = arith.mulf %32, %31 : vector<32x256xf32>
    %34 = arith.addf %29, %33 : vector<32x256xf32>
    %cst_15 = arith.constant 0.797884583 : f32
    %35 = vector.broadcast %cst_15 : f32 to vector<32x256xf32>
    %36 = arith.mulf %35, %34 : vector<32x256xf32>
    %37 = math.tanh %36 : vector<32x256xf32>
    %cst_16 = arith.constant 1.000000e+00 : f32
    %38 = vector.broadcast %cst_16 : f32 to vector<32x256xf32>
    %39 = arith.addf %38, %37 : vector<32x256xf32>
    %cst_17 = arith.constant 5.000000e-01 : f32
    %40 = vector.broadcast %cst_17 : f32 to vector<32x256xf32>
    %41 = arith.mulf %40, %39 : vector<32x256xf32>
    %42 = arith.mulf %29, %41 : vector<32x256xf32>
    %43 = arith.truncf %42 : vector<32x256xf32> to vector<32x256xbf16>
    %c0_18 = arith.constant 0 : index
    %c0_19 = arith.constant 0 : index
    %44 = vector.load %arg6[%c0_18, %c0_19] : memref<32x256xbf16, #tpu.memory_space<vmem>>, vector<32x256xbf16>
    tpu.vector_store %arg6[%c0_18, %c0_19], %43 {strides = array<i32>} : memref<32x256xbf16, #tpu.memory_space<vmem>>, vector<32x256xbf16>,
    return
  }
  func.func @transform_0(%arg0: i32) -> (i32, i32) {
    %c0_i32 = arith.constant 0 : i32
    %c0_i32_0 = arith.constant 0 : i32
    return %arg0, %c0_i32 : i32, i32
  }
  func.func @transform_1(%arg0: i32) -> (i32, i32) {
    %c0_i32 = arith.constant 0 : i32
    %c0_i32_0 = arith.constant 0 : i32
    %c0_i32_1 = arith.constant 0 : i32
    return %c0_i32, %c0_i32_0 : i32, i32
  }
  func.func @transform_2(%arg0: i32) -> (i32, i32) {
    %c0_i32 = arith.constant 0 : i32
    %c0_i32_0 = arith.constant 0 : i32
    %c0_i32_1 = arith.constant 0 : i32
    return %c0_i32, %c0_i32_0 : i32, i32
  }
  func.func @transform_3(%arg0: i32) -> (i32, i32) {
    %c0_i32 = arith.constant 0 : i32
    %c0_i32_0 = arith.constant 0 : i32
    %c0_i32_1 = arith.constant 0 : i32
    return %c0_i32, %c0_i32_0 : i32, i32
  }
  func.func @transform_4(%arg0: i32) -> (i32, i32) {
    %c0_i32 = arith.constant 0 : i32
    %c0_i32_0 = arith.constant 0 : i32
    %c0_i32_1 = arith.constant 0 : i32
    return %c0_i32, %c0_i32_0 : i32, i32
  }
  func.func @transform_5(%arg0: i32) -> (i32, i32) {
    %c0_i32 = arith.constant 0 : i32
    %c0_i32_0 = arith.constant 0 : i32
    return %arg0, %c0_i32 : i32, i32
  }
}

module attributes {stable_mosaic.version = 11 : i64} {
  func.func @_linear_res_kernel(%arg0: i32, %arg1: memref<32x256xbf16, #tpu.memory_space<vmem>>, %arg2: memref<256x64xbf16, #tpu.memory_space<vmem>>, %arg3: memref<1x64xf32, #tpu.memory_space<vmem>>, %arg4: memref<32x64xbf16, #tpu.memory_space<vmem>>, %arg5: memref<32x64xbf16, #tpu.memory_space<vmem>>) attributes {dimension_semantics = [#tpu.dimension_semantics<parallel>], iteration_bounds = array<i64: 1>, scalar_prefetch = 0 : i64, scratch_operands = 0 : i64, tpu.core_type = #tpu.core_type<tc>, window_params = [{transform_indices = @transform_0, window_bounds = array<i64: 32, 256>}, {pipeline_mode = #tpu.pipeline_mode<synchronous>, transform_indices = @transform_1, window_bounds = array<i64: 256, 64>}, {pipeline_mode = #tpu.pipeline_mode<synchronous>, transform_indices = @transform_2, window_bounds = array<i64: 1, 64>}, {transform_indices = @transform_3, window_bounds = array<i64: 32, 64>}, {transform_indices = @transform_4, window_bounds = array<i64: 32, 64>}]} {
    %c0 = arith.constant 0 : index
    %c0_0 = arith.constant 0 : index
    %0 = vector.load %arg1[%c0, %c0_0] : memref<32x256xbf16, #tpu.memory_space<vmem>>, vector<32x256xbf16>
    %c0_1 = arith.constant 0 : index
    %c0_2 = arith.constant 0 : index
    %1 = vector.load %arg2[%c0_1, %c0_2] : memref<256x64xbf16, #tpu.memory_space<vmem>>, vector<256x64xbf16>
    %cst = arith.constant dense<0.000000e+00> : vector<32x64xf32>
    %2 = tpu.matmul %0, %1, %cst {dimension_numbers = #tpu.dot_dimension_numbers<[1], [0], [0], [1], [0, 0, 1, 1], [], []>} : vector<32x256xbf16>, vector<256x64xbf16>, vector<32x64xf32> -> vector<32x64xf32>
    %c0_3 = arith.constant 0 : index
    %c0_4 = arith.constant 0 : index
    %3 = vector.load %arg3[%c0_3, %c0_4] : memref<1x64xf32, #tpu.memory_space<vmem>>, vector<1x64xf32>
    %4 = vector.broadcast %3 : vector<1x64xf32> to vector<32x64xf32>
    %5 = arith.addf %2, %4 : vector<32x64xf32>
    %c0_5 = arith.constant 0 : index
    %c0_6 = arith.constant 0 : index
    %6 = vector.load %arg4[%c0_5, %c0_6] : memref<32x64xbf16, #tpu.memory_space<vmem>>, vector<32x64xbf16>
    %7 = arith.extf %6 : vector<32x64xbf16> to vector<32x64xf32>
    %8 = arith.addf %5, %7 : vector<32x64xf32>
    %9 = arith.truncf %8 : vector<32x64xf32> to vector<32x64xbf16>
    %c0_7 = arith.constant 0 : index
    %c0_8 = arith.constant 0 : index
    %10 = vector.load %arg5[%c0_7, %c0_8] : memref<32x64xbf16, #tpu.memory_space<vmem>>, vector<32x64xbf16>
    tpu.vector_store %arg5[%c0_7, %c0_8], %9 {strides = array<i32>} : memref<32x64xbf16, #tpu.memory_space<vmem>>, vector<32x64xbf16>,
    return
  }
  func.func @transform_0(%arg0: i32) -> (i32, i32) {
    %c0_i32 = arith.constant 0 : i32
    %c0_i32_0 = arith.constant 0 : i32
    return %arg0, %c0_i32 : i32, i32
  }
  func.func @transform_1(%arg0: i32) -> (i32, i32) {
    %c0_i32 = arith.constant 0 : i32
    %c0_i32_0 = arith.constant 0 : i32
    %c0_i32_1 = arith.constant 0 : i32
    return %c0_i32, %c0_i32_0 : i32, i32
  }
  func.func @transform_2(%arg0: i32) -> (i32, i32) {
    %c0_i32 = arith.constant 0 : i32
    %c0_i32_0 = arith.constant 0 : i32
    %c0_i32_1 = arith.constant 0 : i32
    return %c0_i32, %c0_i32_0 : i32, i32
  }
  func.func @transform_3(%arg0: i32) -> (i32, i32) {
    %c0_i32 = arith.constant 0 : i32
    %c0_i32_0 = arith.constant 0 : i32
    return %arg0, %c0_i32 : i32, i32
  }
  func.func @transform_4(%arg0: i32) -> (i32, i32) {
    %c0_i32 = arith.constant 0 : i32
    %c0_i32_0 = arith.constant 0 : i32
    return %arg0, %c0_i32 : i32, i32
  }
}

module attributes {stable_mosaic.version = 11 : i64} {
  func.func @_final_ln_pool_kernel(%arg0: i32, %arg1: memref<32x64xbf16, #tpu.memory_space<vmem>>, %arg2: memref<1x64xf32, #tpu.memory_space<vmem>>, %arg3: memref<1x64xf32, #tpu.memory_space<vmem>>, %arg4: memref<2x32xf32, #tpu.memory_space<vmem>>, %arg5: memref<32x64xf32, #tpu.memory_space<vmem>>, %arg6: memref<2x64xf32, #tpu.memory_space<vmem>>) attributes {dimension_semantics = [#tpu.dimension_semantics<arbitrary>], iteration_bounds = array<i64: 1>, scalar_prefetch = 0 : i64, scratch_operands = 0 : i64, tpu.core_type = #tpu.core_type<tc>, window_params = [{pipeline_mode = #tpu.pipeline_mode<synchronous>, transform_indices = @transform_0, window_bounds = array<i64: 32, 64>}, {pipeline_mode = #tpu.pipeline_mode<synchronous>, transform_indices = @transform_1, window_bounds = array<i64: 1, 64>}, {pipeline_mode = #tpu.pipeline_mode<synchronous>, transform_indices = @transform_2, window_bounds = array<i64: 1, 64>}, {pipeline_mode = #tpu.pipeline_mode<synchronous>, transform_indices = @transform_3, window_bounds = array<i64: 2, 32>}, {pipeline_mode = #tpu.pipeline_mode<synchronous>, transform_indices = @transform_4, window_bounds = array<i64: 32, 64>}, {pipeline_mode = #tpu.pipeline_mode<synchronous>, transform_indices = @transform_5, window_bounds = array<i64: 2, 64>}]} {
    %c0 = arith.constant 0 : index
    %c0_0 = arith.constant 0 : index
    %0 = vector.load %arg1[%c0, %c0_0] : memref<32x64xbf16, #tpu.memory_space<vmem>>, vector<32x64xbf16>
    %1 = arith.extf %0 : vector<32x64xbf16> to vector<32x64xf32>
    %cst = arith.constant dense<0.000000e+00> : vector<32xf32>
    %2 = vector.multi_reduction <add>, %1, %cst [1] : vector<32x64xf32> to vector<32xf32>
    %3 = vector.shape_cast %2 : vector<32xf32> to vector<32x1xf32>
    %cst_1 = arith.constant 6.400000e+01 : f32
    %4 = vector.broadcast %cst_1 : f32 to vector<32x1xf32>
    %5 = arith.divf %3, %4 : vector<32x1xf32>
    %6 = vector.broadcast %5 : vector<32x1xf32> to vector<32x64xf32>
    %7 = arith.subf %1, %6 : vector<32x64xf32>
    %8 = arith.mulf %7, %7 : vector<32x64xf32>
    %cst_2 = arith.constant dense<0.000000e+00> : vector<32xf32>
    %9 = vector.multi_reduction <add>, %8, %cst_2 [1] : vector<32x64xf32> to vector<32xf32>
    %10 = vector.shape_cast %9 : vector<32xf32> to vector<32x1xf32>
    %cst_3 = arith.constant 6.400000e+01 : f32
    %11 = vector.broadcast %cst_3 : f32 to vector<32x1xf32>
    %12 = arith.divf %10, %11 : vector<32x1xf32>
    %cst_4 = arith.constant 9.99999974E-6 : f32
    %13 = vector.broadcast %cst_4 : f32 to vector<32x1xf32>
    %14 = arith.addf %12, %13 : vector<32x1xf32>
    %15 = math.rsqrt %14 : vector<32x1xf32>
    %16 = vector.broadcast %15 : vector<32x1xf32> to vector<32x64xf32>
    %17 = arith.mulf %7, %16 : vector<32x64xf32>
    %c0_5 = arith.constant 0 : index
    %c0_6 = arith.constant 0 : index
    %18 = vector.load %arg2[%c0_5, %c0_6] : memref<1x64xf32, #tpu.memory_space<vmem>>, vector<1x64xf32>
    %19 = vector.broadcast %18 : vector<1x64xf32> to vector<32x64xf32>
    %20 = arith.mulf %17, %19 : vector<32x64xf32>
    %c0_7 = arith.constant 0 : index
    %c0_8 = arith.constant 0 : index
    %21 = vector.load %arg3[%c0_7, %c0_8] : memref<1x64xf32, #tpu.memory_space<vmem>>, vector<1x64xf32>
    %22 = vector.broadcast %21 : vector<1x64xf32> to vector<32x64xf32>
    %23 = arith.addf %20, %22 : vector<32x64xf32>
    %c0_9 = arith.constant 0 : index
    %c0_10 = arith.constant 0 : index
    %24 = vector.load %arg5[%c0_9, %c0_10] : memref<32x64xf32, #tpu.memory_space<vmem>>, vector<32x64xf32>
    tpu.vector_store %arg5[%c0_9, %c0_10], %23 {strides = array<i32>} : memref<32x64xf32, #tpu.memory_space<vmem>>, vector<32x64xf32>,
    %c0_11 = arith.constant 0 : index
    %c0_12 = arith.constant 0 : index
    %25 = vector.load %arg4[%c0_11, %c0_12] : memref<2x32xf32, #tpu.memory_space<vmem>>, vector<2x32xf32>
    %cst_13 = arith.constant dense<0.000000e+00> : vector<2x64xf32>
    %26 = tpu.matmul %25, %23, %cst_13 {dimension_numbers = #tpu.dot_dimension_numbers<[1], [0], [0], [1], [0, 0, 1, 1], [], []>} : vector<2x32xf32>, vector<32x64xf32>, vector<2x64xf32> -> vector<2x64xf32>
    %c0_14 = arith.constant 0 : index
    %c0_15 = arith.constant 0 : index
    %27 = vector.load %arg6[%c0_14, %c0_15] : memref<2x64xf32, #tpu.memory_space<vmem>>, vector<2x64xf32>
    tpu.vector_store %arg6[%c0_14, %c0_15], %26 {strides = array<i32>} : memref<2x64xf32, #tpu.memory_space<vmem>>, vector<2x64xf32>,
    return
  }
  func.func @transform_0(%arg0: i32) -> (i32, i32) {
    %c0_i32 = arith.constant 0 : i32
    %c0_i32_0 = arith.constant 0 : i32
    %c0_i32_1 = arith.constant 0 : i32
    return %c0_i32, %c0_i32_0 : i32, i32
  }
  func.func @transform_1(%arg0: i32) -> (i32, i32) {
    %c0_i32 = arith.constant 0 : i32
    %c0_i32_0 = arith.constant 0 : i32
    %c0_i32_1 = arith.constant 0 : i32
    return %c0_i32, %c0_i32_0 : i32, i32
  }
  func.func @transform_2(%arg0: i32) -> (i32, i32) {
    %c0_i32 = arith.constant 0 : i32
    %c0_i32_0 = arith.constant 0 : i32
    %c0_i32_1 = arith.constant 0 : i32
    return %c0_i32, %c0_i32_0 : i32, i32
  }
  func.func @transform_3(%arg0: i32) -> (i32, i32) {
    %c0_i32 = arith.constant 0 : i32
    %c0_i32_0 = arith.constant 0 : i32
    %c0_i32_1 = arith.constant 0 : i32
    return %c0_i32, %c0_i32_0 : i32, i32
  }
  func.func @transform_4(%arg0: i32) -> (i32, i32) {
    %c0_i32 = arith.constant 0 : i32
    %c0_i32_0 = arith.constant 0 : i32
    %c0_i32_1 = arith.constant 0 : i32
    return %c0_i32, %c0_i32_0 : i32, i32
  }
  func.func @transform_5(%arg0: i32) -> (i32, i32) {
    %c0_i32 = arith.constant 0 : i32
    %c0_i32_0 = arith.constant 0 : i32
    %c0_i32_1 = arith.constant 0 : i32
    return %c0_i32, %c0_i32_0 : i32, i32
  }
}

</mosaic_0001>

<bundles_post_ra>
// kernel: swin_forward.19
= control target key start
LH: loop header
LB: loop body
LE: loop exit
PB: predicated region body
PF: predicated region fallthrough
CT: control target
= control target key end

     0   :  { %vm76_vm0 = vcmask 392192   ;;  %vm198_vm1 = vcmask 261120   ;;  %vm518_vm2 = vcmask 257024   ;;  %s1035_s1 = inlined_call_operand.vmem [shape: bf16[48,32], index: 1, kind: input, shape index: {}]   ;;  %s1036_s0 = inlined_call_operand.vmem [shape: f32[128,48], index: 0, kind: input, shape index: {}]   ;;  %s1037_s2 = inlined_call_operand.vmem [shape: f32[1,32], index: 2, kind: input, shape index: {}]   ;;  %s1038_s3 = inlined_call_operand.vmem [shape: f32[1,32], index: 3, kind: input, shape index: {}]   ;;  %s1039_s4 = inlined_call_operand.vmem [shape: f32[1,32], index: 4, kind: input, shape index: {}]   ;;  %s1040_s5 = inlined_call_operand.vmem [shape: bf16[128,32], index: 5, kind: output, shape index: {}]  }
   0x1   :  { %v624_v0 = vld [vmem:[%s1035_s1 + $0x10] sm:$0xff]   ;;  %v625_v1 = vld [vmem:[%s1035_s1 + $0x8] sm:$0xff]   ;;  %v21_v2 = vld [vmem:[%s1036_s0] sm:$0xff] }
   0x2   :  { %596 = vmatprep.subr.bf16.mxu0 %v624_v0  ;;  %618 = vmatprep.subr.bf16.mxu1 %v624_v0  ;;  %v22_v3 = vld [vmem:[%s1036_s0 + $0x8] sm:$0xff]  ;;  %v29_v4 = vld [vmem:[%s1036_s0 + $0x40] sm:$0xff]  ;;  %v23_v9 = vld [vmem:[%s1036_s0 + $0x10] sm:$0xff] }
   0x3   :  { %597 = vmatpush3.bf16.msra.mxu0 %v624_v0  ;;  %621 = vmatpush3.bf16.msra.mxu1 %v624_v0  ;;  %v626_v5 = vld [vmem:[%s1035_s1] sm:$0xff]   ;;  %v37_v6 = vpack.c.bf16 %v22_v3, %v21_v2  ;;  %v30_v7 = vld [vmem:[%s1036_s0 + $0x48] sm:$0xff]  ;;  %v24_v10 = vld [vmem:[%s1036_s0 + $0x18] sm:$0xff] }
   0x4   :  { %598 = vmatprep.subr.bf16.mxu0 %v625_v1  ;;  %619 = vmatprep.subr.bf16.mxu1 %v625_v1  ;;  %v41_v8 = vpack.c.bf16 %v30_v7, %v29_v4  ;;  %v31_v11 = vld [vmem:[%s1036_s0 + $0x50] sm:$0xff]  ;;  %v32_v12 = vld [vmem:[%s1036_s0 + $0x58] sm:$0xff]  ;;  %v25_v13 = vld [vmem:[%s1036_s0 + $0x20] sm:$0xff]  ;;  %v38_v17 = vpack.c.bf16 %v24_v10, %v23_v9 }
   0x5   :  { %602 = vmatprep.mubr.msk.bf16.mxu0 %vm76_vm0, %v37_v6  ;;  %v26_v14 = vld [vmem:[%s1036_s0 + $0x28] sm:$0xff]  ;;  %v33_v15 = vld [vmem:[%s1036_s0 + $0x60] sm:$0xff]  ;;  %v42_v18 = vpack.c.bf16 %v32_v12, %v31_v11  ;;  %v27_v21 = vld [vmem:[%s1036_s0 + $0x30] sm:$0xff] }
   0x6   :  { %v34_v16 = vld [vmem:[%s1036_s0 + $0x68] sm:$0xff]  ;;  %610 = vmatprep.mubr.msk.bf16.mxu1 %vm76_vm0, %v41_v8  ;;  %v39_v19 = vpack.c.bf16 %v26_v14, %v25_v13  ;;  %v28_v22 = vld [vmem:[%s1036_s0 + $0x38] sm:$0xff]  ;;  %v35_v23 = vld [vmem:[%s1036_s0 + $0x70] sm:$0xff] }
   0x7   :  { %599 = vmatpush3.bf16.msra.mxu0 %v625_v1  ;;  %622 = vmatpush3.bf16.msra.mxu1 %v625_v1  ;;  %v43_v20 = vpack.c.bf16 %v34_v16, %v33_v15  ;;  %v36_v24 = vld [vmem:[%s1036_s0 + $0x78] sm:$0xff]  ;;  %v40_v25 = vpack.c.bf16 %v28_v22, %v27_v21  ;;  %v539_v27 = vld [vmem:[%s1037_s2] ss:$0 sm:$0xff] }
   0x8   :  { %600 = vmatprep.subr.bf16.mxu0 %v626_v5  ;;  %620 = vmatprep.subr.bf16.mxu1 %v626_v5  ;;  %v44_v26 = vpack.c.bf16 %v36_v24, %v35_v23 }
   0xb   :  { %601 = vmatpush3.bf16.msra.mxu0 %v626_v5  ;;  %623 = vmatpush3.bf16.msra.mxu1 %v626_v5 }
   0xe   :  { %603 = vmatmul.mubr.msk.bf16.vlgmr.msra.gmra.mxu0 %vm76_vm0, %v38_v17  ;;  %611 = vmatmul.mubr.msk.bf16.vlgmr.msra.gmra.mxu1 %vm76_vm0, %v42_v18 }
   0xf   :  { %606 = vmatprep.mubr.msk.bf16.mxu0 %vm76_vm0, %v39_v19  ;;  %614 = vmatprep.mubr.msk.bf16.mxu1 %vm76_vm0, %v43_v20 }
  0x16   :  { %607 = vmatmul.mubr.msk.bf16.gmra.mxu0 %vm76_vm0, %v40_v25  ;;  %615 = vmatmul.mubr.msk.bf16.gmra.mxu1 %vm76_vm0, %v44_v26 }
  0xce   :  { %v604_v28 = vpop.f32.mrf.mxu0  ;;  %v612_v29 = vpop.f32.mrf.mxu1 }
  0xcf   :  { %v757_v30 = vadd.f32 %v604_v28, %v539_v27  ;;  %v759_v31 = vadd.f32 %v612_v29, %v539_v27 }
  0xd0   :  { %v135_v32 = vpop.f32.mrf.mxu0  ;;  %v167_v33 = vpop.f32.mrf.mxu1 }
  0xd1   :  { %v761_v34 = vadd.f32 %v539_v27, %v135_v32  ;;  %v229_v35 = vsel %vm198_vm1, %v759_v31, 0.0  ;;  %v205_v36 = vsel %vm198_vm1, %v757_v30, 0.0  ;;  %v767_v42 = vadd.f32 %v539_v27, %v167_v33 }
  0xd2   :  { %230 = vadd.xlane.f32.xlu0 %v229_v35  ;;  %v613_v37 = vpop.f32.mrf.mxu1  ;;  %206 = vadd.xlane.f32.xlu1 %v205_v36  ;;  %v605_v38 = vpop.f32.mrf.mxu0 }
  0xd3   :  { %v147_v39 = vadd.f32 %v605_v38, %v539_v27  ;;  %v769_v43 = vadd.f32 %v613_v37, %v539_v27  ;;  %v199_v45 = vsel %vm198_vm1, %v761_v34, 0.0  ;;  %v223_v52 = vsel %vm198_vm1, %v767_v42, 0.0 }
  0xd4   :  { %v138_v40 = vpop.f32.mrf.mxu0  ;;  %v170_v41 = vpop.f32.mrf.mxu1 }
  0xd5   :  { %v208_v44 = vsel %vm198_vm1, %v147_v39, 0.0  ;;  %v774_v49 = vadd.f32 %v539_v27, %v138_v40  ;;  %v776_v50 = vadd.f32 %v539_v27, %v170_v41  ;;  %v232_v51 = vsel %vm198_vm1, %v769_v43, 0.0 }
  0xd6   :  { %209 = vadd.xlane.f32.xlu1 %v208_v44  ;;  %200 = vadd.xlane.f32.xlu0 %v199_v45  ;;  %v608_v46 = vpop.f32.mrf.mxu0  ;;  %v616_v47 = vpop.f32.mrf.mxu1 }
  0xd7   :  { %v782_v55 = vadd.f32 %v608_v46, %v539_v27  ;;  %v226_v57 = vsel %vm198_vm1, %v776_v50, 0.0  ;;  %v202_v58 = vsel %vm198_vm1, %v774_v49, 0.0  ;;  %v806_v6 = vadd.f32 %v616_v47, %v539_v27 }
  0xd8   :  { %v151_v48 = vpop.f32.mrf.mxu0  ;;  %v183_v54 = vpop.f32.mrf.mxu1 }
  0xd9   :  { %v217_v62 = vsel %vm198_vm1, %v782_v55, 0.0  ;;  %v794_v63 = vadd.f32 %v539_v27, %v151_v48  ;;  %v798_v2 = vadd.f32 %v539_v27, %v183_v54  ;;  %v241_v11 = vsel %vm198_vm1, %v806_v6, 0.0 }
  0xda   :  { %233 = vadd.xlane.f32.xlu1 %v232_v51  ;;  %224 = vadd.xlane.f32.xlu0 %v223_v52  ;;  %v609_v53 = vpop.f32.mrf.mxu0  ;;  %v617_v60 = vpop.f32.mrf.mxu1 }
  0xdb   :  { %v784_v56 = vadd.f32 %v609_v53, %v539_v27  ;;  %v211_v5 = vsel %vm198_vm1, %v794_v63, 0.0  ;;  %v808_v7 = vadd.f32 %v617_v60, %v539_v27  ;;  %v235_v9 = vsel %vm198_vm1, %v798_v2, 0.0 }
  0xdc   :  { %v154_v59 = vpop.f32.mrf.mxu0  ;;  %v186_v1 = vpop.f32.mrf.mxu1 }
  0xdd   :  { %v220_v61 = vsel %vm198_vm1, %v784_v56, 0.0  ;;  %v796_v0 = vadd.f32 %v539_v27, %v154_v59  ;;  %v800_v3 = vadd.f32 %v539_v27, %v186_v1  ;;  %v244_v10 = vsel %vm198_vm1, %v808_v7, 0.0 }
  0xde   :  { %227 = vadd.xlane.f32.xlu1 %v226_v57  ;;  %203 = vadd.xlane.f32.xlu0 %v202_v58 }
  0xdf   :  { %v214_v4 = vsel %vm198_vm1, %v796_v0, 0.0  ;;  %v238_v8 = vsel %vm198_vm1, %v800_v3, 0.0 }
  0xe2   :  { %221 = vadd.xlane.f32.xlu1 %v220_v61  ;;  %218 = vadd.xlane.f32.xlu0 %v217_v62 }
  0xe6   :  { %215 = vadd.xlane.f32.xlu1 %v214_v4  ;;  %212 = vadd.xlane.f32.xlu0 %v211_v5 }
  0xea   :  { %239 = vadd.xlane.f32.xlu1 %v238_v8  ;;  %236 = vadd.xlane.f32.xlu0 %v235_v9 }
  0xee   :  { %245 = vadd.xlane.f32.xlu1 %v244_v10  ;;  %242 = vadd.xlane.f32.xlu0 %v241_v11 }
 0x15b   :  { %v231_v12 = vpop.xlane.xlu0 %230  ;;  %v207_v13 = vpop.xlane.xlu1 %206 }
 0x15c   :  { %v258_v14 = vmul.f32 0.03125, %v231_v12  ;;  %v250_v15 = vmul.f32 0.03125, %v207_v13 }
 0x15e   :  { %v819_v16 = vsub.f32 %v759_v31, %v258_v14  ;;  %v822_v17 = vsub.f32 %v757_v30, %v250_v15 }
 0x15f   :  { %v210_v18 = vpop.xlane.xlu1 %209  ;;  %v201_v19 = vpop.xlane.xlu0 %200 }
 0x160   :  { %v251_v20 = vmul.f32 0.03125, %v210_v18  ;;  %v248_v21 = vmul.f32 0.03125, %v201_v19  ;;  %v282_v22 = vmul.f32 %v822_v17, %v822_v17  ;;  %v290_v26 = vmul.f32 %v819_v16, %v819_v16 }
 0x162   :  { %v826_v23 = vsub.f32 %v147_v39, %v251_v20  ;;  %v829_v24 = vsub.f32 %v761_v34, %v248_v21  ;;  %v302_v25 = vsel %vm198_vm1, %v282_v22, 0.0  ;;  %v326_v36 = vsel %vm198_vm1, %v290_v26, 0.0 }
 0x163   :  { %v234_v27 = vpop.xlane.xlu1 %233  ;;  %303 = vadd.xlane.f32.xlu0 %v302_v25  ;;  %v225_v28 = vpop.xlane.xlu0 %224 }
 0x164   :  { %v259_v29 = vmul.f32 0.03125, %v234_v27  ;;  %v256_v30 = vmul.f32 0.03125, %v225_v28  ;;  %v283_v31 = vmul.f32 %v826_v23, %v826_v23  ;;  %v280_v32 = vmul.f32 %v829_v24, %v829_v24 }
 0x166   :  { %v839_v33 = vsub.f32 %v769_v43, %v259_v29  ;;  %v842_v34 = vsub.f32 %v767_v42, %v256_v30  ;;  %v305_v35 = vsel %vm198_vm1, %v283_v31, 0.0  ;;  %v296_v44 = vsel %vm198_vm1, %v280_v32, 0.0 }
 0x167   :  { %v228_v37 = vpop.xlane.xlu1 %227  ;;  %306 = vadd.xlane.f32.xlu1 %v305_v35  ;;  %327 = vadd.xlane.f32.xlu0 %v326_v36  ;;  %v204_v38 = vpop.xlane.xlu0 %203 }
 0x168   :  { %v257_v39 = vmul.f32 0.03125, %v228_v37  ;;  %v249_v40 = vmul.f32 0.03125, %v204_v38  ;;  %v291_v41 = vmul.f32 %v839_v33, %v839_v33  ;;  %v288_v46 = vmul.f32 %v842_v34, %v842_v34 }
 0x16a   :  { %v850_v43 = vsub.f32 %v776_v50, %v257_v39  ;;  %v853_v42 = vsub.f32 %v774_v49, %v249_v40  ;;  %v329_v45 = vsel %vm198_vm1, %v291_v41, 0.0  ;;  %v320_v57 = vsel %vm198_vm1, %v288_v46, 0.0 }
 0x16b   :  { %v222_v47 = vpop.xlane.xlu1 %221  ;;  %330 = vadd.xlane.f32.xlu1 %v329_v45  ;;  %297 = vadd.xlane.f32.xlu0 %v296_v44  ;;  %v219_v48 = vpop.xlane.xlu0 %218 }
 0x16c   :  { %v255_v51 = vmul.f32 0.03125, %v222_v47  ;;  %v254_v52 = vmul.f32 0.03125, %v219_v48  ;;  %v281_v53 = vmul.f32 %v853_v42, %v853_v42  ;;  %v289_v50 = vmul.f32 %v850_v43, %v850_v43 }
 0x16e   :  { %v863_v49 = vsub.f32 %v784_v56, %v255_v51  ;;  %v866_v54 = vsub.f32 %v782_v55, %v254_v52  ;;  %v299_v58 = vsel %vm198_vm1, %v281_v53, 0.0  ;;  %v323_v4 = vsel %vm198_vm1, %v289_v50, 0.0 }
 0x16f   :  { %v216_v59 = vpop.xlane.xlu1 %215  ;;  %321 = vadd.xlane.f32.xlu0 %v320_v57  ;;  %300 = vadd.xlane.f32.xlu1 %v299_v58  ;;  %v213_v60 = vpop.xlane.xlu0 %212 }
 0x170   :  { %v253_v61 = vmul.f32 0.03125, %v216_v59  ;;  %v252_v62 = vmul.f32 0.03125, %v213_v60  ;;  %v286_v1 = vmul.f32 %v866_v54, %v866_v54  ;;  %v287_v8 = vmul.f32 %v863_v49, %v863_v49 }
 0x172   :  { %v874_v56 = vsub.f32 %v796_v0, %v253_v61  ;;  %v877_v55 = vsub.f32 %v794_v63, %v252_v62  ;;  %v314_v5 = vsel %vm198_vm1, %v286_v1, 0.0  ;;  %v317_v15 = vsel %vm198_vm1, %v287_v8, 0.0  ;;  %v916_v8 = vld [vmem:[%s1038_s3] ss:$0 sm:$0xff] }
 0x173   :  { %v240_v9 = vpop.xlane.xlu1 %239  ;;  %324 = vadd.xlane.f32.xlu1 %v323_v4  ;;  %315 = vadd.xlane.f32.xlu0 %v314_v5  ;;  %v237_v10 = vpop.xlane.xlu0 %236 }
 0x174   :  { %v261_v11 = vmul.f32 0.03125, %v240_v9  ;;  %v260_v12 = vmul.f32 0.03125, %v237_v10  ;;  %v284_v13 = vmul.f32 %v877_v55, %v877_v55  ;;  %v285_v0 = vmul.f32 %v874_v56, %v874_v56 }
 0x176   :  { %v887_v63 = vsub.f32 %v800_v3, %v261_v11  ;;  %v890_v14 = vsub.f32 %v798_v2, %v260_v12  ;;  %v308_v18 = vsel %vm198_vm1, %v284_v13, 0.0  ;;  %v311_v26 = vsel %vm198_vm1, %v285_v0, 0.0  ;;  %v922_v12 = vld [vmem:[%s1039_s4] ss:$0 sm:$0xff] }
 0x177   :  { %v246_v19 = vpop.xlane.xlu1 %245  ;;  %318 = vadd.xlane.f32.xlu1 %v317_v15  ;;  %309 = vadd.xlane.f32.xlu0 %v308_v18  ;;  %v243_v20 = vpop.xlane.xlu0 %242 }
 0x178   :  { %v263_v21 = vmul.f32 0.03125, %v246_v19  ;;  %v262_v22 = vmul.f32 0.03125, %v243_v20  ;;  %v292_v25 = vmul.f32 %v890_v14, %v890_v14  ;;  %v293_v28 = vmul.f32 %v887_v63, %v887_v63 }
 0x17a   :  { %v898_v3 = vsub.f32 %v808_v7, %v263_v21  ;;  %v901_v2 = vsub.f32 %v806_v6, %v262_v22  ;;  %v332_v27 = vsel %vm198_vm1, %v292_v25, 0.0  ;;  %v335_v30 = vsel %vm198_vm1, %v293_v28, 0.0 }
 0x17b   :  { %312 = vadd.xlane.f32.xlu1 %v311_v26  ;;  %333 = vadd.xlane.f32.xlu0 %v332_v27 }
 0x17c   :  { %v294_v29 = vmul.f32 %v901_v2, %v901_v2  ;;  %v295_v7 = vmul.f32 %v898_v3, %v898_v3 }
 0x17e   :  { %v338_v31 = vsel %vm198_vm1, %v294_v29, 0.0  ;;  %v341_v6 = vsel %vm198_vm1, %v295_v7, 0.0 }
 0x17f   :  { %336 = vadd.xlane.f32.xlu1 %v335_v30  ;;  %339 = vadd.xlane.f32.xlu0 %v338_v31 }
 0x183   :  { %342 = vadd.xlane.f32.xlu1 %v341_v6 }
 0x1ec   :  { %v304_v32 = vpop.xlane.xlu0 %303 }
 0x1ed   :  { %v346_v35 = vmul.f32 0.03125, %v304_v32 }
 0x1ef   :  { %v362_v36 = vadd.f32 1e-05, %v346_v35 }
 0x1f0   :  { %v307_v37 = vpop.xlane.xlu1 %306  ;;  %v328_v38 = vpop.xlane.xlu0 %327 }
 0x1f1   :  { %627 = vrsqrt.f32 %v362_v36  ;;  %v347_v39 = vmul.f32 0.03125, %v307_v37  ;;  %v354_v40 = vmul.f32 0.03125, %v328_v38 }
 0x1f3   :  { %v363_v41 = vadd.f32 1e-05, %v347_v39  ;;  %v370_v44 = vadd.f32 1e-05, %v354_v40 }
 0x1f4   :  { %v331_v45 = vpop.xlane.xlu1 %330  ;;  %v298_v46 = vpop.xlane.xlu0 %297 }
 0x1f5   :  { %629 = vrsqrt.f32 %v363_v41  ;;  %v355_v47 = vmul.f32 0.03125, %v331_v45  ;;  %v344_v48 = vmul.f32 0.03125, %v298_v46 }
 0x1f6   :  { %631 = vrsqrt.f32 %v370_v44 }
 0x1f7   :  { %v371_v51 = vadd.f32 1e-05, %v355_v47  ;;  %v360_v52 = vadd.f32 1e-05, %v344_v48 }
 0x1f8   :  { %v301_v53 = vpop.xlane.xlu1 %300  ;;  %v322_v50 = vpop.xlane.xlu0 %321 }
 0x1f9   :  { %633 = vrsqrt.f32 %v371_v51  ;;  %v345_v57 = vmul.f32 0.03125, %v301_v53  ;;  %v352_v58 = vmul.f32 0.03125, %v322_v50 }
 0x1fa   :  { %635 = vrsqrt.f32 %v360_v52 }
 0x1fb   :  { %v361_v59 = vadd.f32 1e-05, %v345_v57  ;;  %v368_v60 = vadd.f32 1e-05, %v352_v58 }
 0x1fc   :  { %v325_v61 = vpop.xlane.xlu1 %324  ;;  %v316_v62 = vpop.xlane.xlu0 %315 }
 0x1fd   :  { %637 = vrsqrt.f32 %v361_v59  ;;  %v353_v1 = vmul.f32 0.03125, %v325_v61  ;;  %v350_v4 = vmul.f32 0.03125, %v316_v62 }
 0x1fe   :  { %v628_v5 = vpop.eup %627  ;;  %639 = vrsqrt.f32 %v368_v60 }
 0x1ff   :  { %v394_v9 = vmul.f32 %v628_v5, %v822_v17  ;;  %v369_v10 = vadd.f32 1e-05, %v353_v1  ;;  %v366_v11 = vadd.f32 1e-05, %v350_v4 }
 0x200   :  { %v319_v13 = vpop.xlane.xlu1 %318  ;;  %v310_v0 = vpop.xlane.xlu0 %309 }
 0x201   :  { %v417_v15 = vmul.f32 %v916_v8, %v394_v9  ;;  %641 = vrsqrt.f32 %v369_v10  ;;  %v351_v18 = vmul.f32 0.03125, %v319_v13  ;;  %v348_v19 = vmul.f32 0.03125, %v310_v0 }
 0x202   :  { %v630_v20 = vpop.eup %629  ;;  %643 = vrsqrt.f32 %v366_v11 }
 0x203   :  { %v632_v21 = vpop.eup %631  ;;  %v440_v22 = vadd.f32 %v922_v12, %v417_v15  ;;  %v395_v17 = vmul.f32 %v630_v20, %v826_v23  ;;  %v367_v25 = vadd.f32 1e-05, %v351_v18  ;;  %v364_v26 = vadd.f32 1e-05, %v348_v19 }
 0x204   :  { %v402_v27 = vmul.f32 %v632_v21, %v819_v16  ;;  %v313_v28 = vpop.xlane.xlu1 %312  ;;  %v334_v29 = vpop.xlane.xlu0 %333 }
 0x205   :  { %v571_v30 = vpack.c.bf16 %v440_v22, %v440_v22  ;;  %v418_v31 = vmul.f32 %v916_v8, %v395_v17  ;;  %645 = vrsqrt.f32 %v367_v25  ;;  %v349_v7 = vmul.f32 0.03125, %v313_v28 }
 0x206   :  { %v634_v6 = vpop.eup %633  ;;  %v425_v32 = vmul.f32 %v916_v8, %v402_v27  ;;  %647 = vrsqrt.f32 %v364_v26  ;;  %v356_v35 = vmul.f32 0.03125, %v334_v29 }
 0x207   :  { %v636_v36 = vpop.eup %635  ;;  %521 = vst.msk [vmem:[%s1040_s5 + $0x8] sm:$0xf] %vm518_vm2, %v571_v30  ;;  %v441_v16 = vadd.f32 %v922_v12, %v418_v31  ;;  %v403_v23 = vmul.f32 %v634_v6, %v839_v33  ;;  %v365_v37 = vadd.f32 1e-05, %v349_v7 }
 0x208   :  { %v448_v38 = vadd.f32 %v922_v12, %v425_v32  ;;  %v392_v39 = vmul.f32 %v636_v36, %v829_v24  ;;  %v372_v40 = vadd.f32 1e-05, %v356_v35  ;;  %v337_v41 = vpop.xlane.xlu1 %336  ;;  %v340_v44 = vpop.xlane.xlu0 %339 }
 0x209   :  { %v572_v45 = vpack.c.bf16 %v441_v16, %v441_v16  ;;  %v426_v46 = vmul.f32 %v916_v8, %v403_v23  ;;  %649 = vrsqrt.f32 %v365_v37  ;;  %v357_v47 = vmul.f32 0.03125, %v337_v41 }
 0x20a   :  { %v638_v48 = vpop.eup %637  ;;  %v579_v51 = vpack.c.bf16 %v448_v38, %v448_v38  ;;  %v415_v52 = vmul.f32 %v916_v8, %v392_v39  ;;  %651 = vrsqrt.f32 %v372_v40  ;;  %v358_v53 = vmul.f32 0.03125, %v340_v44 }
 0x20b   :  { %v640_v33 = vpop.eup %639  ;;  %522 = vst.msk [vmem:[%s1040_s5 + $0xc] sm:$0xf] %vm518_vm2, %v572_v45  ;;  %v449_v24 = vadd.f32 %v922_v12, %v426_v46  ;;  %v393_v50 = vmul.f32 %v638_v48, %v853_v42  ;;  %v373_v57 = vadd.f32 1e-05, %v357_v47 }
 0x20c   :  { %529 = vst.msk [vmem:[%s1040_s5 + $0x28] sm:$0xf] %vm518_vm2, %v579_v51  ;;  %v438_v58 = vadd.f32 %v922_v12, %v415_v52  ;;  %v400_v59 = vmul.f32 %v640_v33, %v842_v34  ;;  %v374_v60 = vadd.f32 1e-05, %v358_v53  ;;  %v343_v61 = vpop.xlane.xlu1 %342 }
 0x20d   :  { %v580_v62 = vpack.c.bf16 %v449_v24, %v449_v24  ;;  %v416_v1 = vmul.f32 %v916_v8, %v393_v50  ;;  %653 = vrsqrt.f32 %v373_v57  ;;  %v359_v4 = vmul.f32 0.03125, %v343_v61 }
 0x20e   :  { %v642_v5 = vpop.eup %641  ;;  %v569_v9 = vpack.c.bf16 %v438_v58, %v438_v58  ;;  %v423_v42 = vmul.f32 %v916_v8, %v400_v59  ;;  %655 = vrsqrt.f32 %v374_v60 }
 0x20f   :  { %v644_v10 = vpop.eup %643  ;;  %530 = vst.msk [vmem:[%s1040_s5 + $0x2c] sm:$0xf] %vm518_vm2, %v580_v62  ;;  %v439_v34 = vadd.f32 %v922_v12, %v416_v1  ;;  %v401_v11 = vmul.f32 %v642_v5, %v850_v43  ;;  %v375_v13 = vadd.f32 1e-05, %v359_v4 }
 0x210   :  { %519 = vst.msk [vmem:[%s1040_s5] sm:$0xf] %vm518_vm2, %v569_v9  ;;  %v446_v0 = vadd.f32 %v922_v12, %v423_v42  ;;  %v398_v15 = vmul.f32 %v644_v10, %v866_v54 }
 0x211   :  { %v570_v18 = vpack.c.bf16 %v439_v34, %v439_v34  ;;  %v424_v19 = vmul.f32 %v916_v8, %v401_v11  ;;  %657 = vrsqrt.f32 %v375_v13 }
 0x212   :  { %v646_v20 = vpop.eup %645  ;;  %v577_v21 = vpack.c.bf16 %v446_v0, %v446_v0  ;;  %v421_v22 = vmul.f32 %v916_v8, %v398_v15 }
 0x213   :  { %v648_v17 = vpop.eup %647  ;;  %520 = vst.msk [vmem:[%s1040_s5 + $0x4] sm:$0xf] %vm518_vm2, %v570_v18  ;;  %v447_v43 = vadd.f32 %v922_v12, %v424_v19  ;;  %v399_v25 = vmul.f32 %v646_v20, %v863_v49 }
 0x214   :  { %527 = vst.msk [vmem:[%s1040_s5 + $0x20] sm:$0xf] %vm518_vm2, %v577_v21  ;;  %v444_v54 = vadd.f32 %v922_v12, %v421_v22  ;;  %v396_v26 = vmul.f32 %v648_v17, %v877_v55 }
 0x215   :  { %v578_v27 = vpack.c.bf16 %v447_v43, %v447_v43  ;;  %v422_v28 = vmul.f32 %v916_v8, %v399_v25 }
 0x216   :  { %v650_v29 = vpop.eup %649  ;;  %v575_v30 = vpack.c.bf16 %v444_v54, %v444_v54  ;;  %v419_v31 = vmul.f32 %v916_v8, %v396_v26 }
 0x217   :  { %v652_v7 = vpop.eup %651  ;;  %528 = vst.msk [vmem:[%s1040_s5 + $0x24] sm:$0xf] %vm518_vm2, %v578_v27  ;;  %v445_v49 = vadd.f32 %v922_v12, %v422_v28  ;;  %v397_v6 = vmul.f32 %v650_v29, %v874_v56 }
 0x218   :  { %525 = vst.msk [vmem:[%s1040_s5 + $0x18] sm:$0xf] %vm518_vm2, %v575_v30  ;;  %v442_v55 = vadd.f32 %v922_v12, %v419_v31  ;;  %v404_v32 = vmul.f32 %v652_v7, %v890_v14 }
 0x219   :  { %v576_v35 = vpack.c.bf16 %v445_v49, %v445_v49  ;;  %v420_v36 = vmul.f32 %v916_v8, %v397_v6 }
 0x21a   :  { %v654_v16 = vpop.eup %653  ;;  %v573_v23 = vpack.c.bf16 %v442_v55, %v442_v55  ;;  %v427_v37 = vmul.f32 %v916_v8, %v404_v32 }
 0x21b   :  { %v656_v38 = vpop.eup %655  ;;  %526 = vst.msk [vmem:[%s1040_s5 + $0x1c] sm:$0xf] %vm518_vm2, %v576_v35  ;;  %v443_v56 = vadd.f32 %v922_v12, %v420_v36  ;;  %v405_v39 = vmul.f32 %v654_v16, %v887_v63 }
 0x21c   :  { %523 = vst.msk [vmem:[%s1040_s5 + $0x10] sm:$0xf] %vm518_vm2, %v573_v23  ;;  %v450_v14 = vadd.f32 %v922_v12, %v427_v37  ;;  %v406_v40 = vmul.f32 %v656_v38, %v901_v2 }
 0x21d   :  { %v574_v41 = vpack.c.bf16 %v443_v56, %v443_v56  ;;  %v428_v44 = vmul.f32 %v916_v8, %v405_v39 }
 0x21e   :  { %v658_v45 = vpop.eup %657  ;;  %v581_v46 = vpack.c.bf16 %v450_v14, %v450_v14  ;;  %v429_v47 = vmul.f32 %v916_v8, %v406_v40 }
 0x21f   :  { %524 = vst.msk [vmem:[%s1040_s5 + $0x14] sm:$0xf] %vm518_vm2, %v574_v41  ;;  %v451_v63 = vadd.f32 %v922_v12, %v428_v44  ;;  %v407_v48 = vmul.f32 %v658_v45, %v898_v3 }
 0x220   :  { %531 = vst.msk [vmem:[%s1040_s5 + $0x30] sm:$0xf] %vm518_vm2, %v581_v46  ;;  %v452_v2 = vadd.f32 %v922_v12, %v429_v47 }
 0x221   :  { %v582_v51 = vpack.c.bf16 %v451_v63, %v451_v63  ;;  %v430_v52 = vmul.f32 %v916_v8, %v407_v48 }
 0x222   :  { %v583_v53 = vpack.c.bf16 %v452_v2, %v452_v2 }
 0x223   :  { %532 = vst.msk [vmem:[%s1040_s5 + $0x34] sm:$0xf] %vm518_vm2, %v582_v51  ;;  %v453_v33 = vadd.f32 %v922_v12, %v430_v52 }
 0x224   :  { %533 = vst.msk [vmem:[%s1040_s5 + $0x38] sm:$0xf] %vm518_vm2, %v583_v53 }
 0x225   :  { %v584_v3 = vpack.c.bf16 %v453_v33, %v453_v33 }
 0x227   :  { %534 = vst.msk [vmem:[%s1040_s5 + $0x3c] sm:$0xf] %vm518_vm2, %v584_v3 }

// kernel: swin_forward.20
= control target key start
LH: loop header
LB: loop body
LE: loop exit
PB: predicated region body
PF: predicated region fallthrough
CT: control target
= control target key end

     0   :  { %vm53_vm0 = vcmask 261120   ;;  %vm525_vm1 = vcmask 781312   ;;  %s1093_s0 = inlined_call_operand.vmem [shape: bf16[128,32], index: 0, kind: input, shape index: {}]   ;;  %s1094_s3 = inlined_call_operand.vmem [shape: bf16[32,96], index: 3, kind: input, shape index: {}]   ;;  %s1095_s1 = inlined_call_operand.vmem [shape: f32[1,32], index: 1, kind: input, shape index: {}]   ;;  %s1096_s2 = inlined_call_operand.vmem [shape: f32[1,32], index: 2, kind: input, shape index: {}]   ;;  %s1097_s4 = inlined_call_operand.vmem [shape: f32[1,96], index: 4, kind: input, shape index: {}]   ;;  %s1098_s5 = inlined_call_operand.vmem [shape: bf16[128,96], index: 5, kind: output, shape index: {}]  }
   0x1   :  { %v731_v0 = vld [vmem:[%s1093_s0] sm:$0xff]   ;;  %v745_v6 = vld [vmem:[%s1093_s0 + $0x8] sm:$0xff]   ;;  %v773_v18 = vld [vmem:[%s1093_s0 + $0x10] sm:$0xff]  }
   0x2   :  { %v736_v1 = vld [vmem:[%s1093_s0 + $0x20] sm:$0xff]   ;;  %v593_v2 = vunpack.c.l.bf16 %v731_v0  ;;  %v594_v4 = vunpack.c.h.bf16 %v731_v0  ;;  %v597_v11 = vunpack.c.l.bf16 %v745_v6  ;;  %v598_v12 = vunpack.c.h.bf16 %v745_v6  ;;  %v760_v13 = vld [vmem:[%s1093_s0 + $0x28] sm:$0xff]   ;;  %v786_v23 = vld [vmem:[%s1093_s0 + $0x30] sm:$0xff]  }
   0x3   :  { %v609_v3 = vunpack.c.l.bf16 %v736_v1  ;;  %v610_v5 = vunpack.c.h.bf16 %v736_v1  ;;  %v613_v16 = vunpack.c.l.bf16 %v760_v13  ;;  %v614_v17 = vunpack.c.h.bf16 %v760_v13  ;;  %v799_v28 = vld [vmem:[%s1093_s0 + $0x18] sm:$0xff]  }
   0x4   :  { %v54_v7 = vsel %vm53_vm0, %v593_v2, 0.0  ;;  %v57_v9 = vsel %vm53_vm0, %v594_v4, 0.0  ;;  %v60_v14 = vsel %vm53_vm0, %v597_v11, 0.0  ;;  %v63_v15 = vsel %vm53_vm0, %v598_v12, 0.0  ;;  %v812_v33 = vld [vmem:[%s1093_s0 + $0x38] sm:$0xff]  }
   0x5   :  { %v78_v8 = vsel %vm53_vm0, %v609_v3, 0.0  ;;  %55 = vadd.xlane.f32.xlu0 %v54_v7  ;;  %v81_v10 = vsel %vm53_vm0, %v610_v5, 0.0  ;;  %v84_v19 = vsel %vm53_vm0, %v613_v16, 0.0  ;;  %v87_v20 = vsel %vm53_vm0, %v614_v17, 0.0 }
   0x6   :  { %79 = vadd.xlane.f32.xlu1 %v78_v8  ;;  %v601_v21 = vunpack.c.l.bf16 %v773_v18  ;;  %v602_v22 = vunpack.c.h.bf16 %v773_v18  ;;  %v617_v26 = vunpack.c.l.bf16 %v786_v23  ;;  %v618_v27 = vunpack.c.h.bf16 %v786_v23 }
   0x7   :  { %v605_v31 = vunpack.c.l.bf16 %v799_v28  ;;  %v606_v32 = vunpack.c.h.bf16 %v799_v28  ;;  %v621_v36 = vunpack.c.l.bf16 %v812_v33  ;;  %v622_v37 = vunpack.c.h.bf16 %v812_v33 }
   0x8   :  { %v66_v24 = vsel %vm53_vm0, %v601_v21, 0.0  ;;  %v69_v25 = vsel %vm53_vm0, %v602_v22, 0.0  ;;  %v90_v29 = vsel %vm53_vm0, %v617_v26, 0.0  ;;  %v93_v30 = vsel %vm53_vm0, %v618_v27, 0.0 }
   0x9   :  { %58 = vadd.xlane.f32.xlu0 %v57_v9  ;;  %v72_v34 = vsel %vm53_vm0, %v605_v31, 0.0  ;;  %v75_v35 = vsel %vm53_vm0, %v606_v32, 0.0  ;;  %v96_v38 = vsel %vm53_vm0, %v621_v36, 0.0  ;;  %v99_v39 = vsel %vm53_vm0, %v622_v37, 0.0 }
   0xa   :  { %82 = vadd.xlane.f32.xlu1 %v81_v10 }
   0xd   :  { %61 = vadd.xlane.f32.xlu0 %v60_v14 }
   0xe   :  { %64 = vadd.xlane.f32.xlu1 %v63_v15 }
  0x11   :  { %85 = vadd.xlane.f32.xlu0 %v84_v19 }
  0x12   :  { %88 = vadd.xlane.f32.xlu1 %v87_v20 }
  0x15   :  { %67 = vadd.xlane.f32.xlu0 %v66_v24 }
  0x16   :  { %70 = vadd.xlane.f32.xlu1 %v69_v25 }
  0x19   :  { %91 = vadd.xlane.f32.xlu0 %v90_v29 }
  0x1a   :  { %94 = vadd.xlane.f32.xlu1 %v93_v30 }
  0x1d   :  { %73 = vadd.xlane.f32.xlu0 %v72_v34 }
  0x1e   :  { %76 = vadd.xlane.f32.xlu1 %v75_v35 }
  0x21   :  { %97 = vadd.xlane.f32.xlu0 %v96_v38 }
  0x22   :  { %100 = vadd.xlane.f32.xlu1 %v99_v39 }
  0x8e   :  { %v56_v40 = vpop.xlane.xlu0 %55 }
  0x8f   :  { %v80_v41 = vpop.xlane.xlu1 %79  ;;  %v103_v42 = vmul.f32 0.03125, %v56_v40 }
  0x90   :  { %v111_v43 = vmul.f32 0.03125, %v80_v41 }
  0x91   :  { %v828_v44 = vsub.f32 %v593_v2, %v103_v42 }
  0x92   :  { %v830_v45 = vsub.f32 %v609_v3, %v111_v43  ;;  %v59_v46 = vpop.xlane.xlu0 %58 }
  0x93   :  { %v83_v47 = vpop.xlane.xlu1 %82  ;;  %v104_v48 = vmul.f32 0.03125, %v59_v46  ;;  %v135_v50 = vmul.f32 %v828_v44, %v828_v44 }
  0x94   :  { %v112_v49 = vmul.f32 0.03125, %v83_v47  ;;  %v143_v51 = vmul.f32 %v830_v45, %v830_v45 }
  0x95   :  { %v838_v52 = vsub.f32 %v594_v4, %v104_v48  ;;  %v151_v54 = vsel %vm53_vm0, %v135_v50, 0.0 }
  0x96   :  { %v842_v53 = vsub.f32 %v610_v5, %v112_v49  ;;  %152 = vadd.xlane.f32.xlu0 %v151_v54  ;;  %v62_v55 = vpop.xlane.xlu0 %61  ;;  %v175_v57 = vsel %vm53_vm0, %v143_v51, 0.0 }
  0x97   :  { %v65_v56 = vpop.xlane.xlu1 %64  ;;  %v105_v58 = vmul.f32 0.03125, %v62_v55  ;;  %v136_v60 = vmul.f32 %v838_v52, %v838_v52 }
  0x98   :  { %v106_v59 = vmul.f32 0.03125, %v65_v56  ;;  %v144_v61 = vmul.f32 %v842_v53, %v842_v53 }
  0x99   :  { %v852_v62 = vsub.f32 %v597_v11, %v105_v58  ;;  %v154_v0 = vsel %vm53_vm0, %v136_v60, 0.0 }
  0x9a   :  { %v856_v63 = vsub.f32 %v598_v12, %v106_v59  ;;  %176 = vadd.xlane.f32.xlu0 %v175_v57  ;;  %155 = vadd.xlane.f32.xlu1 %v154_v0  ;;  %v86_v1 = vpop.xlane.xlu0 %85  ;;  %v178_v3 = vsel %vm53_vm0, %v144_v61, 0.0 }
  0x9b   :  { %v89_v2 = vpop.xlane.xlu1 %88  ;;  %v113_v4 = vmul.f32 0.03125, %v86_v1  ;;  %v137_v7 = vmul.f32 %v852_v62, %v852_v62 }
  0x9c   :  { %v114_v5 = vmul.f32 0.03125, %v89_v2  ;;  %v138_v8 = vmul.f32 %v856_v63, %v856_v63 }
  0x9d   :  { %v866_v6 = vsub.f32 %v613_v16, %v113_v4  ;;  %v157_v10 = vsel %vm53_vm0, %v137_v7, 0.0 }
  0x9e   :  { %v870_v9 = vsub.f32 %v614_v17, %v114_v5  ;;  %179 = vadd.xlane.f32.xlu1 %v178_v3  ;;  %158 = vadd.xlane.f32.xlu0 %v157_v10  ;;  %v68_v11 = vpop.xlane.xlu0 %67  ;;  %v160_v14 = vsel %vm53_vm0, %v138_v8, 0.0 }
  0x9f   :  { %v71_v12 = vpop.xlane.xlu1 %70  ;;  %v107_v15 = vmul.f32 0.03125, %v68_v11  ;;  %v145_v20 = vmul.f32 %v866_v6, %v866_v6 }
  0xa0   :  { %v108_v19 = vmul.f32 0.03125, %v71_v12  ;;  %v146_v16 = vmul.f32 %v870_v9, %v870_v9 }
  0xa1   :  { %v880_v13 = vsub.f32 %v601_v21, %v107_v15  ;;  %v181_v24 = vsel %vm53_vm0, %v145_v20, 0.0 }
  0xa2   :  { %v884_v17 = vsub.f32 %v602_v22, %v108_v19  ;;  %161 = vadd.xlane.f32.xlu1 %v160_v14  ;;  %182 = vadd.xlane.f32.xlu0 %v181_v24  ;;  %v92_v25 = vpop.xlane.xlu0 %91  ;;  %v184_v30 = vsel %vm53_vm0, %v146_v16, 0.0 }
  0xa3   :  { %v95_v29 = vpop.xlane.xlu1 %94  ;;  %v115_v34 = vmul.f32 0.03125, %v92_v25  ;;  %v139_v38 = vmul.f32 %v880_v13, %v880_v13 }
  0xa4   :  { %v116_v35 = vmul.f32 0.03125, %v95_v29  ;;  %v140_v21 = vmul.f32 %v884_v17, %v884_v17 }
  0xa5   :  { %v894_v18 = vsub.f32 %v617_v26, %v115_v34  ;;  %v163_v39 = vsel %vm53_vm0, %v139_v38, 0.0 }
  0xa6   :  { %v898_v22 = vsub.f32 %v618_v27, %v116_v35  ;;  %185 = vadd.xlane.f32.xlu1 %v184_v30  ;;  %164 = vadd.xlane.f32.xlu0 %v163_v39  ;;  %v74_v40 = vpop.xlane.xlu0 %73  ;;  %v166_v42 = vsel %vm53_vm0, %v140_v21, 0.0 }
  0xa7   :  { %v77_v41 = vpop.xlane.xlu1 %76  ;;  %v109_v43 = vmul.f32 0.03125, %v74_v40  ;;  %v147_v47 = vmul.f32 %v894_v18, %v894_v18 }
  0xa8   :  { %v110_v46 = vmul.f32 0.03125, %v77_v41  ;;  %v148_v26 = vmul.f32 %v898_v22, %v898_v22 }
  0xa9   :  { %v908_v23 = vsub.f32 %v605_v31, %v109_v43  ;;  %v187_v48 = vsel %vm53_vm0, %v147_v47, 0.0 }
  0xaa   :  { %v912_v27 = vsub.f32 %v606_v32, %v110_v46  ;;  %167 = vadd.xlane.f32.xlu1 %v166_v42  ;;  %188 = vadd.xlane.f32.xlu0 %v187_v48  ;;  %v98_v49 = vpop.xlane.xlu0 %97  ;;  %v190_v51 = vsel %vm53_vm0, %v148_v26, 0.0  ;;  %v946_v46 = vld [vmem:[%s1095_s1] ss:$0 sm:$0xff] }
  0xab   :  { %v101_v50 = vpop.xlane.xlu1 %100  ;;  %v117_v54 = vmul.f32 0.03125, %v98_v49  ;;  %v141_v56 = vmul.f32 %v908_v23, %v908_v23 }
  0xac   :  { %v118_v55 = vmul.f32 0.03125, %v101_v50  ;;  %v142_v31 = vmul.f32 %v912_v27, %v912_v27 }
  0xad   :  { %v922_v28 = vsub.f32 %v621_v36, %v117_v54  ;;  %v169_v57 = vsel %vm53_vm0, %v141_v56, 0.0  ;;  %v664_v36 = vld [vmem:[%s1094_s3 + $0x8] sm:$0xff]  }
  0xae   :  { %v926_v32 = vsub.f32 %v622_v37, %v118_v55  ;;  %191 = vadd.xlane.f32.xlu1 %v190_v51  ;;  %170 = vadd.xlane.f32.xlu0 %v169_v57  ;;  %v172_v58 = vsel %vm53_vm0, %v142_v31, 0.0  ;;  %v665_v37 = vld [vmem:[%s1094_s3] sm:$0xff]  }
  0xaf   :  { %v149_v59 = vmul.f32 %v922_v28, %v922_v28  ;;  %640 = vmatprep.subr.bf16.mxu0 %v664_v36  ;;  %660 = vmatprep.subr.bf16.mxu1 %v664_v36 }
  0xb0   :  { %v150_v60 = vmul.f32 %v926_v32, %v926_v32  ;;  %641 = vmatpush3.bf16.msra.mxu0 %v664_v36  ;;  %662 = vmatpush3.bf16.msra.mxu1 %v664_v36 }
  0xb1   :  { %v193_v61 = vsel %vm53_vm0, %v149_v59, 0.0  ;;  %642 = vmatprep.subr.bf16.mxu0 %v665_v37  ;;  %661 = vmatprep.subr.bf16.mxu1 %v665_v37 }
  0xb2   :  { %173 = vadd.xlane.f32.xlu1 %v172_v58  ;;  %194 = vadd.xlane.f32.xlu0 %v193_v61  ;;  %v196_v33 = vsel %vm53_vm0, %v150_v60, 0.0 }
  0xb4   :  { %643 = vmatpush3.bf16.msra.mxu0 %v665_v37  ;;  %663 = vmatpush3.bf16.msra.mxu1 %v665_v37 }
  0xb6   :  { %197 = vadd.xlane.f32.xlu1 %v196_v33 }
 0x11f   :  { %v153_v0 = vpop.xlane.xlu0 %152 }
 0x120   :  { %v199_v1 = vmul.f32 0.03125, %v153_v0 }
 0x122   :  { %v215_v2 = vadd.f32 1e-05, %v199_v1 }
 0x123   :  { %v156_v3 = vpop.xlane.xlu1 %155  ;;  %v177_v4 = vpop.xlane.xlu0 %176 }
 0x124   :  { %666 = vrsqrt.f32 %v215_v2  ;;  %v200_v5 = vmul.f32 0.03125, %v156_v3  ;;  %v207_v7 = vmul.f32 0.03125, %v177_v4 }
 0x126   :  { %v216_v8 = vadd.f32 1e-05, %v200_v5  ;;  %v223_v10 = vadd.f32 1e-05, %v207_v7 }
 0x127   :  { %v180_v11 = vpop.xlane.xlu1 %179  ;;  %v159_v12 = vpop.xlane.xlu0 %158 }
 0x128   :  { %668 = vrsqrt.f32 %v216_v8  ;;  %v208_v14 = vmul.f32 0.03125, %v180_v11  ;;  %v201_v15 = vmul.f32 0.03125, %v159_v12 }
 0x129   :  { %670 = vrsqrt.f32 %v223_v10 }
 0x12a   :  { %v224_v19 = vadd.f32 1e-05, %v208_v14  ;;  %v217_v20 = vadd.f32 1e-05, %v201_v15 }
 0x12b   :  { %v162_v16 = vpop.xlane.xlu1 %161  ;;  %v183_v24 = vpop.xlane.xlu0 %182 }
 0x12c   :  { %672 = vrsqrt.f32 %v224_v19  ;;  %v202_v25 = vmul.f32 0.03125, %v162_v16  ;;  %v209_v29 = vmul.f32 0.03125, %v183_v24 }
 0x12d   :  { %674 = vrsqrt.f32 %v217_v20 }
 0x12e   :  { %v218_v30 = vadd.f32 1e-05, %v202_v25  ;;  %v225_v34 = vadd.f32 1e-05, %v209_v29 }
 0x12f   :  { %v186_v35 = vpop.xlane.xlu1 %185  ;;  %v165_v38 = vpop.xlane.xlu0 %164 }
 0x130   :  { %676 = vrsqrt.f32 %v218_v30  ;;  %v210_v21 = vmul.f32 0.03125, %v186_v35  ;;  %v203_v39 = vmul.f32 0.03125, %v165_v38 }
 0x131   :  { %v667_v40 = vpop.eup %666  ;;  %678 = vrsqrt.f32 %v225_v34 }
 0x132   :  { %v226_v41 = vadd.f32 1e-05, %v210_v21  ;;  %v219_v42 = vadd.f32 1e-05, %v203_v39  ;;  %v247_v43 = vmul.f32 %v667_v40, %v828_v44  ;;  %v953_v44 = vld [vmem:[%s1096_s2] ss:$0 sm:$0xff] }
 0x133   :  { %v168_v47 = vpop.xlane.xlu1 %167  ;;  %v189_v26 = vpop.xlane.xlu0 %188 }
 0x134   :  { %680 = vrsqrt.f32 %v226_v41  ;;  %v204_v48 = vmul.f32 0.03125, %v168_v47  ;;  %v211_v49 = vmul.f32 0.03125, %v189_v26  ;;  %v270_v51 = vmul.f32 %v946_v46, %v247_v43 }
 0x135   :  { %v669_v50 = vpop.eup %668  ;;  %682 = vrsqrt.f32 %v219_v42 }
 0x136   :  { %v671_v54 = vpop.eup %670  ;;  %v220_v55 = vadd.f32 1e-05, %v204_v48  ;;  %v227_v56 = vadd.f32 1e-05, %v211_v49  ;;  %v248_v31 = vmul.f32 %v669_v50, %v838_v52  ;;  %v293_v37 = vadd.f32 %v953_v44, %v270_v51 }
 0x137   :  { %v192_v57 = vpop.xlane.xlu1 %191  ;;  %v171_v58 = vpop.xlane.xlu0 %170  ;;  %v255_v59 = vmul.f32 %v671_v54, %v830_v45 }
 0x138   :  { %684 = vrsqrt.f32 %v220_v55  ;;  %v212_v60 = vmul.f32 0.03125, %v192_v57  ;;  %v205_v61 = vmul.f32 0.03125, %v171_v58  ;;  %v271_v33 = vmul.f32 %v946_v46, %v248_v31 }
 0x139   :  { %v673_v36 = vpop.eup %672  ;;  %686 = vrsqrt.f32 %v227_v56  ;;  %v278_v45 = vmul.f32 %v946_v46, %v255_v59 }
 0x13a   :  { %v675_v0 = vpop.eup %674  ;;  %v228_v52 = vadd.f32 1e-05, %v212_v60  ;;  %v221_v1 = vadd.f32 1e-05, %v205_v61  ;;  %v294_v2 = vadd.f32 %v953_v44, %v271_v33  ;;  %v256_v3 = vmul.f32 %v673_v36, %v842_v53 }
 0x13b   :  { %v174_v4 = vpop.xlane.xlu1 %173  ;;  %v195_v5 = vpop.xlane.xlu0 %194  ;;  %v249_v7 = vmul.f32 %v675_v0, %v852_v62  ;;  %v301_v62 = vadd.f32 %v953_v44, %v278_v45 }
 0x13c   :  { %688 = vrsqrt.f32 %v228_v52  ;;  %v206_v8 = vmul.f32 0.03125, %v174_v4  ;;  %v213_v10 = vmul.f32 0.03125, %v195_v5  ;;  %v309_v11 = vpack.c.bf16 %v294_v2, %v293_v37 }
 0x13d   :  { %v677_v12 = vpop.eup %676  ;;  %690 = vrsqrt.f32 %v221_v1  ;;  %v279_v14 = vmul.f32 %v946_v46, %v256_v3  ;;  %v272_v15 = vmul.f32 %v946_v46, %v249_v7 }
 0x13e   :  { %v679_v19 = vpop.eup %678  ;;  %v222_v20 = vadd.f32 1e-05, %v206_v8  ;;  %v229_v16 = vadd.f32 1e-05, %v213_v10  ;;  %644 = vmatprep.mubr.msk.bf16.mxu0 %vm53_vm0, %v309_v11  ;;  %v250_v53 = vmul.f32 %v677_v12, %v856_v63  ;;  %v1011_v12 = vld [vmem:[%s1097_s4] ss:$0 sm:$0xff] }
 0x13f   :  { %v198_v24 = vpop.xlane.xlu1 %197  ;;  %v302_v25 = vadd.f32 %v953_v44, %v279_v14  ;;  %v257_v29 = vmul.f32 %v679_v19, %v866_v6  ;;  %v295_v21 = vadd.f32 %v953_v44, %v272_v15 }
 0x140   :  { %692 = vrsqrt.f32 %v222_v20  ;;  %v214_v30 = vmul.f32 0.03125, %v198_v24  ;;  %v273_v34 = vmul.f32 %v946_v46, %v250_v53 }
 0x141   :  { %v681_v35 = vpop.eup %680  ;;  %694 = vrsqrt.f32 %v229_v16  ;;  %v313_v38 = vpack.c.bf16 %v302_v25, %v301_v62  ;;  %v280_v42 = vmul.f32 %v946_v46, %v257_v29 }
 0x142   :  { %v683_v39 = vpop.eup %682  ;;  %v230_v40 = vadd.f32 1e-05, %v214_v30  ;;  %v296_v63 = vadd.f32 %v953_v44, %v273_v34  ;;  %v258_v41 = vmul.f32 %v681_v35, %v870_v9 }
 0x143   :  { %652 = vmatprep.mubr.msk.bf16.mxu1 %vm53_vm0, %v313_v38  ;;  %v251_v6 = vmul.f32 %v683_v39, %v880_v13  ;;  %v303_v49 = vadd.f32 %v953_v44, %v280_v42 }
 0x144   :  { %696 = vrsqrt.f32 %v230_v40  ;;  %v310_v43 = vpack.c.bf16 %v296_v63, %v295_v21  ;;  %v281_v47 = vmul.f32 %v946_v46, %v258_v41 }
 0x145   :  { %v685_v26 = vpop.eup %684  ;;  %v274_v51 = vmul.f32 %v946_v46, %v251_v6 }
 0x146   :  { %v687_v48 = vpop.eup %686  ;;  %645 = vmatmul.mubr.msk.bf16.vlgmr.msra.gmra.mxu0 %vm53_vm0, %v310_v43  ;;  %v304_v50 = vadd.f32 %v953_v44, %v281_v47  ;;  %v252_v9 = vmul.f32 %v685_v26, %v884_v17 }
 0x147   :  { %v259_v54 = vmul.f32 %v687_v48, %v894_v18  ;;  %v297_v57 = vadd.f32 %v953_v44, %v274_v51 }
 0x148   :  { %v314_v55 = vpack.c.bf16 %v304_v50, %v303_v49  ;;  %v275_v13 = vmul.f32 %v946_v46, %v252_v9 }
 0x149   :  { %v689_v56 = vpop.eup %688  ;;  %v282_v60 = vmul.f32 %v946_v46, %v259_v54 }
 0x14a   :  { %v691_v31 = vpop.eup %690  ;;  %653 = vmatmul.mubr.msk.bf16.vlgmr.msra.gmra.mxu1 %vm53_vm0, %v314_v55  ;;  %v298_v58 = vadd.f32 %v953_v44, %v275_v13  ;;  %v260_v59 = vmul.f32 %v689_v56, %v898_v22 }
 0x14b   :  { %v253_v17 = vmul.f32 %v691_v31, %v908_v23  ;;  %v305_v37 = vadd.f32 %v953_v44, %v282_v60 }
 0x14c   :  { %v311_v61 = vpack.c.bf16 %v298_v58, %v297_v57  ;;  %v283_v18 = vmul.f32 %v946_v46, %v260_v59 }
 0x14d   :  { %v693_v33 = vpop.eup %692  ;;  %v276_v1 = vmul.f32 %v946_v46, %v253_v17 }
 0x14e   :  { %v695_v36 = vpop.eup %694  ;;  %648 = vmatprep.mubr.msk.bf16.mxu0 %vm53_vm0, %v311_v61  ;;  %v306_v0 = vadd.f32 %v953_v44, %v283_v18  ;;  %v254_v52 = vmul.f32 %v693_v33, %v912_v27 }
 0x14f   :  { %v261_v22 = vmul.f32 %v695_v36, %v922_v28  ;;  %v299_v4 = vadd.f32 %v953_v44, %v276_v1 }
 0x150   :  { %v315_v2 = vpack.c.bf16 %v306_v0, %v305_v37  ;;  %v277_v23 = vmul.f32 %v946_v46, %v254_v52 }
 0x151   :  { %v697_v3 = vpop.eup %696  ;;  %v284_v7 = vmul.f32 %v946_v46, %v261_v22 }
 0x152   :  { %656 = vmatprep.mubr.msk.bf16.mxu1 %vm53_vm0, %v315_v2  ;;  %v300_v5 = vadd.f32 %v953_v44, %v277_v23  ;;  %v262_v45 = vmul.f32 %v697_v3, %v926_v32 }
 0x153   :  { %v307_v28 = vadd.f32 %v953_v44, %v284_v7 }
 0x154   :  { %v312_v8 = vpack.c.bf16 %v300_v5, %v299_v4  ;;  %v285_v27 = vmul.f32 %v946_v46, %v262_v45 }
 0x156   :  { %649 = vmatmul.mubr.msk.bf16.gmra.mxu0 %vm53_vm0, %v312_v8  ;;  %v308_v10 = vadd.f32 %v953_v44, %v285_v27 }
 0x158   :  { %v316_v11 = vpack.c.bf16 %v308_v10, %v307_v28 }
 0x15a   :  { %657 = vmatmul.mubr.msk.bf16.gmra.mxu1 %vm53_vm0, %v316_v11 }
 0x206   :  { %v646_v32 = vpop.f32.mrf.mxu0 }
 0x207   :  { %v407_v14 = vadd.f32 %v646_v32, %v1011_v12 }
 0x208   :  { %v398_v15 = vpop.f32.mrf.mxu0 }
 0x209   :  { %v577_v46 = vpack.c.bf16 %v407_v14, %v407_v14  ;;  %v399_v19 = vadd.f32 %v1011_v12, %v398_v15 }
 0x20a   :  { %v647_v20 = vpop.f32.mrf.mxu0  ;;  %v654_v16 = vpop.f32.mrf.mxu1 }
 0x20b   :  { %528 = vst.msk [vmem:[%s1098_s5 + $0x8] sm:$0xf] %vm525_vm1, %v577_v46  ;;  %v575_v44 = vpack.c.bf16 %v399_v19, %v399_v19  ;;  %v410_v53 = vadd.f32 %v647_v20, %v1011_v12  ;;  %v439_v24 = vadd.f32 %v654_v16, %v1011_v12 }
 0x20c   :  { %v401_v62 = vpop.f32.mrf.mxu0  ;;  %v430_v25 = vpop.f32.mrf.mxu1 }
 0x20d   :  { %526 = vst.msk [vmem:[%s1098_s5] sm:$0xf] %vm525_vm1, %v575_v44  ;;  %v578_v29 = vpack.c.bf16 %v410_v53, %v410_v53  ;;  %v585_v30 = vpack.c.bf16 %v439_v24, %v439_v24  ;;  %v402_v34 = vadd.f32 %v1011_v12, %v401_v62  ;;  %v431_v35 = vadd.f32 %v1011_v12, %v430_v25 }
 0x20e   :  { %v655_v38 = vpop.f32.mrf.mxu1 }
 0x20f   :  { %529 = vst.msk [vmem:[%s1098_s5 + $0xc] sm:$0xf] %vm525_vm1, %v578_v29  ;;  %536 = vst.msk [vmem:[%s1098_s5 + $0x28] sm:$0xf] %vm525_vm1, %v585_v30  ;;  %v576_v21 = vpack.c.bf16 %v402_v34, %v402_v34  ;;  %v583_v39 = vpack.c.bf16 %v431_v35, %v431_v35  ;;  %v442_v40 = vadd.f32 %v655_v38, %v1011_v12 }
 0x210   :  { %v433_v63 = vpop.f32.mrf.mxu1 }
 0x211   :  { %527 = vst.msk [vmem:[%s1098_s5 + $0x4] sm:$0xf] %vm525_vm1, %v576_v21  ;;  %534 = vst.msk [vmem:[%s1098_s5 + $0x20] sm:$0xf] %vm525_vm1, %v583_v39  ;;  %v586_v41 = vpack.c.bf16 %v442_v40, %v442_v40  ;;  %v434_v42 = vadd.f32 %v1011_v12, %v433_v63 }
 0x213   :  { %537 = vst.msk [vmem:[%s1098_s5 + $0x2c] sm:$0xf] %vm525_vm1, %v586_v41  ;;  %v584_v6 = vpack.c.bf16 %v434_v42, %v434_v42 }
 0x215   :  { %535 = vst.msk [vmem:[%s1098_s5 + $0x24] sm:$0xf] %vm525_vm1, %v584_v6 }
 0x216   :  { %v650_v43 = vpop.f32.mrf.mxu0 }
 0x217   :  { %v423_v47 = vadd.f32 %v650_v43, %v1011_v12 }
 0x218   :  { %v414_v26 = vpop.f32.mrf.mxu0 }
 0x219   :  { %v581_v48 = vpack.c.bf16 %v423_v47, %v423_v47  ;;  %v415_v49 = vadd.f32 %v1011_v12, %v414_v26 }
 0x21a   :  { %v651_v50 = vpop.f32.mrf.mxu0  ;;  %v658_v9 = vpop.f32.mrf.mxu1 }
 0x21b   :  { %532 = vst.msk [vmem:[%s1098_s5 + $0x18] sm:$0xf] %vm525_vm1, %v581_v48  ;;  %v579_v51 = vpack.c.bf16 %v415_v49, %v415_v49  ;;  %v426_v54 = vadd.f32 %v651_v50, %v1011_v12  ;;  %v455_v55 = vadd.f32 %v658_v9, %v1011_v12 }
 0x21c   :  { %v417_v13 = vpop.f32.mrf.mxu0  ;;  %v446_v56 = vpop.f32.mrf.mxu1 }
 0x21d   :  { %530 = vst.msk [vmem:[%s1098_s5 + $0x10] sm:$0xf] %vm525_vm1, %v579_v51  ;;  %v582_v31 = vpack.c.bf16 %v426_v54, %v426_v54  ;;  %v589_v57 = vpack.c.bf16 %v455_v55, %v455_v55  ;;  %v418_v58 = vadd.f32 %v1011_v12, %v417_v13  ;;  %v447_v59 = vadd.f32 %v1011_v12, %v446_v56 }
 0x21e   :  { %v659_v60 = vpop.f32.mrf.mxu1 }
 0x21f   :  { %533 = vst.msk [vmem:[%s1098_s5 + $0x1c] sm:$0xf] %vm525_vm1, %v582_v31  ;;  %540 = vst.msk [vmem:[%s1098_s5 + $0x38] sm:$0xf] %vm525_vm1, %v589_v57  ;;  %v580_v17 = vpack.c.bf16 %v418_v58, %v418_v58  ;;  %v587_v61 = vpack.c.bf16 %v447_v59, %v447_v59  ;;  %v458_v18 = vadd.f32 %v659_v60, %v1011_v12 }
 0x220   :  { %v449_v33 = vpop.f32.mrf.mxu1 }
 0x221   :  { %531 = vst.msk [vmem:[%s1098_s5 + $0x14] sm:$0xf] %vm525_vm1, %v580_v17  ;;  %538 = vst.msk [vmem:[%s1098_s5 + $0x30] sm:$0xf] %vm525_vm1, %v587_v61  ;;  %v590_v36 = vpack.c.bf16 %v458_v18, %v458_v18  ;;  %v450_v37 = vadd.f32 %v1011_v12, %v449_v33 }
 0x223   :  { %541 = vst.msk [vmem:[%s1098_s5 + $0x3c] sm:$0xf] %vm525_vm1, %v590_v36  ;;  %v588_v0 = vpack.c.bf16 %v450_v37, %v450_v37 }
 0x225   :  { %539 = vst.msk [vmem:[%s1098_s5 + $0x34] sm:$0xf] %vm525_vm1, %v588_v0 }

// kernel: swin_forward.21
= control target key start
LH: loop header
LB: loop body
LE: loop exit
PB: predicated region body
PF: predicated region fallthrough
CT: control target
= control target key end

     0   :  { %s2025_s22 = smov 96   ;;  %vm85_vm0 = vcmask 130048   ;;  %s2026_s10 = smov 64   ;;  %vm1461_vm1 = vcmask 257024   ;;  %s2723_s0 = inlined_call_operand.vmem [shape: bf16[128,96], index: 0, kind: input, shape index: {}]   ;;  %s2724_s1 = inlined_call_operand.vmem [shape: f32[1,2,128,128], index: 1, kind: input, shape index: {}]   ;;  %s2725_s2 = inlined_call_operand.vmem [shape: bf16[2,16,32], index: 2, kind: input, shape index: {}]   ;;  %s2726_s4 = inlined_call_operand.vmem [shape: bf16[128,32], index: 4, kind: input, shape index: {}]   ;;  %s2727_s3 = inlined_call_operand.vmem [shape: f32[1,32], index: 3, kind: input, shape index: {}]   ;;  %s2728_s5 = inlined_call_operand.vmem [shape: bf16[128,32], index: 5, kind: output, shape index: {}]  }
   0x1   :  { %v2063_v0 = vld [vmem:[%s2723_s0 + $0x38] sm:$0xff]   ;;  %v2068_v1 = vld [vmem:[%s2723_s0 + $0x30] sm:$0xff]   ;;  %v2074_v2 = vld [vmem:[%s2723_s0 + $0x28] sm:$0xff]   ;;  %s2027_s19 = smov 80   ;;  %s2028_s20 = smov 112  }
   0x2   :  { %83 = vrot.lane.b32.xlu0 %v2063_v0, %s2025_s22  ;;  %79 = vrot.lane.b32.xlu1 %v2074_v2, %s2025_s22  ;;  %v2080_v3 = vld [vmem:[%s2723_s0 + $0x20] sm:$0xff]   ;;  %v2086_v4 = vld [vmem:[%s2723_s0 + $0x18] sm:$0xff]  }
   0x3   :  { %v2091_v5 = vld [vmem:[%s2723_s0] sm:$0xff]   ;;  %v2097_v6 = vld [vmem:[%s2723_s0 + $0x10] sm:$0xff]   ;;  %v2105_v7 = vld [vmem:[%s2723_s0 + $0x8] sm:$0xff]  }
   0x4   :  { %1712 = vmatprep.mubr.msk.bf16.mxu0 %vm85_vm0, %v2091_v5  ;;  %v249_v33 = vld [vmem:[%s2724_s1 + $0x10] sm:$0xff]  ;;  %v247_v39 = vld [vmem:[%s2724_s1] sm:$0xff]  ;;  %v248_v41 = vld [vmem:[%s2724_s1 + $0x8] sm:$0xff] }
   0x5   :  { %v250_v45 = vld [vmem:[%s2724_s1 + $0x18] sm:$0xff]  ;;  %v253_v56 = vld [vmem:[%s2724_s1 + $0x30] sm:$0xff]  ;;  %v251_v62 = vld [vmem:[%s2724_s1 + $0x20] sm:$0xff] }
   0x6   :  { %81 = vrot.lane.b32.xlu0 %v2068_v1, %s2025_s22  ;;  %77 = vrot.lane.b32.xlu1 %v2080_v3, %s2025_s22  ;;  %v254_v60 = vld [vmem:[%s2724_s1 + $0x38] sm:$0xff] }
   0xa   :  { %75 = vrot.lane.b32.xlu0 %v2086_v4, %s2025_s22  ;;  %73 = vrot.lane.b32.xlu1 %v2097_v6, %s2025_s22 }
   0xe   :  { %71 = vrot.lane.b32.xlu0 %v2105_v7, %s2025_s22  ;;  %69 = vrot.lane.b32.xlu1 %v2091_v5, %s2025_s22  ;;  %s2029_s22 = smov 48  }
  0x12   :  { %445 = vrot.lane.b32.xlu1 %v2063_v0, %s2026_s10  ;;  %441 = vrot.lane.b32.xlu0 %v2074_v2, %s2026_s10 }
  0x16   :  { %443 = vrot.lane.b32.xlu1 %v2068_v1, %s2026_s10 }
  0x1a   :  { %439 = vrot.lane.b32.xlu1 %v2080_v3, %s2026_s10 }
  0x1e   :  { %437 = vrot.lane.b32.xlu1 %v2086_v4, %s2026_s10 }
  0x22   :  { %435 = vrot.lane.b32.xlu1 %v2097_v6, %s2026_s10 }
  0x26   :  { %433 = vrot.lane.b32.xlu1 %v2105_v7, %s2026_s10 }
  0x2a   :  { %431 = vrot.lane.b32.xlu1 %v2091_v5, %s2026_s10 }
  0x74   :  { %v84_v8 = vpop.permute.xlu0 %83  ;;  %v80_v12 = vpop.permute.xlu1 %79 }
  0x75   :  { %1860 = vmatprep.subr.msk.bf16.mxu0 %vm85_vm0, %v84_v8  ;;  %v132_v9 = vsel %vm85_vm0, %v84_v8, 0  ;;  %v126_v13 = vsel %vm85_vm0, %v80_v12, 0 }
  0x76   :  { %1697 = vmatpush3.bf16.xpose.msra.mxu0 %v132_v9 }
  0x78   :  { %v82_v10 = vpop.permute.xlu0 %81  ;;  %v78_v14 = vpop.permute.xlu1 %77 }
  0x79   :  { %1861 = vmatprep.subr.msk.bf16.mxu0 %vm85_vm0, %v82_v10  ;;  %v129_v11 = vsel %vm85_vm0, %v82_v10, 0  ;;  %v123_v15 = vsel %vm85_vm0, %v78_v14, 0 }
  0x7c   :  { %v76_v16 = vpop.permute.xlu0 %75  ;;  %v74_v18 = vpop.permute.xlu1 %73 }
  0x7d   :  { %v120_v17 = vsel %vm85_vm0, %v76_v16, 0  ;;  %v117_v19 = vsel %vm85_vm0, %v74_v18, 0 }
  0x7e   :  { %1699 = vmatpush3.bf16.xpose.msra.mxu0 %v129_v11  ;;  %v252_v11 = vld [vmem:[%s2724_s1 + $0x28] sm:$0xff] }
  0x7f   :  { %1862 = vmatprep.subr.msk.bf16.mxu0 %vm85_vm0, %v80_v12  ;;  %v257_v12 = vld [vmem:[%s2724_s1 + $0x50] sm:$0xff] }
  0x80   :  { %v72_v20 = vpop.permute.xlu0 %71  ;;  %v70_v22 = vpop.permute.xlu1 %69 }
  0x81   :  { %v114_v21 = vsel %vm85_vm0, %v72_v20, 0  ;;  %v111_v23 = vsel %vm85_vm0, %v70_v22, 0 }
  0x84   :  { %v446_v24 = vpop.permute.xlu1 %445  ;;  %v442_v26 = vpop.permute.xlu0 %441 }
  0x85   :  { %1728 = vmatprep.subr.bf16.mxu1 %v446_v24 }
  0x86   :  { %1701 = vmatpush3.bf16.xpose.msra.mxu0 %v126_v13  ;;  %1729 = vmatpush3.bf16.msra.mxu1 %v446_v24  ;;  %v256_v24 = vld [vmem:[%s2724_s1 + $0x48] sm:$0xff] }
  0x87   :  { %1863 = vmatprep.subr.msk.bf16.mxu0 %vm85_vm0, %v78_v14 }
  0x88   :  { %v444_v25 = vpop.permute.xlu1 %443 }
  0x89   :  { %1730 = vmatprep.subr.bf16.mxu1 %v444_v25 }
  0x8a   :  { %1731 = vmatpush3.bf16.msra.mxu1 %v444_v25 }
  0x8b   :  { %1732 = vmatprep.subr.bf16.mxu1 %v442_v26 }
  0x8c   :  { %v440_v27 = vpop.permute.xlu1 %439 }
  0x8e   :  { %1703 = vmatpush3.bf16.xpose.msra.mxu0 %v123_v15  ;;  %1733 = vmatpush3.bf16.msra.mxu1 %v442_v26  ;;  %v258_v15 = vld [vmem:[%s2724_s1 + $0x58] sm:$0xff] }
  0x8f   :  { %1864 = vmatprep.subr.msk.bf16.mxu0 %vm85_vm0, %v76_v16  ;;  %1734 = vmatprep.subr.bf16.mxu1 %v440_v27 }
  0x90   :  { %v438_v28 = vpop.permute.xlu1 %437 }
  0x92   :  { %1735 = vmatpush3.bf16.msra.mxu1 %v440_v27  ;;  %v261_v27 = vld [vmem:[%s2724_s1 + $0x70] sm:$0xff] }
  0x93   :  { %1736 = vmatprep.subr.bf16.mxu1 %v438_v28 }
  0x94   :  { %v436_v29 = vpop.permute.xlu1 %435 }
  0x96   :  { %1705 = vmatpush3.bf16.xpose.msra.mxu0 %v120_v17  ;;  %1737 = vmatpush3.bf16.msra.mxu1 %v438_v28 }
  0x97   :  { %1865 = vmatprep.subr.msk.bf16.mxu0 %vm85_vm0, %v74_v18  ;;  %1738 = vmatprep.subr.bf16.mxu1 %v436_v29 }
  0x98   :  { %v434_v30 = vpop.permute.xlu1 %433 }
  0x9a   :  { %1739 = vmatpush3.bf16.msra.mxu1 %v436_v29 }
  0x9b   :  { %1740 = vmatprep.subr.bf16.mxu1 %v434_v30 }
  0x9c   :  { %v432_v31 = vpop.permute.xlu1 %431 }
  0x9e   :  { %1707 = vmatpush3.bf16.xpose.msra.mxu0 %v117_v19  ;;  %1741 = vmatpush3.bf16.msra.mxu1 %v434_v30 }
  0x9f   :  { %1866 = vmatprep.subr.msk.bf16.mxu0 %vm85_vm0, %v72_v20  ;;  %1742 = vmatprep.subr.bf16.mxu1 %v432_v31  ;;  %v255_v20 = vld [vmem:[%s2724_s1 + $0x40] sm:$0xff] }
  0xa2   :  { %1743 = vmatpush3.bf16.msra.mxu1 %v432_v31  ;;  %v262_v31 = vld [vmem:[%s2724_s1 + $0x78] sm:$0xff] }
  0xa6   :  { %1709 = vmatpush3.bf16.xpose.msra.mxu0 %v114_v21 }
  0xa7   :  { %1867 = vmatprep.subr.msk.bf16.mxu0 %vm85_vm0, %v70_v22 }
  0xae   :  { %1711 = vmatpush3.bf16.xpose.msra.mxu0 %v111_v23 }
  0xb5   :  { %1713 = vmatmul.mubr.msk.bf16.vlgmr.msra.gmra.mxu0 %vm85_vm0, %v2105_v7 }
  0xb6   :  { %1716 = vmatprep.mubr.msk.bf16.mxu0 %vm85_vm0, %v2097_v6 }
  0xbd   :  { %1717 = vmatmul.mubr.msk.bf16.gmra.mxu0 %vm85_vm0, %v2086_v4 }
  0xbe   :  { %1720 = vmatprep.mubr.msk.bf16.mxu0 %vm85_vm0, %v2080_v3 }
  0xc5   :  { %1721 = vmatmul.mubr.msk.bf16.gmra.mxu0 %vm85_vm0, %v2074_v2 }
  0xc6   :  { %1724 = vmatprep.mubr.msk.bf16.mxu0 %vm85_vm0, %v2068_v1 }
  0xcd   :  { %1725 = vmatmul.mubr.msk.bf16.gmra.mxu0 %vm85_vm0, %v2063_v0 }
 0x175   :  { %v1714_v32 = vpop.f32.mrf.mxu0 }
 0x176   :  { %v233_v34 = vmul.f32 0.25, %v1714_v32 }
 0x177   :  { %v168_v35 = vpop.f32.mrf.mxu0 }
 0x178   :  { %v231_v36 = vmul.f32 0.25, %v168_v35  ;;  %v2151_v37 = vadd.f32 %v249_v33, %v233_v34  ;;  %v259_v34 = vld [vmem:[%s2724_s1 + $0x60] sm:$0xff] }
 0x179   :  { %v1715_v38 = vpop.f32.mrf.mxu0 }
 0x17a   :  { %283 = vmax.xlane.f32.xlu0 %v2151_v37  ;;  %v234_v42 = vmul.f32 0.25, %v1715_v38  ;;  %v2160_v44 = vadd.f32 %v247_v39, %v231_v36  ;;  %v260_v38 = vld [vmem:[%s2724_s1 + $0x68] sm:$0xff] }
 0x17b   :  { %v171_v40 = vpop.f32.mrf.mxu0 }
 0x17c   :  { %v232_v43 = vmul.f32 0.25, %v171_v40  ;;  %v2169_v47 = vadd.f32 %v250_v45, %v234_v42 }
 0x17d   :  { %v1718_v48 = vpop.f32.mrf.mxu0 }
 0x17e   :  { %279 = vmax.xlane.f32.xlu0 %v2160_v44  ;;  %v2166_v46 = vadd.f32 %v248_v41, %v232_v43  ;;  %v237_v55 = vmul.f32 0.25, %v1718_v48 }
 0x17f   :  { %v184_v49 = vpop.f32.mrf.mxu0 }
 0x180   :  { %281 = vmax.xlane.f32.xlu1 %v2166_v46  ;;  %v2179_v59 = vadd.f32 %v253_v56, %v237_v55  ;;  %v235_v61 = vmul.f32 0.25, %v184_v49 }
 0x181   :  { %v1719_v50 = vpop.f32.mrf.mxu0 }
 0x182   :  { %285 = vmax.xlane.f32.xlu0 %v2169_v47  ;;  %v238_v58 = vmul.f32 0.25, %v1719_v50  ;;  %v2197_v13 = vadd.f32 %v251_v62, %v235_v61 }
 0x183   :  { %v187_v51 = vpop.f32.mrf.mxu0 }
 0x184   :  { %v236_v8 = vmul.f32 0.25, %v187_v51  ;;  %v2188_v10 = vadd.f32 %v254_v60, %v238_v58 }
 0x185   :  { %v1722_v52 = vpop.f32.mrf.mxu0 }
 0x186   :  { %v241_v9 = vmul.f32 0.25, %v1722_v52  ;;  %v2203_v18 = vadd.f32 %v252_v11, %v236_v8 }
 0x187   :  { %v200_v53 = vpop.f32.mrf.mxu0 }
 0x188   :  { %v239_v17 = vmul.f32 0.25, %v200_v53  ;;  %v2205_v19 = vadd.f32 %v257_v12, %v241_v9 }
 0x189   :  { %v1723_v54 = vpop.f32.mrf.mxu0 }
 0x18a   :  { %v242_v14 = vmul.f32 0.25, %v1723_v54  ;;  %v2217_v26 = vadd.f32 %v255_v20, %v239_v17 }
 0x18b   :  { %v203_v57 = vpop.f32.mrf.mxu0 }
 0x18c   :  { %v240_v21 = vmul.f32 0.25, %v203_v57  ;;  %v2211_v22 = vadd.f32 %v258_v15, %v242_v14 }
 0x18d   :  { %v1726_v63 = vpop.f32.mrf.mxu0 }
 0x18e   :  { %v245_v25 = vmul.f32 0.25, %v1726_v63  ;;  %v2223_v29 = vadd.f32 %v256_v24, %v240_v21 }
 0x18f   :  { %v216_v16 = vpop.f32.mrf.mxu0 }
 0x190   :  { %v243_v32 = vmul.f32 0.25, %v216_v16  ;;  %v2229_v33 = vadd.f32 %v261_v27, %v245_v25 }
 0x191   :  { %590 = vrot.lane.b32.xlu1 %v2068_v1, %s2027_s19  ;;  %v1727_v23 = vpop.f32.mrf.mxu0 }
 0x192   :  { %v246_v28 = vmul.f32 0.25, %v1727_v23  ;;  %v2241_v39 = vadd.f32 %v259_v34, %v243_v32 }
 0x193   :  { %v219_v30 = vpop.f32.mrf.mxu0 }
 0x194   :  { %v244_v35 = vmul.f32 0.25, %v219_v30  ;;  %v2235_v36 = vadd.f32 %v262_v31, %v246_v28 }
 0x196   :  { %v2244_v40 = vadd.f32 %v260_v38, %v244_v35 }
 0x198   :  { %592 = vrot.lane.b32.xlu0 %v2063_v0, %s2027_s19 }
 0x1b5   :  { %291 = vmax.xlane.f32.xlu1 %v2179_v59 }
 0x1b7   :  { %293 = vmax.xlane.f32.xlu0 %v2188_v10 }
 0x1b9   :  { %287 = vmax.xlane.f32.xlu1 %v2197_v13 }
 0x1bb   :  { %289 = vmax.xlane.f32.xlu0 %v2203_v18 }
 0x1bd   :  { %299 = vmax.xlane.f32.xlu1 %v2205_v19 }
 0x1bf   :  { %301 = vmax.xlane.f32.xlu0 %v2211_v22 }
 0x1c1   :  { %295 = vmax.xlane.f32.xlu1 %v2217_v26 }
 0x1c3   :  { %297 = vmax.xlane.f32.xlu0 %v2223_v29 }
 0x1c5   :  { %307 = vmax.xlane.f32.xlu1 %v2229_v33 }
 0x1c7   :  { %309 = vmax.xlane.f32.xlu0 %v2235_v36 }
 0x1c9   :  { %303 = vmax.xlane.f32.xlu1 %v2241_v39 }
 0x1cb   :  { %305 = vmax.xlane.f32.xlu0 %v2244_v40 }
 0x1da   :  { %588 = vrot.lane.b32.xlu1 %v2074_v2, %s2027_s19 }
 0x203   :  { %v284_v41 = vpop.xlane.xlu0 %283 }
 0x204   :  { %v313_v42 = vsub.f32 %v2151_v37, %v284_v41 }
 0x206   :  { %v331_v43 = vmul.f32 1.442695, %v313_v42 }
 0x207   :  { %v280_v45 = vpop.xlane.xlu0 %279 }
 0x208   :  { %1891 = vpow2.f32 %v331_v43  ;;  %v311_v48 = vsub.f32 %v2160_v44, %v280_v45 }
 0x209   :  { %v282_v49 = vpop.xlane.xlu1 %281 }
 0x20a   :  { %v327_v50 = vmul.f32 1.442695, %v311_v48  ;;  %v312_v52 = vsub.f32 %v2166_v46, %v282_v49 }
 0x20b   :  { %v286_v51 = vpop.xlane.xlu0 %285 }
 0x20c   :  { %1893 = vpow2.f32 %v327_v50  ;;  %v314_v53 = vsub.f32 %v2169_v47, %v286_v51  ;;  %v329_v56 = vmul.f32 1.442695, %v312_v52 }
 0x20d   :  { %v2270_v57 = vpop.permute.xlu1 %590 }
 0x20e   :  { %v333_v54 = vmul.f32 1.442695, %v314_v53 }
 0x20f   :  { %v2254_v55 = vpop.permute.xlu0 %592 }
 0x210   :  { %1895 = vpow2.f32 %v333_v54  ;;  %1868 = vmatprep.subr.msk.bf16.mxu1 %vm85_vm0, %v2254_v55 }
 0x211   :  { %1897 = vpow2.f32 %v329_v56 }
 0x215   :  { %v2258_v37 = vpop.eup %1891 }
 0x216   :  { %363 = vadd.xlane.f32.xlu0 %v2258_v37 }
 0x219   :  { %v2261_v44 = vpop.eup %1893 }
 0x21a   :  { %359 = vadd.xlane.f32.xlu0 %v2261_v44 }
 0x21d   :  { %v2264_v46 = vpop.eup %1895 }
 0x21e   :  { %365 = vadd.xlane.f32.xlu0 %v2264_v46  ;;  %v2267_v47 = vpop.eup %1897 }
 0x222   :  { %361 = vadd.xlane.f32.xlu0 %v2267_v47 }
 0x23e   :  { %v292_v58 = vpop.xlane.xlu1 %291 }
 0x23f   :  { %v317_v60 = vsub.f32 %v2179_v59, %v292_v58 }
 0x240   :  { %v294_v61 = vpop.xlane.xlu0 %293 }
 0x241   :  { %v339_v62 = vmul.f32 1.442695, %v317_v60  ;;  %v318_v8 = vsub.f32 %v2188_v10, %v294_v61 }
 0x242   :  { %v288_v63 = vpop.xlane.xlu1 %287 }
 0x243   :  { %1899 = vpow2.f32 %v339_v62  ;;  %v315_v9 = vsub.f32 %v2197_v13, %v288_v63  ;;  %v341_v15 = vmul.f32 1.442695, %v318_v8 }
 0x244   :  { %v290_v11 = vpop.xlane.xlu0 %289 }
 0x245   :  { %v335_v12 = vmul.f32 1.442695, %v315_v9  ;;  %v316_v14 = vsub.f32 %v2203_v18, %v290_v11 }
 0x246   :  { %v300_v25 = vpop.xlane.xlu1 %299 }
 0x247   :  { %1901 = vpow2.f32 %v335_v12  ;;  %v337_v16 = vmul.f32 1.442695, %v316_v14  ;;  %v321_v28 = vsub.f32 %v2205_v19, %v300_v25 }
 0x248   :  { %v302_v18 = vpop.xlane.xlu0 %301 }
 0x249   :  { %1903 = vpow2.f32 %v337_v16  ;;  %v347_v31 = vmul.f32 1.442695, %v321_v28  ;;  %v322_v34 = vsub.f32 %v2211_v22, %v302_v18  ;;  %v640_v16 = vsel %vm85_vm0, %v2254_v55, 0 }
 0x24a   :  { %1905 = vpow2.f32 %v341_v15  ;;  %v296_v30 = vpop.xlane.xlu1 %295 }
 0x24b   :  { %v319_v32 = vsub.f32 %v2217_v26, %v296_v30  ;;  %v349_v41 = vmul.f32 1.442695, %v322_v34 }
 0x24c   :  { %v298_v20 = vpop.xlane.xlu0 %297 }
 0x24d   :  { %v343_v35 = vmul.f32 1.442695, %v319_v32  ;;  %v320_v42 = vsub.f32 %v2223_v29, %v298_v20 }
 0x24e   :  { %v308_v38 = vpop.xlane.xlu1 %307 }
 0x24f   :  { %v325_v19 = vsub.f32 %v2229_v33, %v308_v38 }
 0x250   :  { %v2276_v17 = vpop.eup %1899  ;;  %v310_v21 = vpop.xlane.xlu0 %309 }
 0x251   :  { %371 = vadd.xlane.f32.xlu0 %v2276_v17  ;;  %v355_v26 = vmul.f32 1.442695, %v325_v19  ;;  %v326_v29 = vsub.f32 %v2235_v36, %v310_v21 }
 0x252   :  { %v304_v45 = vpop.xlane.xlu1 %303 }
 0x253   :  { %v323_v48 = vsub.f32 %v2241_v39, %v304_v45  ;;  %v357_v33 = vmul.f32 1.442695, %v326_v29 }
 0x254   :  { %v2279_v59 = vpop.eup %1901  ;;  %v306_v23 = vpop.xlane.xlu0 %305 }
 0x255   :  { %367 = vadd.xlane.f32.xlu0 %v2279_v59  ;;  %v324_v24 = vsub.f32 %v2244_v40, %v306_v23  ;;  %v345_v40 = vmul.f32 1.442695, %v320_v42  ;;  %v351_v49 = vmul.f32 1.442695, %v323_v48 }
 0x256   :  { %v2282_v10 = vpop.eup %1903 }
 0x257   :  { %369 = vadd.xlane.f32.xlu1 %v2282_v10  ;;  %v2285_v13 = vpop.eup %1905  ;;  %v353_v27 = vmul.f32 1.442695, %v324_v24 }
 0x259   :  { %373 = vadd.xlane.f32.xlu0 %v2285_v13  ;;  %1907 = vpow2.f32 %v353_v27 }
 0x25a   :  { %1909 = vpow2.f32 %v347_v31 }
 0x25b   :  { %1911 = vpow2.f32 %v343_v35 }
 0x25c   :  { %1913 = vpow2.f32 %v349_v41 }
 0x25d   :  { %1915 = vpow2.f32 %v345_v40 }
 0x25e   :  { %1917 = vpow2.f32 %v355_v26 }
 0x25f   :  { %1919 = vpow2.f32 %v351_v49 }
 0x260   :  { %1921 = vpow2.f32 %v357_v33 }
 0x266   :  { %v2299_v43 = vpop.eup %1907 }
 0x267   :  { %v2304_v22 = vpop.eup %1909 }
 0x268   :  { %586 = vrot.lane.b32.xlu1 %v2080_v3, %s2027_s19  ;;  %v2308_v50 = vpop.eup %1911 }
 0x269   :  { %v2311_v51 = vpop.eup %1913 }
 0x26a   :  { %v2314_v39 = vpop.eup %1915 }
 0x26b   :  { %v2319_v52 = vpop.eup %1917 }
 0x26c   :  { %v2324_v54 = vpop.eup %1919 }
 0x26d   :  { %v2329_v58 = vpop.eup %1921 }
 0x26f   :  { %584 = vrot.lane.b32.xlu0 %v2086_v4, %s2027_s19 }
 0x273   :  { %582 = vrot.lane.b32.xlu0 %v2097_v6, %s2027_s19 }
 0x28c   :  { %385 = vadd.xlane.f32.xlu1 %v2299_v43 }
 0x292   :  { %379 = vadd.xlane.f32.xlu0 %v2304_v22 }
 0x296   :  { %375 = vadd.xlane.f32.xlu0 %v2308_v50 }
 0x29a   :  { %381 = vadd.xlane.f32.xlu0 %v2311_v51 }
 0x29d   :  { %578 = vrot.lane.b32.xlu1 %v2091_v5, %s2027_s19 }
 0x29e   :  { %377 = vadd.xlane.f32.xlu0 %v2314_v39 }
 0x29f   :  { %v364_v36 = vpop.xlane.xlu0 %363 }
 0x2a1   :  { %570 = vrot.lane.b32.xlu1 %v2080_v3, %s2028_s20 }
 0x2a2   :  { %387 = vadd.xlane.f32.xlu0 %v2319_v52 }
 0x2a3   :  { %v360_v53 = vpop.xlane.xlu0 %359 }
 0x2a5   :  { %574 = vrot.lane.b32.xlu1 %v2068_v1, %s2028_s20 }
 0x2a6   :  { %383 = vadd.xlane.f32.xlu0 %v2324_v54 }
 0x2a7   :  { %v366_v56 = vpop.xlane.xlu0 %365 }
 0x2a8   :  { %1923 = vrcp.f32 %v366_v56 }
 0x2a9   :  { %1925 = vrcp.f32 %v360_v53  ;;  %952 = vrot.lane.b32.xlu1 %v2068_v1, %s2029_s22 }
 0x2aa   :  { %389 = vadd.xlane.f32.xlu0 %v2329_v58  ;;  %1927 = vrcp.f32 %v364_v36 }
 0x2ab   :  { %v362_v60 = vpop.xlane.xlu0 %361 }
 0x2ac   :  { %1929 = vrcp.f32 %v362_v60 }
 0x2b5   :  { %v1924_v3 = vpop.eup %1923 }
 0x2b6   :  { %v1926_v61 = vpop.eup %1925  ;;  %v410_v8 = vmul.f32 %v1924_v3, %v2264_v46 }
 0x2b7   :  { %v1928_v62 = vpop.eup %1927  ;;  %v407_v9 = vmul.f32 %v1926_v61, %v2261_v44  ;;  %v589_v44 = vpop.permute.xlu1 %588 }
 0x2b8   :  { %v409_v12 = vmul.f32 %v1928_v62, %v2258_v37  ;;  %v637_v37 = vsel %vm85_vm0, %v2270_v57, 0  ;;  %v634_v55 = vsel %vm85_vm0, %v589_v44, 0  ;;  %v1889_v62 = vld [vmem:[%s2725_s2] sm:$0xff]  }
 0x2b9   :  { %v1930_v63 = vpop.eup %1929 }
 0x2ba   :  { %v408_v11 = vmul.f32 %v1930_v63, %v2267_v47  ;;  %v424_v15 = vpack.c.bf16 %v410_v8, %v409_v12 }
 0x2bc   :  { %v423_v14 = vpack.c.bf16 %v408_v11, %v407_v9 }
 0x2be   :  { %1744 = vmatprep.mubr.bf16.mxu1 %v423_v14 }
 0x2bf   :  { %1745 = vmatmul.mubr.bf16.vlgmr.msra.gmra.mxu1 %v424_v15 }
 0x2c0   :  { %1761 = vmatpush3.bf16.xpose.msra.mxu1 %v640_v16  ;;  %580 = vrot.lane.b32.xlu0 %v2105_v7, %s2027_s19 }
 0x2c1   :  { %1869 = vmatprep.subr.msk.bf16.mxu1 %vm85_vm0, %v2270_v57 }
 0x2c4   :  { %562 = vrot.lane.b32.xlu0 %v2091_v5, %s2028_s20 }
 0x2c8   :  { %1763 = vmatpush3.bf16.xpose.msra.mxu1 %v637_v37  ;;  %564 = vrot.lane.b32.xlu0 %v2105_v7, %s2028_s20 }
 0x2c9   :  { %1870 = vmatprep.subr.msk.bf16.mxu1 %vm85_vm0, %v589_v44 }
 0x2cc   :  { %566 = vrot.lane.b32.xlu0 %v2097_v6, %s2028_s20 }
 0x2d0   :  { %1765 = vmatpush3.bf16.xpose.msra.mxu1 %v634_v55  ;;  %568 = vrot.lane.b32.xlu0 %v2086_v4, %s2028_s20 }
 0x2d4   :  { %572 = vrot.lane.b32.xlu0 %v2074_v2, %s2028_s20 }
 0x2d8   :  { %576 = vrot.lane.b32.xlu0 %v2063_v0, %s2028_s20 }
 0x2da   :  { %v372_v5 = vpop.xlane.xlu0 %371 }
 0x2dc   :  { %954 = vrot.lane.b32.xlu0 %v2063_v0, %s2029_s22 }
 0x2de   :  { %v368_v46 = vpop.xlane.xlu0 %367 }
 0x2df   :  { %1931 = vrcp.f32 %v368_v46 }
 0x2e0   :  { %1933 = vrcp.f32 %v372_v5  ;;  %v370_v7 = vpop.xlane.xlu1 %369 }
 0x2e1   :  { %1935 = vrcp.f32 %v370_v7 }
 0x2e2   :  { %v374_v47 = vpop.xlane.xlu0 %373 }
 0x2e3   :  { %1937 = vrcp.f32 %v374_v47 }
 0x2e4   :  { %v587_v6 = vpop.permute.xlu1 %586 }
 0x2e5   :  { %v631_v57 = vsel %vm85_vm0, %v587_v6, 0  ;;  %1871 = vmatprep.subr.msk.bf16.mxu1 %vm85_vm0, %v587_v6 }
 0x2e6   :  { %1767 = vmatpush3.bf16.xpose.msra.mxu1 %v631_v57  ;;  %v585_v4 = vpop.permute.xlu0 %584 }
 0x2e7   :  { %1872 = vmatprep.subr.msk.bf16.mxu1 %vm85_vm0, %v585_v4  ;;  %v628_v20 = vsel %vm85_vm0, %v585_v4, 0 }
 0x2ea   :  { %v583_v23 = vpop.permute.xlu0 %582 }
 0x2eb   :  { %v625_v34 = vsel %vm85_vm0, %v583_v23, 0 }
 0x2ec   :  { %v1932_v2 = vpop.eup %1931 }
 0x2ed   :  { %v1934_v18 = vpop.eup %1933  ;;  %v411_v24 = vmul.f32 %v1932_v2, %v2279_v59 }
 0x2ee   :  { %v1936_v21 = vpop.eup %1935  ;;  %1769 = vmatpush3.bf16.xpose.msra.mxu1 %v628_v20  ;;  %v413_v30 = vmul.f32 %v1934_v18, %v2276_v17 }
 0x2ef   :  { %1873 = vmatprep.subr.msk.bf16.mxu1 %vm85_vm0, %v583_v23  ;;  %v412_v25 = vmul.f32 %v1936_v21, %v2282_v10 }
 0x2f0   :  { %v1938_v27 = vpop.eup %1937 }
 0x2f1   :  { %v425_v28 = vpack.c.bf16 %v412_v25, %v411_v24  ;;  %v414_v31 = vmul.f32 %v1938_v27, %v2285_v13 }
 0x2f3   :  { %1748 = vmatprep.mubr.bf16.mxu1 %v425_v28  ;;  %v426_v32 = vpack.c.bf16 %v414_v31, %v413_v30 }
 0x2f5   :  { %1749 = vmatmul.mubr.bf16.gmra.mxu1 %v426_v32 }
 0x2f6   :  { %1771 = vmatpush3.bf16.xpose.msra.mxu1 %v625_v34 }
 0x315   :  { %v386_v10 = vpop.xlane.xlu1 %385 }
 0x319   :  { %v579_v53 = vpop.permute.xlu1 %578 }
 0x31b   :  { %v380_v35 = vpop.xlane.xlu0 %379 }
 0x31d   :  { %v571_v1 = vpop.permute.xlu1 %570 }
 0x31f   :  { %v376_v38 = vpop.xlane.xlu0 %375 }
 0x323   :  { %v382_v41 = vpop.xlane.xlu0 %381 }
 0x324   :  { %1939 = vrcp.f32 %v382_v41 }
 0x325   :  { %1941 = vrcp.f32 %v376_v38 }
 0x326   :  { %1943 = vrcp.f32 %v380_v35 }
 0x327   :  { %v378_v59 = vpop.xlane.xlu0 %377 }
 0x328   :  { %1945 = vrcp.f32 %v378_v59 }
 0x329   :  { %1947 = vrcp.f32 %v386_v10  ;;  %v1508_v10 = vld [vmem:[%s2724_s1 + $0x90] sm:$0xff] }
 0x32b   :  { %v388_v42 = vpop.xlane.xlu0 %387 }
 0x32f   :  { %v384_v17 = vpop.xlane.xlu0 %383 }
 0x330   :  { %1949 = vrcp.f32 %v384_v17 }
 0x331   :  { %v1940_v13 = vpop.eup %1939  ;;  %1951 = vrcp.f32 %v388_v42 }
 0x332   :  { %v1942_v40 = vpop.eup %1941  ;;  %v418_v48 = vmul.f32 %v1940_v13, %v2311_v51  ;;  %v1506_v13 = vld [vmem:[%s2724_s1 + $0x80] sm:$0xff] }
 0x333   :  { %v390_v19 = vpop.xlane.xlu0 %389  ;;  %v1944_v45 = vpop.eup %1943  ;;  %v415_v29 = vmul.f32 %v1942_v40, %v2308_v50 }
 0x334   :  { %1953 = vrcp.f32 %v390_v19  ;;  %v417_v33 = vmul.f32 %v1944_v45, %v2304_v22  ;;  %v619_v22 = vsel %vm85_vm0, %v579_v53, 0 }
 0x335   :  { %v1946_v26 = vpop.eup %1945 }
 0x336   :  { %v416_v49 = vmul.f32 %v1946_v26, %v2314_v39  ;;  %v428_v3 = vpack.c.bf16 %v418_v48, %v417_v33  ;;  %v1948_v61 = vpop.eup %1947  ;;  %v1507_v33 = vld [vmem:[%s2724_s1 + $0x88] sm:$0xff] }
 0x337   :  { %v581_v36 = vpop.permute.xlu0 %580  ;;  %v420_v39 = vmul.f32 %v1948_v61, %v2299_v43 }
 0x338   :  { %v427_v56 = vpack.c.bf16 %v416_v49, %v415_v29  ;;  %v622_v60 = vsel %vm85_vm0, %v581_v36, 0  ;;  %1874 = vmatprep.subr.msk.bf16.mxu1 %vm85_vm0, %v581_v36  ;;  %v1509_v49 = vld [vmem:[%s2724_s1 + $0x98] sm:$0xff] }
 0x339   :  { %1773 = vmatpush3.bf16.xpose.msra.mxu1 %v622_v60 }
 0x33a   :  { %1752 = vmatprep.mubr.bf16.mxu1 %v427_v56  ;;  %1875 = vmatprep.subr.msk.bf16.mxu1 %vm85_vm0, %v579_v53 }
 0x33b   :  { %1753 = vmatmul.mubr.bf16.gmra.mxu1 %v428_v3  ;;  %v563_v9 = vpop.permute.xlu0 %562 }
 0x33d   :  { %v1950_v51 = vpop.eup %1949 }
 0x33e   :  { %v419_v50 = vmul.f32 %v1950_v51, %v2324_v54  ;;  %v1952_v63 = vpop.eup %1951  ;;  %v1512_v51 = vld [vmem:[%s2724_s1 + $0xb0] sm:$0xff] }
 0x33f   :  { %v421_v43 = vmul.f32 %v1952_v63, %v2319_v52  ;;  %v565_v14 = vpop.permute.xlu0 %564 }
 0x340   :  { %v429_v8 = vpack.c.bf16 %v420_v39, %v419_v50  ;;  %v1513_v39 = vld [vmem:[%s2724_s1 + $0xb8] sm:$0xff] }
 0x341   :  { %v1954_v11 = vpop.eup %1953  ;;  %1775 = vmatpush3.bf16.xpose.msra.mxu1 %v619_v22 }
 0x342   :  { %1756 = vmatprep.mubr.bf16.mxu1 %v429_v8  ;;  %v422_v54 = vmul.f32 %v1954_v11, %v2329_v58  ;;  %1842 = vmatprep.subr.bf16.mxu1 %v1889_v62  ;;  %v575_v58 = vpop.permute.xlu1 %574 }
 0x343   :  { %v567_v15 = vpop.permute.xlu0 %566 }
 0x344   :  { %v430_v12 = vpack.c.bf16 %v422_v54, %v421_v43 }
 0x346   :  { %1757 = vmatmul.mubr.bf16.gmra.mxu1 %v430_v12  ;;  %v953_v21 = vpop.permute.xlu1 %952  ;;  %v1511_v12 = vld [vmem:[%s2724_s1 + $0xa8] sm:$0xff] }
 0x347   :  { %1776 = vmatprep.mubr.msk.bf16.mxu1 %vm85_vm0, %v563_v9  ;;  %v569_v0 = vpop.permute.xlu0 %568  ;;  %v1510_v9 = vld [vmem:[%s2724_s1 + $0xa0] sm:$0xff] }
 0x34b   :  { %v573_v52 = vpop.permute.xlu0 %572 }
 0x34e   :  { %1777 = vmatmul.mubr.msk.bf16.vlgmr.msra.gmra.mxu1 %vm85_vm0, %v565_v14 }
 0x34f   :  { %1780 = vmatprep.mubr.msk.bf16.mxu1 %vm85_vm0, %v567_v15  ;;  %1843 = vmatpush3.bf16.msra.mxu1 %v1889_v62  ;;  %v577_v16 = vpop.permute.xlu0 %576 }
 0x353   :  { %v955_v20 = vpop.permute.xlu0 %954 }
 0x354   :  { %1792 = vmatprep.subr.bf16.mxu0 %v955_v20 }
 0x355   :  { %1793 = vmatpush3.bf16.msra.mxu0 %v955_v20 }
 0x356   :  { %1781 = vmatmul.mubr.msk.bf16.gmra.mxu1 %vm85_vm0, %v569_v0  ;;  %1794 = vmatprep.subr.bf16.mxu0 %v953_v21 }
 0x357   :  { %1784 = vmatprep.mubr.msk.bf16.mxu1 %vm85_vm0, %v571_v1  ;;  %v1516_v1 = vld [vmem:[%s2724_s1 + $0xd0] sm:$0xff] }
 0x359   :  { %1795 = vmatpush3.bf16.msra.mxu0 %v953_v21 }
 0x35e   :  { %1785 = vmatmul.mubr.msk.bf16.gmra.mxu1 %vm85_vm0, %v573_v52 }
 0x35f   :  { %1788 = vmatprep.mubr.msk.bf16.mxu1 %vm85_vm0, %v575_v58 }
 0x366   :  { %1789 = vmatmul.mubr.msk.bf16.gmra.mxu1 %vm85_vm0, %v577_v16  ;;  %v1517_v16 = vld [vmem:[%s2724_s1 + $0xd8] sm:$0xff] }
 0x37f   :  { %v1746_v37 = vpop.f32.mrf.mxu1 }
 0x381   :  { %v489_v44 = vpop.f32.mrf.mxu1 }
 0x383   :  { %v1747_v55 = vpop.f32.mrf.mxu1 }
 0x384   :  { %v553_v7 = vpack.c.bf16 %v1747_v55, %v1746_v37 }
 0x385   :  { %v492_v5 = vpop.f32.mrf.mxu1 }
 0x386   :  { %v552_v46 = vpack.c.bf16 %v492_v5, %v489_v44 }
 0x388   :  { %1844 = vmatprep.mubr.msk.bf16.mxu1 %vm85_vm0, %v552_v46  ;;  %v1514_v46 = vld [vmem:[%s2724_s1 + $0xc0] sm:$0xff] }
 0x389   :  { %1845 = vmatmul.mubr.msk.bf16.vlgmr.msra.gmra.mxu1 %vm85_vm0, %v553_v7 }
 0x3b5   :  { %v1750_v47 = vpop.f32.mrf.mxu1 }
 0x3b7   :  { %v505_v6 = vpop.f32.mrf.mxu1 }
 0x3b9   :  { %v1751_v57 = vpop.f32.mrf.mxu1 }
 0x3ba   :  { %v555_v18 = vpack.c.bf16 %v1751_v57, %v1750_v47  ;;  %v1515_v57 = vld [vmem:[%s2724_s1 + $0xc8] sm:$0xff] }
 0x3bb   :  { %v508_v4 = vpop.f32.mrf.mxu1 }
 0x3bc   :  { %v554_v2 = vpack.c.bf16 %v508_v4, %v505_v6  ;;  %v1520_v4 = vld [vmem:[%s2724_s1 + $0xf0] sm:$0xff] }
 0x3be   :  { %1848 = vmatprep.mubr.msk.bf16.mxu1 %vm85_vm0, %v554_v2 }
 0x3bf   :  { %1849 = vmatmul.mubr.msk.bf16.gmra.mxu1 %vm85_vm0, %v555_v18 }
 0x3fb   :  { %v1754_v23 = vpop.f32.mrf.mxu1 }
 0x3fd   :  { %v521_v24 = vpop.f32.mrf.mxu1 }
 0x3ff   :  { %v1755_v25 = vpop.f32.mrf.mxu1 }
 0x400   :  { %v557_v30 = vpack.c.bf16 %v1755_v25, %v1754_v23  ;;  %v1518_v25 = vld [vmem:[%s2724_s1 + $0xe0] sm:$0xff] }
 0x401   :  { %v524_v27 = vpop.f32.mrf.mxu1 }
 0x402   :  { %v556_v28 = vpack.c.bf16 %v524_v27, %v521_v24 }
 0x404   :  { %1852 = vmatprep.mubr.msk.bf16.mxu1 %vm85_vm0, %v556_v28  ;;  %v2019_v28 = vld [vmem:[%s2723_s0 + $0x18] sm:$0xff]  }
 0x405   :  { %1853 = vmatmul.mubr.msk.bf16.gmra.mxu1 %vm85_vm0, %v557_v30  ;;  %v2020_v30 = vld [vmem:[%s2723_s0 + $0x28] sm:$0xff]  }
 0x406   :  { %v1758_v31 = vpop.f32.mrf.mxu1 }
 0x408   :  { %v537_v32 = vpop.f32.mrf.mxu1 }
 0x40a   :  { %v1759_v34 = vpop.f32.mrf.mxu1 }
 0x40b   :  { %v559_v41 = vpack.c.bf16 %v1759_v34, %v1758_v31  ;;  %v2021_v31 = vld [vmem:[%s2723_s0 + $0x20] sm:$0xff]  }
 0x40c   :  { %v540_v35 = vpop.f32.mrf.mxu1 }
 0x40d   :  { %v558_v38 = vpack.c.bf16 %v540_v35, %v537_v32  ;;  %v2022_v32 = vld [vmem:[%s2723_s0 + $0x8] sm:$0xff]  }
 0x40e   :  { %v1778_v59 = vpop.f32.mrf.mxu1 }
 0x40f   :  { %v741_v42 = vmul.f32 0.25, %v1778_v59  ;;  %1856 = vmatprep.mubr.msk.bf16.mxu1 %vm85_vm0, %v558_v38  ;;  %v1521_v38 = vld [vmem:[%s2724_s1 + $0xf8] sm:$0xff] }
 0x410   :  { %v676_v17 = vpop.f32.mrf.mxu1  ;;  %1857 = vmatmul.mubr.msk.bf16.gmra.mxu1 %vm85_vm0, %v559_v41 }
 0x411   :  { %v739_v40 = vmul.f32 0.25, %v676_v17  ;;  %v2409_v19 = vadd.f32 %v1508_v10, %v741_v42  ;;  %v1519_v42 = vld [vmem:[%s2724_s1 + $0xe8] sm:$0xff] }
 0x412   :  { %v1779_v45 = vpop.f32.mrf.mxu1 }
 0x413   :  { %v742_v26 = vmul.f32 0.25, %v1779_v45  ;;  %792 = vmax.xlane.f32.xlu0 %v2409_v19  ;;  %v2412_v48 = vadd.f32 %v1506_v13, %v739_v40  ;;  %v2023_v13 = vld [vmem:[%s2723_s0 + $0x10] sm:$0xff]  }
 0x414   :  { %v679_v29 = vpop.f32.mrf.mxu1 }
 0x415   :  { %v740_v36 = vmul.f32 0.25, %v679_v29  ;;  %788 = vmax.xlane.f32.xlu1 %v2412_v48  ;;  %v2421_v60 = vadd.f32 %v1509_v49, %v742_v26 }
 0x416   :  { %v1782_v53 = vpop.f32.mrf.mxu1 }
 0x417   :  { %v745_v56 = vmul.f32 0.25, %v1782_v53  ;;  %v2423_v3 = vadd.f32 %v1507_v33, %v740_v36 }
 0x418   :  { %v692_v61 = vpop.f32.mrf.mxu1 }
 0x419   :  { %794 = vmax.xlane.f32.xlu1 %v2421_v60  ;;  %790 = vmax.xlane.f32.xlu0 %v2423_v3  ;;  %v743_v22 = vmul.f32 0.25, %v692_v61  ;;  %v2433_v63 = vadd.f32 %v1512_v51, %v745_v56 }
 0x41a   :  { %v1783_v50 = vpop.f32.mrf.mxu1 }
 0x41b   :  { %v746_v62 = vmul.f32 0.25, %v1783_v50  ;;  %v2445_v15 = vadd.f32 %v1510_v9, %v743_v22 }
 0x41c   :  { %v695_v8 = vpop.f32.mrf.mxu1 }
 0x41d   :  { %v744_v11 = vmul.f32 0.25, %v695_v8  ;;  %800 = vmax.xlane.f32.xlu0 %v2433_v63  ;;  %v2439_v43 = vadd.f32 %v1513_v39, %v746_v62 }
 0x41e   :  { %v1786_v54 = vpop.f32.mrf.mxu1 }
 0x41f   :  { %v749_v14 = vmul.f32 0.25, %v1786_v54  ;;  %802 = vmax.xlane.f32.xlu1 %v2439_v43  ;;  %v2451_v52 = vadd.f32 %v1511_v12, %v744_v11 }
 0x420   :  { %v708_v0 = vpop.f32.mrf.mxu1 }
 0x421   :  { %796 = vmax.xlane.f32.xlu0 %v2445_v15  ;;  %v747_v37 = vmul.f32 0.25, %v708_v0  ;;  %v2457_v55 = vadd.f32 %v1516_v1, %v749_v14 }
 0x422   :  { %v1787_v58 = vpop.f32.mrf.mxu1 }
 0x423   :  { %v750_v44 = vmul.f32 0.25, %v1787_v58  ;;  %798 = vmax.xlane.f32.xlu1 %v2451_v52  ;;  %v2472_v18 = vadd.f32 %v1514_v46, %v747_v37 }
 0x424   :  { %v711_v5 = vpop.f32.mrf.mxu1 }
 0x425   :  { %v748_v7 = vmul.f32 0.25, %v711_v5  ;;  %808 = vmax.xlane.f32.xlu0 %v2457_v55  ;;  %v2463_v47 = vadd.f32 %v1517_v16, %v750_v44 }
 0x426   :  { %v1790_v6 = vpop.f32.mrf.mxu1 }
 0x427   :  { %810 = vmax.xlane.f32.xlu1 %v2463_v47  ;;  %v753_v2 = vmul.f32 0.25, %v1790_v6  ;;  %v2475_v21 = vadd.f32 %v1515_v57, %v748_v7 }
 0x428   :  { %v724_v20 = vpop.f32.mrf.mxu1 }
 0x429   :  { %804 = vmax.xlane.f32.xlu0 %v2472_v18  ;;  %v751_v23 = vmul.f32 0.25, %v724_v20  ;;  %v2477_v24 = vadd.f32 %v1520_v4, %v753_v2 }
 0x42a   :  { %v1791_v34 = vpop.f32.mrf.mxu1 }
 0x42b   :  { %806 = vmax.xlane.f32.xlu1 %v2475_v21  ;;  %v2484_v27 = vadd.f32 %v1518_v25, %v751_v23  ;;  %v754_v35 = vmul.f32 0.25, %v1791_v34 }
 0x42c   :  { %v727_v41 = vpop.f32.mrf.mxu1 }
 0x42d   :  { %816 = vmax.xlane.f32.xlu0 %v2477_v24  ;;  %v752_v59 = vmul.f32 0.25, %v727_v41  ;;  %v2506_v10 = vadd.f32 %v1521_v38, %v754_v35 }
 0x42f   :  { %v2512_v17 = vadd.f32 %v1519_v42, %v752_v59  ;;  %v2024_v59 = vld [vmem:[%s2723_s0] sm:$0xff]  }
 0x431   :  { %812 = vmax.xlane.f32.xlu0 %v2484_v27 }
 0x43c   :  { %946 = vrot.lane.b32.xlu1 %v2019_v28, %s2029_s22 }
 0x447   :  { %950 = vrot.lane.b32.xlu0 %v2020_v30, %s2029_s22 }
 0x44b   :  { %948 = vrot.lane.b32.xlu0 %v2021_v31, %s2029_s22 }
 0x44f   :  { %942 = vrot.lane.b32.xlu0 %v2022_v32, %s2029_s22 }
 0x460   :  { %818 = vmax.xlane.f32.xlu1 %v2506_v10 }
 0x464   :  { %814 = vmax.xlane.f32.xlu1 %v2512_v17 }
 0x475   :  { %944 = vrot.lane.b32.xlu1 %v2023_v13, %s2029_s22 }
 0x49c   :  { %v793_v40 = vpop.xlane.xlu0 %792 }
 0x49d   :  { %v822_v45 = vsub.f32 %v2409_v19, %v793_v40 }
 0x49e   :  { %v789_v26 = vpop.xlane.xlu1 %788 }
 0x49f   :  { %v840_v29 = vmul.f32 1.442695, %v822_v45  ;;  %v820_v49 = vsub.f32 %v2412_v48, %v789_v26 }
 0x4a1   :  { %1955 = vpow2.f32 %v840_v29  ;;  %v836_v33 = vmul.f32 1.442695, %v820_v49 }
 0x4a2   :  { %v795_v36 = vpop.xlane.xlu1 %794  ;;  %v791_v53 = vpop.xlane.xlu0 %790 }
 0x4a3   :  { %v823_v56 = vsub.f32 %v2421_v60, %v795_v36  ;;  %1957 = vpow2.f32 %v836_v33  ;;  %v821_v51 = vsub.f32 %v2423_v3, %v791_v53 }
 0x4a5   :  { %v842_v61 = vmul.f32 1.442695, %v823_v56  ;;  %v838_v19 = vmul.f32 1.442695, %v821_v51 }
 0x4a6   :  { %v801_v50 = vpop.xlane.xlu0 %800 }
 0x4a7   :  { %v826_v39 = vsub.f32 %v2433_v63, %v801_v50  ;;  %1959 = vpow2.f32 %v842_v61 }
 0x4a8   :  { %v803_v22 = vpop.xlane.xlu1 %802 }
 0x4a9   :  { %v848_v62 = vmul.f32 1.442695, %v826_v39  ;;  %v827_v48 = vsub.f32 %v2439_v43, %v803_v22 }
 0x4aa   :  { %v797_v8 = vpop.xlane.xlu0 %796 }
 0x4ab   :  { %1961 = vpow2.f32 %v848_v62  ;;  %v824_v9 = vsub.f32 %v2445_v15, %v797_v8  ;;  %v850_v14 = vmul.f32 1.442695, %v827_v48 }
 0x4ac   :  { %v799_v11 = vpop.xlane.xlu1 %798  ;;  %1963 = vpow2.f32 %v838_v19 }
 0x4ad   :  { %v844_v60 = vmul.f32 1.442695, %v824_v9  ;;  %v825_v54 = vsub.f32 %v2451_v52, %v799_v11 }
 0x4ae   :  { %v2527_v12 = vpop.eup %1955  ;;  %v809_v3 = vpop.xlane.xlu0 %808 }
 0x4af   :  { %1965 = vpow2.f32 %v844_v60  ;;  %v846_v63 = vmul.f32 1.442695, %v825_v54  ;;  %v830_v0 = vsub.f32 %v2457_v55, %v809_v3  ;;  %872 = vadd.xlane.f32.xlu1 %v2527_v12 }
 0x4b0   :  { %v811_v1 = vpop.xlane.xlu1 %810  ;;  %v2531_v43 = vpop.eup %1957 }
 0x4b1   :  { %1967 = vpow2.f32 %v846_v63  ;;  %v856_v58 = vmul.f32 1.442695, %v830_v0  ;;  %v831_v55 = vsub.f32 %v2463_v47, %v811_v1 }
 0x4b2   :  { %v805_v15 = vpop.xlane.xlu0 %804  ;;  %1969 = vpow2.f32 %v850_v14 }
 0x4b3   :  { %v828_v16 = vsub.f32 %v2472_v18, %v805_v15  ;;  %868 = vadd.xlane.f32.xlu1 %v2531_v43  ;;  %1971 = vpow2.f32 %v856_v58  ;;  %v858_v20 = vmul.f32 1.442695, %v831_v55 }
 0x4b4   :  { %v807_v52 = vpop.xlane.xlu1 %806  ;;  %v2536_v44 = vpop.eup %1959 }
 0x4b5   :  { %v829_v37 = vsub.f32 %v2475_v21, %v807_v52  ;;  %v852_v46 = vmul.f32 1.442695, %v828_v16 }
 0x4b6   :  { %v817_v5 = vpop.xlane.xlu0 %816 }
 0x4b7   :  { %v854_v7 = vmul.f32 1.442695, %v829_v37  ;;  %v834_v6 = vsub.f32 %v2477_v24, %v817_v5  ;;  %874 = vadd.xlane.f32.xlu1 %v2536_v44 }
 0x4b8   :  { %v2541_v57 = vpop.eup %1961  ;;  %v947_v31 = vpop.permute.xlu1 %946 }
 0x4b9   :  { %1973 = vpow2.f32 %v854_v7  ;;  %v864_v4 = vmul.f32 1.442695, %v834_v6  ;;  %880 = vadd.xlane.f32.xlu0 %v2541_v57  ;;  %v2544_v2 = vpop.eup %1963 }
 0x4ba   :  { %v813_v18 = vpop.xlane.xlu0 %812  ;;  %1975 = vpow2.f32 %v852_v46 }
 0x4bb   :  { %v832_v47 = vsub.f32 %v2484_v27, %v813_v18  ;;  %870 = vadd.xlane.f32.xlu1 %v2544_v2  ;;  %1977 = vpow2.f32 %v864_v4 }
 0x4bc   :  { %v2548_v21 = vpop.eup %1965  ;;  %1979 = vpow2.f32 %v858_v20 }
 0x4bd   :  { %v860_v23 = vmul.f32 1.442695, %v832_v47  ;;  %876 = vadd.xlane.f32.xlu0 %v2548_v21 }
 0x4be   :  { %v2551_v24 = vpop.eup %1967  ;;  %v951_v25 = vpop.permute.xlu0 %950 }
 0x4bf   :  { %878 = vadd.xlane.f32.xlu1 %v2551_v24  ;;  %1796 = vmatprep.subr.bf16.mxu0 %v951_v25  ;;  %v2554_v28 = vpop.eup %1969  ;;  %1981 = vpow2.f32 %v860_v23 }
 0x4c0   :  { %1797 = vmatpush3.bf16.msra.mxu0 %v951_v25  ;;  %v2557_v30 = vpop.eup %1971 }
 0x4c1   :  { %882 = vadd.xlane.f32.xlu0 %v2554_v28 }
 0x4c2   :  { %v949_v27 = vpop.permute.xlu0 %948 }
 0x4c3   :  { %1798 = vmatprep.subr.bf16.mxu0 %v949_v27 }
 0x4c4   :  { %1799 = vmatpush3.bf16.msra.mxu0 %v949_v27 }
 0x4c5   :  { %888 = vadd.xlane.f32.xlu0 %v2557_v30  ;;  %1800 = vmatprep.subr.bf16.mxu0 %v947_v31 }
 0x4c6   :  { %v2560_v32 = vpop.eup %1973  ;;  %v943_v49 = vpop.permute.xlu0 %942 }
 0x4c7   :  { %886 = vadd.xlane.f32.xlu1 %v2560_v32  ;;  %v2563_v34 = vpop.eup %1975 }
 0x4c8   :  { %1801 = vmatpush3.bf16.msra.mxu0 %v947_v31  ;;  %v2566_v35 = vpop.eup %1977 }
 0x4c9   :  { %884 = vadd.xlane.f32.xlu0 %v2563_v34  ;;  %v2569_v38 = vpop.eup %1979 }
 0x4cb   :  { %896 = vadd.xlane.f32.xlu1 %v2566_v35 }
 0x4cc   :  { %v2572_v41 = vpop.eup %1981 }
 0x4cd   :  { %890 = vadd.xlane.f32.xlu0 %v2569_v38 }
 0x4cf   :  { %892 = vadd.xlane.f32.xlu1 %v2572_v41 }
 0x4e0   :  { %940 = vrot.lane.b32.xlu1 %v2024_v59, %s2029_s22 }
 0x4e9   :  { %v819_v42 = vpop.xlane.xlu1 %818 }
 0x4ea   :  { %v835_v40 = vsub.f32 %v2506_v10, %v819_v42 }
 0x4ec   :  { %v866_v33 = vmul.f32 1.442695, %v835_v40 }
 0x4ed   :  { %v815_v13 = vpop.xlane.xlu1 %814 }
 0x4ee   :  { %v833_v45 = vsub.f32 %v2512_v17, %v815_v13 }
 0x4f0   :  { %v862_v26 = vmul.f32 1.442695, %v833_v45 }
 0x4f1   :  { %v945_v29 = vpop.permute.xlu1 %944 }
 0x4f2   :  { %1983 = vpow2.f32 %v862_v26  ;;  %1802 = vmatprep.subr.bf16.mxu0 %v945_v29 }
 0x4f3   :  { %1803 = vmatpush3.bf16.msra.mxu0 %v945_v29  ;;  %1985 = vpow2.f32 %v866_v33  ;;  %v1890_v29 = vld [vmem:[%s2725_s2 + $0x8] sm:$0xff]  }
 0x4f4   :  { %1804 = vmatprep.subr.bf16.mxu0 %v943_v49 }
 0x4f7   :  { %1805 = vmatpush3.bf16.msra.mxu0 %v943_v49 }
 0x4ff   :  { %v2581_v36 = vpop.eup %1983 }
 0x500   :  { %894 = vadd.xlane.f32.xlu0 %v2581_v36  ;;  %v2584_v53 = vpop.eup %1985 }
 0x504   :  { %898 = vadd.xlane.f32.xlu0 %v2584_v53 }
 0x538   :  { %v873_v10 = vpop.xlane.xlu1 %872 }
 0x53c   :  { %v869_v17 = vpop.xlane.xlu1 %868 }
 0x53d   :  { %1987 = vrcp.f32 %v869_v17 }
 0x540   :  { %v875_v56 = vpop.xlane.xlu1 %874 }
 0x542   :  { %v881_v61 = vpop.xlane.xlu0 %880 }
 0x544   :  { %v871_v51 = vpop.xlane.xlu1 %870 }
 0x545   :  { %1989 = vrcp.f32 %v871_v51 }
 0x546   :  { %v877_v50 = vpop.xlane.xlu0 %876  ;;  %1991 = vrcp.f32 %v875_v56 }
 0x548   :  { %v879_v39 = vpop.xlane.xlu1 %878 }
 0x549   :  { %1993 = vrcp.f32 %v879_v39 }
 0x54a   :  { %v883_v22 = vpop.xlane.xlu0 %882  ;;  %1995 = vrcp.f32 %v873_v10  ;;  %v1988_v62 = vpop.eup %1987 }
 0x54b   :  { %1997 = vrcp.f32 %v877_v50  ;;  %v916_v11 = vmul.f32 %v1988_v62, %v2531_v43 }
 0x54c   :  { %1999 = vrcp.f32 %v883_v22 }
 0x54e   :  { %v889_v19 = vpop.xlane.xlu0 %888 }
 0x550   :  { %v887_v8 = vpop.xlane.xlu1 %886 }
 0x552   :  { %v1990_v48 = vpop.eup %1989  ;;  %v885_v9 = vpop.xlane.xlu0 %884 }
 0x553   :  { %v917_v60 = vmul.f32 %v1990_v48, %v2544_v2  ;;  %2001 = vrcp.f32 %v885_v9  ;;  %v1992_v14 = vpop.eup %1991 }
 0x554   :  { %v897_v54 = vpop.xlane.xlu1 %896  ;;  %2003 = vrcp.f32 %v881_v61  ;;  %v919_v16 = vmul.f32 %v1992_v14, %v2536_v44 }
 0x555   :  { %v932_v3 = vpack.c.bf16 %v917_v60, %v916_v11  ;;  %2005 = vrcp.f32 %v887_v8 }
 0x556   :  { %v891_v63 = vpop.xlane.xlu0 %890  ;;  %v1994_v1 = vpop.eup %1993 }
 0x557   :  { %1808 = vmatprep.mubr.bf16.mxu0 %v932_v3  ;;  %v1996_v15 = vpop.eup %1995  ;;  %2007 = vrcp.f32 %v891_v63  ;;  %v921_v43 = vmul.f32 %v1994_v1, %v2551_v24  ;;  %v1846_v63 = vpop.f32.mrf.mxu1 }
 0x558   :  { %v893_v0 = vpop.xlane.xlu1 %892  ;;  %v1998_v58 = vpop.eup %1997  ;;  %2009 = vrcp.f32 %v889_v19  ;;  %v918_v37 = vmul.f32 %v1996_v15, %v2527_v12 }
 0x559   :  { %v920_v55 = vmul.f32 %v1998_v58, %v2548_v21  ;;  %v2000_v46 = vpop.eup %1999  ;;  %2011 = vrcp.f32 %v893_v0  ;;  %v1263_v0 = vpop.f32.mrf.mxu1 }
 0x55a   :  { %v933_v5 = vpack.c.bf16 %v919_v16, %v918_v37  ;;  %v923_v44 = vmul.f32 %v2000_v46, %v2554_v28  ;;  %v1607_v16 = vld [vmem:[%s2726_s4 + $0x8] sm:$0xff]   ;;  %v2620_v37 = vld [vmem:[%s2727_s3] ss:$0 sm:$0xff] }
 0x55b   :  { %v934_v7 = vpack.c.bf16 %v921_v43, %v920_v55  ;;  %v1847_v1 = vpop.f32.mrf.mxu1  ;;  %v1576_v55 = vld [vmem:[%s2726_s4] sm:$0xff]   ;;  %v1581_v46 = vunpack.c.l.bf16 %v1607_v16 }
 0x55c   :  { %v941_v52 = vpop.permute.xlu1 %940 }
 0x55d   :  { %1806 = vmatprep.subr.bf16.mxu0 %v941_v52  ;;  %v1266_v15 = vpop.f32.mrf.mxu1 }
 0x55e   :  { %1807 = vmatpush3.bf16.msra.mxu0 %v941_v52 }
 0x55f   :  { %1824 = vmatprep.subr.bf16.mxu0 %v1890_v29  ;;  %v1850_v58 = vpop.f32.mrf.mxu1 }
 0x560   :  { %v2002_v6 = vpop.eup %2001 }
 0x561   :  { %1809 = vmatmul.mubr.bf16.vlgmr.msra.gmra.mxu0 %v933_v5  ;;  %v2004_v4 = vpop.eup %2003  ;;  %v924_v18 = vmul.f32 %v2002_v6, %v2563_v34  ;;  %v1279_v52 = vpop.f32.mrf.mxu1 }
 0x562   :  { %1812 = vmatprep.mubr.bf16.mxu0 %v934_v7  ;;  %v2006_v2 = vpop.eup %2005  ;;  %v922_v20 = vmul.f32 %v2004_v4, %v2541_v57  ;;  %1825 = vmatpush3.bf16.msra.mxu0 %v1890_v29 }
 0x563   :  { %v925_v47 = vmul.f32 %v2006_v2, %v2560_v32  ;;  %v1577_v2 = vunpack.c.l.bf16 %v1576_v55 }
 0x564   :  { %v935_v12 = vpack.c.bf16 %v923_v44, %v922_v20  ;;  %v2008_v23 = vpop.eup %2007  ;;  %v1851_v44 = vpop.f32.mrf.mxu1 }
 0x565   :  { %v936_v24 = vpack.c.bf16 %v925_v47, %v924_v18  ;;  %v2010_v21 = vpop.eup %2009  ;;  %v927_v25 = vmul.f32 %v2008_v23, %v2569_v38  ;;  %v1582_v23 = vunpack.c.h.bf16 %v1607_v16 }
 0x566   :  { %v926_v27 = vmul.f32 %v2010_v21, %v2557_v30  ;;  %v2012_v57 = vpop.eup %2011 }
 0x567   :  { %v928_v59 = vmul.f32 %v2012_v57, %v2572_v41  ;;  %v1608_v57 = vld [vmem:[%s2726_s4 + $0x10] sm:$0xff]  }
 0x568   :  { %v937_v31 = vpack.c.bf16 %v927_v25, %v926_v27  ;;  %v1578_v25 = vunpack.c.h.bf16 %v1576_v55  ;;  %v1585_v29 = vunpack.c.l.bf16 %v1608_v57 }
 0x569   :  { %1813 = vmatmul.mubr.bf16.gmra.mxu0 %v935_v12 }
 0x56a   :  { %1816 = vmatprep.mubr.bf16.mxu0 %v936_v24  ;;  %v1609_v24 = vld [vmem:[%s2726_s4 + $0x18] sm:$0xff]  }
 0x571   :  { %1817 = vmatmul.mubr.bf16.gmra.mxu0 %v937_v31 }
 0x589   :  { %v895_v28 = vpop.xlane.xlu0 %894 }
 0x58a   :  { %2013 = vrcp.f32 %v895_v28 }
 0x58b   :  { %2015 = vrcp.f32 %v897_v54 }
 0x58d   :  { %v899_v34 = vpop.xlane.xlu0 %898 }
 0x58e   :  { %2017 = vrcp.f32 %v899_v34 }
 0x597   :  { %v2014_v32 = vpop.eup %2013 }
 0x598   :  { %v929_v42 = vmul.f32 %v2014_v32, %v2581_v36  ;;  %v2016_v13 = vpop.eup %2015  ;;  %v1282_v32 = vpop.f32.mrf.mxu1 }
 0x599   :  { %v930_v30 = vmul.f32 %v2016_v13, %v2566_v35 }
 0x59a   :  { %v938_v40 = vpack.c.bf16 %v929_v42, %v928_v59  ;;  %v1589_v42 = vunpack.c.l.bf16 %v1609_v24 }
 0x59b   :  { %v2018_v45 = vpop.eup %2017 }
 0x59c   :  { %1820 = vmatprep.mubr.bf16.mxu0 %v938_v40  ;;  %v931_v38 = vmul.f32 %v2018_v45, %v2584_v53 }
 0x59e   :  { %v939_v26 = vpack.c.bf16 %v931_v38, %v930_v30  ;;  %v1854_v38 = vpop.f32.mrf.mxu1 }
 0x5a0   :  { %1821 = vmatmul.mubr.bf16.gmra.mxu0 %v939_v26 }
 0x621   :  { %v1810_v49 = vpop.f32.mrf.mxu0 }
 0x623   :  { %v998_v41 = vpop.f32.mrf.mxu0 }
 0x625   :  { %v1811_v33 = vpop.f32.mrf.mxu0 }
 0x626   :  { %v1062_v17 = vpack.c.bf16 %v1811_v33, %v1810_v49 }
 0x627   :  { %v1001_v36 = vpop.f32.mrf.mxu0 }
 0x628   :  { %v1061_v10 = vpack.c.bf16 %v1001_v36, %v998_v41 }
 0x629   :  { %v1814_v56 = vpop.f32.mrf.mxu0 }
 0x62a   :  { %1826 = vmatprep.mubr.msk.bf16.mxu0 %vm85_vm0, %v1061_v10 }
 0x62b   :  { %v1014_v35 = vpop.f32.mrf.mxu0  ;;  %1827 = vmatmul.mubr.msk.bf16.vlgmr.msra.gmra.mxu0 %vm85_vm0, %v1062_v17  ;;  %v1590_v17 = vunpack.c.h.bf16 %v1609_v24 }
 0x62d   :  { %v1815_v53 = vpop.f32.mrf.mxu0 }
 0x62e   :  { %v1064_v50 = vpack.c.bf16 %v1815_v53, %v1814_v56 }
 0x62f   :  { %v1017_v61 = vpop.f32.mrf.mxu0 }
 0x630   :  { %v1063_v51 = vpack.c.bf16 %v1017_v61, %v1014_v35 }
 0x631   :  { %v1818_v39 = vpop.f32.mrf.mxu0 }
 0x632   :  { %1830 = vmatprep.mubr.msk.bf16.mxu0 %vm85_vm0, %v1063_v51  ;;  %v1611_v51 = vld [vmem:[%s2726_s4 + $0x28] sm:$0xff]  }
 0x633   :  { %v1030_v22 = vpop.f32.mrf.mxu0  ;;  %1831 = vmatmul.mubr.msk.bf16.gmra.mxu0 %vm85_vm0, %v1064_v50  ;;  %v1295_v50 = vpop.f32.mrf.mxu1 }
 0x635   :  { %v1819_v19 = vpop.f32.mrf.mxu0 }
 0x636   :  { %v1066_v48 = vpack.c.bf16 %v1819_v19, %v1818_v39 }
 0x637   :  { %v1033_v62 = vpop.f32.mrf.mxu0 }
 0x638   :  { %v1065_v8 = vpack.c.bf16 %v1033_v62, %v1030_v22  ;;  %v1586_v22 = vunpack.c.h.bf16 %v1608_v57 }
 0x63a   :  { %1834 = vmatprep.mubr.msk.bf16.mxu0 %vm85_vm0, %v1065_v8 }
 0x63b   :  { %1835 = vmatmul.mubr.msk.bf16.gmra.mxu0 %vm85_vm0, %v1066_v48 }
 0x660   :  { %v1822_v9 = vpop.f32.mrf.mxu0 }
 0x662   :  { %v1046_v11 = vpop.f32.mrf.mxu0 }
 0x664   :  { %v1823_v60 = vpop.f32.mrf.mxu0 }
 0x665   :  { %v1068_v14 = vpack.c.bf16 %v1823_v60, %v1822_v9  ;;  %v1610_v9 = vld [vmem:[%s2726_s4 + $0x20] sm:$0xff]   ;;  %v1597_v60 = vunpack.c.l.bf16 %v1611_v51 }
 0x666   :  { %v1049_v54 = vpop.f32.mrf.mxu0 }
 0x667   :  { %v1067_v3 = vpack.c.bf16 %v1049_v54, %v1046_v11 }
 0x669   :  { %1838 = vmatprep.mubr.msk.bf16.mxu0 %vm85_vm0, %v1067_v3 }
 0x66a   :  { %1839 = vmatmul.mubr.msk.bf16.gmra.mxu0 %vm85_vm0, %v1068_v14 }
 0x6eb   :  { %v1828_v43 = vpop.f32.mrf.mxu0 }
 0x6ec   :  { %v1272_v5 = vadd.f32 %v1846_v63, %v1828_v43 }
 0x6ed   :  { %v1136_v7 = vpop.f32.mrf.mxu0 }
 0x6ee   :  { %v1335_v6 = vadd.f32 %v2620_v37, %v1272_v5  ;;  %v1264_v4 = vadd.f32 %v1263_v0, %v1136_v7  ;;  %v1855_v0 = vpop.f32.mrf.mxu1  ;;  %v1598_v5 = vunpack.c.h.bf16 %v1611_v51 }
 0x6ef   :  { %v1829_v18 = vpop.f32.mrf.mxu0 }
 0x6f0   :  { %v1383_v20 = vadd.f32 %v1581_v46, %v1335_v6  ;;  %v1333_v47 = vadd.f32 %v2620_v37, %v1264_v4  ;;  %v1275_v12 = vadd.f32 %v1847_v1, %v1829_v18  ;;  %v1594_v18 = vunpack.c.h.bf16 %v1610_v9 }
 0x6f1   :  { %v1139_v21 = vpop.f32.mrf.mxu0 }
 0x6f2   :  { %v1561_v27 = vpack.c.bf16 %v1383_v20, %v1383_v20  ;;  %v1381_v31 = vadd.f32 %v1577_v2, %v1333_v47  ;;  %v1336_v28 = vadd.f32 %v2620_v37, %v1275_v12  ;;  %v1267_v34 = vadd.f32 %v1266_v15, %v1139_v21  ;;  %v1298_v2 = vpop.f32.mrf.mxu1 }
 0x6f3   :  { %v1832_v59 = vpop.f32.mrf.mxu0  ;;  %v1593_v15 = vunpack.c.l.bf16 %v1610_v9 }
 0x6f4   :  { %1464 = vst.msk [vmem:[%s2728_s5 + $0x8] sm:$0xf] %vm1461_vm1, %v1561_v27  ;;  %v1559_v13 = vpack.c.bf16 %v1381_v31, %v1381_v31  ;;  %v1384_v40 = vadd.f32 %v1582_v23, %v1336_v28  ;;  %v1334_v45 = vadd.f32 %v2620_v37, %v1267_v34  ;;  %v1288_v30 = vadd.f32 %v1850_v58, %v1832_v59  ;;  %v1858_v34 = vpop.f32.mrf.mxu1 }
 0x6f5   :  { %v1152_v26 = vpop.f32.mrf.mxu0 }
 0x6f6   :  { %1462 = vst.msk [vmem:[%s2728_s5] sm:$0xf] %vm1461_vm1, %v1559_v13  ;;  %v1562_v49 = vpack.c.bf16 %v1384_v40, %v1384_v40  ;;  %v1382_v41 = vadd.f32 %v1578_v25, %v1334_v45  ;;  %v1339_v33 = vadd.f32 %v2620_v37, %v1288_v30  ;;  %v1280_v36 = vadd.f32 %v1279_v52, %v1152_v26  ;;  %v1311_v57 = vpop.f32.mrf.mxu1 }
 0x6f7   :  { %v1833_v10 = vpop.f32.mrf.mxu0 }
 0x6f8   :  { %1465 = vst.msk [vmem:[%s2728_s5 + $0xc] sm:$0xf] %vm1461_vm1, %v1562_v49  ;;  %v1560_v56 = vpack.c.bf16 %v1382_v41, %v1382_v41  ;;  %v1387_v35 = vadd.f32 %v1589_v42, %v1339_v33  ;;  %v1337_v53 = vadd.f32 %v2620_v37, %v1280_v36  ;;  %v1291_v61 = vadd.f32 %v1851_v44, %v1833_v10  ;;  %v1612_v42 = vld [vmem:[%s2726_s4 + $0x30] sm:$0xff]   ;;  %v1859_v45 = vpop.f32.mrf.mxu1 }
 0x6f9   :  { %v1155_v39 = vpop.f32.mrf.mxu0 }
 0x6fa   :  { %1463 = vst.msk [vmem:[%s2728_s5 + $0x4] sm:$0xf] %vm1461_vm1, %v1560_v56  ;;  %v1565_v19 = vpack.c.bf16 %v1387_v35, %v1387_v35  ;;  %v1385_v62 = vadd.f32 %v1585_v29, %v1337_v53  ;;  %v1340_v8 = vadd.f32 %v2620_v37, %v1291_v61  ;;  %v1283_v48 = vadd.f32 %v1282_v32, %v1155_v39  ;;  %v1613_v32 = vld [vmem:[%s2726_s4 + $0x38] sm:$0xff]  }
 0x6fb   :  { %v1836_v11 = vpop.f32.mrf.mxu0  ;;  %v1605_v40 = vunpack.c.l.bf16 %v1613_v32  ;;  %v1601_v29 = vunpack.c.l.bf16 %v1612_v42  ;;  %v1606_v10 = vunpack.c.h.bf16 %v1613_v32  ;;  %v1602_v35 = vunpack.c.h.bf16 %v1612_v42 }
 0x6fc   :  { %1468 = vst.msk [vmem:[%s2728_s5 + $0x18] sm:$0xf] %vm1461_vm1, %v1565_v19  ;;  %v1563_v54 = vpack.c.bf16 %v1385_v62, %v1385_v62  ;;  %v1388_v3 = vadd.f32 %v1590_v17, %v1340_v8  ;;  %v1338_v14 = vadd.f32 %v2620_v37, %v1283_v48  ;;  %v1304_v63 = vadd.f32 %v1854_v38, %v1836_v11  ;;  %v1314_v17 = vpop.f32.mrf.mxu1 }
 0x6fd   :  { %v1168_v1 = vpop.f32.mrf.mxu0 }
 0x6fe   :  { %1466 = vst.msk [vmem:[%s2728_s5 + $0x10] sm:$0xf] %vm1461_vm1, %v1563_v54  ;;  %v1566_v58 = vpack.c.bf16 %v1388_v3, %v1388_v3  ;;  %v1386_v16 = vadd.f32 %v1586_v22, %v1338_v14  ;;  %v1343_v52 = vadd.f32 %v2620_v37, %v1304_v63  ;;  %v1296_v43 = vadd.f32 %v1295_v50, %v1168_v1 }
 0x6ff   :  { %v1837_v55 = vpop.f32.mrf.mxu0 }
 0x700   :  { %1469 = vst.msk [vmem:[%s2728_s5 + $0x1c] sm:$0xf] %vm1461_vm1, %v1566_v58  ;;  %v1564_v46 = vpack.c.bf16 %v1386_v16, %v1386_v16  ;;  %v1391_v7 = vadd.f32 %v1597_v60, %v1343_v52  ;;  %v1341_v6 = vadd.f32 %v2620_v37, %v1296_v43  ;;  %v1307_v4 = vadd.f32 %v1855_v0, %v1837_v55 }
 0x701   :  { %v1171_v44 = vpop.f32.mrf.mxu0 }
 0x702   :  { %1467 = vst.msk [vmem:[%s2728_s5 + $0x14] sm:$0xf] %vm1461_vm1, %v1564_v46  ;;  %v1569_v20 = vpack.c.bf16 %v1391_v7, %v1391_v7  ;;  %v1389_v47 = vadd.f32 %v1593_v15, %v1341_v6  ;;  %v1344_v12 = vadd.f32 %v2620_v37, %v1307_v4  ;;  %v1299_v23 = vadd.f32 %v1298_v2, %v1171_v44 }
 0x704   :  { %1472 = vst.msk [vmem:[%s2728_s5 + $0x28] sm:$0xf] %vm1461_vm1, %v1569_v20  ;;  %v1567_v24 = vpack.c.bf16 %v1389_v47, %v1389_v47  ;;  %v1392_v21 = vadd.f32 %v1598_v5, %v1344_v12  ;;  %v1342_v25 = vadd.f32 %v2620_v37, %v1299_v23 }
 0x706   :  { %1470 = vst.msk [vmem:[%s2728_s5 + $0x20] sm:$0xf] %vm1461_vm1, %v1567_v24  ;;  %v1570_v27 = vpack.c.bf16 %v1392_v21, %v1392_v21  ;;  %v1390_v31 = vadd.f32 %v1594_v18, %v1342_v25 }
 0x708   :  { %1473 = vst.msk [vmem:[%s2728_s5 + $0x2c] sm:$0xf] %vm1461_vm1, %v1570_v27  ;;  %v1568_v28 = vpack.c.bf16 %v1390_v31, %v1390_v31 }
 0x70a   :  { %1471 = vst.msk [vmem:[%s2728_s5 + $0x24] sm:$0xf] %vm1461_vm1, %v1568_v28 }
 0x72a   :  { %v1840_v59 = vpop.f32.mrf.mxu0 }
 0x72b   :  { %v1320_v13 = vadd.f32 %v1858_v34, %v1840_v59 }
 0x72c   :  { %v1184_v30 = vpop.f32.mrf.mxu0 }
 0x72d   :  { %v1347_v38 = vadd.f32 %v2620_v37, %v1320_v13  ;;  %v1312_v26 = vadd.f32 %v1311_v57, %v1184_v30 }
 0x72e   :  { %v1841_v49 = vpop.f32.mrf.mxu0 }
 0x72f   :  { %v1395_v41 = vadd.f32 %v1605_v40, %v1347_v38  ;;  %v1345_v33 = vadd.f32 %v2620_v37, %v1312_v26  ;;  %v1323_v36 = vadd.f32 %v1859_v45, %v1841_v49 }
 0x730   :  { %v1187_v56 = vpop.f32.mrf.mxu0 }
 0x731   :  { %v1573_v53 = vpack.c.bf16 %v1395_v41, %v1395_v41  ;;  %v1393_v61 = vadd.f32 %v1601_v29, %v1345_v33  ;;  %v1348_v51 = vadd.f32 %v2620_v37, %v1323_v36  ;;  %v1315_v50 = vadd.f32 %v1314_v17, %v1187_v56 }
 0x733   :  { %1476 = vst.msk [vmem:[%s2728_s5 + $0x38] sm:$0xf] %vm1461_vm1, %v1573_v53  ;;  %v1571_v39 = vpack.c.bf16 %v1393_v61, %v1393_v61  ;;  %v1396_v22 = vadd.f32 %v1606_v10, %v1348_v51  ;;  %v1346_v19 = vadd.f32 %v2620_v37, %v1315_v50 }
 0x735   :  { %1474 = vst.msk [vmem:[%s2728_s5 + $0x30] sm:$0xf] %vm1461_vm1, %v1571_v39  ;;  %v1574_v62 = vpack.c.bf16 %v1396_v22, %v1396_v22  ;;  %v1394_v8 = vadd.f32 %v1602_v35, %v1346_v19 }
 0x737   :  { %1477 = vst.msk [vmem:[%s2728_s5 + $0x3c] sm:$0xf] %vm1461_vm1, %v1574_v62  ;;  %v1572_v48 = vpack.c.bf16 %v1394_v8, %v1394_v8 }
 0x739   :  { %1475 = vst.msk [vmem:[%s2728_s5 + $0x34] sm:$0xf] %vm1461_vm1, %v1572_v48 }

// kernel: swin_forward.23
= control target key start
LH: loop header
LB: loop body
LE: loop exit
PB: predicated region body
PF: predicated region fallthrough
CT: control target
= control target key end

     0   :  { %vm362_vm0 = vcmask 257024   ;;  %s749_s1 = inlined_call_operand.vmem [shape: bf16[128,32], index: 1, kind: input, shape index: {}]   ;;  %s750_s0 = inlined_call_operand.vmem [shape: bf16[128,128], index: 0, kind: input, shape index: {}]   ;;  %s751_s3 = inlined_call_operand.vmem [shape: bf16[128,32], index: 3, kind: input, shape index: {}]   ;;  %s752_s2 = inlined_call_operand.vmem [shape: f32[1,32], index: 2, kind: input, shape index: {}]   ;;  %s753_s4 = inlined_call_operand.vmem [shape: bf16[128,32], index: 4, kind: output, shape index: {}]  }
   0x1   :  { %v535_v0 = vld [vmem:[%s749_s1 + $0x38] sm:$0xff]   ;;  %v536_v1 = vld [vmem:[%s749_s1 + $0x30] sm:$0xff]   ;;  %v537_v2 = vld [vmem:[%s749_s1 + $0x28] sm:$0xff]  }
   0x2   :  { %487 = vmatprep.subr.bf16.mxu0 %v535_v0  ;;  %519 = vmatprep.subr.bf16.mxu1 %v535_v0  ;;  %v538_v3 = vld [vmem:[%s749_s1 + $0x20] sm:$0xff]   ;;  %v539_v6 = vld [vmem:[%s749_s1 + $0x18] sm:$0xff]   ;;  %v540_v7 = vld [vmem:[%s749_s1 + $0x10] sm:$0xff]  }
   0x3   :  { %488 = vmatpush3.bf16.msra.mxu0 %v535_v0  ;;  %527 = vmatpush3.bf16.msra.mxu1 %v535_v0  ;;  %v543_v4 = vld [vmem:[%s750_s0] sm:$0xff]   ;;  %v541_v8 = vld [vmem:[%s749_s1 + $0x8] sm:$0xff]   ;;  %v547_v12 = vld [vmem:[%s750_s0 + $0x10] sm:$0xff]  }
   0x4   :  { %489 = vmatprep.subr.bf16.mxu0 %v536_v1  ;;  %520 = vmatprep.subr.bf16.mxu1 %v536_v1  ;;  %v544_v5 = vld [vmem:[%s750_s0 + $0x20] sm:$0xff]   ;;  %v545_v10 = vld [vmem:[%s750_s0 + $0x8] sm:$0xff]   ;;  %v548_v13 = vld [vmem:[%s750_s0 + $0x30] sm:$0xff]  }
   0x5   :  { %503 = vmatprep.mubr.bf16.mxu0 %v543_v4  ;;  %511 = vmatprep.mubr.bf16.mxu1 %v544_v5  ;;  %v542_v9 = vld [vmem:[%s749_s1] sm:$0xff]   ;;  %v546_v11 = vld [vmem:[%s750_s0 + $0x28] sm:$0xff]   ;;  %v549_v14 = vld [vmem:[%s750_s0 + $0x18] sm:$0xff]  }
   0x6   :  { %v550_v15 = vld [vmem:[%s750_s0 + $0x38] sm:$0xff]   ;;  %v464_v16 = vld [vmem:[%s751_s3 + $0x8] sm:$0xff]   ;;  %v633_v18 = vld [vmem:[%s752_s2] ss:$0 sm:$0xff] }
   0x7   :  { %490 = vmatpush3.bf16.msra.mxu0 %v536_v1  ;;  %528 = vmatpush3.bf16.msra.mxu1 %v536_v1  ;;  %v468_v17 = vld [vmem:[%s751_s3 + $0x28] sm:$0xff]   ;;  %v433_v19 = vld [vmem:[%s751_s3] sm:$0xff]   ;;  %v438_v21 = vunpack.c.l.bf16 %v464_v16  ;;  %v648_v35 = vld [vmem:[%s751_s3 + $0x18] sm:$0xff]   ;;  %v439_v38 = vunpack.c.h.bf16 %v464_v16 }
   0x8   :  { %491 = vmatprep.subr.bf16.mxu0 %v537_v2  ;;  %521 = vmatprep.subr.bf16.mxu1 %v537_v2  ;;  %v467_v20 = vld [vmem:[%s751_s3 + $0x20] sm:$0xff]   ;;  %v454_v22 = vunpack.c.l.bf16 %v468_v17  ;;  %v434_v27 = vunpack.c.l.bf16 %v433_v19  ;;  %v653_v36 = vld [vmem:[%s751_s3 + $0x38] sm:$0xff]   ;;  %v455_v40 = vunpack.c.h.bf16 %v468_v17  ;;  %v435_v41 = vunpack.c.h.bf16 %v433_v19  ;;  %v658_v47 = vld [vmem:[%s751_s3 + $0x10] sm:$0xff]  }
   0x9   :  { %v450_v28 = vunpack.c.l.bf16 %v467_v20  ;;  %v451_v42 = vunpack.c.h.bf16 %v467_v20  ;;  %v663_v48 = vld [vmem:[%s751_s3 + $0x30] sm:$0xff]   ;;  %v446_v53 = vunpack.c.l.bf16 %v648_v35  ;;  %v462_v54 = vunpack.c.l.bf16 %v653_v36 }
   0xa   :  { %v442_v63 = vunpack.c.l.bf16 %v658_v47  ;;  %v458_v0 = vunpack.c.l.bf16 %v663_v48  ;;  %v443_v20 = vunpack.c.h.bf16 %v658_v47 }
   0xb   :  { %492 = vmatpush3.bf16.msra.mxu0 %v537_v2  ;;  %529 = vmatpush3.bf16.msra.mxu1 %v537_v2 }
   0xc   :  { %493 = vmatprep.subr.bf16.mxu0 %v538_v3  ;;  %522 = vmatprep.subr.bf16.mxu1 %v538_v3 }
   0xf   :  { %494 = vmatpush3.bf16.msra.mxu0 %v538_v3  ;;  %530 = vmatpush3.bf16.msra.mxu1 %v538_v3 }
  0x10   :  { %495 = vmatprep.subr.bf16.mxu0 %v539_v6  ;;  %523 = vmatprep.subr.bf16.mxu1 %v539_v6 }
  0x13   :  { %496 = vmatpush3.bf16.msra.mxu0 %v539_v6  ;;  %531 = vmatpush3.bf16.msra.mxu1 %v539_v6 }
  0x14   :  { %497 = vmatprep.subr.bf16.mxu0 %v540_v7  ;;  %524 = vmatprep.subr.bf16.mxu1 %v540_v7 }
  0x17   :  { %498 = vmatpush3.bf16.msra.mxu0 %v540_v7  ;;  %532 = vmatpush3.bf16.msra.mxu1 %v540_v7 }
  0x18   :  { %499 = vmatprep.subr.bf16.mxu0 %v541_v8  ;;  %525 = vmatprep.subr.bf16.mxu1 %v541_v8 }
  0x1b   :  { %500 = vmatpush3.bf16.msra.mxu0 %v541_v8  ;;  %533 = vmatpush3.bf16.msra.mxu1 %v541_v8 }
  0x1c   :  { %501 = vmatprep.subr.bf16.mxu0 %v542_v9  ;;  %526 = vmatprep.subr.bf16.mxu1 %v542_v9 }
  0x1f   :  { %502 = vmatpush3.bf16.msra.mxu0 %v542_v9  ;;  %534 = vmatpush3.bf16.msra.mxu1 %v542_v9  ;;  %v447_v9 = vunpack.c.h.bf16 %v648_v35 }
  0x22   :  { %504 = vmatmul.mubr.bf16.vlgmr.msra.gmra.mxu0 %v545_v10  ;;  %512 = vmatmul.mubr.bf16.vlgmr.msra.gmra.mxu1 %v546_v11  ;;  %v463_v10 = vunpack.c.h.bf16 %v653_v36 }
  0x23   :  { %507 = vmatprep.mubr.bf16.mxu0 %v547_v12  ;;  %515 = vmatprep.mubr.bf16.mxu1 %v548_v13 }
  0x2a   :  { %508 = vmatmul.mubr.bf16.gmra.mxu0 %v549_v14  ;;  %516 = vmatmul.mubr.bf16.gmra.mxu1 %v550_v15 }
  0xe2   :  { %v505_v23 = vpop.f32.mrf.mxu0  ;;  %v513_v24 = vpop.f32.mrf.mxu1 }
  0xe3   :  { %v196_v25 = vadd.f32 %v505_v23, %v633_v18  ;;  %v228_v26 = vadd.f32 %v513_v24, %v633_v18 }
  0xe4   :  { %v187_v29 = vpop.f32.mrf.mxu0  ;;  %v219_v30 = vpop.f32.mrf.mxu1 }
  0xe5   :  { %v284_v31 = vadd.f32 %v438_v21, %v196_v25  ;;  %v292_v32 = vadd.f32 %v454_v22, %v228_v26  ;;  %v188_v33 = vadd.f32 %v633_v18, %v187_v29  ;;  %v220_v34 = vadd.f32 %v633_v18, %v219_v30 }
  0xe6   :  { %v506_v37 = vpop.f32.mrf.mxu0  ;;  %v514_v39 = vpop.f32.mrf.mxu1  ;;  %v459_v21 = vunpack.c.h.bf16 %v663_v48 }
  0xe7   :  { %v418_v43 = vpack.c.bf16 %v284_v31, %v284_v31  ;;  %v426_v44 = vpack.c.bf16 %v292_v32, %v292_v32  ;;  %v282_v45 = vadd.f32 %v434_v27, %v188_v33  ;;  %v290_v46 = vadd.f32 %v450_v28, %v220_v34 }
  0xe8   :  { %v199_v49 = vadd.f32 %v506_v37, %v633_v18  ;;  %v231_v50 = vadd.f32 %v514_v39, %v633_v18  ;;  %v190_v51 = vpop.f32.mrf.mxu0  ;;  %v222_v52 = vpop.f32.mrf.mxu1 }
  0xe9   :  { %365 = vst.msk [vmem:[%s753_s4 + $0x8] sm:$0xf] %vm362_vm0, %v418_v43  ;;  %373 = vst.msk [vmem:[%s753_s4 + $0x28] sm:$0xf] %vm362_vm0, %v426_v44  ;;  %v416_v55 = vpack.c.bf16 %v282_v45, %v282_v45  ;;  %v424_v56 = vpack.c.bf16 %v290_v46, %v290_v46  ;;  %v191_v57 = vadd.f32 %v633_v18, %v190_v51 }
  0xea   :  { %v223_v58 = vadd.f32 %v633_v18, %v222_v52  ;;  %v285_v59 = vadd.f32 %v439_v38, %v199_v49  ;;  %v293_v60 = vadd.f32 %v455_v40, %v231_v50  ;;  %v509_v61 = vpop.f32.mrf.mxu0  ;;  %v517_v62 = vpop.f32.mrf.mxu1 }
  0xeb   :  { %363 = vst.msk [vmem:[%s753_s4] sm:$0xf] %vm362_vm0, %v416_v55  ;;  %371 = vst.msk [vmem:[%s753_s4 + $0x20] sm:$0xf] %vm362_vm0, %v424_v56  ;;  %v283_v1 = vadd.f32 %v435_v41, %v191_v57  ;;  %v212_v3 = vadd.f32 %v509_v61, %v633_v18  ;;  %v244_v4 = vadd.f32 %v517_v62, %v633_v18 }
  0xec   :  { %v291_v2 = vadd.f32 %v451_v42, %v223_v58  ;;  %v419_v5 = vpack.c.bf16 %v285_v59, %v285_v59  ;;  %v427_v6 = vpack.c.bf16 %v293_v60, %v293_v60  ;;  %v203_v7 = vpop.f32.mrf.mxu0  ;;  %v235_v8 = vpop.f32.mrf.mxu1 }
  0xed   :  { %v417_v11 = vpack.c.bf16 %v283_v1, %v283_v1  ;;  %v288_v13 = vadd.f32 %v446_v53, %v212_v3  ;;  %v296_v14 = vadd.f32 %v462_v54, %v244_v4  ;;  %v204_v15 = vadd.f32 %v633_v18, %v203_v7 }
  0xee   :  { %v425_v12 = vpack.c.bf16 %v291_v2, %v291_v2  ;;  %366 = vst.msk [vmem:[%s753_s4 + $0xc] sm:$0xf] %vm362_vm0, %v419_v5  ;;  %374 = vst.msk [vmem:[%s753_s4 + $0x2c] sm:$0xf] %vm362_vm0, %v427_v6  ;;  %v236_v16 = vadd.f32 %v633_v18, %v235_v8  ;;  %v510_v17 = vpop.f32.mrf.mxu0  ;;  %v518_v19 = vpop.f32.mrf.mxu1 }
  0xef   :  { %364 = vst.msk [vmem:[%s753_s4 + $0x4] sm:$0xf] %vm362_vm0, %v417_v11  ;;  %v422_v22 = vpack.c.bf16 %v288_v13, %v288_v13  ;;  %v430_v23 = vpack.c.bf16 %v296_v14, %v296_v14  ;;  %v215_v24 = vadd.f32 %v510_v17, %v633_v18  ;;  %v247_v25 = vadd.f32 %v518_v19, %v633_v18 }
  0xf0   :  { %372 = vst.msk [vmem:[%s753_s4 + $0x24] sm:$0xf] %vm362_vm0, %v425_v12  ;;  %v286_v26 = vadd.f32 %v442_v63, %v204_v15  ;;  %v294_v27 = vadd.f32 %v458_v0, %v236_v16  ;;  %v206_v28 = vpop.f32.mrf.mxu0  ;;  %v238_v29 = vpop.f32.mrf.mxu1 }
  0xf1   :  { %369 = vst.msk [vmem:[%s753_s4 + $0x18] sm:$0xf] %vm362_vm0, %v422_v22  ;;  %377 = vst.msk [vmem:[%s753_s4 + $0x38] sm:$0xf] %vm362_vm0, %v430_v23  ;;  %v289_v30 = vadd.f32 %v447_v9, %v215_v24  ;;  %v297_v31 = vadd.f32 %v463_v10, %v247_v25  ;;  %v207_v32 = vadd.f32 %v633_v18, %v206_v28 }
  0xf2   :  { %v239_v33 = vadd.f32 %v633_v18, %v238_v29  ;;  %v420_v34 = vpack.c.bf16 %v286_v26, %v286_v26  ;;  %v428_v35 = vpack.c.bf16 %v294_v27, %v294_v27 }
  0xf3   :  { %v423_v36 = vpack.c.bf16 %v289_v30, %v289_v30  ;;  %v431_v37 = vpack.c.bf16 %v297_v31, %v297_v31  ;;  %v287_v38 = vadd.f32 %v443_v20, %v207_v32 }
  0xf4   :  { %v295_v39 = vadd.f32 %v459_v21, %v239_v33  ;;  %367 = vst.msk [vmem:[%s753_s4 + $0x10] sm:$0xf] %vm362_vm0, %v420_v34  ;;  %375 = vst.msk [vmem:[%s753_s4 + $0x30] sm:$0xf] %vm362_vm0, %v428_v35 }
  0xf5   :  { %370 = vst.msk [vmem:[%s753_s4 + $0x1c] sm:$0xf] %vm362_vm0, %v423_v36  ;;  %378 = vst.msk [vmem:[%s753_s4 + $0x3c] sm:$0xf] %vm362_vm0, %v431_v37  ;;  %v421_v18 = vpack.c.bf16 %v287_v38, %v287_v38 }
  0xf6   :  { %v429_v40 = vpack.c.bf16 %v295_v39, %v295_v39 }
  0xf7   :  { %368 = vst.msk [vmem:[%s753_s4 + $0x14] sm:$0xf] %vm362_vm0, %v421_v18 }
  0xf8   :  { %376 = vst.msk [vmem:[%s753_s4 + $0x34] sm:$0xf] %vm362_vm0, %v429_v40 }

// kernel: swin_forward.22
= control target key start
LH: loop header
LB: loop body
LE: loop exit
PB: predicated region body
PF: predicated region fallthrough
CT: control target
= control target key end

     0   :  { %vm53_vm0 = vcmask 261120   ;;  %s1387_s0 = inlined_call_operand.vmem [shape: bf16[128,32], index: 0, kind: input, shape index: {}]   ;;  %s1388_s3 = inlined_call_operand.vmem [shape: bf16[32,128], index: 3, kind: input, shape index: {}]   ;;  %s1389_s1 = inlined_call_operand.vmem [shape: f32[1,32], index: 1, kind: input, shape index: {}]   ;;  %s1390_s2 = inlined_call_operand.vmem [shape: f32[1,32], index: 2, kind: input, shape index: {}]   ;;  %s1391_s4 = inlined_call_operand.vmem [shape: f32[1,128], index: 4, kind: input, shape index: {}]   ;;  %s1392_s5 = inlined_call_operand.vmem [shape: bf16[128,128], index: 5, kind: output, shape index: {}]  }
   0x1   :  { %v953_v0 = vld [vmem:[%s1387_s0] sm:$0xff]   ;;  %v967_v6 = vld [vmem:[%s1387_s0 + $0x8] sm:$0xff]   ;;  %v995_v18 = vld [vmem:[%s1387_s0 + $0x10] sm:$0xff]  }
   0x2   :  { %v958_v1 = vld [vmem:[%s1387_s0 + $0x20] sm:$0xff]   ;;  %v736_v2 = vunpack.c.l.bf16 %v953_v0  ;;  %v737_v4 = vunpack.c.h.bf16 %v953_v0  ;;  %v740_v11 = vunpack.c.l.bf16 %v967_v6  ;;  %v741_v12 = vunpack.c.h.bf16 %v967_v6  ;;  %v982_v13 = vld [vmem:[%s1387_s0 + $0x28] sm:$0xff]   ;;  %v1008_v23 = vld [vmem:[%s1387_s0 + $0x30] sm:$0xff]  }
   0x3   :  { %v752_v3 = vunpack.c.l.bf16 %v958_v1  ;;  %v753_v5 = vunpack.c.h.bf16 %v958_v1  ;;  %v756_v16 = vunpack.c.l.bf16 %v982_v13  ;;  %v757_v17 = vunpack.c.h.bf16 %v982_v13  ;;  %v1021_v28 = vld [vmem:[%s1387_s0 + $0x18] sm:$0xff]  }
   0x4   :  { %v54_v7 = vsel %vm53_vm0, %v736_v2, 0.0  ;;  %v57_v9 = vsel %vm53_vm0, %v737_v4, 0.0  ;;  %v60_v14 = vsel %vm53_vm0, %v740_v11, 0.0  ;;  %v63_v15 = vsel %vm53_vm0, %v741_v12, 0.0  ;;  %v1034_v33 = vld [vmem:[%s1387_s0 + $0x38] sm:$0xff]  }
   0x5   :  { %v78_v8 = vsel %vm53_vm0, %v752_v3, 0.0  ;;  %55 = vadd.xlane.f32.xlu0 %v54_v7  ;;  %v81_v10 = vsel %vm53_vm0, %v753_v5, 0.0  ;;  %v84_v19 = vsel %vm53_vm0, %v756_v16, 0.0  ;;  %v87_v20 = vsel %vm53_vm0, %v757_v17, 0.0 }
   0x6   :  { %79 = vadd.xlane.f32.xlu1 %v78_v8  ;;  %v744_v21 = vunpack.c.l.bf16 %v995_v18  ;;  %v745_v22 = vunpack.c.h.bf16 %v995_v18  ;;  %v760_v26 = vunpack.c.l.bf16 %v1008_v23  ;;  %v761_v27 = vunpack.c.h.bf16 %v1008_v23 }
   0x7   :  { %v748_v31 = vunpack.c.l.bf16 %v1021_v28  ;;  %v749_v32 = vunpack.c.h.bf16 %v1021_v28  ;;  %v764_v36 = vunpack.c.l.bf16 %v1034_v33  ;;  %v765_v37 = vunpack.c.h.bf16 %v1034_v33 }
   0x8   :  { %v66_v24 = vsel %vm53_vm0, %v744_v21, 0.0  ;;  %v69_v25 = vsel %vm53_vm0, %v745_v22, 0.0  ;;  %v90_v29 = vsel %vm53_vm0, %v760_v26, 0.0  ;;  %v93_v30 = vsel %vm53_vm0, %v761_v27, 0.0 }
   0x9   :  { %58 = vadd.xlane.f32.xlu0 %v57_v9  ;;  %v72_v34 = vsel %vm53_vm0, %v748_v31, 0.0  ;;  %v75_v35 = vsel %vm53_vm0, %v749_v32, 0.0  ;;  %v96_v38 = vsel %vm53_vm0, %v764_v36, 0.0  ;;  %v99_v39 = vsel %vm53_vm0, %v765_v37, 0.0 }
   0xa   :  { %82 = vadd.xlane.f32.xlu1 %v81_v10 }
   0xd   :  { %61 = vadd.xlane.f32.xlu0 %v60_v14 }
   0xe   :  { %64 = vadd.xlane.f32.xlu1 %v63_v15 }
  0x11   :  { %85 = vadd.xlane.f32.xlu0 %v84_v19 }
  0x12   :  { %88 = vadd.xlane.f32.xlu1 %v87_v20 }
  0x15   :  { %67 = vadd.xlane.f32.xlu0 %v66_v24 }
  0x16   :  { %70 = vadd.xlane.f32.xlu1 %v69_v25 }
  0x19   :  { %91 = vadd.xlane.f32.xlu0 %v90_v29 }
  0x1a   :  { %94 = vadd.xlane.f32.xlu1 %v93_v30 }
  0x1d   :  { %73 = vadd.xlane.f32.xlu0 %v72_v34 }
  0x1e   :  { %76 = vadd.xlane.f32.xlu1 %v75_v35 }
  0x21   :  { %97 = vadd.xlane.f32.xlu0 %v96_v38 }
  0x22   :  { %100 = vadd.xlane.f32.xlu1 %v99_v39 }
  0x8e   :  { %v56_v40 = vpop.xlane.xlu0 %55 }
  0x8f   :  { %v80_v41 = vpop.xlane.xlu1 %79  ;;  %v103_v42 = vmul.f32 0.03125, %v56_v40 }
  0x90   :  { %v111_v43 = vmul.f32 0.03125, %v80_v41 }
  0x91   :  { %v1050_v44 = vsub.f32 %v736_v2, %v103_v42 }
  0x92   :  { %v1052_v45 = vsub.f32 %v752_v3, %v111_v43  ;;  %v59_v46 = vpop.xlane.xlu0 %58 }
  0x93   :  { %v83_v47 = vpop.xlane.xlu1 %82  ;;  %v104_v48 = vmul.f32 0.03125, %v59_v46  ;;  %v135_v50 = vmul.f32 %v1050_v44, %v1050_v44 }
  0x94   :  { %v112_v49 = vmul.f32 0.03125, %v83_v47  ;;  %v143_v51 = vmul.f32 %v1052_v45, %v1052_v45 }
  0x95   :  { %v1060_v52 = vsub.f32 %v737_v4, %v104_v48  ;;  %v151_v54 = vsel %vm53_vm0, %v135_v50, 0.0 }
  0x96   :  { %v1064_v53 = vsub.f32 %v753_v5, %v112_v49  ;;  %152 = vadd.xlane.f32.xlu0 %v151_v54  ;;  %v62_v55 = vpop.xlane.xlu0 %61  ;;  %v175_v57 = vsel %vm53_vm0, %v143_v51, 0.0 }
  0x97   :  { %v65_v56 = vpop.xlane.xlu1 %64  ;;  %v105_v58 = vmul.f32 0.03125, %v62_v55  ;;  %v136_v60 = vmul.f32 %v1060_v52, %v1060_v52 }
  0x98   :  { %v106_v59 = vmul.f32 0.03125, %v65_v56  ;;  %v144_v61 = vmul.f32 %v1064_v53, %v1064_v53 }
  0x99   :  { %v1074_v62 = vsub.f32 %v740_v11, %v105_v58  ;;  %v154_v0 = vsel %vm53_vm0, %v136_v60, 0.0 }
  0x9a   :  { %v1078_v63 = vsub.f32 %v741_v12, %v106_v59  ;;  %176 = vadd.xlane.f32.xlu0 %v175_v57  ;;  %155 = vadd.xlane.f32.xlu1 %v154_v0  ;;  %v86_v1 = vpop.xlane.xlu0 %85  ;;  %v178_v3 = vsel %vm53_vm0, %v144_v61, 0.0 }
  0x9b   :  { %v89_v2 = vpop.xlane.xlu1 %88  ;;  %v113_v4 = vmul.f32 0.03125, %v86_v1  ;;  %v137_v7 = vmul.f32 %v1074_v62, %v1074_v62 }
  0x9c   :  { %v114_v5 = vmul.f32 0.03125, %v89_v2  ;;  %v138_v8 = vmul.f32 %v1078_v63, %v1078_v63 }
  0x9d   :  { %v1088_v6 = vsub.f32 %v756_v16, %v113_v4  ;;  %v157_v10 = vsel %vm53_vm0, %v137_v7, 0.0 }
  0x9e   :  { %v1092_v9 = vsub.f32 %v757_v17, %v114_v5  ;;  %179 = vadd.xlane.f32.xlu1 %v178_v3  ;;  %158 = vadd.xlane.f32.xlu0 %v157_v10  ;;  %v68_v11 = vpop.xlane.xlu0 %67  ;;  %v160_v14 = vsel %vm53_vm0, %v138_v8, 0.0 }
  0x9f   :  { %v71_v12 = vpop.xlane.xlu1 %70  ;;  %v107_v15 = vmul.f32 0.03125, %v68_v11  ;;  %v145_v20 = vmul.f32 %v1088_v6, %v1088_v6 }
  0xa0   :  { %v108_v19 = vmul.f32 0.03125, %v71_v12  ;;  %v146_v16 = vmul.f32 %v1092_v9, %v1092_v9 }
  0xa1   :  { %v1102_v13 = vsub.f32 %v744_v21, %v107_v15  ;;  %v181_v24 = vsel %vm53_vm0, %v145_v20, 0.0 }
  0xa2   :  { %v1106_v17 = vsub.f32 %v745_v22, %v108_v19  ;;  %161 = vadd.xlane.f32.xlu1 %v160_v14  ;;  %182 = vadd.xlane.f32.xlu0 %v181_v24  ;;  %v92_v25 = vpop.xlane.xlu0 %91  ;;  %v184_v30 = vsel %vm53_vm0, %v146_v16, 0.0 }
  0xa3   :  { %v95_v29 = vpop.xlane.xlu1 %94  ;;  %v115_v34 = vmul.f32 0.03125, %v92_v25  ;;  %v139_v38 = vmul.f32 %v1102_v13, %v1102_v13 }
  0xa4   :  { %v116_v35 = vmul.f32 0.03125, %v95_v29  ;;  %v140_v21 = vmul.f32 %v1106_v17, %v1106_v17 }
  0xa5   :  { %v1116_v18 = vsub.f32 %v760_v26, %v115_v34  ;;  %v163_v39 = vsel %vm53_vm0, %v139_v38, 0.0 }
  0xa6   :  { %v1120_v22 = vsub.f32 %v761_v27, %v116_v35  ;;  %185 = vadd.xlane.f32.xlu1 %v184_v30  ;;  %164 = vadd.xlane.f32.xlu0 %v163_v39  ;;  %v74_v40 = vpop.xlane.xlu0 %73  ;;  %v166_v42 = vsel %vm53_vm0, %v140_v21, 0.0 }
  0xa7   :  { %v77_v41 = vpop.xlane.xlu1 %76  ;;  %v109_v43 = vmul.f32 0.03125, %v74_v40  ;;  %v147_v47 = vmul.f32 %v1116_v18, %v1116_v18 }
  0xa8   :  { %v110_v46 = vmul.f32 0.03125, %v77_v41  ;;  %v148_v26 = vmul.f32 %v1120_v22, %v1120_v22 }
  0xa9   :  { %v1130_v23 = vsub.f32 %v748_v31, %v109_v43  ;;  %v187_v48 = vsel %vm53_vm0, %v147_v47, 0.0 }
  0xaa   :  { %v1134_v27 = vsub.f32 %v749_v32, %v110_v46  ;;  %167 = vadd.xlane.f32.xlu1 %v166_v42  ;;  %188 = vadd.xlane.f32.xlu0 %v187_v48  ;;  %v98_v49 = vpop.xlane.xlu0 %97  ;;  %v190_v51 = vsel %vm53_vm0, %v148_v26, 0.0  ;;  %v1168_v46 = vld [vmem:[%s1389_s1] ss:$0 sm:$0xff] }
  0xab   :  { %v101_v50 = vpop.xlane.xlu1 %100  ;;  %v117_v54 = vmul.f32 0.03125, %v98_v49  ;;  %v141_v56 = vmul.f32 %v1130_v23, %v1130_v23 }
  0xac   :  { %v118_v55 = vmul.f32 0.03125, %v101_v50  ;;  %v142_v31 = vmul.f32 %v1134_v27, %v1134_v27 }
  0xad   :  { %v1144_v28 = vsub.f32 %v764_v36, %v117_v54  ;;  %v169_v57 = vsel %vm53_vm0, %v141_v56, 0.0  ;;  %v854_v36 = vld [vmem:[%s1388_s3 + $0x8] sm:$0xff]  }
  0xae   :  { %v1148_v32 = vsub.f32 %v765_v37, %v118_v55  ;;  %191 = vadd.xlane.f32.xlu1 %v190_v51  ;;  %170 = vadd.xlane.f32.xlu0 %v169_v57  ;;  %v172_v58 = vsel %vm53_vm0, %v142_v31, 0.0  ;;  %v855_v37 = vld [vmem:[%s1388_s3] sm:$0xff]  }
  0xaf   :  { %v149_v59 = vmul.f32 %v1144_v28, %v1144_v28  ;;  %830 = vmatprep.subr.bf16.mxu0 %v854_v36  ;;  %850 = vmatprep.subr.bf16.mxu1 %v854_v36 }
  0xb0   :  { %v150_v60 = vmul.f32 %v1148_v32, %v1148_v32  ;;  %831 = vmatpush3.bf16.msra.mxu0 %v854_v36  ;;  %852 = vmatpush3.bf16.msra.mxu1 %v854_v36 }
  0xb1   :  { %v193_v61 = vsel %vm53_vm0, %v149_v59, 0.0  ;;  %832 = vmatprep.subr.bf16.mxu0 %v855_v37  ;;  %851 = vmatprep.subr.bf16.mxu1 %v855_v37 }
  0xb2   :  { %173 = vadd.xlane.f32.xlu1 %v172_v58  ;;  %194 = vadd.xlane.f32.xlu0 %v193_v61  ;;  %v196_v33 = vsel %vm53_vm0, %v150_v60, 0.0 }
  0xb4   :  { %833 = vmatpush3.bf16.msra.mxu0 %v855_v37  ;;  %853 = vmatpush3.bf16.msra.mxu1 %v855_v37 }
  0xb6   :  { %197 = vadd.xlane.f32.xlu1 %v196_v33 }
 0x11f   :  { %v153_v0 = vpop.xlane.xlu0 %152 }
 0x120   :  { %v199_v1 = vmul.f32 0.03125, %v153_v0 }
 0x122   :  { %v215_v2 = vadd.f32 1e-05, %v199_v1 }
 0x123   :  { %v156_v3 = vpop.xlane.xlu1 %155  ;;  %v177_v4 = vpop.xlane.xlu0 %176 }
 0x124   :  { %856 = vrsqrt.f32 %v215_v2  ;;  %v200_v5 = vmul.f32 0.03125, %v156_v3  ;;  %v207_v7 = vmul.f32 0.03125, %v177_v4 }
 0x126   :  { %v216_v8 = vadd.f32 1e-05, %v200_v5  ;;  %v223_v10 = vadd.f32 1e-05, %v207_v7 }
 0x127   :  { %v180_v11 = vpop.xlane.xlu1 %179  ;;  %v159_v12 = vpop.xlane.xlu0 %158 }
 0x128   :  { %858 = vrsqrt.f32 %v216_v8  ;;  %v208_v14 = vmul.f32 0.03125, %v180_v11  ;;  %v201_v15 = vmul.f32 0.03125, %v159_v12 }
 0x129   :  { %860 = vrsqrt.f32 %v223_v10 }
 0x12a   :  { %v224_v19 = vadd.f32 1e-05, %v208_v14  ;;  %v217_v20 = vadd.f32 1e-05, %v201_v15 }
 0x12b   :  { %v162_v16 = vpop.xlane.xlu1 %161  ;;  %v183_v24 = vpop.xlane.xlu0 %182 }
 0x12c   :  { %862 = vrsqrt.f32 %v224_v19  ;;  %v202_v25 = vmul.f32 0.03125, %v162_v16  ;;  %v209_v29 = vmul.f32 0.03125, %v183_v24 }
 0x12d   :  { %864 = vrsqrt.f32 %v217_v20 }
 0x12e   :  { %v218_v30 = vadd.f32 1e-05, %v202_v25  ;;  %v225_v34 = vadd.f32 1e-05, %v209_v29 }
 0x12f   :  { %v186_v35 = vpop.xlane.xlu1 %185  ;;  %v165_v38 = vpop.xlane.xlu0 %164 }
 0x130   :  { %866 = vrsqrt.f32 %v218_v30  ;;  %v210_v21 = vmul.f32 0.03125, %v186_v35  ;;  %v203_v39 = vmul.f32 0.03125, %v165_v38 }
 0x131   :  { %v857_v40 = vpop.eup %856  ;;  %868 = vrsqrt.f32 %v225_v34 }
 0x132   :  { %v226_v41 = vadd.f32 1e-05, %v210_v21  ;;  %v219_v42 = vadd.f32 1e-05, %v203_v39  ;;  %v247_v43 = vmul.f32 %v857_v40, %v1050_v44  ;;  %v1175_v44 = vld [vmem:[%s1390_s2] ss:$0 sm:$0xff] }
 0x133   :  { %v168_v47 = vpop.xlane.xlu1 %167  ;;  %v189_v26 = vpop.xlane.xlu0 %188 }
 0x134   :  { %870 = vrsqrt.f32 %v226_v41  ;;  %v204_v48 = vmul.f32 0.03125, %v168_v47  ;;  %v211_v49 = vmul.f32 0.03125, %v189_v26  ;;  %v270_v51 = vmul.f32 %v1168_v46, %v247_v43 }
 0x135   :  { %v859_v50 = vpop.eup %858  ;;  %872 = vrsqrt.f32 %v219_v42 }
 0x136   :  { %v861_v54 = vpop.eup %860  ;;  %v220_v55 = vadd.f32 1e-05, %v204_v48  ;;  %v227_v56 = vadd.f32 1e-05, %v211_v49  ;;  %v248_v31 = vmul.f32 %v859_v50, %v1060_v52  ;;  %v293_v37 = vadd.f32 %v1175_v44, %v270_v51 }
 0x137   :  { %v192_v57 = vpop.xlane.xlu1 %191  ;;  %v171_v58 = vpop.xlane.xlu0 %170  ;;  %v255_v59 = vmul.f32 %v861_v54, %v1052_v45 }
 0x138   :  { %874 = vrsqrt.f32 %v220_v55  ;;  %v212_v60 = vmul.f32 0.03125, %v192_v57  ;;  %v205_v61 = vmul.f32 0.03125, %v171_v58  ;;  %v271_v33 = vmul.f32 %v1168_v46, %v248_v31 }
 0x139   :  { %v863_v36 = vpop.eup %862  ;;  %876 = vrsqrt.f32 %v227_v56  ;;  %v278_v45 = vmul.f32 %v1168_v46, %v255_v59 }
 0x13a   :  { %v865_v0 = vpop.eup %864  ;;  %v228_v52 = vadd.f32 1e-05, %v212_v60  ;;  %v221_v1 = vadd.f32 1e-05, %v205_v61  ;;  %v294_v2 = vadd.f32 %v1175_v44, %v271_v33  ;;  %v256_v3 = vmul.f32 %v863_v36, %v1064_v53 }
 0x13b   :  { %v174_v4 = vpop.xlane.xlu1 %173  ;;  %v195_v5 = vpop.xlane.xlu0 %194  ;;  %v249_v7 = vmul.f32 %v865_v0, %v1074_v62  ;;  %v301_v62 = vadd.f32 %v1175_v44, %v278_v45 }
 0x13c   :  { %878 = vrsqrt.f32 %v228_v52  ;;  %v206_v8 = vmul.f32 0.03125, %v174_v4  ;;  %v213_v10 = vmul.f32 0.03125, %v195_v5  ;;  %v309_v11 = vpack.c.bf16 %v294_v2, %v293_v37 }
 0x13d   :  { %v867_v12 = vpop.eup %866  ;;  %880 = vrsqrt.f32 %v221_v1  ;;  %v279_v14 = vmul.f32 %v1168_v46, %v256_v3  ;;  %v272_v15 = vmul.f32 %v1168_v46, %v249_v7 }
 0x13e   :  { %v869_v19 = vpop.eup %868  ;;  %v222_v20 = vadd.f32 1e-05, %v206_v8  ;;  %v229_v16 = vadd.f32 1e-05, %v213_v10  ;;  %834 = vmatprep.mubr.msk.bf16.mxu0 %vm53_vm0, %v309_v11  ;;  %v250_v53 = vmul.f32 %v867_v12, %v1078_v63  ;;  %v1233_v12 = vld [vmem:[%s1391_s4] ss:$0 sm:$0xff] }
 0x13f   :  { %v198_v24 = vpop.xlane.xlu1 %197  ;;  %v302_v25 = vadd.f32 %v1175_v44, %v279_v14  ;;  %v257_v29 = vmul.f32 %v869_v19, %v1088_v6  ;;  %v295_v21 = vadd.f32 %v1175_v44, %v272_v15 }
 0x140   :  { %882 = vrsqrt.f32 %v222_v20  ;;  %v214_v30 = vmul.f32 0.03125, %v198_v24  ;;  %v273_v34 = vmul.f32 %v1168_v46, %v250_v53 }
 0x141   :  { %v871_v35 = vpop.eup %870  ;;  %884 = vrsqrt.f32 %v229_v16  ;;  %v313_v38 = vpack.c.bf16 %v302_v25, %v301_v62  ;;  %v280_v42 = vmul.f32 %v1168_v46, %v257_v29 }
 0x142   :  { %v873_v39 = vpop.eup %872  ;;  %v230_v40 = vadd.f32 1e-05, %v214_v30  ;;  %v296_v63 = vadd.f32 %v1175_v44, %v273_v34  ;;  %v258_v41 = vmul.f32 %v871_v35, %v1092_v9 }
 0x143   :  { %842 = vmatprep.mubr.msk.bf16.mxu1 %vm53_vm0, %v313_v38  ;;  %v251_v6 = vmul.f32 %v873_v39, %v1102_v13  ;;  %v303_v49 = vadd.f32 %v1175_v44, %v280_v42 }
 0x144   :  { %886 = vrsqrt.f32 %v230_v40  ;;  %v310_v43 = vpack.c.bf16 %v296_v63, %v295_v21  ;;  %v281_v47 = vmul.f32 %v1168_v46, %v258_v41 }
 0x145   :  { %v875_v26 = vpop.eup %874  ;;  %v274_v51 = vmul.f32 %v1168_v46, %v251_v6 }
 0x146   :  { %v877_v48 = vpop.eup %876  ;;  %835 = vmatmul.mubr.msk.bf16.vlgmr.msra.gmra.mxu0 %vm53_vm0, %v310_v43  ;;  %v304_v50 = vadd.f32 %v1175_v44, %v281_v47  ;;  %v252_v9 = vmul.f32 %v875_v26, %v1106_v17 }
 0x147   :  { %v259_v54 = vmul.f32 %v877_v48, %v1116_v18  ;;  %v297_v57 = vadd.f32 %v1175_v44, %v274_v51 }
 0x148   :  { %v314_v55 = vpack.c.bf16 %v304_v50, %v303_v49  ;;  %v275_v13 = vmul.f32 %v1168_v46, %v252_v9 }
 0x149   :  { %v879_v56 = vpop.eup %878  ;;  %v282_v60 = vmul.f32 %v1168_v46, %v259_v54 }
 0x14a   :  { %v881_v31 = vpop.eup %880  ;;  %843 = vmatmul.mubr.msk.bf16.vlgmr.msra.gmra.mxu1 %vm53_vm0, %v314_v55  ;;  %v298_v58 = vadd.f32 %v1175_v44, %v275_v13  ;;  %v260_v59 = vmul.f32 %v879_v56, %v1120_v22 }
 0x14b   :  { %v253_v17 = vmul.f32 %v881_v31, %v1130_v23  ;;  %v305_v37 = vadd.f32 %v1175_v44, %v282_v60 }
 0x14c   :  { %v311_v61 = vpack.c.bf16 %v298_v58, %v297_v57  ;;  %v283_v18 = vmul.f32 %v1168_v46, %v260_v59 }
 0x14d   :  { %v883_v33 = vpop.eup %882  ;;  %v276_v1 = vmul.f32 %v1168_v46, %v253_v17 }
 0x14e   :  { %v885_v36 = vpop.eup %884  ;;  %838 = vmatprep.mubr.msk.bf16.mxu0 %vm53_vm0, %v311_v61  ;;  %v306_v0 = vadd.f32 %v1175_v44, %v283_v18  ;;  %v254_v52 = vmul.f32 %v883_v33, %v1134_v27 }
 0x14f   :  { %v261_v22 = vmul.f32 %v885_v36, %v1144_v28  ;;  %v299_v4 = vadd.f32 %v1175_v44, %v276_v1 }
 0x150   :  { %v315_v2 = vpack.c.bf16 %v306_v0, %v305_v37  ;;  %v277_v23 = vmul.f32 %v1168_v46, %v254_v52 }
 0x151   :  { %v887_v3 = vpop.eup %886  ;;  %v284_v7 = vmul.f32 %v1168_v46, %v261_v22 }
 0x152   :  { %846 = vmatprep.mubr.msk.bf16.mxu1 %vm53_vm0, %v315_v2  ;;  %v300_v5 = vadd.f32 %v1175_v44, %v277_v23  ;;  %v262_v45 = vmul.f32 %v887_v3, %v1148_v32 }
 0x153   :  { %v307_v28 = vadd.f32 %v1175_v44, %v284_v7 }
 0x154   :  { %v312_v8 = vpack.c.bf16 %v300_v5, %v299_v4  ;;  %v285_v27 = vmul.f32 %v1168_v46, %v262_v45 }
 0x156   :  { %839 = vmatmul.mubr.msk.bf16.gmra.mxu0 %vm53_vm0, %v312_v8  ;;  %v308_v10 = vadd.f32 %v1175_v44, %v285_v27 }
 0x158   :  { %v316_v11 = vpack.c.bf16 %v308_v10, %v307_v28 }
 0x15a   :  { %847 = vmatmul.mubr.msk.bf16.gmra.mxu1 %vm53_vm0, %v316_v11 }
 0x206   :  { %v836_v32 = vpop.f32.mrf.mxu0 }
 0x207   :  { %v1236_v14 = vadd.f32 %v836_v32, %v1233_v12 }
 0x208   :  { %v398_v15 = vpop.f32.mrf.mxu0 }
 0x209   :  { %v463_v46 = vmul.f32 %v1236_v14, %v1236_v14  ;;  %v1241_v19 = vadd.f32 %v1233_v12, %v398_v15 }
 0x20a   :  { %v837_v44 = vpop.f32.mrf.mxu0  ;;  %v844_v20 = vpop.f32.mrf.mxu1 }
 0x20b   :  { %v479_v16 = vmul.f32 %v463_v46, %v1236_v14  ;;  %v461_v53 = vmul.f32 %v1241_v19, %v1241_v19  ;;  %v1247_v24 = vadd.f32 %v837_v44, %v1233_v12  ;;  %v1250_v62 = vadd.f32 %v844_v20, %v1233_v12 }
 0x20c   :  { %v401_v25 = vpop.f32.mrf.mxu0  ;;  %v430_v29 = vpop.f32.mrf.mxu1 }
 0x20d   :  { %v495_v30 = vmul.f32 0.044715, %v479_v16  ;;  %v477_v34 = vmul.f32 %v461_v53, %v1241_v19  ;;  %v464_v35 = vmul.f32 %v1247_v24, %v1247_v24  ;;  %v471_v38 = vmul.f32 %v1250_v62, %v1250_v62 }
 0x20e   :  { %v1258_v21 = vadd.f32 %v1233_v12, %v401_v25  ;;  %v1261_v39 = vadd.f32 %v1233_v12, %v430_v29  ;;  %v845_v40 = vpop.f32.mrf.mxu1 }
 0x20f   :  { %v511_v63 = vadd.f32 %v495_v30, %v1236_v14  ;;  %v493_v41 = vmul.f32 0.044715, %v477_v34  ;;  %v480_v42 = vmul.f32 %v464_v35, %v1247_v24  ;;  %v487_v6 = vmul.f32 %v471_v38, %v1250_v62 }
 0x210   :  { %v462_v43 = vmul.f32 %v1258_v21, %v1258_v21  ;;  %v469_v47 = vmul.f32 %v1261_v39, %v1261_v39  ;;  %v1271_v26 = vadd.f32 %v845_v40, %v1233_v12  ;;  %v433_v48 = vpop.f32.mrf.mxu1 }
 0x211   :  { %v527_v49 = vmul.f32 0.7978846, %v511_v63  ;;  %v509_v50 = vadd.f32 %v493_v41, %v1241_v19  ;;  %v496_v9 = vmul.f32 0.044715, %v480_v42  ;;  %v503_v51 = vmul.f32 0.044715, %v487_v6 }
 0x212   :  { %v478_v54 = vmul.f32 %v462_v43, %v1258_v21  ;;  %v485_v55 = vmul.f32 %v469_v47, %v1261_v39  ;;  %v472_v13 = vmul.f32 %v1271_v26, %v1271_v26  ;;  %v1279_v56 = vadd.f32 %v1233_v12, %v433_v48 }
 0x213   :  { %888 = vtanh.f32 %v527_v49  ;;  %v525_v31 = vmul.f32 0.7978846, %v509_v50  ;;  %v512_v57 = vadd.f32 %v496_v9, %v1247_v24  ;;  %v519_v58 = vadd.f32 %v503_v51, %v1250_v62 }
 0x214   :  { %v494_v59 = vmul.f32 0.044715, %v478_v54  ;;  %v501_v60 = vmul.f32 0.044715, %v485_v55  ;;  %v488_v17 = vmul.f32 %v472_v13, %v1271_v26  ;;  %v470_v61 = vmul.f32 %v1279_v56, %v1279_v56 }
 0x215   :  { %890 = vtanh.f32 %v525_v31  ;;  %v528_v18 = vmul.f32 0.7978846, %v512_v57  ;;  %v535_v33 = vmul.f32 0.7978846, %v519_v58 }
 0x216   :  { %v510_v36 = vadd.f32 %v494_v59, %v1258_v21  ;;  %v517_v37 = vadd.f32 %v501_v60, %v1261_v39  ;;  %v504_v0 = vmul.f32 0.044715, %v488_v17  ;;  %v486_v52 = vmul.f32 %v470_v61, %v1279_v56  ;;  %v840_v1 = vpop.f32.mrf.mxu0 }
 0x217   :  { %892 = vtanh.f32 %v528_v18  ;;  %v1290_v22 = vadd.f32 %v840_v1, %v1233_v12 }
 0x218   :  { %894 = vtanh.f32 %v535_v33  ;;  %v526_v2 = vmul.f32 0.7978846, %v510_v36  ;;  %v533_v23 = vmul.f32 0.7978846, %v517_v37  ;;  %v520_v3 = vadd.f32 %v504_v0, %v1271_v26  ;;  %v414_v4 = vpop.f32.mrf.mxu0 }
 0x219   :  { %v502_v5 = vmul.f32 0.044715, %v486_v52  ;;  %v467_v45 = vmul.f32 %v1290_v22, %v1290_v22  ;;  %v1296_v7 = vadd.f32 %v1233_v12, %v414_v4 }
 0x21a   :  { %896 = vtanh.f32 %v526_v2  ;;  %v536_v8 = vmul.f32 0.7978846, %v520_v3  ;;  %v841_v27 = vpop.f32.mrf.mxu0  ;;  %v848_v28 = vpop.f32.mrf.mxu1 }
 0x21b   :  { %898 = vtanh.f32 %v533_v23  ;;  %v518_v10 = vadd.f32 %v502_v5, %v1279_v56  ;;  %v483_v11 = vmul.f32 %v467_v45, %v1290_v22  ;;  %v465_v32 = vmul.f32 %v1296_v7, %v1296_v7 }
 0x21c   :  { %900 = vtanh.f32 %v536_v8  ;;  %v1303_v15 = vadd.f32 %v841_v27, %v1233_v12  ;;  %v1306_v46 = vadd.f32 %v848_v28, %v1233_v12  ;;  %v417_v44 = vpop.f32.mrf.mxu0  ;;  %v446_v20 = vpop.f32.mrf.mxu1 }
 0x21d   :  { %v534_v16 = vmul.f32 0.7978846, %v518_v10  ;;  %v499_v53 = vmul.f32 0.044715, %v483_v11  ;;  %v481_v25 = vmul.f32 %v465_v32, %v1296_v7  ;;  %v1310_v29 = vadd.f32 %v1233_v12, %v417_v44 }
 0x21e   :  { %v468_v30 = vmul.f32 %v1303_v15, %v1303_v15  ;;  %v475_v34 = vmul.f32 %v1306_v46, %v1306_v46  ;;  %v1317_v35 = vadd.f32 %v1233_v12, %v446_v20  ;;  %v849_v38 = vpop.f32.mrf.mxu1 }
 0x21f   :  { %902 = vtanh.f32 %v534_v16  ;;  %v515_v40 = vadd.f32 %v499_v53, %v1290_v22  ;;  %v497_v63 = vmul.f32 0.044715, %v481_v25  ;;  %v466_v41 = vmul.f32 %v1310_v29, %v1310_v29 }
 0x220   :  { %v889_v42 = vpop.eup %888  ;;  %v484_v6 = vmul.f32 %v468_v30, %v1303_v15  ;;  %v491_v43 = vmul.f32 %v475_v34, %v1306_v46  ;;  %v473_v47 = vmul.f32 %v1317_v35, %v1317_v35  ;;  %v1327_v48 = vadd.f32 %v849_v38, %v1233_v12  ;;  %v449_v16 = vpop.f32.mrf.mxu1 }
 0x221   :  { %v559_v49 = vadd.f32 1.0, %v889_v42  ;;  %v531_v50 = vmul.f32 0.7978846, %v515_v40  ;;  %v513_v9 = vadd.f32 %v497_v63, %v1296_v7  ;;  %v482_v51 = vmul.f32 %v466_v41, %v1310_v29 }
 0x222   :  { %v891_v54 = vpop.eup %890  ;;  %v500_v55 = vmul.f32 0.044715, %v484_v6  ;;  %v507_v13 = vmul.f32 0.044715, %v491_v43  ;;  %v489_v31 = vmul.f32 %v473_v47, %v1317_v35  ;;  %v476_v58 = vmul.f32 %v1327_v48, %v1327_v48 }
 0x223   :  { %904 = vtanh.f32 %v531_v50  ;;  %v529_v57 = vmul.f32 0.7978846, %v513_v9  ;;  %v557_v60 = vadd.f32 1.0, %v891_v54  ;;  %v498_v18 = vmul.f32 0.044715, %v482_v51 }
 0x224   :  { %v893_v59 = vpop.eup %892  ;;  %v516_v17 = vadd.f32 %v500_v55, %v1303_v15  ;;  %v523_v61 = vadd.f32 %v507_v13, %v1306_v46  ;;  %v575_v36 = vmul.f32 0.5, %v559_v49  ;;  %v505_v0 = vmul.f32 0.044715, %v489_v31 }
 0x225   :  { %v895_v33 = vpop.eup %894  ;;  %v560_v37 = vadd.f32 1.0, %v893_v59  ;;  %906 = vtanh.f32 %v529_v57  ;;  %v514_v2 = vadd.f32 %v498_v18, %v1310_v29  ;;  %v492_v5 = vmul.f32 %v476_v58, %v1327_v48 }
 0x226   :  { %v567_v52 = vadd.f32 1.0, %v895_v33  ;;  %v532_v1 = vmul.f32 0.7978846, %v516_v17  ;;  %v539_v4 = vmul.f32 0.7978846, %v523_v61  ;;  %v573_v8 = vmul.f32 0.5, %v557_v60 }
 0x227   :  { %v897_v23 = vpop.eup %896  ;;  %v576_v3 = vmul.f32 0.5, %v560_v37  ;;  %v530_v28 = vmul.f32 0.7978846, %v514_v2  ;;  %v591_v11 = vmul.f32 %v575_v36, %v1236_v14  ;;  %v521_v20 = vadd.f32 %v505_v0, %v1317_v35 }
 0x228   :  { %v899_v45 = vpop.eup %898  ;;  %v558_v27 = vadd.f32 1.0, %v897_v23  ;;  %908 = vtanh.f32 %v532_v1  ;;  %v583_v53 = vmul.f32 0.5, %v567_v52  ;;  %v508_v38 = vmul.f32 0.044715, %v492_v5 }
 0x229   :  { %v901_v10 = vpop.eup %900  ;;  %v592_v32 = vmul.f32 %v576_v3, %v1247_v24  ;;  %v565_v44 = vadd.f32 1.0, %v899_v45  ;;  %910 = vtanh.f32 %v530_v28  ;;  %v589_v63 = vmul.f32 %v573_v8, %v1241_v19 }
 0x22a   :  { %v574_v25 = vmul.f32 0.5, %v558_v27  ;;  %v568_v30 = vadd.f32 1.0, %v901_v10  ;;  %912 = vtanh.f32 %v539_v4  ;;  %v1344_v14 = vadd.f32 %v1233_v12, %v449_v16 }
 0x22b   :  { %v774_v34 = vpack.c.bf16 %v592_v32, %v591_v11  ;;  %v581_v24 = vmul.f32 0.5, %v565_v44  ;;  %v537_v43 = vmul.f32 0.7978846, %v521_v20  ;;  %v524_v47 = vadd.f32 %v508_v38, %v1327_v48 }
 0x22c   :  { %v903_v40 = vpop.eup %902  ;;  %v590_v41 = vmul.f32 %v574_v25, %v1258_v21  ;;  %v584_v42 = vmul.f32 0.5, %v568_v30  ;;  %v599_v49 = vmul.f32 %v583_v53, %v1250_v62  ;;  %v474_v21 = vmul.f32 %v1344_v14, %v1344_v14 }
 0x22d   :  { %813 = vst [vmem:[%s1392_s5 + $0x8] sm:$0xff] %v774_v34   ;;  %v566_v6 = vadd.f32 1.0, %v903_v40  ;;  %v540_v12 = vmul.f32 0.7978846, %v524_v47  ;;  %v597_v13 = vmul.f32 %v581_v24, %v1261_v39 }
 0x22e   :  { %v769_v50 = vpack.c.bf16 %v590_v41, %v589_v63  ;;  %v600_v19 = vmul.f32 %v584_v42, %v1271_v26  ;;  %v490_v55 = vmul.f32 %v474_v21, %v1344_v14 }
 0x22f   :  { %v582_v9 = vmul.f32 0.5, %v566_v6  ;;  %914 = vtanh.f32 %v540_v12 }
 0x230   :  { %v905_v51 = vpop.eup %904  ;;  %770 = vst [vmem:[%s1392_s5] sm:$0xff] %v769_v50   ;;  %v794_v54 = vpack.c.bf16 %v600_v19, %v599_v49  ;;  %916 = vtanh.f32 %v537_v43  ;;  %v506_v57 = vmul.f32 0.044715, %v490_v55 }
 0x231   :  { %v598_v62 = vmul.f32 %v582_v9, %v1279_v56  ;;  %v563_v26 = vadd.f32 1.0, %v905_v51 }
 0x232   :  { %v907_v31 = vpop.eup %906  ;;  %817 = vst [vmem:[%s1392_s5 + $0x28] sm:$0xff] %v794_v54   ;;  %v522_v60 = vadd.f32 %v506_v57, %v1344_v14 }
 0x233   :  { %v789_v58 = vpack.c.bf16 %v598_v62, %v597_v13  ;;  %v561_v59 = vadd.f32 1.0, %v907_v31  ;;  %v579_v39 = vmul.f32 0.5, %v563_v26 }
 0x234   :  { %v538_v61 = vmul.f32 0.7978846, %v522_v60 }
 0x235   :  { %v909_v17 = vpop.eup %908  ;;  %816 = vst [vmem:[%s1392_s5 + $0x20] sm:$0xff] %v789_v58   ;;  %v577_v36 = vmul.f32 0.5, %v561_v59  ;;  %v595_v52 = vmul.f32 %v579_v39, %v1290_v22 }
 0x236   :  { %v564_v56 = vadd.f32 1.0, %v909_v17  ;;  %v911_v18 = vpop.eup %910  ;;  %918 = vtanh.f32 %v538_v61 }
 0x237   :  { %v913_v33 = vpop.eup %912  ;;  %v562_v0 = vadd.f32 1.0, %v911_v18  ;;  %v593_v3 = vmul.f32 %v577_v36, %v1296_v7 }
 0x238   :  { %v580_v37 = vmul.f32 0.5, %v564_v56  ;;  %v571_v23 = vadd.f32 1.0, %v913_v33 }
 0x239   :  { %v578_v2 = vmul.f32 0.5, %v562_v0 }
 0x23a   :  { %v596_v1 = vmul.f32 %v580_v37, %v1303_v15  ;;  %v587_v28 = vmul.f32 0.5, %v571_v23 }
 0x23b   :  { %v594_v5 = vmul.f32 %v578_v2, %v1310_v29 }
 0x23c   :  { %v784_v4 = vpack.c.bf16 %v596_v1, %v595_v52  ;;  %v915_v45 = vpop.eup %914  ;;  %v603_v7 = vmul.f32 %v587_v28, %v1306_v46 }
 0x23d   :  { %v779_v8 = vpack.c.bf16 %v594_v5, %v593_v3  ;;  %v917_v27 = vpop.eup %916  ;;  %v572_v10 = vadd.f32 1.0, %v915_v45 }
 0x23e   :  { %815 = vst [vmem:[%s1392_s5 + $0x18] sm:$0xff] %v784_v4   ;;  %v569_v15 = vadd.f32 1.0, %v917_v27 }
 0x23f   :  { %814 = vst [vmem:[%s1392_s5 + $0x10] sm:$0xff] %v779_v8   ;;  %v588_v22 = vmul.f32 0.5, %v572_v10 }
 0x240   :  { %v585_v44 = vmul.f32 0.5, %v569_v15 }
 0x241   :  { %v604_v11 = vmul.f32 %v588_v22, %v1327_v48 }
 0x242   :  { %v601_v53 = vmul.f32 %v585_v44, %v1317_v35 }
 0x243   :  { %v919_v29 = vpop.eup %918  ;;  %v804_v32 = vpack.c.bf16 %v604_v11, %v603_v7 }
 0x244   :  { %v570_v20 = vadd.f32 1.0, %v919_v29 }
 0x245   :  { %819 = vst [vmem:[%s1392_s5 + $0x38] sm:$0xff] %v804_v32  }
 0x246   :  { %v586_v16 = vmul.f32 0.5, %v570_v20 }
 0x248   :  { %v602_v25 = vmul.f32 %v586_v16, %v1344_v14 }
 0x24a   :  { %v799_v30 = vpack.c.bf16 %v602_v25, %v601_v53 }
 0x24c   :  { %818 = vst [vmem:[%s1392_s5 + $0x30] sm:$0xff] %v799_v30  }

// kernel: swin_forward.28
= control target key start
LH: loop header
LB: loop body
LE: loop exit
PB: predicated region body
PF: predicated region fallthrough
CT: control target
= control target key end

     0   :  { %vm234_vm0 = vcmask 519168   ;;  %s408_s0 = inlined_call_operand.vmem [shape: bf16[32,128], index: 0, kind: input, shape index: {}]   ;;  %s409_s3 = inlined_call_operand.vmem [shape: bf16[128,64], index: 3, kind: input, shape index: {}]   ;;  %s410_s1 = inlined_call_operand.vmem [shape: f32[1,128], index: 1, kind: input, shape index: {}]   ;;  %s411_s2 = inlined_call_operand.vmem [shape: f32[1,128], index: 2, kind: input, shape index: {}]   ;;  %s412_s4 = inlined_call_operand.vmem [shape: f32[1,64], index: 4, kind: input, shape index: {}]   ;;  %s413_s5 = inlined_call_operand.vmem [shape: bf16[32,64], index: 5, kind: output, shape index: {}]  }
   0x1   :  { %v263_v0 = vld [vmem:[%s408_s0] sm:$0xff]   ;;  %v270_v1 = vld [vmem:[%s408_s0 + $0x8] sm:$0xff]   ;;  %v301_v22 = vld [vmem:[%s409_s3 + $0x38] sm:$0xff]  }
   0x2   :  { %v264_v2 = vunpack.c.l.bf16 %v263_v0  ;;  %v268_v3 = vunpack.c.l.bf16 %v270_v1  ;;  %v265_v4 = vunpack.c.h.bf16 %v263_v0  ;;  %v269_v5 = vunpack.c.h.bf16 %v270_v1  ;;  %281 = vmatprep.subr.bf16.mxu0 %v301_v22  ;;  %v302_v23 = vld [vmem:[%s409_s3 + $0x30] sm:$0xff]   ;;  %v303_v24 = vld [vmem:[%s409_s3 + $0x28] sm:$0xff]   ;;  %v304_v25 = vld [vmem:[%s409_s3 + $0x20] sm:$0xff]  }
   0x3   :  { %282 = vmatpush3.bf16.msra.mxu0 %v301_v22  ;;  %v305_v26 = vld [vmem:[%s409_s3 + $0x18] sm:$0xff]   ;;  %v306_v27 = vld [vmem:[%s409_s3 + $0x10] sm:$0xff]   ;;  %v307_v28 = vld [vmem:[%s409_s3 + $0x8] sm:$0xff]  }
   0x4   :  { %29 = vadd.xlane.f32.xlu0 %v264_v2  ;;  %33 = vadd.xlane.f32.xlu1 %v268_v3  ;;  %v308_v29 = vld [vmem:[%s409_s3] sm:$0xff]  }
   0x5   :  { %283 = vmatprep.subr.bf16.mxu0 %v302_v23  ;;  %v243_v44 = vld [vmem:[%s410_s1] ss:$0 sm:$0xff] }
   0x6   :  { %v244_v49 = vld [vmem:[%s411_s2] ss:$0 sm:$0xff] }
   0x7   :  { %284 = vmatpush3.bf16.msra.mxu0 %v302_v23  ;;  %v245_v62 = vld [vmem:[%s412_s4] ss:$0 sm:$0xff] }
   0x8   :  { %31 = vadd.xlane.f32.xlu0 %v265_v4  ;;  %35 = vadd.xlane.f32.xlu1 %v269_v5 }
   0x9   :  { %285 = vmatprep.subr.bf16.mxu0 %v303_v24 }
   0xb   :  { %286 = vmatpush3.bf16.msra.mxu0 %v303_v24 }
   0xc   :  { %287 = vmatprep.subr.bf16.mxu0 %v304_v25 }
   0xf   :  { %288 = vmatpush3.bf16.msra.mxu0 %v304_v25 }
  0x10   :  { %289 = vmatprep.subr.bf16.mxu0 %v305_v26 }
  0x13   :  { %290 = vmatpush3.bf16.msra.mxu0 %v305_v26 }
  0x14   :  { %291 = vmatprep.subr.bf16.mxu0 %v306_v27 }
  0x17   :  { %292 = vmatpush3.bf16.msra.mxu0 %v306_v27 }
  0x18   :  { %293 = vmatprep.subr.bf16.mxu0 %v307_v28 }
  0x1b   :  { %294 = vmatpush3.bf16.msra.mxu0 %v307_v28 }
  0x1c   :  { %295 = vmatprep.subr.bf16.mxu0 %v308_v29 }
  0x1f   :  { %296 = vmatpush3.bf16.msra.mxu0 %v308_v29 }
  0x8d   :  { %v30_v6 = vpop.xlane.xlu0 %29  ;;  %v34_v7 = vpop.xlane.xlu1 %33 }
  0x8e   :  { %v38_v8 = vmul.f32 0.0078125, %v30_v6  ;;  %v40_v9 = vmul.f32 0.0078125, %v34_v7 }
  0x90   :  { %v42_v10 = vsub.f32 %v264_v2, %v38_v8  ;;  %v353_v11 = vsub.f32 %v268_v3, %v40_v9 }
  0x91   :  { %v32_v12 = vpop.xlane.xlu0 %31  ;;  %v36_v13 = vpop.xlane.xlu1 %35 }
  0x92   :  { %v39_v14 = vmul.f32 0.0078125, %v32_v12  ;;  %v46_v15 = vmul.f32 %v42_v10, %v42_v10  ;;  %v41_v16 = vmul.f32 0.0078125, %v36_v13  ;;  %v48_v19 = vmul.f32 %v353_v11, %v353_v11 }
  0x94   :  { %v43_v17 = vsub.f32 %v265_v4, %v39_v14  ;;  %50 = vadd.xlane.f32.xlu0 %v46_v15  ;;  %v355_v18 = vsub.f32 %v269_v5, %v41_v16 }
  0x96   :  { %v47_v20 = vmul.f32 %v43_v17, %v43_v17  ;;  %v49_v21 = vmul.f32 %v355_v18, %v355_v18 }
  0x98   :  { %54 = vadd.xlane.f32.xlu0 %v48_v19  ;;  %52 = vadd.xlane.f32.xlu1 %v47_v20 }
  0x9c   :  { %56 = vadd.xlane.f32.xlu1 %v49_v21 }
 0x11d   :  { %v51_v30 = vpop.xlane.xlu0 %50 }
 0x11e   :  { %v58_v31 = vmul.f32 0.0078125, %v51_v30 }
 0x120   :  { %v62_v32 = vadd.f32 1e-05, %v58_v31 }
 0x121   :  { %v53_v33 = vpop.xlane.xlu1 %52  ;;  %v55_v34 = vpop.xlane.xlu0 %54 }
 0x122   :  { %309 = vrsqrt.f32 %v62_v32  ;;  %v59_v35 = vmul.f32 0.0078125, %v53_v33  ;;  %v60_v36 = vmul.f32 0.0078125, %v55_v34 }
 0x124   :  { %v63_v37 = vadd.f32 1e-05, %v59_v35  ;;  %v64_v38 = vadd.f32 1e-05, %v60_v36 }
 0x125   :  { %v57_v39 = vpop.xlane.xlu1 %56 }
 0x126   :  { %311 = vrsqrt.f32 %v63_v37  ;;  %v61_v40 = vmul.f32 0.0078125, %v57_v39 }
 0x127   :  { %313 = vrsqrt.f32 %v64_v38 }
 0x128   :  { %v65_v41 = vadd.f32 1e-05, %v61_v40 }
 0x12a   :  { %315 = vrsqrt.f32 %v65_v41 }
 0x12f   :  { %v310_v42 = vpop.eup %309 }
 0x130   :  { %v70_v43 = vmul.f32 %v310_v42, %v42_v10 }
 0x132   :  { %v81_v48 = vmul.f32 %v243_v44, %v70_v43 }
 0x133   :  { %v312_v45 = vpop.eup %311 }
 0x134   :  { %v314_v46 = vpop.eup %313  ;;  %v71_v47 = vmul.f32 %v312_v45, %v43_v17  ;;  %v92_v53 = vadd.f32 %v244_v49, %v81_v48 }
 0x135   :  { %v72_v50 = vmul.f32 %v314_v46, %v353_v11 }
 0x136   :  { %v82_v51 = vmul.f32 %v243_v44, %v71_v47 }
 0x137   :  { %v316_v52 = vpop.eup %315  ;;  %v83_v56 = vmul.f32 %v243_v44, %v72_v50 }
 0x138   :  { %v93_v54 = vadd.f32 %v244_v49, %v82_v51  ;;  %v73_v55 = vmul.f32 %v316_v52, %v355_v18 }
 0x139   :  { %v94_v59 = vadd.f32 %v244_v49, %v83_v56 }
 0x13a   :  { %v96_v57 = vpack.c.bf16 %v93_v54, %v92_v53  ;;  %v84_v58 = vmul.f32 %v243_v44, %v73_v55 }
 0x13c   :  { %297 = vmatprep.mubr.bf16.mxu0 %v96_v57  ;;  %v95_v60 = vadd.f32 %v244_v49, %v84_v58 }
 0x13e   :  { %v97_v61 = vpack.c.bf16 %v95_v60, %v94_v59 }
 0x140   :  { %298 = vmatmul.mubr.bf16.vlgmr.msra.gmra.mxu0 %v97_v61 }
 0x200   :  { %v299_v63 = vpop.f32.mrf.mxu0 }
 0x201   :  { %v212_v0 = vadd.f32 %v299_v63, %v245_v62 }
 0x202   :  { %v203_v1 = vpop.f32.mrf.mxu0 }
 0x203   :  { %v260_v2 = vpack.c.bf16 %v212_v0, %v212_v0  ;;  %v204_v3 = vadd.f32 %v245_v62, %v203_v1 }
 0x204   :  { %v300_v4 = vpop.f32.mrf.mxu0 }
 0x205   :  { %237 = vst.msk [vmem:[%s413_s5 + $0x8] sm:$0xf] %vm234_vm0, %v260_v2  ;;  %v258_v5 = vpack.c.bf16 %v204_v3, %v204_v3  ;;  %v215_v6 = vadd.f32 %v300_v4, %v245_v62 }
 0x206   :  { %v206_v7 = vpop.f32.mrf.mxu0 }
 0x207   :  { %235 = vst.msk [vmem:[%s413_s5] sm:$0xf] %vm234_vm0, %v258_v5  ;;  %v261_v8 = vpack.c.bf16 %v215_v6, %v215_v6  ;;  %v207_v9 = vadd.f32 %v245_v62, %v206_v7 }
 0x209   :  { %238 = vst.msk [vmem:[%s413_s5 + $0xc] sm:$0xf] %vm234_vm0, %v261_v8  ;;  %v259_v10 = vpack.c.bf16 %v207_v9, %v207_v9 }
 0x20b   :  { %236 = vst.msk [vmem:[%s413_s5 + $0x4] sm:$0xf] %vm234_vm0, %v259_v10 }

// kernel: swin_forward.29
= control target key start
LH: loop header
LB: loop body
LE: loop exit
PB: predicated region body
PF: predicated region fallthrough
CT: control target
= control target key end

     0   :  { %vm29_vm0 = vcmask 523264   ;;  %v319_v31 = vmov 0   ;;  %vm250_vm1 = vcmask 1043456   ;;  %vm251_vm2 = vcmask 523268   ;;  %s443_s0 = inlined_call_operand.vmem [shape: bf16[32,64], index: 0, kind: input, shape index: {}]   ;;  %s444_s3 = inlined_call_operand.vmem [shape: bf16[64,192], index: 3, kind: input, shape index: {}]   ;;  %s445_s1 = inlined_call_operand.vmem [shape: f32[1,64], index: 1, kind: input, shape index: {}]   ;;  %s446_s2 = inlined_call_operand.vmem [shape: f32[1,64], index: 2, kind: input, shape index: {}]   ;;  %s447_s4 = inlined_call_operand.vmem [shape: f32[1,192], index: 4, kind: input, shape index: {}]   ;;  %s448_s5 = inlined_call_operand.vmem [shape: bf16[32,192], index: 5, kind: output, shape index: {}]  }
   0x1   :  { %v282_v0 = vld [vmem:[%s443_s0] sm:$0xff]   ;;  %v289_v1 = vld [vmem:[%s443_s0 + $0x8] sm:$0xff]   ;;  %v299_v30 = vld [vmem:[%s444_s3 + $0x34] ss:$8 sps:$4 sm:$0xff]   ;;  %205 = vmatprep.mubr.bf16.mxu0 %v319_v31  ;;  %215 = vmatprep.mubr.bf16.mxu1 %v319_v31 }
   0x2   :  { %v283_v2 = vunpack.c.l.bf16 %v282_v0  ;;  %v287_v3 = vunpack.c.l.bf16 %v289_v1  ;;  %v284_v4 = vunpack.c.h.bf16 %v282_v0  ;;  %v288_v5 = vunpack.c.h.bf16 %v289_v1  ;;  %v301_v32 = vld [vmem:[%s444_s3 + $0x30] ss:$8 sps:$4 sm:$0xff]   ;;  %181 = vmatprep.subr.bf16.mxu0 %v299_v30  ;;  %290 = vmatprep.subr.bf16.mxu1 %v299_v30  ;;  %v302_v33 = vld [vmem:[%s444_s3 + $0x24] ss:$8 sps:$4 sm:$0xff]   ;;  %v304_v34 = vld [vmem:[%s444_s3 + $0x20] ss:$8 sps:$4 sm:$0xff]  }
   0x3   :  { %182 = vmatpush1.bf16.msra.mxu0 %v301_v32  ;;  %294 = vmatpush1.bf16.msra.mxu1 %v301_v32  ;;  %v305_v35 = vld [vmem:[%s444_s3 + $0x14] ss:$8 sps:$4 sm:$0xff]   ;;  %v307_v36 = vld [vmem:[%s444_s3 + $0x10] ss:$8 sps:$4 sm:$0xff]   ;;  %v308_v37 = vld [vmem:[%s444_s3 + $0x4] ss:$8 sps:$4 sm:$0xff]  }
   0x4   :  { %v30_v6 = vsel %vm29_vm0, %v283_v2, 0.0  ;;  %v36_v7 = vsel %vm29_vm0, %v287_v3, 0.0  ;;  %v33_v8 = vsel %vm29_vm0, %v284_v4, 0.0  ;;  %v39_v9 = vsel %vm29_vm0, %v288_v5, 0.0  ;;  %183 = vmatprep.subr.bf16.mxu0 %v302_v33  ;;  %291 = vmatprep.subr.bf16.mxu1 %v302_v33  ;;  %v310_v38 = vld [vmem:[%s444_s3] ss:$8 sps:$4 sm:$0xff]   ;;  %vm419_vm3 = vmor %vm251_vm2, %vm250_vm1 }
   0x5   :  { %31 = vadd.xlane.f32.xlu0 %v30_v6  ;;  %37 = vadd.xlane.f32.xlu1 %v36_v7  ;;  %v261_v53 = vld [vmem:[%s445_s1] ss:$0 sm:$0xff]  ;;  %v117_v7 = vlaneseq }
   0x6   :  { %v262_v58 = vld [vmem:[%s446_s2] ss:$0 sm:$0xff] }
   0x7   :  { %184 = vmatpush1.bf16.msra.mxu0 %v304_v34  ;;  %295 = vmatpush1.bf16.msra.mxu1 %v304_v34 }
   0x8   :  { %185 = vmatprep.subr.bf16.mxu0 %v305_v35  ;;  %292 = vmatprep.subr.bf16.mxu1 %v305_v35 }
   0x9   :  { %34 = vadd.xlane.f32.xlu0 %v33_v8  ;;  %40 = vadd.xlane.f32.xlu1 %v39_v9  ;;  %v118_v8 = vshrl.u32 %v117_v7, 7 }
   0xb   :  { %186 = vmatpush1.bf16.msra.mxu0 %v307_v36  ;;  %296 = vmatpush1.bf16.msra.mxu1 %v307_v36  ;;  %v119_v9 = vsub.s32 0, %v118_v8 }
   0xc   :  { %187 = vmatprep.subr.bf16.mxu0 %v308_v37  ;;  %293 = vmatprep.subr.bf16.mxu1 %v308_v37 }
   0xf   :  { %188 = vmatpush1.bf16.msra.mxu0 %v310_v38  ;;  %297 = vmatpush1.bf16.msra.mxu1 %v310_v38 }
  0x8e   :  { %v32_v10 = vpop.xlane.xlu0 %31  ;;  %v38_v11 = vpop.xlane.xlu1 %37 }
  0x8f   :  { %v43_v12 = vmul.f32 0.015625, %v32_v10  ;;  %v45_v13 = vmul.f32 0.015625, %v38_v11  ;;  %v123_v10 = vsub.s32 1, %v118_v8  ;;  %v115_v11 = vld [vmem:[%s447_s4] sm:$0x3] }
  0x91   :  { %v360_v14 = vsub.f32 %v283_v2, %v43_v12  ;;  %v362_v15 = vsub.f32 %v287_v3, %v45_v13  ;;  %v120_v12 = vrot.slane %v115_v11, %v119_v9  ;;  %v124_v13 = vrot.slane %v115_v11, %v123_v10 }
  0x92   :  { %v35_v16 = vpop.xlane.xlu0 %34  ;;  %v41_v17 = vpop.xlane.xlu1 %40 }
  0x93   :  { %v44_v18 = vmul.f32 0.015625, %v35_v16  ;;  %v46_v19 = vmul.f32 0.015625, %v41_v17  ;;  %v51_v20 = vmul.f32 %v360_v14, %v360_v14  ;;  %v53_v21 = vmul.f32 %v362_v15, %v362_v15 }
  0x95   :  { %v368_v22 = vsub.f32 %v284_v4, %v44_v18  ;;  %v370_v23 = vsub.f32 %v288_v5, %v46_v19  ;;  %v55_v24 = vsel %vm29_vm0, %v51_v20, 0.0  ;;  %v61_v25 = vsel %vm29_vm0, %v53_v21, 0.0 }
  0x96   :  { %56 = vadd.xlane.f32.xlu0 %v55_v24 }
  0x97   :  { %v52_v26 = vmul.f32 %v368_v22, %v368_v22  ;;  %v54_v27 = vmul.f32 %v370_v23, %v370_v23 }
  0x99   :  { %v58_v28 = vsel %vm29_vm0, %v52_v26, 0.0  ;;  %v64_v29 = vsel %vm29_vm0, %v54_v27, 0.0 }
  0x9a   :  { %62 = vadd.xlane.f32.xlu0 %v61_v25  ;;  %59 = vadd.xlane.f32.xlu1 %v58_v28 }
  0x9e   :  { %65 = vadd.xlane.f32.xlu1 %v64_v29 }
 0x11f   :  { %v57_v39 = vpop.xlane.xlu0 %56 }
 0x120   :  { %v67_v40 = vmul.f32 0.015625, %v57_v39 }
 0x122   :  { %v71_v41 = vadd.f32 1e-05, %v67_v40 }
 0x123   :  { %v60_v42 = vpop.xlane.xlu1 %59  ;;  %v63_v43 = vpop.xlane.xlu0 %62 }
 0x124   :  { %311 = vrsqrt.f32 %v71_v41  ;;  %v68_v44 = vmul.f32 0.015625, %v60_v42  ;;  %v69_v45 = vmul.f32 0.015625, %v63_v43 }
 0x126   :  { %v72_v46 = vadd.f32 1e-05, %v68_v44  ;;  %v73_v47 = vadd.f32 1e-05, %v69_v45 }
 0x127   :  { %v66_v48 = vpop.xlane.xlu1 %65 }
 0x128   :  { %313 = vrsqrt.f32 %v72_v46  ;;  %v70_v49 = vmul.f32 0.015625, %v66_v48 }
 0x129   :  { %315 = vrsqrt.f32 %v73_v47 }
 0x12a   :  { %v74_v50 = vadd.f32 1e-05, %v70_v49 }
 0x12c   :  { %317 = vrsqrt.f32 %v74_v50 }
 0x131   :  { %v312_v51 = vpop.eup %311 }
 0x132   :  { %v79_v52 = vmul.f32 %v312_v51, %v360_v14 }
 0x134   :  { %v90_v57 = vmul.f32 %v261_v53, %v79_v52 }
 0x135   :  { %v314_v54 = vpop.eup %313 }
 0x136   :  { %v316_v55 = vpop.eup %315  ;;  %v80_v56 = vmul.f32 %v314_v54, %v368_v22  ;;  %v101_v62 = vadd.f32 %v262_v58, %v90_v57 }
 0x137   :  { %v81_v59 = vmul.f32 %v316_v55, %v362_v15 }
 0x138   :  { %v91_v60 = vmul.f32 %v261_v53, %v80_v56 }
 0x139   :  { %v318_v61 = vpop.eup %317  ;;  %v92_v1 = vmul.f32 %v261_v53, %v81_v59 }
 0x13a   :  { %v102_v63 = vadd.f32 %v262_v58, %v91_v60  ;;  %v82_v0 = vmul.f32 %v318_v61, %v370_v23 }
 0x13b   :  { %v103_v4 = vadd.f32 %v262_v58, %v92_v1 }
 0x13c   :  { %v105_v2 = vpack.c.bf16 %v102_v63, %v101_v62  ;;  %v93_v3 = vmul.f32 %v261_v53, %v82_v0 }
 0x13e   :  { %271 = vmatmul.mubr.msk.bf16.vlgmr.msra.gmra.mxu0 %vm29_vm0, %v105_v2  ;;  %v104_v5 = vadd.f32 %v262_v58, %v93_v3 }
 0x140   :  { %v106_v6 = vpack.c.bf16 %v104_v5, %v103_v4 }
 0x142   :  { %272 = vmatmul.mubr.msk.bf16.vlgmr.msra.gmra.mxu1 %vm29_vm0, %v106_v6 }
 0x1fe   :  { %v207_v14 = vpop.f32.mrf.mxu0 }
 0x1ff   :  { %v208_v16 = vadd.f32 %v207_v14, %v120_v12 }
 0x200   :  { %v209_v15 = vpop.f32.mrf.mxu0 }
 0x201   :  { %v210_v17 = vadd.f32 %v209_v15, %v124_v13 }
 0x202   :  { %v211_v19 = vpop.f32.mrf.mxu0  ;;  %v217_v20 = vpop.f32.mrf.mxu1 }
 0x203   :  { %v277_v21 = vpack.c.bf16 %v210_v17, %v208_v16  ;;  %v212_v24 = vadd.f32 %v211_v19, %v120_v12  ;;  %v218_v25 = vadd.f32 %v217_v20, %v120_v12 }
 0x204   :  { %v213_v22 = vpop.f32.mrf.mxu0  ;;  %v219_v23 = vpop.f32.mrf.mxu1 }
 0x205   :  { %253 = vst.msk [vmem:[%s448_s5] sm:$0xff] %vm419_vm3, %v277_v21  ;;  %v214_v26 = vadd.f32 %v213_v22, %v124_v13  ;;  %v220_v27 = vadd.f32 %v219_v23, %v124_v13 }
 0x206   :  { %v221_v28 = vpop.f32.mrf.mxu1 }
 0x207   :  { %v278_v29 = vpack.c.bf16 %v214_v26, %v212_v24  ;;  %v279_v30 = vpack.c.bf16 %v220_v27, %v218_v25  ;;  %v222_v32 = vadd.f32 %v221_v28, %v120_v12 }
 0x208   :  { %v223_v31 = vpop.f32.mrf.mxu1 }
 0x209   :  { %254 = vst.msk [vmem:[%s448_s5 + $0x8] sm:$0xff] %vm419_vm3, %v278_v29  ;;  %255 = vst.msk [vmem:[%s448_s5 + $0x10] sm:$0xff] %vm419_vm3, %v279_v30  ;;  %v224_v33 = vadd.f32 %v223_v31, %v124_v13 }
 0x20b   :  { %v280_v34 = vpack.c.bf16 %v224_v33, %v222_v32 }
 0x20d   :  { %256 = vst.msk [vmem:[%s448_s5 + $0x18] sm:$0xff] %vm419_vm3, %v280_v34 }

// kernel: swin_forward.31
= control target key start
LH: loop header
LB: loop body
LE: loop exit
PB: predicated region body
PF: predicated region fallthrough
CT: control target
= control target key end

     0   :  { %vm29_vm0 = vcmask 523264   ;;  %v404_v31 = vmov 0   ;;  %s572_s0 = inlined_call_operand.vmem [shape: bf16[32,64], index: 0, kind: input, shape index: {}]   ;;  %s573_s3 = inlined_call_operand.vmem [shape: bf16[64,256], index: 3, kind: input, shape index: {}]   ;;  %s574_s1 = inlined_call_operand.vmem [shape: f32[1,64], index: 1, kind: input, shape index: {}]   ;;  %s575_s2 = inlined_call_operand.vmem [shape: f32[1,64], index: 2, kind: input, shape index: {}]   ;;  %s576_s4 = inlined_call_operand.vmem [shape: f32[1,256], index: 4, kind: input, shape index: {}]   ;;  %s577_s5 = inlined_call_operand.vmem [shape: bf16[32,256], index: 5, kind: output, shape index: {}]  }
   0x1   :  { %v351_v0 = vld [vmem:[%s572_s0] sm:$0xff]   ;;  %v358_v1 = vld [vmem:[%s572_s0 + $0x8] sm:$0xff]   ;;  %v368_v30 = vld [vmem:[%s573_s3 + $0x34] ss:$8 sps:$4 sm:$0xff]   ;;  %205 = vmatprep.mubr.bf16.mxu0 %v404_v31  ;;  %215 = vmatprep.mubr.bf16.mxu1 %v404_v31 }
   0x2   :  { %v352_v2 = vunpack.c.l.bf16 %v351_v0  ;;  %v356_v3 = vunpack.c.l.bf16 %v358_v1  ;;  %v353_v4 = vunpack.c.h.bf16 %v351_v0  ;;  %v357_v5 = vunpack.c.h.bf16 %v358_v1  ;;  %v370_v32 = vld [vmem:[%s573_s3 + $0x30] ss:$8 sps:$4 sm:$0xff]   ;;  %181 = vmatprep.subr.bf16.mxu0 %v368_v30  ;;  %359 = vmatprep.subr.bf16.mxu1 %v368_v30  ;;  %v371_v33 = vld [vmem:[%s573_s3 + $0x24] ss:$8 sps:$4 sm:$0xff]   ;;  %v373_v34 = vld [vmem:[%s573_s3 + $0x20] ss:$8 sps:$4 sm:$0xff]  }
   0x3   :  { %182 = vmatpush1.bf16.msra.mxu0 %v370_v32  ;;  %363 = vmatpush1.bf16.msra.mxu1 %v370_v32  ;;  %v374_v35 = vld [vmem:[%s573_s3 + $0x14] ss:$8 sps:$4 sm:$0xff]   ;;  %v376_v36 = vld [vmem:[%s573_s3 + $0x10] ss:$8 sps:$4 sm:$0xff]   ;;  %v377_v37 = vld [vmem:[%s573_s3 + $0x4] ss:$8 sps:$4 sm:$0xff]  }
   0x4   :  { %v30_v6 = vsel %vm29_vm0, %v352_v2, 0.0  ;;  %v36_v7 = vsel %vm29_vm0, %v356_v3, 0.0  ;;  %v33_v8 = vsel %vm29_vm0, %v353_v4, 0.0  ;;  %v39_v9 = vsel %vm29_vm0, %v357_v5, 0.0  ;;  %183 = vmatprep.subr.bf16.mxu0 %v371_v33  ;;  %360 = vmatprep.subr.bf16.mxu1 %v371_v33  ;;  %v379_v38 = vld [vmem:[%s573_s3] ss:$8 sps:$4 sm:$0xff]  }
   0x5   :  { %31 = vadd.xlane.f32.xlu0 %v30_v6  ;;  %37 = vadd.xlane.f32.xlu1 %v36_v7  ;;  %v330_v53 = vld [vmem:[%s574_s1] ss:$0 sm:$0xff]  ;;  %v117_v7 = vlaneseq }
   0x6   :  { %v331_v58 = vld [vmem:[%s575_s2] ss:$0 sm:$0xff] }
   0x7   :  { %184 = vmatpush1.bf16.msra.mxu0 %v373_v34  ;;  %364 = vmatpush1.bf16.msra.mxu1 %v373_v34 }
   0x8   :  { %185 = vmatprep.subr.bf16.mxu0 %v374_v35  ;;  %361 = vmatprep.subr.bf16.mxu1 %v374_v35 }
   0x9   :  { %34 = vadd.xlane.f32.xlu0 %v33_v8  ;;  %40 = vadd.xlane.f32.xlu1 %v39_v9  ;;  %v118_v8 = vshrl.u32 %v117_v7, 7 }
   0xb   :  { %186 = vmatpush1.bf16.msra.mxu0 %v376_v36  ;;  %365 = vmatpush1.bf16.msra.mxu1 %v376_v36  ;;  %v119_v9 = vsub.s32 0, %v118_v8 }
   0xc   :  { %187 = vmatprep.subr.bf16.mxu0 %v377_v37  ;;  %362 = vmatprep.subr.bf16.mxu1 %v377_v37 }
   0xf   :  { %188 = vmatpush1.bf16.msra.mxu0 %v379_v38  ;;  %366 = vmatpush1.bf16.msra.mxu1 %v379_v38 }
  0x8e   :  { %v32_v10 = vpop.xlane.xlu0 %31  ;;  %v38_v11 = vpop.xlane.xlu1 %37 }
  0x8f   :  { %v43_v12 = vmul.f32 0.015625, %v32_v10  ;;  %v45_v13 = vmul.f32 0.015625, %v38_v11  ;;  %v115_v10 = vld [vmem:[%s576_s4] sm:$0x3]  ;;  %v123_v11 = vsub.s32 1, %v118_v8 }
  0x91   :  { %v445_v14 = vsub.f32 %v352_v2, %v43_v12  ;;  %v447_v15 = vsub.f32 %v356_v3, %v45_v13  ;;  %v120_v12 = vrot.slane %v115_v10, %v119_v9  ;;  %v124_v13 = vrot.slane %v115_v10, %v123_v11 }
  0x92   :  { %v35_v16 = vpop.xlane.xlu0 %34  ;;  %v41_v17 = vpop.xlane.xlu1 %40 }
  0x93   :  { %v44_v18 = vmul.f32 0.015625, %v35_v16  ;;  %v46_v19 = vmul.f32 0.015625, %v41_v17  ;;  %v51_v20 = vmul.f32 %v445_v14, %v445_v14  ;;  %v53_v21 = vmul.f32 %v447_v15, %v447_v15 }
  0x95   :  { %v453_v22 = vsub.f32 %v353_v4, %v44_v18  ;;  %v455_v23 = vsub.f32 %v357_v5, %v46_v19  ;;  %v55_v24 = vsel %vm29_vm0, %v51_v20, 0.0  ;;  %v61_v25 = vsel %vm29_vm0, %v53_v21, 0.0 }
  0x96   :  { %56 = vadd.xlane.f32.xlu0 %v55_v24 }
  0x97   :  { %v52_v26 = vmul.f32 %v453_v22, %v453_v22  ;;  %v54_v27 = vmul.f32 %v455_v23, %v455_v23 }
  0x99   :  { %v58_v28 = vsel %vm29_vm0, %v52_v26, 0.0  ;;  %v64_v29 = vsel %vm29_vm0, %v54_v27, 0.0 }
  0x9a   :  { %62 = vadd.xlane.f32.xlu0 %v61_v25  ;;  %59 = vadd.xlane.f32.xlu1 %v58_v28 }
  0x9e   :  { %65 = vadd.xlane.f32.xlu1 %v64_v29 }
 0x11f   :  { %v57_v39 = vpop.xlane.xlu0 %56 }
 0x120   :  { %v67_v40 = vmul.f32 0.015625, %v57_v39 }
 0x122   :  { %v71_v41 = vadd.f32 1e-05, %v67_v40 }
 0x123   :  { %v60_v42 = vpop.xlane.xlu1 %59  ;;  %v63_v43 = vpop.xlane.xlu0 %62 }
 0x124   :  { %380 = vrsqrt.f32 %v71_v41  ;;  %v68_v44 = vmul.f32 0.015625, %v60_v42  ;;  %v69_v45 = vmul.f32 0.015625, %v63_v43 }
 0x126   :  { %v72_v46 = vadd.f32 1e-05, %v68_v44  ;;  %v73_v47 = vadd.f32 1e-05, %v69_v45 }
 0x127   :  { %v66_v48 = vpop.xlane.xlu1 %65 }
 0x128   :  { %382 = vrsqrt.f32 %v72_v46  ;;  %v70_v49 = vmul.f32 0.015625, %v66_v48 }
 0x129   :  { %384 = vrsqrt.f32 %v73_v47 }
 0x12a   :  { %v74_v50 = vadd.f32 1e-05, %v70_v49 }
 0x12c   :  { %386 = vrsqrt.f32 %v74_v50 }
 0x131   :  { %v381_v51 = vpop.eup %380 }
 0x132   :  { %v79_v52 = vmul.f32 %v381_v51, %v445_v14 }
 0x134   :  { %v90_v57 = vmul.f32 %v330_v53, %v79_v52 }
 0x135   :  { %v383_v54 = vpop.eup %382 }
 0x136   :  { %v385_v55 = vpop.eup %384  ;;  %v80_v56 = vmul.f32 %v383_v54, %v453_v22  ;;  %v101_v62 = vadd.f32 %v331_v58, %v90_v57 }
 0x137   :  { %v81_v59 = vmul.f32 %v385_v55, %v447_v15 }
 0x138   :  { %v91_v60 = vmul.f32 %v330_v53, %v80_v56 }
 0x139   :  { %v387_v61 = vpop.eup %386  ;;  %v92_v1 = vmul.f32 %v330_v53, %v81_v59 }
 0x13a   :  { %v102_v63 = vadd.f32 %v331_v58, %v91_v60  ;;  %v82_v0 = vmul.f32 %v387_v61, %v455_v23 }
 0x13b   :  { %v103_v4 = vadd.f32 %v331_v58, %v92_v1 }
 0x13c   :  { %v105_v2 = vpack.c.bf16 %v102_v63, %v101_v62  ;;  %v93_v3 = vmul.f32 %v330_v53, %v82_v0 }
 0x13e   :  { %340 = vmatmul.mubr.msk.bf16.vlgmr.msra.gmra.mxu0 %vm29_vm0, %v105_v2  ;;  %v104_v5 = vadd.f32 %v331_v58, %v93_v3 }
 0x140   :  { %v106_v6 = vpack.c.bf16 %v104_v5, %v103_v4 }
 0x142   :  { %341 = vmatmul.mubr.msk.bf16.vlgmr.msra.gmra.mxu1 %vm29_vm0, %v106_v6 }
 0x1fe   :  { %v207_v14 = vpop.f32.mrf.mxu0 }
 0x1ff   :  { %v504_v15 = vadd.f32 %v207_v14, %v120_v12 }
 0x200   :  { %v209_v16 = vpop.f32.mrf.mxu0 }
 0x201   :  { %v226_v17 = vmul.f32 %v504_v15, %v504_v15  ;;  %v508_v18 = vadd.f32 %v209_v16, %v124_v13 }
 0x202   :  { %v211_v19 = vpop.f32.mrf.mxu0  ;;  %v217_v20 = vpop.f32.mrf.mxu1 }
 0x203   :  { %v234_v21 = vmul.f32 %v226_v17, %v504_v15  ;;  %v227_v22 = vmul.f32 %v508_v18, %v508_v18  ;;  %v513_v23 = vadd.f32 %v211_v19, %v120_v12  ;;  %v515_v24 = vadd.f32 %v217_v20, %v120_v12 }
 0x204   :  { %v213_v25 = vpop.f32.mrf.mxu0  ;;  %v219_v26 = vpop.f32.mrf.mxu1 }
 0x205   :  { %v242_v27 = vmul.f32 0.044715, %v234_v21  ;;  %v235_v28 = vmul.f32 %v227_v22, %v508_v18  ;;  %v228_v29 = vmul.f32 %v513_v23, %v513_v23  ;;  %v230_v30 = vmul.f32 %v515_v24, %v515_v24 }
 0x206   :  { %v522_v31 = vadd.f32 %v213_v25, %v124_v13  ;;  %v524_v32 = vadd.f32 %v219_v26, %v124_v13  ;;  %v221_v33 = vpop.f32.mrf.mxu1 }
 0x207   :  { %v250_v34 = vadd.f32 %v242_v27, %v504_v15  ;;  %v243_v35 = vmul.f32 0.044715, %v235_v28  ;;  %v236_v36 = vmul.f32 %v228_v29, %v513_v23  ;;  %v238_v37 = vmul.f32 %v230_v30, %v515_v24 }
 0x208   :  { %v229_v38 = vmul.f32 %v522_v31, %v522_v31  ;;  %v231_v39 = vmul.f32 %v524_v32, %v524_v32  ;;  %v533_v40 = vadd.f32 %v221_v33, %v120_v12  ;;  %v223_v41 = vpop.f32.mrf.mxu1 }
 0x209   :  { %v258_v42 = vmul.f32 0.7978846, %v250_v34  ;;  %v251_v43 = vadd.f32 %v243_v35, %v508_v18  ;;  %v244_v44 = vmul.f32 0.044715, %v236_v36  ;;  %v246_v45 = vmul.f32 0.044715, %v238_v37 }
 0x20a   :  { %v237_v46 = vmul.f32 %v229_v38, %v522_v31  ;;  %v239_v47 = vmul.f32 %v231_v39, %v524_v32  ;;  %v232_v48 = vmul.f32 %v533_v40, %v533_v40  ;;  %v540_v49 = vadd.f32 %v223_v41, %v124_v13 }
 0x20b   :  { %388 = vtanh.f32 %v258_v42  ;;  %v259_v50 = vmul.f32 0.7978846, %v251_v43  ;;  %v252_v51 = vadd.f32 %v244_v44, %v513_v23  ;;  %v254_v52 = vadd.f32 %v246_v45, %v515_v24 }
 0x20c   :  { %v245_v53 = vmul.f32 0.044715, %v237_v46  ;;  %v247_v54 = vmul.f32 0.044715, %v239_v47  ;;  %v240_v55 = vmul.f32 %v232_v48, %v533_v40  ;;  %v233_v56 = vmul.f32 %v540_v49, %v540_v49 }
 0x20d   :  { %390 = vtanh.f32 %v259_v50  ;;  %v260_v57 = vmul.f32 0.7978846, %v252_v51  ;;  %v262_v58 = vmul.f32 0.7978846, %v254_v52 }
 0x20e   :  { %v253_v59 = vadd.f32 %v245_v53, %v522_v31  ;;  %v255_v60 = vadd.f32 %v247_v54, %v524_v32  ;;  %v248_v61 = vmul.f32 0.044715, %v240_v55  ;;  %v241_v62 = vmul.f32 %v233_v56, %v540_v49 }
 0x20f   :  { %392 = vtanh.f32 %v260_v57 }
 0x210   :  { %394 = vtanh.f32 %v262_v58  ;;  %v261_v63 = vmul.f32 0.7978846, %v253_v59  ;;  %v263_v0 = vmul.f32 0.7978846, %v255_v60  ;;  %v256_v1 = vadd.f32 %v248_v61, %v533_v40 }
 0x211   :  { %v249_v2 = vmul.f32 0.044715, %v241_v62 }
 0x212   :  { %396 = vtanh.f32 %v261_v63  ;;  %v264_v3 = vmul.f32 0.7978846, %v256_v1 }
 0x213   :  { %398 = vtanh.f32 %v263_v0  ;;  %v257_v4 = vadd.f32 %v249_v2, %v540_v49 }
 0x214   :  { %400 = vtanh.f32 %v264_v3 }
 0x215   :  { %v265_v5 = vmul.f32 0.7978846, %v257_v4 }
 0x217   :  { %402 = vtanh.f32 %v265_v5 }
 0x218   :  { %v389_v6 = vpop.eup %388 }
 0x219   :  { %v274_v7 = vadd.f32 1.0, %v389_v6 }
 0x21a   :  { %v391_v8 = vpop.eup %390 }
 0x21b   :  { %v282_v9 = vmul.f32 0.5, %v274_v7  ;;  %v275_v10 = vadd.f32 1.0, %v391_v8 }
 0x21c   :  { %v393_v11 = vpop.eup %392 }
 0x21d   :  { %v395_v12 = vpop.eup %394  ;;  %v283_v13 = vmul.f32 0.5, %v275_v10  ;;  %v276_v14 = vadd.f32 1.0, %v393_v11  ;;  %v290_v19 = vmul.f32 %v282_v9, %v504_v15 }
 0x21e   :  { %v278_v16 = vadd.f32 1.0, %v395_v12 }
 0x21f   :  { %v397_v17 = vpop.eup %396  ;;  %v291_v20 = vmul.f32 %v283_v13, %v508_v18  ;;  %v284_v22 = vmul.f32 0.5, %v276_v14 }
 0x220   :  { %v399_v21 = vpop.eup %398  ;;  %v277_v25 = vadd.f32 1.0, %v397_v17  ;;  %v286_v28 = vmul.f32 0.5, %v278_v16 }
 0x221   :  { %v401_v26 = vpop.eup %400  ;;  %v346_v27 = vpack.c.bf16 %v291_v20, %v290_v19  ;;  %v279_v29 = vadd.f32 1.0, %v399_v21  ;;  %v292_v36 = vmul.f32 %v284_v22, %v513_v23 }
 0x222   :  { %v285_v30 = vmul.f32 0.5, %v277_v25  ;;  %v280_v33 = vadd.f32 1.0, %v401_v26  ;;  %v294_v18 = vmul.f32 %v286_v28, %v515_v24 }
 0x223   :  { %322 = vst [vmem:[%s577_s5] sm:$0xff] %v346_v27  ;;  %v287_v34 = vmul.f32 0.5, %v279_v29 }
 0x224   :  { %v403_v35 = vpop.eup %402  ;;  %v293_v15 = vmul.f32 %v285_v30, %v522_v31  ;;  %v288_v38 = vmul.f32 0.5, %v280_v33 }
 0x225   :  { %v295_v37 = vmul.f32 %v287_v34, %v524_v32  ;;  %v281_v39 = vadd.f32 1.0, %v403_v35 }
 0x226   :  { %v347_v41 = vpack.c.bf16 %v293_v15, %v292_v36  ;;  %v296_v23 = vmul.f32 %v288_v38, %v533_v40 }
 0x227   :  { %v348_v42 = vpack.c.bf16 %v295_v37, %v294_v18  ;;  %v289_v43 = vmul.f32 0.5, %v281_v39 }
 0x228   :  { %323 = vst [vmem:[%s577_s5 + $0x8] sm:$0xff] %v347_v41 }
 0x229   :  { %324 = vst [vmem:[%s577_s5 + $0x10] sm:$0xff] %v348_v42  ;;  %v297_v31 = vmul.f32 %v289_v43, %v540_v49 }
 0x22b   :  { %v349_v24 = vpack.c.bf16 %v297_v31, %v296_v23 }
 0x22d   :  { %325 = vst [vmem:[%s577_s5 + $0x18] sm:$0xff] %v349_v24 }

// kernel: swin_forward.30
= control target key start
LH: loop header
LB: loop body
LE: loop exit
PB: predicated region body
PF: predicated region fallthrough
CT: control target
= control target key end

     0   :  { %s1396_s22 = smov 64   ;;  %vm43_vm0 = vcmask 130048   ;;  %vm117_vm1 = vcmask 261120   ;;  %s1397_s6 = smov 48   ;;  %vm1098_vm2 = vcmask 519168   ;;  %s1662_s0 = inlined_call_operand.vmem [shape: bf16[32,192], index: 0, kind: input, shape index: {}]   ;;  %s1663_s1 = inlined_call_operand.vmem [shape: f32[1,4,32,32], index: 1, kind: input, shape index: {}]   ;;  %s1664_s2 = inlined_call_operand.vmem [shape: bf16[4,16,64], index: 2, kind: input, shape index: {}]   ;;  %s1665_s4 = inlined_call_operand.vmem [shape: bf16[32,64], index: 4, kind: input, shape index: {}]   ;;  %s1666_s3 = inlined_call_operand.vmem [shape: f32[1,64], index: 3, kind: input, shape index: {}]   ;;  %s1667_s5 = inlined_call_operand.vmem [shape: bf16[32,64], index: 5, kind: output, shape index: {}]  }
   0x1   :  { %v1436_v0 = vld [vmem:[%s1662_s0 + $0x10] ss:$8 sps:$4 sm:$0xff]   ;;  %v1441_v1 = vld [vmem:[%s1662_s0] ss:$8 sps:$4 sm:$0xff]   ;;  %v1478_v46 = vld [vmem:[%s1662_s0 + $0x14] ss:$8 sps:$4 sm:$0xff]  }
   0x2   :  { %41 = vrot.lane.b32.xlu0 %v1436_v0, %s1396_s22  ;;  %1223 = vmatprep.mubr.msk.bf16.mxu0 %vm43_vm0, %v1441_v1  ;;  %v111_v7 = vld [vmem:[%s1663_s1 + $0x10] sm:$0xff]  ;;  %v109_v10 = vld [vmem:[%s1663_s1] sm:$0xff]  ;;  %v110_v17 = vld [vmem:[%s1663_s1 + $0x8] sm:$0xff]  ;;  %s1398_s11 = smov 112   ;;  %s1399_s21 = smov 32  }
   0x3   :  { %v112_v21 = vld [vmem:[%s1663_s1 + $0x18] sm:$0xff]  ;;  %v1483_v47 = vld [vmem:[%s1662_s0 + $0x4] ss:$8 sps:$4 sm:$0xff]   ;;  %1227 = vmatprep.subr.bf16.mxu1 %v1478_v46  ;;  %s1401_s25 = smov 16   ;;  %s1402_s26 = smov 80  }
   0x4   :  { %1228 = vmatpush3.bf16.msra.mxu1 %v1478_v46 }
   0x5   :  { %1229 = vmatprep.subr.bf16.mxu1 %v1483_v47 }
   0x6   :  { %39 = vrot.lane.b32.xlu0 %v1441_v1, %s1396_s22  ;;  %s1400_s22 = smov 96  }
   0x8   :  { %1230 = vmatpush3.bf16.msra.mxu1 %v1483_v47 }
  0x74   :  { %v42_v2 = vpop.permute.xlu0 %41 }
  0x75   :  { %1307 = vmatprep.subr.msk.bf16.mxu0 %vm43_vm0, %v42_v2  ;;  %v54_v3 = vsel %vm43_vm0, %v42_v2, 0 }
  0x76   :  { %1220 = vmatpush3.bf16.xpose.msra.mxu0 %v54_v3 }
  0x78   :  { %v40_v4 = vpop.permute.xlu0 %39 }
  0x79   :  { %1308 = vmatprep.subr.msk.bf16.mxu0 %vm43_vm0, %v40_v4  ;;  %v51_v5 = vsel %vm43_vm0, %v40_v4, 0 }
  0x7e   :  { %1222 = vmatpush3.bf16.xpose.msra.mxu0 %v51_v5 }
  0x85   :  { %1224 = vmatmul.mubr.msk.bf16.vlgmr.msra.gmra.mxu0 %vm43_vm0, %v1436_v0 }
 0x145   :  { %v1225_v6 = vpop.f32.mrf.mxu0 }
 0x146   :  { %v107_v8 = vmul.f32 0.25, %v1225_v6  ;;  %v1328_v6 = vld [vmem:[%s1664_s2] sm:$0xff]  }
 0x147   :  { %v90_v9 = vpop.f32.mrf.mxu0 }
 0x148   :  { %v105_v11 = vmul.f32 0.25, %v90_v9  ;;  %v115_v12 = vadd.f32 %v111_v7, %v107_v8 }
 0x149   :  { %v1226_v13 = vpop.f32.mrf.mxu0 }
 0x14a   :  { %v124_v14 = vsel %vm117_vm1, %v115_v12, -inf  ;;  %v113_v15 = vadd.f32 %v109_v10, %v105_v11  ;;  %v108_v18 = vmul.f32 0.25, %v1226_v13 }
 0x14b   :  { %125 = vmax.xlane.f32.xlu0 %v124_v14  ;;  %v93_v16 = vpop.f32.mrf.mxu0 }
 0x14c   :  { %v106_v19 = vmul.f32 0.25, %v93_v16  ;;  %v118_v20 = vsel %vm117_vm1, %v113_v15, -inf  ;;  %v116_v24 = vadd.f32 %v112_v21, %v108_v18 }
 0x14d   :  { %119 = vmax.xlane.f32.xlu1 %v118_v20 }
 0x14e   :  { %v114_v22 = vadd.f32 %v110_v17, %v106_v19  ;;  %v127_v25 = vsel %vm117_vm1, %v116_v24, -inf  ;;  %v1119_v19 = vld [vmem:[%s1663_s1 + $0x30] sm:$0xff] }
 0x150   :  { %v121_v23 = vsel %vm117_vm1, %v114_v22, -inf }
 0x151   :  { %122 = vmax.xlane.f32.xlu1 %v121_v23 }
 0x155   :  { %128 = vmax.xlane.f32.xlu1 %v127_v25 }
 0x161   :  { %227 = vrot.lane.b32.xlu0 %v1441_v1, %s1397_s6 }
 0x1d4   :  { %v126_v26 = vpop.xlane.xlu0 %125 }
 0x1d5   :  { %v132_v27 = vsub.f32 %v115_v12, %v126_v26 }
 0x1d6   :  { %v120_v28 = vpop.xlane.xlu1 %119 }
 0x1d7   :  { %v138_v29 = vmul.f32 1.442695, %v132_v27  ;;  %v130_v30 = vsub.f32 %v113_v15, %v120_v28  ;;  %v1117_v15 = vld [vmem:[%s1663_s1 + $0x20] sm:$0xff]  ;;  %v1120_v27 = vld [vmem:[%s1663_s1 + $0x38] sm:$0xff] }
 0x1d8   :  { %v228_v3 = vpop.permute.xlu0 %227 }
 0x1d9   :  { %1332 = vpow2.f32 %v138_v29  ;;  %v134_v31 = vmul.f32 1.442695, %v130_v30  ;;  %v238_v4 = vsel %vm43_vm0, %v228_v3, 0 }
 0x1da   :  { %v123_v32 = vpop.xlane.xlu1 %122 }
 0x1db   :  { %1334 = vpow2.f32 %v134_v31  ;;  %v131_v33 = vsub.f32 %v114_v22, %v123_v32  ;;  %v1118_v22 = vld [vmem:[%s1663_s1 + $0x28] sm:$0xff] }
 0x1dd   :  { %v136_v36 = vmul.f32 1.442695, %v131_v33 }
 0x1de   :  { %v129_v34 = vpop.xlane.xlu1 %128 }
 0x1df   :  { %v133_v35 = vsub.f32 %v116_v24, %v129_v34 }
 0x1e1   :  { %v140_v37 = vmul.f32 1.442695, %v133_v35 }
 0x1e3   :  { %1336 = vpow2.f32 %v140_v37 }
 0x1e4   :  { %1338 = vpow2.f32 %v136_v36 }
 0x1e6   :  { %v1333_v38 = vpop.eup %1332 }
 0x1e7   :  { %v148_v39 = vsel %vm117_vm1, %v1333_v38, 0.0 }
 0x1e8   :  { %v1335_v40 = vpop.eup %1334  ;;  %149 = vadd.xlane.f32.xlu1 %v148_v39 }
 0x1e9   :  { %v142_v41 = vsel %vm117_vm1, %v1335_v40, 0.0 }
 0x1ec   :  { %143 = vadd.xlane.f32.xlu1 %v142_v41 }
 0x1f0   :  { %v1337_v42 = vpop.eup %1336 }
 0x1f1   :  { %v151_v43 = vsel %vm117_vm1, %v1337_v42, 0.0  ;;  %v1339_v44 = vpop.eup %1338 }
 0x1f2   :  { %152 = vadd.xlane.f32.xlu1 %v151_v43  ;;  %v145_v45 = vsel %vm117_vm1, %v1339_v44, 0.0 }
 0x1f6   :  { %146 = vadd.xlane.f32.xlu1 %v145_v45 }
 0x207   :  { %229 = vrot.lane.b32.xlu1 %v1436_v0, %s1397_s6 }
 0x20b   :  { %223 = vrot.lane.b32.xlu1 %v1441_v1, %s1398_s11 }
 0x20f   :  { %225 = vrot.lane.b32.xlu1 %v1436_v0, %s1398_s11 }
 0x271   :  { %v150_v48 = vpop.xlane.xlu1 %149 }
 0x275   :  { %v144_v49 = vpop.xlane.xlu1 %143 }
 0x27b   :  { %v153_v50 = vpop.xlane.xlu1 %152 }
 0x27c   :  { %1340 = vrcp.f32 %v153_v50 }
 0x27d   :  { %1342 = vrcp.f32 %v144_v49 }
 0x27e   :  { %1344 = vrcp.f32 %v150_v48 }
 0x27f   :  { %v147_v51 = vpop.xlane.xlu1 %146 }
 0x280   :  { %1346 = vrcp.f32 %v147_v51 }
 0x283   :  { %v230_v52 = vpop.permute.xlu1 %229 }
 0x284   :  { %1309 = vmatprep.subr.msk.bf16.mxu1 %vm43_vm0, %v230_v52  ;;  %v241_v62 = vsel %vm43_vm0, %v230_v52, 0 }
 0x287   :  { %v224_v2 = vpop.permute.xlu1 %223 }
 0x289   :  { %v1341_v53 = vpop.eup %1340 }
 0x28a   :  { %v1343_v54 = vpop.eup %1342  ;;  %v161_v57 = vmul.f32 %v1341_v53, %v1337_v42 }
 0x28b   :  { %v1345_v55 = vpop.eup %1344  ;;  %v158_v58 = vmul.f32 %v1343_v54, %v1335_v40  ;;  %v226_v5 = vpop.permute.xlu1 %225 }
 0x28c   :  { %v160_v60 = vmul.f32 %v1345_v55, %v1333_v38 }
 0x28d   :  { %v1347_v56 = vpop.eup %1346 }
 0x28e   :  { %v159_v59 = vmul.f32 %v1347_v56, %v1339_v44  ;;  %v163_v63 = vpack.c.bf16 %v161_v57, %v160_v60 }
 0x290   :  { %v162_v61 = vpack.c.bf16 %v159_v59, %v158_v58 }
 0x292   :  { %1231 = vmatprep.mubr.msk.bf16.mxu1 %vm117_vm1, %v162_v61 }
 0x293   :  { %1232 = vmatmul.mubr.msk.bf16.vlgmr.msra.gmra.mxu1 %vm117_vm1, %v163_v63 }
 0x294   :  { %1236 = vmatpush3.bf16.xpose.msra.mxu1 %v241_v62  ;;  %1239 = vmatprep.mubr.msk.bf16.mxu1 %vm43_vm0, %v224_v2 }
 0x295   :  { %1310 = vmatprep.subr.msk.bf16.mxu1 %vm43_vm0, %v228_v3 }
 0x29c   :  { %1238 = vmatpush3.bf16.xpose.msra.mxu1 %v238_v4 }
 0x29d   :  { %1257 = vmatprep.subr.bf16.mxu1 %v1328_v6 }
 0x2a3   :  { %1240 = vmatmul.mubr.msk.bf16.vlgmr.msra.gmra.mxu1 %vm43_vm0, %v226_v5 }
 0x2a4   :  { %1258 = vmatpush3.bf16.msra.mxu1 %v1328_v6 }
 0x353   :  { %v1233_v7 = vpop.f32.mrf.mxu1 }
 0x355   :  { %v204_v8 = vpop.f32.mrf.mxu1 }
 0x357   :  { %v1234_v9 = vpop.f32.mrf.mxu1 }
 0x358   :  { %v220_v12 = vpack.c.bf16 %v1234_v9, %v1233_v7  ;;  %v1329_v9 = vld [vmem:[%s1664_s2 + $0x8] sm:$0xff]  }
 0x359   :  { %v207_v10 = vpop.f32.mrf.mxu1 }
 0x35a   :  { %v219_v11 = vpack.c.bf16 %v207_v10, %v204_v8 }
 0x35c   :  { %1259 = vmatprep.mubr.msk.bf16.mxu1 %vm43_vm0, %v219_v11 }
 0x35d   :  { %1260 = vmatmul.mubr.msk.bf16.vlgmr.msra.gmra.mxu1 %vm43_vm0, %v220_v12 }
 0x363   :  { %v1241_v13 = vpop.f32.mrf.mxu1 }
 0x364   :  { %v294_v16 = vmul.f32 0.25, %v1241_v13 }
 0x365   :  { %v277_v14 = vpop.f32.mrf.mxu1 }
 0x366   :  { %v292_v17 = vmul.f32 0.25, %v277_v14  ;;  %v303_v26 = vadd.f32 %v1119_v19, %v294_v16 }
 0x367   :  { %v1242_v18 = vpop.f32.mrf.mxu1 }
 0x368   :  { %v301_v20 = vadd.f32 %v1117_v15, %v292_v17  ;;  %v295_v23 = vmul.f32 0.25, %v1242_v18  ;;  %v311_v29 = vsel %vm117_vm1, %v303_v26, -inf }
 0x369   :  { %v280_v21 = vpop.f32.mrf.mxu1 }
 0x36a   :  { %v293_v24 = vmul.f32 0.25, %v280_v21  ;;  %v305_v25 = vsel %vm117_vm1, %v301_v20, -inf  ;;  %v304_v31 = vadd.f32 %v1120_v27, %v295_v23 }
 0x36b   :  { %306 = vmax.xlane.f32.xlu1 %v305_v25 }
 0x36c   :  { %v302_v28 = vadd.f32 %v1118_v22, %v293_v24  ;;  %v314_v32 = vsel %vm117_vm1, %v304_v31, -inf }
 0x36e   :  { %v308_v30 = vsel %vm117_vm1, %v302_v28, -inf }
 0x36f   :  { %312 = vmax.xlane.f32.xlu1 %v311_v29  ;;  %309 = vmax.xlane.f32.xlu0 %v308_v30 }
 0x373   :  { %315 = vmax.xlane.f32.xlu0 %v314_v32  ;;  %v1133_v32 = vld [vmem:[%s1663_s1 + $0x40] sm:$0xff] }
 0x3f4   :  { %v307_v33 = vpop.xlane.xlu1 %306 }
 0x3f5   :  { %v317_v34 = vsub.f32 %v301_v20, %v307_v33 }
 0x3f7   :  { %v321_v38 = vmul.f32 1.442695, %v317_v34 }
 0x3f8   :  { %v313_v35 = vpop.xlane.xlu1 %312  ;;  %v310_v36 = vpop.xlane.xlu0 %309 }
 0x3f9   :  { %v319_v37 = vsub.f32 %v303_v26, %v313_v35  ;;  %v318_v40 = vsub.f32 %v302_v28, %v310_v36  ;;  %v1135_v36 = vld [vmem:[%s1663_s1 + $0x50] sm:$0xff] }
 0x3fb   :  { %v325_v39 = vmul.f32 1.442695, %v319_v37  ;;  %v323_v43 = vmul.f32 1.442695, %v318_v40 }
 0x3fc   :  { %v316_v41 = vpop.xlane.xlu0 %315 }
 0x3fd   :  { %1348 = vpow2.f32 %v325_v39  ;;  %v320_v42 = vsub.f32 %v304_v31, %v316_v41  ;;  %v1134_v39 = vld [vmem:[%s1663_s1 + $0x48] sm:$0xff] }
 0x3fe   :  { %1350 = vpow2.f32 %v321_v38 }
 0x3ff   :  { %v327_v44 = vmul.f32 1.442695, %v320_v42 }
 0x401   :  { %1352 = vpow2.f32 %v327_v44  ;;  %v1136_v44 = vld [vmem:[%s1663_s1 + $0x58] sm:$0xff] }
 0x402   :  { %1354 = vpow2.f32 %v323_v43 }
 0x40a   :  { %v1349_v45 = vpop.eup %1348 }
 0x40b   :  { %v335_v48 = vsel %vm117_vm1, %v1349_v45, 0.0  ;;  %v1351_v49 = vpop.eup %1350 }
 0x40c   :  { %336 = vadd.xlane.f32.xlu1 %v335_v48  ;;  %v329_v51 = vsel %vm117_vm1, %v1351_v49, 0.0 }
 0x40e   :  { %v1353_v50 = vpop.eup %1352 }
 0x40f   :  { %v338_v52 = vsel %vm117_vm1, %v1353_v50, 0.0  ;;  %v1355_v53 = vpop.eup %1354 }
 0x410   :  { %330 = vadd.xlane.f32.xlu1 %v329_v51  ;;  %339 = vadd.xlane.f32.xlu0 %v338_v52  ;;  %v332_v54 = vsel %vm117_vm1, %v1355_v53, 0.0 }
 0x414   :  { %333 = vadd.xlane.f32.xlu0 %v332_v54 }
 0x421   :  { %355 = vrot.lane.b32.xlu1 %v1478_v46, %s1398_s11 }
 0x425   :  { %547 = vrot.lane.b32.xlu1 %v1436_v0, %s1399_s21 }
 0x429   :  { %545 = vrot.lane.b32.xlu1 %v1441_v1, %s1399_s21 }
 0x42a   :  { %353 = vrot.lane.b32.xlu0 %v1483_v47, %s1398_s11 }
 0x42d   :  { %543 = vrot.lane.b32.xlu1 %v1436_v0, %s1400_s22 }
 0x42e   :  { %541 = vrot.lane.b32.xlu0 %v1441_v1, %s1400_s22 }
 0x431   :  { %804 = vrot.lane.b32.xlu1 %v1441_v1, %s1401_s25 }
 0x432   :  { %806 = vrot.lane.b32.xlu0 %v1436_v0, %s1401_s25 }
 0x435   :  { %802 = vrot.lane.b32.xlu1 %v1436_v0, %s1402_s26 }
 0x436   :  { %800 = vrot.lane.b32.xlu0 %v1441_v1, %s1402_s26 }
 0x495   :  { %v337_v55 = vpop.xlane.xlu1 %336 }
 0x499   :  { %v331_v56 = vpop.xlane.xlu1 %330  ;;  %v340_v57 = vpop.xlane.xlu0 %339 }
 0x49a   :  { %1356 = vrcp.f32 %v340_v57 }
 0x49b   :  { %1358 = vrcp.f32 %v331_v56 }
 0x49c   :  { %1360 = vrcp.f32 %v337_v55 }
 0x49d   :  { %v334_v58 = vpop.xlane.xlu0 %333  ;;  %v356_v59 = vpop.permute.xlu1 %355 }
 0x49e   :  { %1362 = vrcp.f32 %v334_v58  ;;  %1243 = vmatprep.subr.bf16.mxu0 %v356_v59 }
 0x49f   :  { %1244 = vmatpush3.bf16.msra.mxu0 %v356_v59 }
 0x4a1   :  { %v354_v60 = vpop.permute.xlu0 %353  ;;  %v548_v10 = vpop.permute.xlu1 %547 }
 0x4a2   :  { %1245 = vmatprep.subr.bf16.mxu0 %v354_v60  ;;  %v559_v17 = vsel %vm43_vm0, %v548_v10, 0 }
 0x4a3   :  { %1246 = vmatpush3.bf16.msra.mxu0 %v354_v60 }
 0x4a4   :  { %1251 = vmatprep.subr.bf16.mxu0 %v1329_v9 }
 0x4a5   :  { %v542_v18 = vpop.permute.xlu0 %541  ;;  %v546_v19 = vpop.permute.xlu1 %545 }
 0x4a6   :  { %v556_v0 = vsel %vm43_vm0, %v546_v19, 0 }
 0x4a7   :  { %v1357_v61 = vpop.eup %1356 }
 0x4a8   :  { %v1359_v62 = vpop.eup %1358  ;;  %v348_v3 = vmul.f32 %v1357_v61, %v1353_v50 }
 0x4a9   :  { %v1361_v63 = vpop.eup %1360  ;;  %v345_v4 = vmul.f32 %v1359_v62, %v1351_v49  ;;  %v544_v1 = vpop.permute.xlu1 %543 }
 0x4aa   :  { %v347_v6 = vmul.f32 %v1361_v63, %v1349_v45  ;;  %v807_v20 = vpop.permute.xlu0 %806 }
 0x4ab   :  { %v1363_v2 = vpop.eup %1362  ;;  %v818_v21 = vsel %vm43_vm0, %v807_v20, 0 }
 0x4ac   :  { %v346_v5 = vmul.f32 %v1363_v2, %v1355_v53  ;;  %v350_v8 = vpack.c.bf16 %v348_v3, %v347_v6 }
 0x4ad   :  { %v805_v22 = vpop.permute.xlu1 %804 }
 0x4ae   :  { %v349_v7 = vpack.c.bf16 %v346_v5, %v345_v4  ;;  %v815_v23 = vsel %vm43_vm0, %v805_v22, 0  ;;  %v801_v24 = vpop.permute.xlu0 %800 }
 0x4b0   :  { %1247 = vmatprep.mubr.msk.bf16.mxu0 %vm117_vm1, %v349_v7 }
 0x4b1   :  { %1248 = vmatmul.mubr.msk.bf16.vlgmr.msra.gmra.mxu0 %vm117_vm1, %v350_v8  ;;  %v803_v25 = vpop.permute.xlu1 %802 }
 0x4b2   :  { %1252 = vmatpush3.bf16.msra.mxu0 %v1329_v9 }
 0x4b3   :  { %1311 = vmatprep.subr.msk.bf16.mxu0 %vm43_vm0, %v548_v10 }
 0x571   :  { %v1249_v11 = vpop.f32.mrf.mxu0 }
 0x573   :  { %v399_v12 = vpop.f32.mrf.mxu0 }
 0x575   :  { %v1250_v13 = vpop.f32.mrf.mxu0 }
 0x576   :  { %v415_v16 = vpack.c.bf16 %v1250_v13, %v1249_v11 }
 0x577   :  { %v402_v14 = vpop.f32.mrf.mxu0 }
 0x578   :  { %v414_v15 = vpack.c.bf16 %v402_v14, %v399_v12 }
 0x57a   :  { %1253 = vmatprep.mubr.msk.bf16.mxu0 %vm43_vm0, %v414_v15  ;;  %v1146_v15 = vld [vmem:[%s1663_s1 + $0x60] sm:$0xff] }
 0x57b   :  { %1254 = vmatmul.mubr.msk.bf16.vlgmr.msra.gmra.mxu0 %vm43_vm0, %v415_v16 }
 0x57c   :  { %1264 = vmatpush3.bf16.xpose.msra.mxu0 %v559_v17  ;;  %1267 = vmatprep.mubr.msk.bf16.mxu0 %vm43_vm0, %v542_v18  ;;  %v1147_v18 = vld [vmem:[%s1663_s1 + $0x68] sm:$0xff] }
 0x57d   :  { %1312 = vmatprep.subr.msk.bf16.mxu0 %vm43_vm0, %v546_v19 }
 0x584   :  { %1266 = vmatpush3.bf16.xpose.msra.mxu0 %v556_v0  ;;  %v1148_v0 = vld [vmem:[%s1663_s1 + $0x70] sm:$0xff] }
 0x585   :  { %1313 = vmatprep.subr.msk.bf16.mxu0 %vm43_vm0, %v807_v20 }
 0x58b   :  { %1268 = vmatmul.mubr.msk.bf16.vlgmr.msra.gmra.mxu0 %vm43_vm0, %v544_v1 }
 0x58c   :  { %1286 = vmatpush3.bf16.xpose.msra.mxu0 %v818_v21  ;;  %1289 = vmatprep.mubr.msk.bf16.mxu0 %vm43_vm0, %v801_v24 }
 0x58d   :  { %1314 = vmatprep.subr.msk.bf16.mxu0 %vm43_vm0, %v805_v22 }
 0x594   :  { %1288 = vmatpush3.bf16.xpose.msra.mxu0 %v815_v23  ;;  %v1149_v23 = vld [vmem:[%s1663_s1 + $0x78] sm:$0xff] }
 0x59b   :  { %1290 = vmatmul.mubr.msk.bf16.vlgmr.msra.gmra.mxu0 %vm43_vm0, %v803_v25 }
 0x63b   :  { %v1563_v26 = vpop.f32.mrf.mxu0 }
 0x63d   :  { %v1565_v27 = vpop.f32.mrf.mxu0 }
 0x63f   :  { %v1567_v28 = vpop.f32.mrf.mxu0 }
 0x641   :  { %v1569_v29 = vpop.f32.mrf.mxu0 }
 0x64b   :  { %v1269_v30 = vpop.f32.mrf.mxu0 }
 0x64c   :  { %v612_v33 = vmul.f32 0.25, %v1269_v30 }
 0x64d   :  { %v595_v31 = vpop.f32.mrf.mxu0 }
 0x64e   :  { %v610_v34 = vmul.f32 0.25, %v595_v31  ;;  %v621_v43 = vadd.f32 %v1135_v36, %v612_v33 }
 0x64f   :  { %v1270_v35 = vpop.f32.mrf.mxu0 }
 0x650   :  { %v619_v37 = vadd.f32 %v1133_v32, %v610_v34  ;;  %v613_v40 = vmul.f32 0.25, %v1270_v35  ;;  %v629_v48 = vsel %vm117_vm1, %v621_v43, -inf }
 0x651   :  { %v598_v38 = vpop.f32.mrf.mxu0 }
 0x652   :  { %v611_v41 = vmul.f32 0.25, %v598_v38  ;;  %v623_v42 = vsel %vm117_vm1, %v619_v37, -inf  ;;  %v622_v50 = vadd.f32 %v1136_v44, %v613_v40 }
 0x653   :  { %624 = vmax.xlane.f32.xlu0 %v623_v42 }
 0x654   :  { %v620_v45 = vadd.f32 %v1134_v39, %v611_v41  ;;  %v632_v51 = vsel %vm117_vm1, %v622_v50, -inf }
 0x656   :  { %v626_v49 = vsel %vm117_vm1, %v620_v45, -inf }
 0x657   :  { %630 = vmax.xlane.f32.xlu0 %v629_v48  ;;  %627 = vmax.xlane.f32.xlu1 %v626_v49 }
 0x65b   :  { %633 = vmax.xlane.f32.xlu0 %v632_v51  ;;  %v1291_v10 = vpop.f32.mrf.mxu0 }
 0x65c   :  { %v871_v17 = vmul.f32 0.25, %v1291_v10 }
 0x65d   :  { %v854_v11 = vpop.f32.mrf.mxu0 }
 0x65e   :  { %v869_v13 = vmul.f32 0.25, %v854_v11  ;;  %v880_v22 = vadd.f32 %v1148_v0, %v871_v17 }
 0x65f   :  { %v1292_v12 = vpop.f32.mrf.mxu0 }
 0x660   :  { %v878_v19 = vadd.f32 %v1146_v15, %v869_v13  ;;  %v872_v1 = vmul.f32 0.25, %v1292_v12  ;;  %v888_v30 = vsel %vm117_vm1, %v880_v22, -inf }
 0x661   :  { %v857_v14 = vpop.f32.mrf.mxu0 }
 0x662   :  { %v870_v16 = vmul.f32 0.25, %v857_v14  ;;  %v882_v21 = vsel %vm117_vm1, %v878_v19, -inf  ;;  %v881_v25 = vadd.f32 %v1149_v23, %v872_v1 }
 0x664   :  { %v879_v20 = vadd.f32 %v1147_v18, %v870_v16  ;;  %v891_v31 = vsel %vm117_vm1, %v881_v25, -inf }
 0x666   :  { %v885_v24 = vsel %vm117_vm1, %v879_v20, -inf }
 0x6dc   :  { %v625_v52 = vpop.xlane.xlu0 %624 }
 0x6dd   :  { %v635_v53 = vsub.f32 %v619_v37, %v625_v52 }
 0x6df   :  { %v639_v59 = vmul.f32 1.442695, %v635_v53 }
 0x6e0   :  { %v628_v54 = vpop.xlane.xlu1 %627  ;;  %v631_v55 = vpop.xlane.xlu0 %630 }
 0x6e1   :  { %v637_v56 = vsub.f32 %v621_v43, %v631_v55  ;;  %v636_v57 = vsub.f32 %v620_v45, %v628_v54 }
 0x6e3   :  { %v643_v58 = vmul.f32 1.442695, %v637_v56  ;;  %v641_v62 = vmul.f32 1.442695, %v636_v57 }
 0x6e4   :  { %v634_v60 = vpop.xlane.xlu0 %633 }
 0x6e5   :  { %v638_v61 = vsub.f32 %v622_v50, %v634_v60  ;;  %1364 = vpow2.f32 %v643_v58 }
 0x6e6   :  { %1366 = vpow2.f32 %v639_v59 }
 0x6e7   :  { %v645_v63 = vmul.f32 1.442695, %v638_v61 }
 0x6e9   :  { %1368 = vpow2.f32 %v645_v63 }
 0x6ea   :  { %1370 = vpow2.f32 %v641_v62 }
 0x6f2   :  { %v1365_v2 = vpop.eup %1364 }
 0x6f3   :  { %v653_v3 = vsel %vm117_vm1, %v1365_v2, 0.0  ;;  %v1367_v4 = vpop.eup %1366 }
 0x6f4   :  { %654 = vadd.xlane.f32.xlu1 %v653_v3  ;;  %v647_v8 = vsel %vm117_vm1, %v1367_v4, 0.0 }
 0x6f6   :  { %v1369_v5 = vpop.eup %1368 }
 0x6f7   :  { %v656_v6 = vsel %vm117_vm1, %v1369_v5, 0.0  ;;  %v1371_v7 = vpop.eup %1370 }
 0x6f8   :  { %657 = vadd.xlane.f32.xlu0 %v656_v6  ;;  %648 = vadd.xlane.f32.xlu1 %v647_v8  ;;  %v650_v9 = vsel %vm117_vm1, %v1371_v7, 0.0  ;;  %v1330_v8 = vld [vmem:[%s1664_s2 + $0x10] sm:$0xff]  }
 0x6fc   :  { %651 = vadd.xlane.f32.xlu0 %v650_v9  ;;  %v1261_v9 = vpop.f32.mrf.mxu1 }
 0x6fe   :  { %v526_v10 = vpop.f32.mrf.mxu1 }
 0x700   :  { %v1262_v11 = vpop.f32.mrf.mxu1 }
 0x702   :  { %v529_v12 = vpop.f32.mrf.mxu1 }
 0x709   :  { %671 = vrot.lane.b32.xlu1 %v1478_v46, %s1400_s22 }
 0x712   :  { %669 = vrot.lane.b32.xlu0 %v1483_v47, %s1400_s22 }
 0x72d   :  { %883 = vmax.xlane.f32.xlu1 %v882_v21 }
 0x731   :  { %886 = vmax.xlane.f32.xlu0 %v885_v24  ;;  %889 = vmax.xlane.f32.xlu1 %v888_v30 }
 0x735   :  { %892 = vmax.xlane.f32.xlu0 %v891_v31 }
 0x77d   :  { %v655_v32 = vpop.xlane.xlu1 %654 }
 0x781   :  { %v658_v33 = vpop.xlane.xlu0 %657  ;;  %v649_v34 = vpop.xlane.xlu1 %648 }
 0x782   :  { %1372 = vrcp.f32 %v658_v33 }
 0x783   :  { %1374 = vrcp.f32 %v649_v34 }
 0x784   :  { %1376 = vrcp.f32 %v655_v32 }
 0x785   :  { %v652_v35 = vpop.xlane.xlu0 %651  ;;  %v672_v36 = vpop.permute.xlu1 %671 }
 0x786   :  { %1378 = vrcp.f32 %v652_v35  ;;  %1271 = vmatprep.subr.bf16.mxu1 %v672_v36  ;;  %v1331_v35 = vld [vmem:[%s1664_s2 + $0x18] sm:$0xff]  }
 0x787   :  { %1272 = vmatpush3.bf16.msra.mxu1 %v672_v36  ;;  %v535_v36 = vadd.f32 %v1261_v9, %v1563_v26 }
 0x789   :  { %v670_v37 = vpop.permute.xlu0 %669 }
 0x78a   :  { %1273 = vmatprep.subr.bf16.mxu1 %v670_v37 }
 0x78b   :  { %1274 = vmatpush3.bf16.msra.mxu1 %v670_v37 }
 0x78c   :  { %1279 = vmatprep.subr.bf16.mxu1 %v1330_v8 }
 0x78f   :  { %v1373_v38 = vpop.eup %1372 }
 0x790   :  { %v1375_v39 = vpop.eup %1374  ;;  %v666_v42 = vmul.f32 %v1373_v38, %v1369_v5  ;;  %v527_v38 = vadd.f32 %v526_v10, %v1565_v27  ;;  %v1174_v27 = vld [vmem:[%s1665_s4 + $0x8] sm:$0xff]  }
 0x791   :  { %v1377_v40 = vpop.eup %1376  ;;  %v663_v43 = vmul.f32 %v1375_v39, %v1367_v4 }
 0x792   :  { %v665_v45 = vmul.f32 %v1377_v40, %v1365_v2 }
 0x793   :  { %v1379_v41 = vpop.eup %1378 }
 0x794   :  { %v664_v44 = vmul.f32 %v1379_v41, %v1371_v7  ;;  %v668_v49 = vpack.c.bf16 %v666_v42, %v665_v45  ;;  %v538_v41 = vadd.f32 %v1262_v11, %v1567_v28 }
 0x796   :  { %v667_v48 = vpack.c.bf16 %v664_v44, %v663_v43  ;;  %v530_v44 = vadd.f32 %v529_v12, %v1569_v29  ;;  %v1157_v29 = vld [vmem:[%s1666_s3] ss:$0 sm:$0xff] }
 0x798   :  { %1275 = vmatprep.mubr.msk.bf16.mxu1 %vm117_vm1, %v667_v48 }
 0x799   :  { %1276 = vmatmul.mubr.msk.bf16.vlgmr.msra.gmra.mxu1 %vm117_vm1, %v668_v49 }
 0x79a   :  { %1280 = vmatpush3.bf16.msra.mxu1 %v1330_v8 }
 0x7b6   :  { %v884_v50 = vpop.xlane.xlu1 %883 }
 0x7b7   :  { %v894_v51 = vsub.f32 %v878_v19, %v884_v50 }
 0x7b9   :  { %v898_v56 = vmul.f32 1.442695, %v894_v51 }
 0x7ba   :  { %v887_v52 = vpop.xlane.xlu0 %886  ;;  %v890_v53 = vpop.xlane.xlu1 %889 }
 0x7bb   :  { %v896_v54 = vsub.f32 %v880_v22, %v890_v53  ;;  %v895_v55 = vsub.f32 %v879_v20, %v887_v52 }
 0x7bd   :  { %v902_v57 = vmul.f32 1.442695, %v896_v54  ;;  %v900_v60 = vmul.f32 1.442695, %v895_v55  ;;  %v1167_v55 = vld [vmem:[%s1665_s4] sm:$0xff]  }
 0x7be   :  { %v893_v58 = vpop.xlane.xlu0 %892 }
 0x7bf   :  { %v897_v59 = vsub.f32 %v881_v25, %v893_v58  ;;  %1380 = vpow2.f32 %v902_v57  ;;  %v1172_v57 = vunpack.c.l.bf16 %v1174_v27 }
 0x7c0   :  { %1382 = vpow2.f32 %v898_v56 }
 0x7c1   :  { %v904_v61 = vmul.f32 1.442695, %v897_v59 }
 0x7c3   :  { %1384 = vpow2.f32 %v904_v61  ;;  %v1168_v61 = vunpack.c.l.bf16 %v1167_v55 }
 0x7c4   :  { %1386 = vpow2.f32 %v900_v60 }
 0x7cc   :  { %v1381_v62 = vpop.eup %1380 }
 0x7cd   :  { %v912_v63 = vsel %vm117_vm1, %v1381_v62, 0.0  ;;  %v1383_v2 = vpop.eup %1382 }
 0x7ce   :  { %913 = vadd.xlane.f32.xlu1 %v912_v63  ;;  %v906_v6 = vsel %vm117_vm1, %v1383_v2, 0.0 }
 0x7d0   :  { %v1385_v3 = vpop.eup %1384 }
 0x7d1   :  { %v915_v4 = vsel %vm117_vm1, %v1385_v3, 0.0  ;;  %v1387_v5 = vpop.eup %1386 }
 0x7d2   :  { %916 = vadd.xlane.f32.xlu0 %v915_v4  ;;  %907 = vadd.xlane.f32.xlu1 %v906_v6  ;;  %v909_v7 = vsel %vm117_vm1, %v1387_v5, 0.0  ;;  %v1173_v4 = vunpack.c.h.bf16 %v1174_v27  ;;  %v1169_v6 = vunpack.c.h.bf16 %v1167_v55 }
 0x7d6   :  { %910 = vadd.xlane.f32.xlu0 %v909_v7 }
 0x7e3   :  { %930 = vrot.lane.b32.xlu1 %v1478_v46, %s1402_s26 }
 0x7ec   :  { %928 = vrot.lane.b32.xlu0 %v1483_v47, %s1402_s26 }
 0x857   :  { %v914_v13 = vpop.xlane.xlu1 %913 }
 0x859   :  { %v1277_v14 = vpop.f32.mrf.mxu1 }
 0x85b   :  { %v715_v15 = vpop.f32.mrf.mxu1  ;;  %v917_v16 = vpop.xlane.xlu0 %916 }
 0x85c   :  { %v908_v17 = vpop.xlane.xlu1 %907  ;;  %1388 = vrcp.f32 %v917_v16 }
 0x85d   :  { %v1278_v18 = vpop.f32.mrf.mxu1  ;;  %1390 = vrcp.f32 %v908_v17 }
 0x85e   :  { %1392 = vrcp.f32 %v914_v13  ;;  %v731_v20 = vpack.c.bf16 %v1278_v18, %v1277_v14 }
 0x85f   :  { %v718_v19 = vpop.f32.mrf.mxu1  ;;  %v911_v0 = vpop.xlane.xlu0 %910 }
 0x860   :  { %v730_v1 = vpack.c.bf16 %v718_v19, %v715_v15  ;;  %1394 = vrcp.f32 %v911_v0  ;;  %v931_v46 = vpop.permute.xlu1 %930 }
 0x861   :  { %1293 = vmatprep.subr.bf16.mxu1 %v931_v46 }
 0x862   :  { %1281 = vmatprep.mubr.msk.bf16.mxu1 %vm43_vm0, %v730_v1 }
 0x863   :  { %1282 = vmatmul.mubr.msk.bf16.vlgmr.msra.gmra.mxu1 %vm43_vm0, %v731_v20  ;;  %v929_v47 = vpop.permute.xlu0 %928 }
 0x864   :  { %1294 = vmatpush3.bf16.msra.mxu1 %v931_v46 }
 0x865   :  { %1295 = vmatprep.subr.bf16.mxu1 %v929_v47 }
 0x868   :  { %1296 = vmatpush3.bf16.msra.mxu1 %v929_v47 }
 0x869   :  { %v1389_v21 = vpop.eup %1388  ;;  %1301 = vmatprep.subr.bf16.mxu1 %v1331_v35 }
 0x86a   :  { %v1391_v22 = vpop.eup %1390  ;;  %v925_v25 = vmul.f32 %v1389_v21, %v1385_v3 }
 0x86b   :  { %v1393_v23 = vpop.eup %1392  ;;  %v922_v30 = vmul.f32 %v1391_v22, %v1383_v2 }
 0x86c   :  { %v924_v32 = vmul.f32 %v1393_v23, %v1381_v62 }
 0x86d   :  { %v1395_v24 = vpop.eup %1394 }
 0x86e   :  { %v923_v31 = vmul.f32 %v1395_v24, %v1387_v5  ;;  %v927_v34 = vpack.c.bf16 %v925_v25, %v924_v32 }
 0x870   :  { %v926_v33 = vpack.c.bf16 %v923_v31, %v922_v30 }
 0x872   :  { %1297 = vmatprep.mubr.msk.bf16.mxu1 %vm117_vm1, %v926_v33 }
 0x873   :  { %1298 = vmatmul.mubr.msk.bf16.vlgmr.msra.gmra.mxu1 %vm117_vm1, %v927_v34 }
 0x874   :  { %1302 = vmatpush3.bf16.msra.mxu1 %v1331_v35 }
 0x923   :  { %v1283_v37 = vpop.f32.mrf.mxu1 }
 0x924   :  { %v798_v39 = vadd.f32 %v1283_v37, %v535_v36 }
 0x925   :  { %v781_v40 = vpop.f32.mrf.mxu1 }
 0x926   :  { %v796_v42 = vadd.f32 %v781_v40, %v527_v38 }
 0x927   :  { %v1284_v43 = vpop.f32.mrf.mxu1 }
 0x928   :  { %v799_v45 = vadd.f32 %v1284_v43, %v538_v41 }
 0x929   :  { %v784_v48 = vpop.f32.mrf.mxu1 }
 0x92a   :  { %v797_v49 = vadd.f32 %v784_v48, %v530_v44 }
 0x933   :  { %v1299_v50 = vpop.f32.mrf.mxu1 }
 0x935   :  { %v974_v51 = vpop.f32.mrf.mxu1 }
 0x937   :  { %v1300_v52 = vpop.f32.mrf.mxu1 }
 0x938   :  { %v990_v26 = vpack.c.bf16 %v1300_v52, %v1299_v50 }
 0x939   :  { %v977_v53 = vpop.f32.mrf.mxu1 }
 0x93a   :  { %v989_v54 = vpack.c.bf16 %v977_v53, %v974_v51 }
 0x93c   :  { %1303 = vmatprep.mubr.msk.bf16.mxu1 %vm43_vm0, %v989_v54 }
 0x93d   :  { %1304 = vmatmul.mubr.msk.bf16.vlgmr.msra.gmra.mxu1 %vm43_vm0, %v990_v26 }
 0x9fd   :  { %v1305_v28 = vpop.f32.mrf.mxu1 }
 0x9fe   :  { %v1057_v56 = vadd.f32 %v1305_v28, %v798_v39 }
 0x9ff   :  { %v1040_v58 = vpop.f32.mrf.mxu1 }
 0xa00   :  { %v1068_v59 = vadd.f32 %v1157_v29, %v1057_v56  ;;  %v1055_v60 = vadd.f32 %v1040_v58, %v796_v42 }
 0xa01   :  { %v1306_v62 = vpop.f32.mrf.mxu1 }
 0xa02   :  { %v1080_v63 = vadd.f32 %v1172_v57, %v1068_v59  ;;  %v1066_v2 = vadd.f32 %v1157_v29, %v1055_v60  ;;  %v1058_v3 = vadd.f32 %v1306_v62, %v799_v45 }
 0xa03   :  { %v1043_v5 = vpop.f32.mrf.mxu1 }
 0xa04   :  { %v1164_v7 = vpack.c.bf16 %v1080_v63, %v1080_v63  ;;  %v1078_v8 = vadd.f32 %v1168_v61, %v1066_v2  ;;  %v1069_v9 = vadd.f32 %v1157_v29, %v1058_v3  ;;  %v1056_v10 = vadd.f32 %v1043_v5, %v797_v49 }
 0xa06   :  { %1101 = vst.msk [vmem:[%s1667_s5 + $0x8] sm:$0xf] %vm1098_vm2, %v1164_v7  ;;  %v1162_v11 = vpack.c.bf16 %v1078_v8, %v1078_v8  ;;  %v1081_v12 = vadd.f32 %v1173_v4, %v1069_v9  ;;  %v1067_v13 = vadd.f32 %v1157_v29, %v1056_v10 }
 0xa08   :  { %1099 = vst.msk [vmem:[%s1667_s5] sm:$0xf] %vm1098_vm2, %v1162_v11  ;;  %v1165_v14 = vpack.c.bf16 %v1081_v12, %v1081_v12  ;;  %v1079_v15 = vadd.f32 %v1169_v6, %v1067_v13 }
 0xa0a   :  { %1102 = vst.msk [vmem:[%s1667_s5 + $0xc] sm:$0xf] %vm1098_vm2, %v1165_v14  ;;  %v1163_v16 = vpack.c.bf16 %v1079_v15, %v1079_v15 }
 0xa0c   :  { %1100 = vst.msk [vmem:[%s1667_s5 + $0x4] sm:$0xf] %vm1098_vm2, %v1163_v16 }

// kernel: swin_forward.37
= control target key start
LH: loop header
LB: loop body
LE: loop exit
PB: predicated region body
PF: predicated region fallthrough
CT: control target
= control target key end

     0   :  { %11 = vsyncpa [#allocation3], 0  ;;  %vm29_vm0 = vcmask 523264   ;;  %s371_s0 = inlined_call_operand.vmem [shape: bf16[32,64], index: 0, kind: input, shape index: {}]   ;;  %s372_s1 = inlined_call_operand.vmem [shape: f32[1,64], index: 1, kind: input, shape index: {}]   ;;  %s373_s2 = inlined_call_operand.vmem [shape: f32[1,64], index: 2, kind: input, shape index: {}]   ;;  %s374_s3 = inlined_call_operand.vmem [shape: f32[2,32], index: 3, kind: input, shape index: {}]   ;;  %s375_s4 = inlined_call_operand.hbm [shape: f32[32,64], index: 4, kind: output, shape index: {0}]   ;;  %s376_s5 = inlined_call_operand.hbm [shape: f32[2,64], index: 5, kind: output, shape index: {1}]  }
   0x1   :  { %v227_v0 = vld [vmem:[%s371_s0 + $0x8] sm:$0xff]   ;;  %v220_v1 = vld [vmem:[%s371_s0] sm:$0xff]  }
   0x2   :  { %12 = vsyncpa [#allocation5], 0  ;;  %v226_v2 = vunpack.c.h.bf16 %v227_v0  ;;  %v225_v3 = vunpack.c.l.bf16 %v227_v0  ;;  %v222_v4 = vunpack.c.h.bf16 %v220_v1  ;;  %v221_v5 = vunpack.c.l.bf16 %v220_v1  ;;  %v216_v44 = vld [vmem:[%s372_s1] ss:$0 sm:$0xff]  ;;  %s304_s25 = smov [#allocation2]  }
   0x3   :  { %v302_v30 = vmov 0.0   ;;  %vm303_vm1 = vmmov 0   ;;  %v217_v46 = vld [vmem:[%s373_s2] ss:$0 sm:$0xff]  ;;  %vm110_vm2 = vcmask 261120   ;;  %s191_s26 = sshll.u32 %s304_s25, 4  ;;  %s192_s26 = int_to_ptr.vmem [resolvable:$true] %s191_s26 }
   0x4   :  { %v39_v6 = vsel %vm29_vm0, %v226_v2, 0.0  ;;  %v33_v7 = vsel %vm29_vm0, %v222_v4, 0.0  ;;  %v36_v8 = vsel %vm29_vm0, %v225_v3, 0.0  ;;  %v30_v9 = vsel %vm29_vm0, %v221_v5, 0.0  ;;  %233 = vmatprep.subr.mxu0 %v302_v30  ;;  %241 = vmatprep.mubr.msk.f32.mxu0 %vm303_vm1, %v302_v30  ;;  %v109_v61 = vld [vmem:[%s374_s3] sm:$0x3]  ;;  %p263_p1 = scmp.lt.s32.totalorder %s192_s26, %s192_s26 }
   0x5   :  { %40 = vadd.xlane.f32.xlu0 %v39_v6  ;;  %34 = vadd.xlane.f32.xlu1 %v33_v7  ;;  %s258_s27 = scalar_lea.vmem %s192_s26, 512 }
   0x6   :  { %p259_p0 = scmp.ne.s32.totalorder %s192_s26, %s258_s27  ;;  %p264_p2 = scmp.lt.s32.totalorder %s258_s27, %s258_s27 }
   0x8   :  { %p265_p3 = por %p264_p2, %p263_p1 }
   0x9   :  { %37 = vadd.xlane.f32.xlu0 %v36_v8  ;;  %31 = vadd.xlane.f32.xlu1 %v30_v9 }
   0xa   :  { %p266_p4 = pnand %p265_p3, %p259_p0 }
  0x8e   :  { %v41_v10 = vpop.xlane.xlu0 %40  ;;  %v35_v11 = vpop.xlane.xlu1 %34 }
  0x8f   :  { %v46_v12 = vmul.f32 0.015625, %v41_v10  ;;  %v44_v13 = vmul.f32 0.015625, %v35_v11 }
  0x91   :  { %v50_v14 = vsub.f32 %v226_v2, %v46_v12  ;;  %v48_v15 = vsub.f32 %v222_v4, %v44_v13 }
  0x92   :  { %v38_v16 = vpop.xlane.xlu0 %37  ;;  %v32_v17 = vpop.xlane.xlu1 %31 }
  0x93   :  { %v45_v18 = vmul.f32 0.015625, %v38_v16  ;;  %v54_v19 = vmul.f32 %v50_v14, %v50_v14  ;;  %v43_v20 = vmul.f32 0.015625, %v32_v17  ;;  %v52_v21 = vmul.f32 %v48_v15, %v48_v15 }
  0x95   :  { %v49_v22 = vsub.f32 %v225_v3, %v45_v18  ;;  %v64_v23 = vsel %vm29_vm0, %v54_v19, 0.0  ;;  %v47_v24 = vsub.f32 %v221_v5, %v43_v20  ;;  %v58_v25 = vsel %vm29_vm0, %v52_v21, 0.0 }
  0x96   :  { %65 = vadd.xlane.f32.xlu0 %v64_v23 }
  0x97   :  { %v53_v26 = vmul.f32 %v49_v22, %v49_v22  ;;  %v51_v27 = vmul.f32 %v47_v24, %v47_v24 }
  0x99   :  { %v61_v28 = vsel %vm29_vm0, %v53_v26, 0.0  ;;  %v55_v29 = vsel %vm29_vm0, %v51_v27, 0.0 }
  0x9a   :  { %59 = vadd.xlane.f32.xlu0 %v58_v25  ;;  %62 = vadd.xlane.f32.xlu1 %v61_v28 }
  0x9e   :  { %56 = vadd.xlane.f32.xlu1 %v55_v29 }
 0x11f   :  { %v66_v31 = vpop.xlane.xlu0 %65 }
 0x120   :  { %v70_v32 = vmul.f32 0.015625, %v66_v31 }
 0x122   :  { %v74_v33 = vadd.f32 1e-05, %v70_v32 }
 0x123   :  { %v60_v34 = vpop.xlane.xlu0 %59  ;;  %v63_v35 = vpop.xlane.xlu1 %62 }
 0x124   :  { %250 = vrsqrt.f32 %v74_v33  ;;  %v68_v36 = vmul.f32 0.015625, %v60_v34  ;;  %v69_v37 = vmul.f32 0.015625, %v63_v35 }
 0x126   :  { %v72_v38 = vadd.f32 1e-05, %v68_v36  ;;  %v73_v39 = vadd.f32 1e-05, %v69_v37 }
 0x127   :  { %v57_v40 = vpop.xlane.xlu1 %56 }
 0x128   :  { %252 = vrsqrt.f32 %v72_v38  ;;  %v67_v41 = vmul.f32 0.015625, %v57_v40 }
 0x129   :  { %254 = vrsqrt.f32 %v73_v39 }
 0x12a   :  { %v71_v42 = vadd.f32 1e-05, %v67_v41 }
 0x12c   :  { %256 = vrsqrt.f32 %v71_v42 }
 0x131   :  { %v251_v43 = vpop.eup %250 }
 0x132   :  { %v82_v45 = vmul.f32 %v251_v43, %v50_v14 }
 0x134   :  { %v93_v47 = vmul.f32 %v216_v44, %v82_v45 }
 0x135   :  { %v253_v48 = vpop.eup %252 }
 0x136   :  { %v255_v49 = vpop.eup %254  ;;  %v104_v50 = vadd.f32 %v217_v46, %v93_v47  ;;  %v80_v51 = vmul.f32 %v253_v48, %v48_v15 }
 0x137   :  { %v81_v52 = vmul.f32 %v255_v49, %v49_v22 }
 0x138   :  { %108 = vst.msk [vmem:[#allocation2 + $0x18] sm:$0xff] %vm29_vm0, %v104_v50  ;;  %234 = vmatpush3.msra.mxu0 %v104_v50  ;;  %v91_v53 = vmul.f32 %v216_v44, %v80_v51 }
 0x139   :  { %v257_v54 = vpop.eup %256  ;;  %235 = vmatprep.subr.mxu0 %v302_v30  ;;  %v92_v55 = vmul.f32 %v216_v44, %v81_v52 }
 0x13a   :  { %v102_v56 = vadd.f32 %v217_v46, %v91_v53  ;;  %v79_v57 = vmul.f32 %v257_v54, %v47_v24 }
 0x13b   :  { %v103_v58 = vadd.f32 %v217_v46, %v92_v55 }
 0x13c   :  { %106 = vst.msk [vmem:[#allocation2 + $0x8] sm:$0xff] %vm29_vm0, %v102_v56  ;;  %v90_v59 = vmul.f32 %v216_v44, %v79_v57 }
 0x13d   :  { %107 = vst.msk [vmem:[#allocation2 + $0x10] sm:$0xff] %vm29_vm0, %v103_v58  ;;  %236 = vmatpush3.msra.mxu0 %v103_v58 }
 0x13e   :  { %237 = vmatprep.subr.mxu0 %v302_v30  ;;  %v101_v60 = vadd.f32 %v217_v46, %v90_v59 }
 0x13f   :  { %238 = vmatpush3.msra.mxu0 %v102_v56 }
 0x140   :  { %239 = vmatprep.subr.mxu0 %v302_v30  ;;  %105 = vst.msk [vmem:[#allocation2] sm:$0xff] %vm29_vm0, %v101_v60 }
 0x141   :  { %240 = vmatpush3.msra.mxu0 %v101_v60 }
 0x142   :  { %242 = vmatmul.mubr.msk.f32.vlgmr.msra.gmra.mxu0 %vm110_vm2, %v109_v61 }
 0x143   :  { %269 = shalt.err (!%p266_p4)
}
 0x144   :  { %s305_s28 = smov 128   ;;  %s306_s29 = smov 8   ;;  %vm184_vm3 = vcmask 517120  }
 0x145   :  { %197 = dma.vmem_to_hbm [thread:$0]  %s192_s26, 512, %s375_s4, [#allocation3], %s305_s28, %s305_s28, %s306_s29  }
 0x146   :  { %s307_s6 = smov [#allocation4]  }
 0x147   :  { %s204_s7 = sshll.u32 %s307_s6, 4  ;;  %s205_s7 = int_to_ptr.vmem [resolvable:$true] %s204_s7 }
 0x148   :  { %s278_s8 = scalar_lea.vmem %s205_s7, 32  ;;  %p283_p6 = scmp.lt.s32.totalorder %s205_s7, %s205_s7 }
 0x149   :  { %p279_p5 = scmp.ne.s32.totalorder %s205_s7, %s278_s8  ;;  %p284_p7 = scmp.lt.s32.totalorder %s278_s8, %s278_s8 }
 0x14b   :  { %p285_p8 = por %p284_p7, %p283_p6 }
 0x14d   :  { %p286_p9 = pnand %p285_p8, %p279_p5 }
 0x202   :  { %v180_v62 = vpop.f32.mrf.mxu0 }
 0x203   :  { %185 = vst.msk [vmem:[#allocation4] sm:$0x3] %vm184_vm3, %v180_v62 }
 0x204   :  { %v243_v63 = vpop.f32.mrf.mxu0 }
 0x205   :  { %289 = shalt.err (!%p286_p9)
}
 0x206   :  { %207 = dma.vmem_to_hbm [thread:$0]  %s205_s7, 32, %s376_s5, [#allocation5]  }
 0x207   :  { %298 = dma.done.wait [#allocation3], 512  }
 0x208   :  { %299 = vsyncadd [#allocation3], 4294966784 }
 0x209   :  { %300 = dma.done.wait [#allocation5], 32  }
 0x20a   :  { %301 = vsyncadd [#allocation5], 4294967264 }
 0x20b   :  { %214 = vsyncpa [#allocation3], 1 }
 0x20c   :  { %215 = vsyncpa [#allocation5], 1 }

// kernel: swin_forward.32
= control target key start
LH: loop header
LB: loop body
LE: loop exit
PB: predicated region body
PF: predicated region fallthrough
CT: control target
= control target key end

     0   :  { %vm254_vm0 = vcmask 519168   ;;  %s473_s1 = inlined_call_operand.vmem [shape: bf16[256,64], index: 1, kind: input, shape index: {}]   ;;  %s474_s0 = inlined_call_operand.vmem [shape: bf16[32,256], index: 0, kind: input, shape index: {}]   ;;  %s475_s3 = inlined_call_operand.vmem [shape: bf16[32,64], index: 3, kind: input, shape index: {}]   ;;  %s476_s2 = inlined_call_operand.vmem [shape: f32[1,64], index: 2, kind: input, shape index: {}]   ;;  %s477_s4 = inlined_call_operand.vmem [shape: bf16[32,64], index: 4, kind: output, shape index: {}]  }
   0x1   :  { %v345_v0 = vld [vmem:[%s473_s1 + $0x78] sm:$0xff]   ;;  %v347_v2 = vld [vmem:[%s473_s1 + $0x70] sm:$0xff]   ;;  %v349_v4 = vld [vmem:[%s473_s1 + $0x68] sm:$0xff]  }
   0x2   :  { %v346_v1 = vld [vmem:[%s473_s1 + $0x38] sm:$0xff]   ;;  %301 = vmatprep.subr.bf16.mxu0 %v345_v0  ;;  %329 = vmatprep.subr.bf16.mxu1 %v345_v0  ;;  %v348_v3 = vld [vmem:[%s473_s1 + $0x30] sm:$0xff]   ;;  %v350_v5 = vld [vmem:[%s473_s1 + $0x28] sm:$0xff]  }
   0x3   :  { %302 = vmatpush3.bf16.msra.mxu0 %v346_v1  ;;  %337 = vmatpush3.bf16.msra.mxu1 %v346_v1  ;;  %v351_v6 = vld [vmem:[%s473_s1 + $0x60] sm:$0xff]   ;;  %v353_v8 = vld [vmem:[%s473_s1 + $0x58] sm:$0xff]   ;;  %v355_v10 = vld [vmem:[%s473_s1 + $0x50] sm:$0xff]  }
   0x4   :  { %303 = vmatprep.subr.bf16.mxu0 %v347_v2  ;;  %330 = vmatprep.subr.bf16.mxu1 %v347_v2  ;;  %v352_v7 = vld [vmem:[%s473_s1 + $0x20] sm:$0xff]   ;;  %v354_v9 = vld [vmem:[%s473_s1 + $0x18] sm:$0xff]   ;;  %v356_v13 = vld [vmem:[%s473_s1 + $0x10] sm:$0xff]  }
   0x5   :  { %v363_v11 = vld [vmem:[%s474_s0 + $0x4] ss:$8 sps:$4 sm:$0xff]   ;;  %v366_v12 = vld [vmem:[%s474_s0 + $0x14] ss:$8 sps:$4 sm:$0xff]   ;;  %v361_v18 = vld [vmem:[%s474_s0] ss:$8 sps:$4 sm:$0xff]  }
   0x6   :  { %v357_v14 = vld [vmem:[%s473_s1 + $0x48] sm:$0xff]   ;;  %209 = vmatprep.mubr.bf16.mxu0 %v363_v11  ;;  %217 = vmatprep.mubr.bf16.mxu1 %v366_v12  ;;  %v359_v16 = vld [vmem:[%s473_s1 + $0x40] sm:$0xff]   ;;  %v364_v19 = vld [vmem:[%s474_s0 + $0x10] ss:$8 sps:$4 sm:$0xff]  }
   0x7   :  { %304 = vmatpush3.bf16.msra.mxu0 %v348_v3  ;;  %338 = vmatpush3.bf16.msra.mxu1 %v348_v3  ;;  %v358_v15 = vld [vmem:[%s473_s1 + $0x8] sm:$0xff]   ;;  %v360_v17 = vld [vmem:[%s473_s1] sm:$0xff]  }
   0x8   :  { %305 = vmatprep.subr.bf16.mxu0 %v349_v4  ;;  %331 = vmatprep.subr.bf16.mxu1 %v349_v4  ;;  %v293_v22 = vld [vmem:[%s475_s3] sm:$0xff]   ;;  %v300_v23 = vld [vmem:[%s475_s3 + $0x8] sm:$0xff]  }
   0x9   :  { %v263_v24 = vld [vmem:[%s476_s2] ss:$0 sm:$0xff]  ;;  %v294_v28 = vunpack.c.l.bf16 %v293_v22  ;;  %v298_v30 = vunpack.c.l.bf16 %v300_v23  ;;  %v295_v36 = vunpack.c.h.bf16 %v293_v22  ;;  %v299_v38 = vunpack.c.h.bf16 %v300_v23 }
   0xb   :  { %306 = vmatpush3.bf16.msra.mxu0 %v350_v5  ;;  %339 = vmatpush3.bf16.msra.mxu1 %v350_v5 }
   0xc   :  { %307 = vmatprep.subr.bf16.mxu0 %v351_v6  ;;  %332 = vmatprep.subr.bf16.mxu1 %v351_v6 }
   0xf   :  { %308 = vmatpush3.bf16.msra.mxu0 %v352_v7  ;;  %340 = vmatpush3.bf16.msra.mxu1 %v352_v7 }
  0x10   :  { %309 = vmatprep.subr.bf16.mxu0 %v353_v8  ;;  %333 = vmatprep.subr.bf16.mxu1 %v353_v8 }
  0x13   :  { %310 = vmatpush3.bf16.msra.mxu0 %v354_v9  ;;  %341 = vmatpush3.bf16.msra.mxu1 %v354_v9 }
  0x14   :  { %311 = vmatprep.subr.bf16.mxu0 %v355_v10  ;;  %334 = vmatprep.subr.bf16.mxu1 %v355_v10 }
  0x17   :  { %312 = vmatpush3.bf16.msra.mxu0 %v356_v13  ;;  %342 = vmatpush3.bf16.msra.mxu1 %v356_v13 }
  0x18   :  { %313 = vmatprep.subr.bf16.mxu0 %v357_v14  ;;  %335 = vmatprep.subr.bf16.mxu1 %v357_v14 }
  0x1b   :  { %314 = vmatpush3.bf16.msra.mxu0 %v358_v15  ;;  %343 = vmatpush3.bf16.msra.mxu1 %v358_v15 }
  0x1c   :  { %315 = vmatprep.subr.bf16.mxu0 %v359_v16  ;;  %336 = vmatprep.subr.bf16.mxu1 %v359_v16 }
  0x1f   :  { %316 = vmatpush3.bf16.msra.mxu0 %v360_v17  ;;  %344 = vmatpush3.bf16.msra.mxu1 %v360_v17 }
  0x22   :  { %210 = vmatmul.mubr.bf16.vlgmr.msra.gmra.mxu0 %v361_v18  ;;  %218 = vmatmul.mubr.bf16.vlgmr.msra.gmra.mxu1 %v364_v19 }
  0xe2   :  { %v317_v20 = vpop.f32.mrf.mxu0  ;;  %v323_v21 = vpop.f32.mrf.mxu1 }
  0xe4   :  { %v318_v25 = vpop.f32.mrf.mxu0  ;;  %v324_v26 = vpop.f32.mrf.mxu1 }
  0xe5   :  { %v319_v27 = vadd.f32 %v318_v25, %v317_v20  ;;  %v325_v29 = vadd.f32 %v324_v26, %v323_v21 }
  0xe6   :  { %v320_v31 = vpop.f32.mrf.mxu0  ;;  %v326_v32 = vpop.f32.mrf.mxu1 }
  0xe7   :  { %v212_v33 = vadd.f32 %v319_v27, %v263_v24  ;;  %v220_v34 = vadd.f32 %v325_v29, %v263_v24 }
  0xe8   :  { %v321_v35 = vpop.f32.mrf.mxu0  ;;  %v327_v37 = vpop.f32.mrf.mxu1 }
  0xe9   :  { %v234_v39 = vadd.f32 %v294_v28, %v212_v33  ;;  %v236_v40 = vadd.f32 %v298_v30, %v220_v34  ;;  %v322_v41 = vadd.f32 %v321_v35, %v320_v31  ;;  %v328_v42 = vadd.f32 %v327_v37, %v326_v32 }
  0xeb   :  { %v288_v43 = vpack.c.bf16 %v234_v39, %v234_v39  ;;  %v290_v44 = vpack.c.bf16 %v236_v40, %v236_v40  ;;  %v215_v45 = vadd.f32 %v322_v41, %v263_v24  ;;  %v223_v46 = vadd.f32 %v328_v42, %v263_v24 }
  0xed   :  { %255 = vst.msk [vmem:[%s477_s4] sm:$0xf] %vm254_vm0, %v288_v43  ;;  %257 = vst.msk [vmem:[%s477_s4 + $0x8] sm:$0xf] %vm254_vm0, %v290_v44  ;;  %v235_v47 = vadd.f32 %v295_v36, %v215_v45  ;;  %v237_v48 = vadd.f32 %v299_v38, %v223_v46 }
  0xef   :  { %v289_v49 = vpack.c.bf16 %v235_v47, %v235_v47  ;;  %v291_v50 = vpack.c.bf16 %v237_v48, %v237_v48 }
  0xf1   :  { %256 = vst.msk [vmem:[%s477_s4 + $0x4] sm:$0xf] %vm254_vm0, %v289_v49  ;;  %258 = vst.msk [vmem:[%s477_s4 + $0xc] sm:$0xf] %vm254_vm0, %v291_v50 }

</bundles_post_ra>
